<compile_context>
chip_gen: v7x
topology: tpu7x:2x2x1
jax: 0.10.0
libtpu: 0.0.40
codegen_flags: <defaults>
</compile_context>

<pallas_src>
import math

import jax
import jax.numpy as jnp
from jax.experimental import pallas as pl
from jax.experimental.pallas import tpu as pltpu


# ----------------------------------------------------------------------------
# In-kernel building blocks (operate on values; everything stays in VMEM/vregs)
# ----------------------------------------------------------------------------
def _conv3x3_bn_relu(x, w, b):
    """x: (H, W, Cin) f32, w: (9*Cin, Cout) bf16 (BN-folded), b: (1, Cout) f32.
    Returns (H, W, Cout) f32.  Single im2col MXU matmul, K = 9*Cin."""
    H, W, Cin = x.shape
    Cout = w.shape[-1]
    xb = x.astype(jnp.bfloat16)
    # 'same' padding built in-kernel (zero rows / cols).
    zc = jnp.zeros((H, 1, Cin), jnp.bfloat16)
    zr = jnp.zeros((1, W + 2, Cin), jnp.bfloat16)
    xp = jnp.concatenate([zr, jnp.concatenate([zc, xb, zc], axis=1), zr], axis=0)
    # Hoist the 3 dx (sublane) shifts; dy shifts are cheap leading-dim offsets.
    xdx = [xp[:, dx:dx + W, :] for dx in range(3)]                     # (H+2, W, Cin)
    taps = [xdx[dx][dy:dy + H] for dy in range(3) for dx in range(3)]  # k = 3*dy+dx
    patch = jnp.concatenate(taps, axis=-1).reshape(H * W, 9 * Cin)     # im2col
    acc = jnp.dot(patch, w, preferred_element_type=jnp.float32)        # (H*W, Cout)
    acc = jnp.maximum(acc + b, 0.0)                                    # f32 epilogue
    return acc.reshape(H, W, Cout)


def _maxpool2x2(x):
    """x: (H, W, C) f32 -> (H//2, W//2, C).  Vectorized, channels stay on lanes."""
    H, W, C = x.shape
    Ho, Wo = H // 2, W // 2
    xr = x.reshape(Ho, 2, W, C)                 # leading-dim split (layout-trivial)
    rows = jnp.maximum(xr[:, 0], xr[:, 1])      # (Ho, W, C)
    cols = [jnp.max(rows[:, 2 * j:2 * j + 2, :], axis=1, keepdims=True)
            for j in range(Wo)]
    return jnp.concatenate(cols, axis=1)        # (Ho, Wo, C)


# ----------------------------------------------------------------------------
# Fused kernel: one grid step == full forward pass for one image
# ----------------------------------------------------------------------------
def fused_cnn_kernel(x_ref,
                     w1a_ref, b1a_ref, w1b_ref, b1b_ref,
                     w2a_ref, b2a_ref, w2b_ref, b2b_ref,
                     w3a_ref, b3a_ref, w3b_ref, b3b_ref,
                     wh1_ref, bh1_ref, wh2_ref, bh2_ref,
                     o_ref):
    x = x_ref[0]                                             # (16, 16, 3) f32
    # block 1 (Dropout(0.1) is identity at inference)
    x = _conv3x3_bn_relu(x, w1a_ref[...], b1a_ref[...])
    x = _conv3x3_bn_relu(x, w1b_ref[...], b1b_ref[...])
    x = _maxpool2x2(x)                                       # (8, 8, 64)
    # block 2
    x = _conv3x3_bn_relu(x, w2a_ref[...], b2a_ref[...])
    x = _conv3x3_bn_relu(x, w2b_ref[...], b2b_ref[...])
    x = _maxpool2x2(x)                                       # (4, 4, 128)
    # block 3
    x = _conv3x3_bn_relu(x, w3a_ref[...], b3a_ref[...])
    x = _conv3x3_bn_relu(x, w3b_ref[...], b3b_ref[...])
    x = _maxpool2x2(x)                                       # (2, 2, 256)
    # head: AdaptiveAvgPool2d((1,1)) + Flatten + Linear(256,128) + ReLU + Linear
    v = jnp.mean(jnp.mean(x, axis=0), axis=0, keepdims=True)  # (1, 256) f32
    h = jnp.dot(v.astype(jnp.bfloat16), wh1_ref[...],
                preferred_element_type=jnp.float32) + bh1_ref[...]
    h = jnp.maximum(h, 0.0)
    o = jnp.dot(h.astype(jnp.bfloat16), wh2_ref[...],
                preferred_element_type=jnp.float32) + bh2_ref[...]
    o_ref[0] = o.astype(o_ref.dtype)                         # (1, num_classes)


# ----------------------------------------------------------------------------
# Wrapper: one pallas_call for the whole network
# ----------------------------------------------------------------------------
def custom_cnn_forward(x_nchw, params):
    x = jnp.transpose(x_nchw, (0, 2, 3, 1)).astype(jnp.float32)   # NCHW -> NHWC
    N, H, W, Cin = x.shape
    num_classes = params["wh2"].shape[-1]

    flat = [x,
            params["w1a"], params["b1a"], params["w1b"], params["b1b"],
            params["w2a"], params["b2a"], params["w2b"], params["b2b"],
            params["w3a"], params["b3a"], params["w3b"], params["b3b"],
            params["wh1"], params["bh1"], params["wh2"], params["bh2"]]

    def full_spec(a):
        # Whole-array, grid-invariant block: weights stay resident in VMEM
        # across grid iterations (no per-image re-DMA).
        nd = a.ndim
        return pl.BlockSpec(a.shape, lambda n, _nd=nd: (0,) * _nd)

    in_specs = ([pl.BlockSpec((1, H, W, Cin), lambda n: (n, 0, 0, 0))]
                + [full_spec(a) for a in flat[1:]])

    out = pl.pallas_call(
        fused_cnn_kernel,
        out_shape=jax.ShapeDtypeStruct((N, 1, num_classes), jnp.float32),
        grid=(N,),
        in_specs=in_specs,
        out_specs=pl.BlockSpec((1, 1, num_classes), lambda n: (n, 0, 0)),
        compiler_params=pltpu.CompilerParams(dimension_semantics=("parallel",)),
    )(*flat)
    return out[:, 0, :]


# ----------------------------------------------------------------------------
# Deterministic parameter setup: conv + BN (eval mode) folded, weights in bf16
# ----------------------------------------------------------------------------
def make_conv_params(key, cin, cout):
    k1, k2, k3, k4 = jax.random.split(key, 4)
    w = jax.random.normal(k1, (3, 3, cin, cout), jnp.float32) / math.sqrt(9.0 * cin)
    b = 0.01 * jax.random.normal(k2, (cout,), jnp.float32)
    gamma = 1.0 + 0.1 * jax.random.normal(k3, (cout,), jnp.float32)
    beta = 0.1 * jax.random.normal(k4, (cout,), jnp.float32)
    run_mean = jnp.zeros((cout,), jnp.float32)
    run_var = jnp.ones((cout,), jnp.float32)
    eps = 1e-5
    scale = gamma / jnp.sqrt(run_var + eps)
    # Tap-major contraction dim: k = 3*dy + dx, matching the kernel's im2col order.
    w_f = (w * scale[None, None, None, :]).reshape(9 * cin, cout)
    b_f = (b - run_mean) * scale + beta
    return w_f.astype(jnp.bfloat16), b_f.reshape(1, cout).astype(jnp.float32)


def make_params(num_classes=4):
    key = jax.random.PRNGKey(42)
    keys = jax.random.split(key, 8)
    chans = [(3, 64), (64, 64), (64, 128), (128, 128), (128, 256), (256, 256)]
    names = ["1a", "1b", "2a", "2b", "3a", "3b"]
    params = {}
    for i, ((ci, co), nm) in enumerate(zip(chans, names)):
        w, b = make_conv_params(keys[i], ci, co)
        params[f"w{nm}"] = w
        params[f"b{nm}"] = b
    params["wh1"] = (jax.random.normal(keys[6], (256, 128), jnp.float32)
                     / math.sqrt(256.0)).astype(jnp.bfloat16)
    params["bh1"] = jnp.zeros((1, 128), jnp.float32)
    params["wh2"] = (jax.random.normal(keys[7], (128, num_classes), jnp.float32)
                     / math.sqrt(128.0)).astype(jnp.bfloat16)
    params["bh2"] = jnp.zeros((1, num_classes), jnp.float32)
    return params


if __name__ == "__main__":
    num_classes = 4
    params = make_params(num_classes)
    # PyTorch-convention input: NCHW, 3 input channels, 16x16 spatial, batch 2.
    x = jax.random.normal(jax.random.PRNGKey(0), (2, 3, 16, 16), jnp.float32)
    fwd = jax.jit(lambda xin: custom_cnn_forward(xin, params))
    out = fwd(x)
    jax.block_until_ready(out)
    assert out.shape == (2, num_classes), out.shape
    assert bool(jnp.all(jnp.isfinite(out)))
    print("KERNEL_OK")
</pallas_src>

<mosaic_0001>
module attributes {stable_mosaic.version = 11 : i64} {
  func.func @fused_cnn_kernel(%arg0: i32, %arg1: memref<1x16x16x3xf32, #tpu.memory_space<vmem>>, %arg2: memref<27x64xbf16, #tpu.memory_space<vmem>>, %arg3: memref<1x64xf32, #tpu.memory_space<vmem>>, %arg4: memref<576x64xbf16, #tpu.memory_space<vmem>>, %arg5: memref<1x64xf32, #tpu.memory_space<vmem>>, %arg6: memref<576x128xbf16, #tpu.memory_space<vmem>>, %arg7: memref<1x128xf32, #tpu.memory_space<vmem>>, %arg8: memref<1152x128xbf16, #tpu.memory_space<vmem>>, %arg9: memref<1x128xf32, #tpu.memory_space<vmem>>, %arg10: memref<1152x256xbf16, #tpu.memory_space<vmem>>, %arg11: memref<1x256xf32, #tpu.memory_space<vmem>>, %arg12: memref<2304x256xbf16, #tpu.memory_space<vmem>>, %arg13: memref<1x256xf32, #tpu.memory_space<vmem>>, %arg14: memref<256x128xbf16, #tpu.memory_space<vmem>>, %arg15: memref<1x128xf32, #tpu.memory_space<vmem>>, %arg16: memref<128x4xbf16, #tpu.memory_space<vmem>>, %arg17: memref<1x4xf32, #tpu.memory_space<vmem>>, %arg18: memref<1x1x4xf32, #tpu.memory_space<vmem>>) attributes {dimension_semantics = [#tpu.dimension_semantics<parallel>], iteration_bounds = array<i64: 2>, scalar_prefetch = 0 : i64, scratch_operands = 0 : i64, tpu.core_type = #tpu.core_type<tc>, window_params = [{transform_indices = @transform_0, window_bounds = array<i64: 1, 16, 16, 3>}, {pipeline_mode = #tpu.pipeline_mode<synchronous>, transform_indices = @transform_1, window_bounds = array<i64: 27, 64>}, {pipeline_mode = #tpu.pipeline_mode<synchronous>, transform_indices = @transform_2, window_bounds = array<i64: 1, 64>}, {pipeline_mode = #tpu.pipeline_mode<synchronous>, transform_indices = @transform_3, window_bounds = array<i64: 576, 64>}, {pipeline_mode = #tpu.pipeline_mode<synchronous>, transform_indices = @transform_4, window_bounds = array<i64: 1, 64>}, {pipeline_mode = #tpu.pipeline_mode<synchronous>, transform_indices = @transform_5, window_bounds = array<i64: 576, 128>}, {pipeline_mode = #tpu.pipeline_mode<synchronous>, transform_indices = @transform_6, window_bounds = array<i64: 1, 128>}, {pipeline_mode = #tpu.pipeline_mode<synchronous>, transform_indices = @transform_7, window_bounds = array<i64: 1152, 128>}, {pipeline_mode = #tpu.pipeline_mode<synchronous>, transform_indices = @transform_8, window_bounds = array<i64: 1, 128>}, {pipeline_mode = #tpu.pipeline_mode<synchronous>, transform_indices = @transform_9, window_bounds = array<i64: 1152, 256>}, {pipeline_mode = #tpu.pipeline_mode<synchronous>, transform_indices = @transform_10, window_bounds = array<i64: 1, 256>}, {pipeline_mode = #tpu.pipeline_mode<synchronous>, transform_indices = @transform_11, window_bounds = array<i64: 2304, 256>}, {pipeline_mode = #tpu.pipeline_mode<synchronous>, transform_indices = @transform_12, window_bounds = array<i64: 1, 256>}, {pipeline_mode = #tpu.pipeline_mode<synchronous>, transform_indices = @transform_13, window_bounds = array<i64: 256, 128>}, {pipeline_mode = #tpu.pipeline_mode<synchronous>, transform_indices = @transform_14, window_bounds = array<i64: 1, 128>}, {pipeline_mode = #tpu.pipeline_mode<synchronous>, transform_indices = @transform_15, window_bounds = array<i64: 128, 4>}, {pipeline_mode = #tpu.pipeline_mode<synchronous>, transform_indices = @transform_16, window_bounds = array<i64: 1, 4>}, {transform_indices = @transform_17, window_bounds = array<i64: 1, 1, 4>}]} {
    %c0 = arith.constant 0 : index
    %c0_0 = arith.constant 0 : index
    %c0_1 = arith.constant 0 : index
    %c0_2 = arith.constant 0 : index
    %0 = vector.load %arg1[%c0, %c0_0, %c0_1, %c0_2] : memref<1x16x16x3xf32, #tpu.memory_space<vmem>>, vector<1x16x16x3xf32>
    %1 = vector.shape_cast %0 : vector<1x16x16x3xf32> to vector<16x16x3xf32>
    %c0_3 = arith.constant 0 : index
    %c0_4 = arith.constant 0 : index
    %2 = vector.load %arg2[%c0_3, %c0_4] : memref<27x64xbf16, #tpu.memory_space<vmem>>, vector<27x64xbf16>
    %c0_5 = arith.constant 0 : index
    %c0_6 = arith.constant 0 : index
    %3 = vector.load %arg3[%c0_5, %c0_6] : memref<1x64xf32, #tpu.memory_space<vmem>>, vector<1x64xf32>
    %4 = arith.truncf %1 : vector<16x16x3xf32> to vector<16x16x3xbf16>
    %cst = arith.constant 0.000000e+00 : bf16
    %5 = vector.broadcast %cst : bf16 to vector<16x1x3xbf16>
    %cst_7 = arith.constant 0.000000e+00 : bf16
    %6 = vector.broadcast %cst_7 : bf16 to vector<1x18x3xbf16>
    %7 = tpu.concatenate %5, %4, %5 in 1 : vector<16x1x3xbf16>, vector<16x16x3xbf16>, vector<16x1x3xbf16> -> vector<16x18x3xbf16>
    %8 = tpu.concatenate %6, %7, %6 in 0 : vector<1x18x3xbf16>, vector<16x18x3xbf16>, vector<1x18x3xbf16> -> vector<18x18x3xbf16>
    %9 = vector.extract_strided_slice %8 {offsets = [0, 0, 0], sizes = [18, 16, 3], strides = [1, 1, 1]} : vector<18x18x3xbf16> to vector<18x16x3xbf16>
    %10 = vector.extract_strided_slice %8 {offsets = [0, 1, 0], sizes = [18, 16, 3], strides = [1, 1, 1]} : vector<18x18x3xbf16> to vector<18x16x3xbf16>
    %11 = vector.extract_strided_slice %8 {offsets = [0, 2, 0], sizes = [18, 16, 3], strides = [1, 1, 1]} : vector<18x18x3xbf16> to vector<18x16x3xbf16>
    %12 = vector.extract_strided_slice %9 {offsets = [0, 0, 0], sizes = [16, 16, 3], strides = [1, 1, 1]} : vector<18x16x3xbf16> to vector<16x16x3xbf16>
    %13 = vector.extract_strided_slice %10 {offsets = [0, 0, 0], sizes = [16, 16, 3], strides = [1, 1, 1]} : vector<18x16x3xbf16> to vector<16x16x3xbf16>
    %14 = vector.extract_strided_slice %11 {offsets = [0, 0, 0], sizes = [16, 16, 3], strides = [1, 1, 1]} : vector<18x16x3xbf16> to vector<16x16x3xbf16>
    %15 = vector.extract_strided_slice %9 {offsets = [1, 0, 0], sizes = [16, 16, 3], strides = [1, 1, 1]} : vector<18x16x3xbf16> to vector<16x16x3xbf16>
    %16 = vector.extract_strided_slice %10 {offsets = [1, 0, 0], sizes = [16, 16, 3], strides = [1, 1, 1]} : vector<18x16x3xbf16> to vector<16x16x3xbf16>
    %17 = vector.extract_strided_slice %11 {offsets = [1, 0, 0], sizes = [16, 16, 3], strides = [1, 1, 1]} : vector<18x16x3xbf16> to vector<16x16x3xbf16>
    %18 = vector.extract_strided_slice %9 {offsets = [2, 0, 0], sizes = [16, 16, 3], strides = [1, 1, 1]} : vector<18x16x3xbf16> to vector<16x16x3xbf16>
    %19 = vector.extract_strided_slice %10 {offsets = [2, 0, 0], sizes = [16, 16, 3], strides = [1, 1, 1]} : vector<18x16x3xbf16> to vector<16x16x3xbf16>
    %20 = vector.extract_strided_slice %11 {offsets = [2, 0, 0], sizes = [16, 16, 3], strides = [1, 1, 1]} : vector<18x16x3xbf16> to vector<16x16x3xbf16>
    %21 = tpu.concatenate %12, %13, %14, %15, %16, %17, %18, %19, %20 in 2 : vector<16x16x3xbf16>, vector<16x16x3xbf16>, vector<16x16x3xbf16>, vector<16x16x3xbf16>, vector<16x16x3xbf16>, vector<16x16x3xbf16>, vector<16x16x3xbf16>, vector<16x16x3xbf16>, vector<16x16x3xbf16> -> vector<16x16x27xbf16>
    %22 = vector.shape_cast %21 : vector<16x16x27xbf16> to vector<256x27xbf16>
    %cst_8 = arith.constant dense<0.000000e+00> : vector<256x64xf32>
    %23 = tpu.matmul %22, %2, %cst_8 {dimension_numbers = #tpu.dot_dimension_numbers<[1], [0], [0], [1], [0, 0, 1, 1], [], []>} : vector<256x27xbf16>, vector<27x64xbf16>, vector<256x64xf32> -> vector<256x64xf32>
    %24 = vector.broadcast %3 : vector<1x64xf32> to vector<256x64xf32>
    %25 = arith.addf %23, %24 : vector<256x64xf32>
    %cst_9 = arith.constant 0.000000e+00 : f32
    %26 = vector.broadcast %cst_9 : f32 to vector<256x64xf32>
    %27 = arith.maximumf %25, %26 : vector<256x64xf32>
    %28 = vector.shape_cast %27 : vector<256x64xf32> to vector<16x16x64xf32>
    %c0_10 = arith.constant 0 : index
    %c0_11 = arith.constant 0 : index
    %29 = vector.load %arg4[%c0_10, %c0_11] : memref<576x64xbf16, #tpu.memory_space<vmem>>, vector<576x64xbf16>
    %c0_12 = arith.constant 0 : index
    %c0_13 = arith.constant 0 : index
    %30 = vector.load %arg5[%c0_12, %c0_13] : memref<1x64xf32, #tpu.memory_space<vmem>>, vector<1x64xf32>
    %31 = arith.truncf %28 : vector<16x16x64xf32> to vector<16x16x64xbf16>
    %cst_14 = arith.constant 0.000000e+00 : bf16
    %32 = vector.broadcast %cst_14 : bf16 to vector<16x1x64xbf16>
    %cst_15 = arith.constant 0.000000e+00 : bf16
    %33 = vector.broadcast %cst_15 : bf16 to vector<1x18x64xbf16>
    %34 = tpu.concatenate %32, %31, %32 in 1 : vector<16x1x64xbf16>, vector<16x16x64xbf16>, vector<16x1x64xbf16> -> vector<16x18x64xbf16>
    %35 = tpu.concatenate %33, %34, %33 in 0 : vector<1x18x64xbf16>, vector<16x18x64xbf16>, vector<1x18x64xbf16> -> vector<18x18x64xbf16>
    %36 = vector.extract_strided_slice %35 {offsets = [0, 0, 0], sizes = [18, 16, 64], strides = [1, 1, 1]} : vector<18x18x64xbf16> to vector<18x16x64xbf16>
    %37 = vector.extract_strided_slice %35 {offsets = [0, 1, 0], sizes = [18, 16, 64], strides = [1, 1, 1]} : vector<18x18x64xbf16> to vector<18x16x64xbf16>
    %38 = vector.extract_strided_slice %35 {offsets = [0, 2, 0], sizes = [18, 16, 64], strides = [1, 1, 1]} : vector<18x18x64xbf16> to vector<18x16x64xbf16>
    %39 = vector.extract_strided_slice %36 {offsets = [0, 0, 0], sizes = [16, 16, 64], strides = [1, 1, 1]} : vector<18x16x64xbf16> to vector<16x16x64xbf16>
    %40 = vector.extract_strided_slice %37 {offsets = [0, 0, 0], sizes = [16, 16, 64], strides = [1, 1, 1]} : vector<18x16x64xbf16> to vector<16x16x64xbf16>
    %41 = vector.extract_strided_slice %38 {offsets = [0, 0, 0], sizes = [16, 16, 64], strides = [1, 1, 1]} : vector<18x16x64xbf16> to vector<16x16x64xbf16>
    %42 = vector.extract_strided_slice %36 {offsets = [1, 0, 0], sizes = [16, 16, 64], strides = [1, 1, 1]} : vector<18x16x64xbf16> to vector<16x16x64xbf16>
    %43 = vector.extract_strided_slice %37 {offsets = [1, 0, 0], sizes = [16, 16, 64], strides = [1, 1, 1]} : vector<18x16x64xbf16> to vector<16x16x64xbf16>
    %44 = vector.extract_strided_slice %38 {offsets = [1, 0, 0], sizes = [16, 16, 64], strides = [1, 1, 1]} : vector<18x16x64xbf16> to vector<16x16x64xbf16>
    %45 = vector.extract_strided_slice %36 {offsets = [2, 0, 0], sizes = [16, 16, 64], strides = [1, 1, 1]} : vector<18x16x64xbf16> to vector<16x16x64xbf16>
    %46 = vector.extract_strided_slice %37 {offsets = [2, 0, 0], sizes = [16, 16, 64], strides = [1, 1, 1]} : vector<18x16x64xbf16> to vector<16x16x64xbf16>
    %47 = vector.extract_strided_slice %38 {offsets = [2, 0, 0], sizes = [16, 16, 64], strides = [1, 1, 1]} : vector<18x16x64xbf16> to vector<16x16x64xbf16>
    %48 = tpu.concatenate %39, %40, %41, %42, %43, %44, %45, %46, %47 in 2 : vector<16x16x64xbf16>, vector<16x16x64xbf16>, vector<16x16x64xbf16>, vector<16x16x64xbf16>, vector<16x16x64xbf16>, vector<16x16x64xbf16>, vector<16x16x64xbf16>, vector<16x16x64xbf16>, vector<16x16x64xbf16> -> vector<16x16x576xbf16>
    %49 = vector.shape_cast %48 : vector<16x16x576xbf16> to vector<256x576xbf16>
    %cst_16 = arith.constant dense<0.000000e+00> : vector<256x64xf32>
    %50 = tpu.matmul %49, %29, %cst_16 {dimension_numbers = #tpu.dot_dimension_numbers<[1], [0], [0], [1], [0, 0, 1, 1], [], []>} : vector<256x576xbf16>, vector<576x64xbf16>, vector<256x64xf32> -> vector<256x64xf32>
    %51 = vector.broadcast %30 : vector<1x64xf32> to vector<256x64xf32>
    %52 = arith.addf %50, %51 : vector<256x64xf32>
    %cst_17 = arith.constant 0.000000e+00 : f32
    %53 = vector.broadcast %cst_17 : f32 to vector<256x64xf32>
    %54 = arith.maximumf %52, %53 : vector<256x64xf32>
    %55 = vector.shape_cast %54 : vector<256x64xf32> to vector<16x16x64xf32>
    %56 = vector.shape_cast %55 : vector<16x16x64xf32> to vector<8x2x16x64xf32>
    %57 = vector.extract_strided_slice %56 {offsets = [0, 0, 0, 0], sizes = [8, 1, 16, 64], strides = [1, 1, 1, 1]} : vector<8x2x16x64xf32> to vector<8x1x16x64xf32>
    %58 = vector.shape_cast %57 : vector<8x1x16x64xf32> to vector<8x16x64xf32>
    %59 = vector.extract_strided_slice %56 {offsets = [0, 1, 0, 0], sizes = [8, 1, 16, 64], strides = [1, 1, 1, 1]} : vector<8x2x16x64xf32> to vector<8x1x16x64xf32>
    %60 = vector.shape_cast %59 : vector<8x1x16x64xf32> to vector<8x16x64xf32>
    %61 = arith.maximumf %58, %60 : vector<8x16x64xf32>
    %62 = vector.extract_strided_slice %61 {offsets = [0, 0, 0], sizes = [8, 2, 64], strides = [1, 1, 1]} : vector<8x16x64xf32> to vector<8x2x64xf32>
    %cst_18 = arith.constant dense<0xFF800000> : vector<8x64xf32>
    %63 = vector.multi_reduction <maximumf>, %62, %cst_18 [1] : vector<8x2x64xf32> to vector<8x64xf32>
    %64 = vector.shape_cast %63 : vector<8x64xf32> to vector<8x1x64xf32>
    %65 = vector.extract_strided_slice %61 {offsets = [0, 2, 0], sizes = [8, 2, 64], strides = [1, 1, 1]} : vector<8x16x64xf32> to vector<8x2x64xf32>
    %cst_19 = arith.constant dense<0xFF800000> : vector<8x64xf32>
    %66 = vector.multi_reduction <maximumf>, %65, %cst_19 [1] : vector<8x2x64xf32> to vector<8x64xf32>
    %67 = vector.shape_cast %66 : vector<8x64xf32> to vector<8x1x64xf32>
    %68 = vector.extract_strided_slice %61 {offsets = [0, 4, 0], sizes = [8, 2, 64], strides = [1, 1, 1]} : vector<8x16x64xf32> to vector<8x2x64xf32>
    %cst_20 = arith.constant dense<0xFF800000> : vector<8x64xf32>
    %69 = vector.multi_reduction <maximumf>, %68, %cst_20 [1] : vector<8x2x64xf32> to vector<8x64xf32>
    %70 = vector.shape_cast %69 : vector<8x64xf32> to vector<8x1x64xf32>
    %71 = vector.extract_strided_slice %61 {offsets = [0, 6, 0], sizes = [8, 2, 64], strides = [1, 1, 1]} : vector<8x16x64xf32> to vector<8x2x64xf32>
    %cst_21 = arith.constant dense<0xFF800000> : vector<8x64xf32>
    %72 = vector.multi_reduction <maximumf>, %71, %cst_21 [1] : vector<8x2x64xf32> to vector<8x64xf32>
    %73 = vector.shape_cast %72 : vector<8x64xf32> to vector<8x1x64xf32>
    %74 = vector.extract_strided_slice %61 {offsets = [0, 8, 0], sizes = [8, 2, 64], strides = [1, 1, 1]} : vector<8x16x64xf32> to vector<8x2x64xf32>
    %cst_22 = arith.constant dense<0xFF800000> : vector<8x64xf32>
    %75 = vector.multi_reduction <maximumf>, %74, %cst_22 [1] : vector<8x2x64xf32> to vector<8x64xf32>
    %76 = vector.shape_cast %75 : vector<8x64xf32> to vector<8x1x64xf32>
    %77 = vector.extract_strided_slice %61 {offsets = [0, 10, 0], sizes = [8, 2, 64], strides = [1, 1, 1]} : vector<8x16x64xf32> to vector<8x2x64xf32>
    %cst_23 = arith.constant dense<0xFF800000> : vector<8x64xf32>
    %78 = vector.multi_reduction <maximumf>, %77, %cst_23 [1] : vector<8x2x64xf32> to vector<8x64xf32>
    %79 = vector.shape_cast %78 : vector<8x64xf32> to vector<8x1x64xf32>
    %80 = vector.extract_strided_slice %61 {offsets = [0, 12, 0], sizes = [8, 2, 64], strides = [1, 1, 1]} : vector<8x16x64xf32> to vector<8x2x64xf32>
    %cst_24 = arith.constant dense<0xFF800000> : vector<8x64xf32>
    %81 = vector.multi_reduction <maximumf>, %80, %cst_24 [1] : vector<8x2x64xf32> to vector<8x64xf32>
    %82 = vector.shape_cast %81 : vector<8x64xf32> to vector<8x1x64xf32>
    %83 = vector.extract_strided_slice %61 {offsets = [0, 14, 0], sizes = [8, 2, 64], strides = [1, 1, 1]} : vector<8x16x64xf32> to vector<8x2x64xf32>
    %cst_25 = arith.constant dense<0xFF800000> : vector<8x64xf32>
    %84 = vector.multi_reduction <maximumf>, %83, %cst_25 [1] : vector<8x2x64xf32> to vector<8x64xf32>
    %85 = vector.shape_cast %84 : vector<8x64xf32> to vector<8x1x64xf32>
    %86 = tpu.concatenate %64, %67, %70, %73, %76, %79, %82, %85 in 1 : vector<8x1x64xf32>, vector<8x1x64xf32>, vector<8x1x64xf32>, vector<8x1x64xf32>, vector<8x1x64xf32>, vector<8x1x64xf32>, vector<8x1x64xf32>, vector<8x1x64xf32> -> vector<8x8x64xf32>
    %c0_26 = arith.constant 0 : index
    %c0_27 = arith.constant 0 : index
    %87 = vector.load %arg6[%c0_26, %c0_27] : memref<576x128xbf16, #tpu.memory_space<vmem>>, vector<576x128xbf16>
    %c0_28 = arith.constant 0 : index
    %c0_29 = arith.constant 0 : index
    %88 = vector.load %arg7[%c0_28, %c0_29] : memref<1x128xf32, #tpu.memory_space<vmem>>, vector<1x128xf32>
    %89 = arith.truncf %86 : vector<8x8x64xf32> to vector<8x8x64xbf16>
    %cst_30 = arith.constant 0.000000e+00 : bf16
    %90 = vector.broadcast %cst_30 : bf16 to vector<8x1x64xbf16>
    %cst_31 = arith.constant 0.000000e+00 : bf16
    %91 = vector.broadcast %cst_31 : bf16 to vector<1x10x64xbf16>
    %92 = tpu.concatenate %90, %89, %90 in 1 : vector<8x1x64xbf16>, vector<8x8x64xbf16>, vector<8x1x64xbf16> -> vector<8x10x64xbf16>
    %93 = tpu.concatenate %91, %92, %91 in 0 : vector<1x10x64xbf16>, vector<8x10x64xbf16>, vector<1x10x64xbf16> -> vector<10x10x64xbf16>
    %94 = vector.extract_strided_slice %93 {offsets = [0, 0, 0], sizes = [10, 8, 64], strides = [1, 1, 1]} : vector<10x10x64xbf16> to vector<10x8x64xbf16>
    %95 = vector.extract_strided_slice %93 {offsets = [0, 1, 0], sizes = [10, 8, 64], strides = [1, 1, 1]} : vector<10x10x64xbf16> to vector<10x8x64xbf16>
    %96 = vector.extract_strided_slice %93 {offsets = [0, 2, 0], sizes = [10, 8, 64], strides = [1, 1, 1]} : vector<10x10x64xbf16> to vector<10x8x64xbf16>
    %97 = vector.extract_strided_slice %94 {offsets = [0, 0, 0], sizes = [8, 8, 64], strides = [1, 1, 1]} : vector<10x8x64xbf16> to vector<8x8x64xbf16>
    %98 = vector.extract_strided_slice %95 {offsets = [0, 0, 0], sizes = [8, 8, 64], strides = [1, 1, 1]} : vector<10x8x64xbf16> to vector<8x8x64xbf16>
    %99 = vector.extract_strided_slice %96 {offsets = [0, 0, 0], sizes = [8, 8, 64], strides = [1, 1, 1]} : vector<10x8x64xbf16> to vector<8x8x64xbf16>
    %100 = vector.extract_strided_slice %94 {offsets = [1, 0, 0], sizes = [8, 8, 64], strides = [1, 1, 1]} : vector<10x8x64xbf16> to vector<8x8x64xbf16>
    %101 = vector.extract_strided_slice %95 {offsets = [1, 0, 0], sizes = [8, 8, 64], strides = [1, 1, 1]} : vector<10x8x64xbf16> to vector<8x8x64xbf16>
    %102 = vector.extract_strided_slice %96 {offsets = [1, 0, 0], sizes = [8, 8, 64], strides = [1, 1, 1]} : vector<10x8x64xbf16> to vector<8x8x64xbf16>
    %103 = vector.extract_strided_slice %94 {offsets = [2, 0, 0], sizes = [8, 8, 64], strides = [1, 1, 1]} : vector<10x8x64xbf16> to vector<8x8x64xbf16>
    %104 = vector.extract_strided_slice %95 {offsets = [2, 0, 0], sizes = [8, 8, 64], strides = [1, 1, 1]} : vector<10x8x64xbf16> to vector<8x8x64xbf16>
    %105 = vector.extract_strided_slice %96 {offsets = [2, 0, 0], sizes = [8, 8, 64], strides = [1, 1, 1]} : vector<10x8x64xbf16> to vector<8x8x64xbf16>
    %106 = tpu.concatenate %97, %98, %99, %100, %101, %102, %103, %104, %105 in 2 : vector<8x8x64xbf16>, vector<8x8x64xbf16>, vector<8x8x64xbf16>, vector<8x8x64xbf16>, vector<8x8x64xbf16>, vector<8x8x64xbf16>, vector<8x8x64xbf16>, vector<8x8x64xbf16>, vector<8x8x64xbf16> -> vector<8x8x576xbf16>
    %107 = vector.shape_cast %106 : vector<8x8x576xbf16> to vector<64x576xbf16>
    %cst_32 = arith.constant dense<0.000000e+00> : vector<64x128xf32>
    %108 = tpu.matmul %107, %87, %cst_32 {dimension_numbers = #tpu.dot_dimension_numbers<[1], [0], [0], [1], [0, 0, 1, 1], [], []>} : vector<64x576xbf16>, vector<576x128xbf16>, vector<64x128xf32> -> vector<64x128xf32>
    %109 = vector.broadcast %88 : vector<1x128xf32> to vector<64x128xf32>
    %110 = arith.addf %108, %109 : vector<64x128xf32>
    %cst_33 = arith.constant 0.000000e+00 : f32
    %111 = vector.broadcast %cst_33 : f32 to vector<64x128xf32>
    %112 = arith.maximumf %110, %111 : vector<64x128xf32>
    %113 = vector.shape_cast %112 : vector<64x128xf32> to vector<8x8x128xf32>
    %c0_34 = arith.constant 0 : index
    %c0_35 = arith.constant 0 : index
    %114 = vector.load %arg8[%c0_34, %c0_35] : memref<1152x128xbf16, #tpu.memory_space<vmem>>, vector<1152x128xbf16>
    %c0_36 = arith.constant 0 : index
    %c0_37 = arith.constant 0 : index
    %115 = vector.load %arg9[%c0_36, %c0_37] : memref<1x128xf32, #tpu.memory_space<vmem>>, vector<1x128xf32>
    %116 = arith.truncf %113 : vector<8x8x128xf32> to vector<8x8x128xbf16>
    %cst_38 = arith.constant 0.000000e+00 : bf16
    %117 = vector.broadcast %cst_38 : bf16 to vector<8x1x128xbf16>
    %cst_39 = arith.constant 0.000000e+00 : bf16
    %118 = vector.broadcast %cst_39 : bf16 to vector<1x10x128xbf16>
    %119 = tpu.concatenate %117, %116, %117 in 1 : vector<8x1x128xbf16>, vector<8x8x128xbf16>, vector<8x1x128xbf16> -> vector<8x10x128xbf16>
    %120 = tpu.concatenate %118, %119, %118 in 0 : vector<1x10x128xbf16>, vector<8x10x128xbf16>, vector<1x10x128xbf16> -> vector<10x10x128xbf16>
    %121 = vector.extract_strided_slice %120 {offsets = [0, 0, 0], sizes = [10, 8, 128], strides = [1, 1, 1]} : vector<10x10x128xbf16> to vector<10x8x128xbf16>
    %122 = vector.extract_strided_slice %120 {offsets = [0, 1, 0], sizes = [10, 8, 128], strides = [1, 1, 1]} : vector<10x10x128xbf16> to vector<10x8x128xbf16>
    %123 = vector.extract_strided_slice %120 {offsets = [0, 2, 0], sizes = [10, 8, 128], strides = [1, 1, 1]} : vector<10x10x128xbf16> to vector<10x8x128xbf16>
    %124 = vector.extract_strided_slice %121 {offsets = [0, 0, 0], sizes = [8, 8, 128], strides = [1, 1, 1]} : vector<10x8x128xbf16> to vector<8x8x128xbf16>
    %125 = vector.extract_strided_slice %122 {offsets = [0, 0, 0], sizes = [8, 8, 128], strides = [1, 1, 1]} : vector<10x8x128xbf16> to vector<8x8x128xbf16>
    %126 = vector.extract_strided_slice %123 {offsets = [0, 0, 0], sizes = [8, 8, 128], strides = [1, 1, 1]} : vector<10x8x128xbf16> to vector<8x8x128xbf16>
    %127 = vector.extract_strided_slice %121 {offsets = [1, 0, 0], sizes = [8, 8, 128], strides = [1, 1, 1]} : vector<10x8x128xbf16> to vector<8x8x128xbf16>
    %128 = vector.extract_strided_slice %122 {offsets = [1, 0, 0], sizes = [8, 8, 128], strides = [1, 1, 1]} : vector<10x8x128xbf16> to vector<8x8x128xbf16>
    %129 = vector.extract_strided_slice %123 {offsets = [1, 0, 0], sizes = [8, 8, 128], strides = [1, 1, 1]} : vector<10x8x128xbf16> to vector<8x8x128xbf16>
    %130 = vector.extract_strided_slice %121 {offsets = [2, 0, 0], sizes = [8, 8, 128], strides = [1, 1, 1]} : vector<10x8x128xbf16> to vector<8x8x128xbf16>
    %131 = vector.extract_strided_slice %122 {offsets = [2, 0, 0], sizes = [8, 8, 128], strides = [1, 1, 1]} : vector<10x8x128xbf16> to vector<8x8x128xbf16>
    %132 = vector.extract_strided_slice %123 {offsets = [2, 0, 0], sizes = [8, 8, 128], strides = [1, 1, 1]} : vector<10x8x128xbf16> to vector<8x8x128xbf16>
    %133 = tpu.concatenate %124, %125, %126, %127, %128, %129, %130, %131, %132 in 2 : vector<8x8x128xbf16>, vector<8x8x128xbf16>, vector<8x8x128xbf16>, vector<8x8x128xbf16>, vector<8x8x128xbf16>, vector<8x8x128xbf16>, vector<8x8x128xbf16>, vector<8x8x128xbf16>, vector<8x8x128xbf16> -> vector<8x8x1152xbf16>
    %134 = vector.shape_cast %133 : vector<8x8x1152xbf16> to vector<64x1152xbf16>
    %cst_40 = arith.constant dense<0.000000e+00> : vector<64x128xf32>
    %135 = tpu.matmul %134, %114, %cst_40 {dimension_numbers = #tpu.dot_dimension_numbers<[1], [0], [0], [1], [0, 0, 1, 1], [], []>} : vector<64x1152xbf16>, vector<1152x128xbf16>, vector<64x128xf32> -> vector<64x128xf32>
    %136 = vector.broadcast %115 : vector<1x128xf32> to vector<64x128xf32>
    %137 = arith.addf %135, %136 : vector<64x128xf32>
    %cst_41 = arith.constant 0.000000e+00 : f32
    %138 = vector.broadcast %cst_41 : f32 to vector<64x128xf32>
    %139 = arith.maximumf %137, %138 : vector<64x128xf32>
    %140 = vector.shape_cast %139 : vector<64x128xf32> to vector<8x8x128xf32>
    %141 = vector.shape_cast %140 : vector<8x8x128xf32> to vector<4x2x8x128xf32>
    %142 = vector.extract_strided_slice %141 {offsets = [0, 0, 0, 0], sizes = [4, 1, 8, 128], strides = [1, 1, 1, 1]} : vector<4x2x8x128xf32> to vector<4x1x8x128xf32>
    %143 = vector.shape_cast %142 : vector<4x1x8x128xf32> to vector<4x8x128xf32>
    %144 = vector.extract_strided_slice %141 {offsets = [0, 1, 0, 0], sizes = [4, 1, 8, 128], strides = [1, 1, 1, 1]} : vector<4x2x8x128xf32> to vector<4x1x8x128xf32>
    %145 = vector.shape_cast %144 : vector<4x1x8x128xf32> to vector<4x8x128xf32>
    %146 = arith.maximumf %143, %145 : vector<4x8x128xf32>
    %147 = vector.extract_strided_slice %146 {offsets = [0, 0, 0], sizes = [4, 2, 128], strides = [1, 1, 1]} : vector<4x8x128xf32> to vector<4x2x128xf32>
    %cst_42 = arith.constant dense<0xFF800000> : vector<4x128xf32>
    %148 = vector.multi_reduction <maximumf>, %147, %cst_42 [1] : vector<4x2x128xf32> to vector<4x128xf32>
    %149 = vector.shape_cast %148 : vector<4x128xf32> to vector<4x1x128xf32>
    %150 = vector.extract_strided_slice %146 {offsets = [0, 2, 0], sizes = [4, 2, 128], strides = [1, 1, 1]} : vector<4x8x128xf32> to vector<4x2x128xf32>
    %cst_43 = arith.constant dense<0xFF800000> : vector<4x128xf32>
    %151 = vector.multi_reduction <maximumf>, %150, %cst_43 [1] : vector<4x2x128xf32> to vector<4x128xf32>
    %152 = vector.shape_cast %151 : vector<4x128xf32> to vector<4x1x128xf32>
    %153 = vector.extract_strided_slice %146 {offsets = [0, 4, 0], sizes = [4, 2, 128], strides = [1, 1, 1]} : vector<4x8x128xf32> to vector<4x2x128xf32>
    %cst_44 = arith.constant dense<0xFF800000> : vector<4x128xf32>
    %154 = vector.multi_reduction <maximumf>, %153, %cst_44 [1] : vector<4x2x128xf32> to vector<4x128xf32>
    %155 = vector.shape_cast %154 : vector<4x128xf32> to vector<4x1x128xf32>
    %156 = vector.extract_strided_slice %146 {offsets = [0, 6, 0], sizes = [4, 2, 128], strides = [1, 1, 1]} : vector<4x8x128xf32> to vector<4x2x128xf32>
    %cst_45 = arith.constant dense<0xFF800000> : vector<4x128xf32>
    %157 = vector.multi_reduction <maximumf>, %156, %cst_45 [1] : vector<4x2x128xf32> to vector<4x128xf32>
    %158 = vector.shape_cast %157 : vector<4x128xf32> to vector<4x1x128xf32>
    %159 = tpu.concatenate %149, %152, %155, %158 in 1 : vector<4x1x128xf32>, vector<4x1x128xf32>, vector<4x1x128xf32>, vector<4x1x128xf32> -> vector<4x4x128xf32>
    %c0_46 = arith.constant 0 : index
    %c0_47 = arith.constant 0 : index
    %160 = vector.load %arg10[%c0_46, %c0_47] : memref<1152x256xbf16, #tpu.memory_space<vmem>>, vector<1152x256xbf16>
    %c0_48 = arith.constant 0 : index
    %c0_49 = arith.constant 0 : index
    %161 = vector.load %arg11[%c0_48, %c0_49] : memref<1x256xf32, #tpu.memory_space<vmem>>, vector<1x256xf32>
    %162 = arith.truncf %159 : vector<4x4x128xf32> to vector<4x4x128xbf16>
    %cst_50 = arith.constant 0.000000e+00 : bf16
    %163 = vector.broadcast %cst_50 : bf16 to vector<4x1x128xbf16>
    %cst_51 = arith.constant 0.000000e+00 : bf16
    %164 = vector.broadcast %cst_51 : bf16 to vector<1x6x128xbf16>
    %165 = tpu.concatenate %163, %162, %163 in 1 : vector<4x1x128xbf16>, vector<4x4x128xbf16>, vector<4x1x128xbf16> -> vector<4x6x128xbf16>
    %166 = tpu.concatenate %164, %165, %164 in 0 : vector<1x6x128xbf16>, vector<4x6x128xbf16>, vector<1x6x128xbf16> -> vector<6x6x128xbf16>
    %167 = vector.extract_strided_slice %166 {offsets = [0, 0, 0], sizes = [6, 4, 128], strides = [1, 1, 1]} : vector<6x6x128xbf16> to vector<6x4x128xbf16>
    %168 = vector.extract_strided_slice %166 {offsets = [0, 1, 0], sizes = [6, 4, 128], strides = [1, 1, 1]} : vector<6x6x128xbf16> to vector<6x4x128xbf16>
    %169 = vector.extract_strided_slice %166 {offsets = [0, 2, 0], sizes = [6, 4, 128], strides = [1, 1, 1]} : vector<6x6x128xbf16> to vector<6x4x128xbf16>
    %170 = vector.extract_strided_slice %167 {offsets = [0, 0, 0], sizes = [4, 4, 128], strides = [1, 1, 1]} : vector<6x4x128xbf16> to vector<4x4x128xbf16>
    %171 = vector.extract_strided_slice %168 {offsets = [0, 0, 0], sizes = [4, 4, 128], strides = [1, 1, 1]} : vector<6x4x128xbf16> to vector<4x4x128xbf16>
    %172 = vector.extract_strided_slice %169 {offsets = [0, 0, 0], sizes = [4, 4, 128], strides = [1, 1, 1]} : vector<6x4x128xbf16> to vector<4x4x128xbf16>
    %173 = vector.extract_strided_slice %167 {offsets = [1, 0, 0], sizes = [4, 4, 128], strides = [1, 1, 1]} : vector<6x4x128xbf16> to vector<4x4x128xbf16>
    %174 = vector.extract_strided_slice %168 {offsets = [1, 0, 0], sizes = [4, 4, 128], strides = [1, 1, 1]} : vector<6x4x128xbf16> to vector<4x4x128xbf16>
    %175 = vector.extract_strided_slice %169 {offsets = [1, 0, 0], sizes = [4, 4, 128], strides = [1, 1, 1]} : vector<6x4x128xbf16> to vector<4x4x128xbf16>
    %176 = vector.extract_strided_slice %167 {offsets = [2, 0, 0], sizes = [4, 4, 128], strides = [1, 1, 1]} : vector<6x4x128xbf16> to vector<4x4x128xbf16>
    %177 = vector.extract_strided_slice %168 {offsets = [2, 0, 0], sizes = [4, 4, 128], strides = [1, 1, 1]} : vector<6x4x128xbf16> to vector<4x4x128xbf16>
    %178 = vector.extract_strided_slice %169 {offsets = [2, 0, 0], sizes = [4, 4, 128], strides = [1, 1, 1]} : vector<6x4x128xbf16> to vector<4x4x128xbf16>
    %179 = tpu.concatenate %170, %171, %172, %173, %174, %175, %176, %177, %178 in 2 : vector<4x4x128xbf16>, vector<4x4x128xbf16>, vector<4x4x128xbf16>, vector<4x4x128xbf16>, vector<4x4x128xbf16>, vector<4x4x128xbf16>, vector<4x4x128xbf16>, vector<4x4x128xbf16>, vector<4x4x128xbf16> -> vector<4x4x1152xbf16>
    %180 = vector.shape_cast %179 : vector<4x4x1152xbf16> to vector<16x1152xbf16>
    %cst_52 = arith.constant dense<0.000000e+00> : vector<16x256xf32>
    %181 = tpu.matmul %180, %160, %cst_52 {dimension_numbers = #tpu.dot_dimension_numbers<[1], [0], [0], [1], [0, 0, 1, 1], [], []>} : vector<16x1152xbf16>, vector<1152x256xbf16>, vector<16x256xf32> -> vector<16x256xf32>
    %182 = vector.broadcast %161 : vector<1x256xf32> to vector<16x256xf32>
    %183 = arith.addf %181, %182 : vector<16x256xf32>
    %cst_53 = arith.constant 0.000000e+00 : f32
    %184 = vector.broadcast %cst_53 : f32 to vector<16x256xf32>
    %185 = arith.maximumf %183, %184 : vector<16x256xf32>
    %186 = vector.shape_cast %185 : vector<16x256xf32> to vector<4x4x256xf32>
    %c0_54 = arith.constant 0 : index
    %c0_55 = arith.constant 0 : index
    %187 = vector.load %arg12[%c0_54, %c0_55] : memref<2304x256xbf16, #tpu.memory_space<vmem>>, vector<2304x256xbf16>
    %c0_56 = arith.constant 0 : index
    %c0_57 = arith.constant 0 : index
    %188 = vector.load %arg13[%c0_56, %c0_57] : memref<1x256xf32, #tpu.memory_space<vmem>>, vector<1x256xf32>
    %189 = arith.truncf %186 : vector<4x4x256xf32> to vector<4x4x256xbf16>
    %cst_58 = arith.constant 0.000000e+00 : bf16
    %190 = vector.broadcast %cst_58 : bf16 to vector<4x1x256xbf16>
    %cst_59 = arith.constant 0.000000e+00 : bf16
    %191 = vector.broadcast %cst_59 : bf16 to vector<1x6x256xbf16>
    %192 = tpu.concatenate %190, %189, %190 in 1 : vector<4x1x256xbf16>, vector<4x4x256xbf16>, vector<4x1x256xbf16> -> vector<4x6x256xbf16>
    %193 = tpu.concatenate %191, %192, %191 in 0 : vector<1x6x256xbf16>, vector<4x6x256xbf16>, vector<1x6x256xbf16> -> vector<6x6x256xbf16>
    %194 = vector.extract_strided_slice %193 {offsets = [0, 0, 0], sizes = [6, 4, 256], strides = [1, 1, 1]} : vector<6x6x256xbf16> to vector<6x4x256xbf16>
    %195 = vector.extract_strided_slice %193 {offsets = [0, 1, 0], sizes = [6, 4, 256], strides = [1, 1, 1]} : vector<6x6x256xbf16> to vector<6x4x256xbf16>
    %196 = vector.extract_strided_slice %193 {offsets = [0, 2, 0], sizes = [6, 4, 256], strides = [1, 1, 1]} : vector<6x6x256xbf16> to vector<6x4x256xbf16>
    %197 = vector.extract_strided_slice %194 {offsets = [0, 0, 0], sizes = [4, 4, 256], strides = [1, 1, 1]} : vector<6x4x256xbf16> to vector<4x4x256xbf16>
    %198 = vector.extract_strided_slice %195 {offsets = [0, 0, 0], sizes = [4, 4, 256], strides = [1, 1, 1]} : vector<6x4x256xbf16> to vector<4x4x256xbf16>
    %199 = vector.extract_strided_slice %196 {offsets = [0, 0, 0], sizes = [4, 4, 256], strides = [1, 1, 1]} : vector<6x4x256xbf16> to vector<4x4x256xbf16>
    %200 = vector.extract_strided_slice %194 {offsets = [1, 0, 0], sizes = [4, 4, 256], strides = [1, 1, 1]} : vector<6x4x256xbf16> to vector<4x4x256xbf16>
    %201 = vector.extract_strided_slice %195 {offsets = [1, 0, 0], sizes = [4, 4, 256], strides = [1, 1, 1]} : vector<6x4x256xbf16> to vector<4x4x256xbf16>
    %202 = vector.extract_strided_slice %196 {offsets = [1, 0, 0], sizes = [4, 4, 256], strides = [1, 1, 1]} : vector<6x4x256xbf16> to vector<4x4x256xbf16>
    %203 = vector.extract_strided_slice %194 {offsets = [2, 0, 0], sizes = [4, 4, 256], strides = [1, 1, 1]} : vector<6x4x256xbf16> to vector<4x4x256xbf16>
    %204 = vector.extract_strided_slice %195 {offsets = [2, 0, 0], sizes = [4, 4, 256], strides = [1, 1, 1]} : vector<6x4x256xbf16> to vector<4x4x256xbf16>
    %205 = vector.extract_strided_slice %196 {offsets = [2, 0, 0], sizes = [4, 4, 256], strides = [1, 1, 1]} : vector<6x4x256xbf16> to vector<4x4x256xbf16>
    %206 = tpu.concatenate %197, %198, %199, %200, %201, %202, %203, %204, %205 in 2 : vector<4x4x256xbf16>, vector<4x4x256xbf16>, vector<4x4x256xbf16>, vector<4x4x256xbf16>, vector<4x4x256xbf16>, vector<4x4x256xbf16>, vector<4x4x256xbf16>, vector<4x4x256xbf16>, vector<4x4x256xbf16> -> vector<4x4x2304xbf16>
    %207 = vector.shape_cast %206 : vector<4x4x2304xbf16> to vector<16x2304xbf16>
    %cst_60 = arith.constant dense<0.000000e+00> : vector<16x256xf32>
    %208 = tpu.matmul %207, %187, %cst_60 {dimension_numbers = #tpu.dot_dimension_numbers<[1], [0], [0], [1], [0, 0, 1, 1], [], []>} : vector<16x2304xbf16>, vector<2304x256xbf16>, vector<16x256xf32> -> vector<16x256xf32>
    %209 = vector.broadcast %188 : vector<1x256xf32> to vector<16x256xf32>
    %210 = arith.addf %208, %209 : vector<16x256xf32>
    %cst_61 = arith.constant 0.000000e+00 : f32
    %211 = vector.broadcast %cst_61 : f32 to vector<16x256xf32>
    %212 = arith.maximumf %210, %211 : vector<16x256xf32>
    %213 = vector.shape_cast %212 : vector<16x256xf32> to vector<4x4x256xf32>
    %214 = vector.shape_cast %213 : vector<4x4x256xf32> to vector<2x2x4x256xf32>
    %215 = vector.extract_strided_slice %214 {offsets = [0, 0, 0, 0], sizes = [2, 1, 4, 256], strides = [1, 1, 1, 1]} : vector<2x2x4x256xf32> to vector<2x1x4x256xf32>
    %216 = vector.shape_cast %215 : vector<2x1x4x256xf32> to vector<2x4x256xf32>
    %217 = vector.extract_strided_slice %214 {offsets = [0, 1, 0, 0], sizes = [2, 1, 4, 256], strides = [1, 1, 1, 1]} : vector<2x2x4x256xf32> to vector<2x1x4x256xf32>
    %218 = vector.shape_cast %217 : vector<2x1x4x256xf32> to vector<2x4x256xf32>
    %219 = arith.maximumf %216, %218 : vector<2x4x256xf32>
    %220 = vector.extract_strided_slice %219 {offsets = [0, 0, 0], sizes = [2, 2, 256], strides = [1, 1, 1]} : vector<2x4x256xf32> to vector<2x2x256xf32>
    %cst_62 = arith.constant dense<0xFF800000> : vector<2x256xf32>
    %221 = vector.multi_reduction <maximumf>, %220, %cst_62 [1] : vector<2x2x256xf32> to vector<2x256xf32>
    %222 = vector.shape_cast %221 : vector<2x256xf32> to vector<2x1x256xf32>
    %223 = vector.extract_strided_slice %219 {offsets = [0, 2, 0], sizes = [2, 2, 256], strides = [1, 1, 1]} : vector<2x4x256xf32> to vector<2x2x256xf32>
    %cst_63 = arith.constant dense<0xFF800000> : vector<2x256xf32>
    %224 = vector.multi_reduction <maximumf>, %223, %cst_63 [1] : vector<2x2x256xf32> to vector<2x256xf32>
    %225 = vector.shape_cast %224 : vector<2x256xf32> to vector<2x1x256xf32>
    %226 = tpu.concatenate %222, %225 in 1 : vector<2x1x256xf32>, vector<2x1x256xf32> -> vector<2x2x256xf32>
    %cst_64 = arith.constant dense<0.000000e+00> : vector<2x256xf32>
    %227 = vector.multi_reduction <add>, %226, %cst_64 [0] : vector<2x2x256xf32> to vector<2x256xf32>
    %cst_65 = arith.constant 2.000000e+00 : f32
    %228 = vector.broadcast %cst_65 : f32 to vector<2x256xf32>
    %229 = arith.divf %227, %228 : vector<2x256xf32>
    %cst_66 = arith.constant dense<0.000000e+00> : vector<256xf32>
    %230 = vector.multi_reduction <add>, %229, %cst_66 [0] : vector<2x256xf32> to vector<256xf32>
    %231 = vector.shape_cast %230 : vector<256xf32> to vector<1x256xf32>
    %cst_67 = arith.constant 2.000000e+00 : f32
    %232 = vector.broadcast %cst_67 : f32 to vector<1x256xf32>
    %233 = arith.divf %231, %232 : vector<1x256xf32>
    %234 = arith.truncf %233 : vector<1x256xf32> to vector<1x256xbf16>
    %c0_68 = arith.constant 0 : index
    %c0_69 = arith.constant 0 : index
    %235 = vector.load %arg14[%c0_68, %c0_69] : memref<256x128xbf16, #tpu.memory_space<vmem>>, vector<256x128xbf16>
    %cst_70 = arith.constant dense<0.000000e+00> : vector<1x128xf32>
    %236 = tpu.matmul %234, %235, %cst_70 {dimension_numbers = #tpu.dot_dimension_numbers<[1], [0], [0], [1], [0, 0, 1, 1], [], []>} : vector<1x256xbf16>, vector<256x128xbf16>, vector<1x128xf32> -> vector<1x128xf32>
    %c0_71 = arith.constant 0 : index
    %c0_72 = arith.constant 0 : index
    %237 = vector.load %arg15[%c0_71, %c0_72] : memref<1x128xf32, #tpu.memory_space<vmem>>, vector<1x128xf32>
    %238 = arith.addf %236, %237 : vector<1x128xf32>
    %cst_73 = arith.constant 0.000000e+00 : f32
    %239 = vector.broadcast %cst_73 : f32 to vector<1x128xf32>
    %240 = arith.maximumf %238, %239 : vector<1x128xf32>
    %241 = arith.truncf %240 : vector<1x128xf32> to vector<1x128xbf16>
    %c0_74 = arith.constant 0 : index
    %c0_75 = arith.constant 0 : index
    %242 = vector.load %arg16[%c0_74, %c0_75] : memref<128x4xbf16, #tpu.memory_space<vmem>>, vector<128x4xbf16>
    %cst_76 = arith.constant dense<0.000000e+00> : vector<1x4xf32>
    %243 = tpu.matmul %241, %242, %cst_76 {dimension_numbers = #tpu.dot_dimension_numbers<[1], [0], [0], [1], [0, 0, 1, 1], [], []>} : vector<1x128xbf16>, vector<128x4xbf16>, vector<1x4xf32> -> vector<1x4xf32>
    %c0_77 = arith.constant 0 : index
    %c0_78 = arith.constant 0 : index
    %244 = vector.load %arg17[%c0_77, %c0_78] : memref<1x4xf32, #tpu.memory_space<vmem>>, vector<1x4xf32>
    %245 = arith.addf %243, %244 : vector<1x4xf32>
    %c0_79 = arith.constant 0 : index
    %c0_80 = arith.constant 0 : index
    %c0_81 = arith.constant 0 : index
    %246 = vector.load %arg18[%c0_79, %c0_80, %c0_81] : memref<1x1x4xf32, #tpu.memory_space<vmem>>, vector<1x1x4xf32>
    %247 = vector.shape_cast %246 : vector<1x1x4xf32> to vector<1x4xf32>
    %248 = vector.shape_cast %245 : vector<1x4xf32> to vector<1x1x4xf32>
    tpu.vector_store %arg18[%c0_79, %c0_80, %c0_81], %248 {strides = array<i32>} : memref<1x1x4xf32, #tpu.memory_space<vmem>>, vector<1x1x4xf32>,
    return
  }
  func.func @transform_0(%arg0: i32) -> (i32, i32, i32, i32) {
    %c0_i32 = arith.constant 0 : i32
    %c0_i32_0 = arith.constant 0 : i32
    %c0_i32_1 = arith.constant 0 : i32
    %c0_i32_2 = arith.constant 0 : i32
    return %arg0, %c0_i32, %c0_i32_0, %c0_i32_1 : i32, i32, i32, i32
  }
  func.func @transform_1(%arg0: i32) -> (i32, i32) {
    %c0_i32 = arith.constant 0 : i32
    %c0_i32_0 = arith.constant 0 : i32
    %c0_i32_1 = arith.constant 0 : i32
    return %c0_i32, %c0_i32_0 : i32, i32
  }
  func.func @transform_2(%arg0: i32) -> (i32, i32) {
    %c0_i32 = arith.constant 0 : i32
    %c0_i32_0 = arith.constant 0 : i32
    %c0_i32_1 = arith.constant 0 : i32
    return %c0_i32, %c0_i32_0 : i32, i32
  }
  func.func @transform_3(%arg0: i32) -> (i32, i32) {
    %c0_i32 = arith.constant 0 : i32
    %c0_i32_0 = arith.constant 0 : i32
    %c0_i32_1 = arith.constant 0 : i32
    return %c0_i32, %c0_i32_0 : i32, i32
  }
  func.func @transform_4(%arg0: i32) -> (i32, i32) {
    %c0_i32 = arith.constant 0 : i32
    %c0_i32_0 = arith.constant 0 : i32
    %c0_i32_1 = arith.constant 0 : i32
    return %c0_i32, %c0_i32_0 : i32, i32
  }
  func.func @transform_5(%arg0: i32) -> (i32, i32) {
    %c0_i32 = arith.constant 0 : i32
    %c0_i32_0 = arith.constant 0 : i32
    %c0_i32_1 = arith.constant 0 : i32
    return %c0_i32, %c0_i32_0 : i32, i32
  }
  func.func @transform_6(%arg0: i32) -> (i32, i32) {
    %c0_i32 = arith.constant 0 : i32
    %c0_i32_0 = arith.constant 0 : i32
    %c0_i32_1 = arith.constant 0 : i32
    return %c0_i32, %c0_i32_0 : i32, i32
  }
  func.func @transform_7(%arg0: i32) -> (i32, i32) {
    %c0_i32 = arith.constant 0 : i32
    %c0_i32_0 = arith.constant 0 : i32
    %c0_i32_1 = arith.constant 0 : i32
    return %c0_i32, %c0_i32_0 : i32, i32
  }
  func.func @transform_8(%arg0: i32) -> (i32, i32) {
    %c0_i32 = arith.constant 0 : i32
    %c0_i32_0 = arith.constant 0 : i32
    %c0_i32_1 = arith.constant 0 : i32
    return %c0_i32, %c0_i32_0 : i32, i32
  }
  func.func @transform_9(%arg0: i32) -> (i32, i32) {
    %c0_i32 = arith.constant 0 : i32
    %c0_i32_0 = arith.constant 0 : i32
    %c0_i32_1 = arith.constant 0 : i32
    return %c0_i32, %c0_i32_0 : i32, i32
  }
  func.func @transform_10(%arg0: i32) -> (i32, i32) {
    %c0_i32 = arith.constant 0 : i32
    %c0_i32_0 = arith.constant 0 : i32
    %c0_i32_1 = arith.constant 0 : i32
    return %c0_i32, %c0_i32_0 : i32, i32
  }
  func.func @transform_11(%arg0: i32) -> (i32, i32) {
    %c0_i32 = arith.constant 0 : i32
    %c0_i32_0 = arith.constant 0 : i32
    %c0_i32_1 = arith.constant 0 : i32
    return %c0_i32, %c0_i32_0 : i32, i32
  }
  func.func @transform_12(%arg0: i32) -> (i32, i32) {
    %c0_i32 = arith.constant 0 : i32
    %c0_i32_0 = arith.constant 0 : i32
    %c0_i32_1 = arith.constant 0 : i32
    return %c0_i32, %c0_i32_0 : i32, i32
  }
  func.func @transform_13(%arg0: i32) -> (i32, i32) {
    %c0_i32 = arith.constant 0 : i32
    %c0_i32_0 = arith.constant 0 : i32
    %c0_i32_1 = arith.constant 0 : i32
    return %c0_i32, %c0_i32_0 : i32, i32
  }
  func.func @transform_14(%arg0: i32) -> (i32, i32) {
    %c0_i32 = arith.constant 0 : i32
    %c0_i32_0 = arith.constant 0 : i32
    %c0_i32_1 = arith.constant 0 : i32
    return %c0_i32, %c0_i32_0 : i32, i32
  }
  func.func @transform_15(%arg0: i32) -> (i32, i32) {
    %c0_i32 = arith.constant 0 : i32
    %c0_i32_0 = arith.constant 0 : i32
    %c0_i32_1 = arith.constant 0 : i32
    return %c0_i32, %c0_i32_0 : i32, i32
  }
  func.func @transform_16(%arg0: i32) -> (i32, i32) {
    %c0_i32 = arith.constant 0 : i32
    %c0_i32_0 = arith.constant 0 : i32
    %c0_i32_1 = arith.constant 0 : i32
    return %c0_i32, %c0_i32_0 : i32, i32
  }
  func.func @transform_17(%arg0: i32) -> (i32, i32, i32) {
    %c0_i32 = arith.constant 0 : i32
    %c0_i32_0 = arith.constant 0 : i32
    %c0_i32_1 = arith.constant 0 : i32
    return %arg0, %c0_i32, %c0_i32_0 : i32, i32, i32
  }
}

</mosaic_0001>

<bundles_post_ra>
// kernel: _lambda_.1
= control target key start
LH: loop header
LB: loop body
LE: loop exit
PB: predicated region body
PF: predicated region fallthrough
CT: control target
= control target key end

     0   :  { %s17812_s0 = inlined_call_operand.vmem [shape: f32[2,16,16,3], index: 0, kind: input, shape index: {}]   ;;  %s17813_s1 = inlined_call_operand.vmem [shape: bf16[27,64], index: 1, kind: input, shape index: {}]   ;;  %s17814_s2 = inlined_call_operand.vmem [shape: f32[1,64], index: 2, kind: input, shape index: {}]   ;;  %s17815_s3 = inlined_call_operand.vmem [shape: bf16[576,64], index: 3, kind: input, shape index: {}]   ;;  %s17816_s4 = inlined_call_operand.vmem [shape: f32[1,64], index: 4, kind: input, shape index: {}]   ;;  %s17817_s5 = inlined_call_operand.vmem [shape: bf16[576,128], index: 5, kind: input, shape index: {}]   ;;  %s17818_s6 = inlined_call_operand.vmem [shape: f32[1,128], index: 6, kind: input, shape index: {}]   ;;  %s17819_s7 = inlined_call_operand.vmem [shape: bf16[1152,128], index: 7, kind: input, shape index: {}]   ;;  %s17820_s8 = inlined_call_operand.vmem [shape: f32[1,128], index: 8, kind: input, shape index: {}]   ;;  %s17821_s9 = inlined_call_operand.vmem [shape: bf16[1152,256], index: 9, kind: input, shape index: {}]   ;;  %s17822_s10 = inlined_call_operand.vmem [shape: f32[1,256], index: 10, kind: input, shape index: {}]   ;;  %s17823_s11 = inlined_call_operand.vmem [shape: bf16[2304,256], index: 11, kind: input, shape index: {}]   ;;  %s17824_s12 = inlined_call_operand.vmem [shape: f32[1,256], index: 12, kind: input, shape index: {}]   ;;  %s17825_s13 = inlined_call_operand.vmem [shape: bf16[256,128], index: 13, kind: input, shape index: {}]   ;;  %s17826_s14 = inlined_call_operand.vmem [shape: f32[1,128], index: 14, kind: input, shape index: {}]   ;;  %s17827_s15 = inlined_call_operand.vmem [shape: bf16[128,4], index: 15, kind: input, shape index: {}]   ;;  %s17828_s16 = inlined_call_operand.vmem [shape: f32[1,4], index: 16, kind: input, shape index: {}]   ;;  %s17829_s17 = inlined_call_operand.hbm [shape: f32[2,1,4], index: 17, kind: output, shape index: {}]  }
   0x1   :  { %17861 = sst [smem:[#allocation42_spill]] %s17812_s0 }
   0x2   :  { %17862 = sst [smem:[#allocation43_spill]] %s17813_s1 }
   0x3   :  { %22 = vsyncpa [#allocation3], 0 }
   0x4   :  { %24 = vsyncpa [#allocation3 + $0x1], 0  ;;  %s13104_s24 = smov 0   ;;  %s13106_s25 = smov 0  }
   0x5   :  { %s13108_s26 = smov 0   ;;  %s13110_s27 = smov 0  }
   0x6 LB: > { %17863 = sst [smem:[#allocation5_spill]] %s12993_s26  ;;  %s13125_s28 = sadd.s32 4294967295, %s12997_s27   ;;  %s12997_s27 = sphi %s13110_s27, %s17965_s27   ;;  %s12993_s26 = sphi %s13108_s26, %s17967_s26   ;;  %s12989_s25 = sphi %s13106_s25, %s17969_s25   ;;  %s12985_s24 = sphi %s13104_s24, %s17968_s24  }
   0x7   : > { %s10589_s29 = sadd.s32 4294967294, %s12997_s27   ;;  %s13129_s0 = sadd.s32 1, %s12997_s27  }
   0x8   : > { %17864 = sst [smem:[#allocation6_spill]] %s13129_s0  ;;  %s399_s30 = sadd.s32 1, %s12993_s26 }
   0x9   : > { %s396_s18 = ssub.s32 %s12997_s27, %s13129_s0  ;;  %p409_p0 = scmp.ne.s32.totalorder %s12993_s26, %s12989_s25 }
   0xa   : > { %p397_p1 = scmp.eq.s32.totalorder %s396_s18, 0  ;;  %p410_p2 = scmp.eq.s32.totalorder %s13125_s28, 1 }
   0xb   : > { %p415_p3 = scmp.ne.s32.totalorder %s12989_s25, %s12985_s24  ;;  %p416_p4 = scmp.eq.s32.totalorder %s10589_s29, 1 }
   0xc   : > { %s13140_s19 = scalar_select %p397_p1, %s12993_s26, %s399_s30  }
   0xd   : > { %p13142_p5 = por %p410_p2, %p409_p0  ;;  %p13146_p6 = por %p416_p4, %p415_p3 }
   0xe   : > { %17865 = sst [smem:[#allocation7_spill]] %s13140_s19  ;;  %p10592_p7 = scmp.ge.s32.totalorder %s12997_s27, 1 }
   0xf   : > { %s17867_s20 = scalar_select %p13146_p6, 1, 0 }
  0x10   : > { %p490_p8 = scmp.lt.s32.totalorder %s12997_s27, 3 }
  0x11   : > { %17868 = sst [smem:[#allocation8_spill]] %s17867_s20 }
  0x12   : > { %p491_p9 = pnand %p10592_p7, %p490_p8 }
  0x14   : > { %494 = sbr.rel (%p491_p9) target bundleno = 3608 (0xe18), region = 88 }
  0x1b   : > { %v17852_v0 = vmov 0   ;;  %p541_p10 = scmp.lt.s32.totalorder %s13125_s28, 1  ;;  %s17845_s21 = smov 6   ;;  %vm744_vm0 = vcmask 1040384   ;;  %vm745_vm1 = vsmask.f32 256 }
  0x1c   : > { %v13153_v1 = vrot.slane %v17852_v0, 1  ;;  %s13001_s22 = smov 3   ;;  %s17870_s19 = sld [smem:[#allocation42_spill]]  ;;  %vm13173_vm2 = vmand %vm744_vm0, %vm745_vm1  ;;  %v17871_v18 = vmov 0  ;;  %vm1031_vm3 = vcmask 1046528   ;;  %vm1634_vm5 = vcmask 1044480  }
  0x1d   : > { %s542_s23 = scalar_select %p541_p10, %s13125_s28, 1  ;;  %v17872_v18 = vsel %vm13173_vm2, 4294967295, %v17871_v18  ;;  %vm779_vm4 = vsmask.f32 7424  ;;  %vm1635_vm6 = vcmask 1045504   ;;  %vm1320_vm7 = vcmask 23552  }
  0x1e   : > { %17869 = vst [vmem:[#allocation9_spill] sm:$0xff] %v13153_v1  ;;  %1079 = vrot.lane.b32.xlu1 %v13153_v1, %s17845_s21  ;;  %968 = vrot.lane.b32.xlu0 %v13153_v1, %s13001_s22  ;;  %17873 = vst [vmem:[#allocation10_spill] sm:$0xff] %v17872_v18  ;;  %s17874_s18 = sld [smem:[#allocation43_spill]]  ;;  %s17840_s30 = smov 12   ;;  %vm1353_vm8 = vcmask 48128   ;;  %vm1386_vm9 = vcmask 72704  }
  0x1f   : > { %s11314_s29 = sshll.u32 %s542_s23, 8  ;;  %s17832_s23 = smov 18   ;;  %vm1419_vm10 = vcmask 97280   ;;  %vm1452_vm11 = vcmask 121856   ;;  %vm1485_vm12 = vcmask 146432   ;;  %vm1518_vm13 = vcmask 171008  }
  0x20   : > { %s17881_s0 = smov 6   ;;  %vm1551_vm14 = vcmask 195584   ;;  %vm1601_vm15 = vcmask 220160   ;;  %vm2469_vm1 = vcmask 523264  }
  0x22   : > { %s13164_s26 = scalar_lea.vmem %s17870_s19, %s11314_s29  ;;  %s17842_s19 = smov 9  }
  0x23   : > { %v549_v2 = vld [vmem:[%s13164_s26 + $0x10] sm:$0xff]  ;;  %v550_v3 = vld [vmem:[%s13164_s26 + $0x18] sm:$0xff]  ;;  %v547_v4 = vld [vmem:[%s13164_s26] sm:$0xff]  ;;  %s17834_s29 = smov 15  }
  0x24   : > { %v585_v5 = vpack.c.bf16 %v550_v3, %v549_v2  ;;  %v548_v6 = vld [vmem:[%s13164_s26 + $0x8] sm:$0xff]  ;;  %v551_v7 = vld [vmem:[%s13164_s26 + $0x20] sm:$0xff]  ;;  %v553_v32 = vld [vmem:[%s13164_s26 + $0x30] sm:$0xff] }
  0x25   : > { %v552_v8 = vld [vmem:[%s13164_s26 + $0x28] sm:$0xff]  ;;  %v584_v9 = vpack.c.bf16 %v548_v6, %v547_v4  ;;  %v554_v37 = vld [vmem:[%s13164_s26 + $0x38] sm:$0xff]  ;;  %v12117_v41 = vld [vmem:[%s17874_s18] sm:$0xff]  }
  0x26   : > { %v586_v10 = vpack.c.bf16 %v552_v8, %v551_v7  ;;  %v608_v11 = vshrl.u32 %v585_v5, 16  ;;  %v611_v12 = vshll.u32 %v585_v5, 16  ;;  %v587_v49 = vpack.c.bf16 %v554_v37, %v553_v32  ;;  %11868 = vmatprep.subr.bf16.mxu0 %v12117_v41  ;;  %12004 = vmatprep.subr.bf16.mxu1 %v12117_v41  ;;  %v555_v63 = vld [vmem:[%s13164_s26 + $0x40] sm:$0xff]  ;;  %v556_v2 = vld [vmem:[%s13164_s26 + $0x48] sm:$0xff] }
  0x27   : > { %v601_v13 = vshrl.u32 %v584_v9, 16  ;;  %v604_v14 = vshll.u32 %v584_v9, 16  ;;  %11869 = vmatpush3.bf16.msra.mxu0 %v12117_v41  ;;  %12006 = vmatpush3.bf16.msra.mxu1 %v12117_v41  ;;  %v588_v7 = vpack.c.bf16 %v556_v2, %v555_v63  ;;  %v13008_v37 = vmov 65535  }
  0x28   : > { %v615_v15 = vshrl.u32 %v586_v10, 16  ;;  %v618_v16 = vshll.u32 %v586_v10, 16  ;;  %v610_v17 = vrot.slane %v608_v11, 7  ;;  %v622_v57 = vshrl.u32 %v587_v49, 16  ;;  %v557_v11 = vld [vmem:[%s13164_s26 + $0x50] sm:$0xff] }
  0x29   : > { %v603_v19 = vrot.slane %v601_v13, 7  ;;  %v625_v62 = vshll.u32 %v587_v49, 16  ;;  %v629_v10 = vshrl.u32 %v588_v7, 16  ;;  %v558_v13 = vld [vmem:[%s13164_s26 + $0x58] sm:$0xff] }
  0x2a   : > { %v617_v20 = vrot.slane %v615_v15, 7  ;;  %v613_v21 = vor.u32 %v611_v12, %v610_v17  ;;  %v764_v27 = vsel %vm13173_vm2, %v610_v17, 0  ;;  %v624_v61 = vrot.slane %v622_v57, 7 }
  0x2b   : > { %v606_v22 = vor.u32 %v604_v14, %v603_v19  ;;  %v763_v24 = vsel %vm13173_vm2, %v603_v19, 0  ;;  %v1038_v39 = vrot.slane %v764_v27, 1  ;;  %v808_v40 = vshll.u32 %v764_v27, 16  ;;  %v559_v19 = vld [vmem:[%s13164_s26 + $0x60] sm:$0xff]  ;;  %v12118_v27 = vld [vmem:[%s17874_s18 + $0x8] sm:$0x3f]  }
  0x2c   : > { %v620_v23 = vor.u32 %v618_v16, %v617_v20  ;;  %v13181_v25 = vsel %vm13173_vm2, 0, %v613_v21  ;;  %v1035_v30 = vrot.slane %v763_v24, 1  ;;  %v796_v34 = vshll.u32 %v763_v24, 16  ;;  %s17879_s18 = smov 9  }
  0x2d   : > { %1114 = vrot.lane.b32.xlu1 %v13181_v25, %s17842_s19  ;;  %v13187_v26 = vsel %vm13173_vm2, 0, %v606_v22  ;;  %v803_v35 = vshll.u32 %v13181_v25, 16  ;;  %v1037_v38 = vrot.slane %v13181_v25, 1  ;;  %v801_v43 = vshrl.u32 %v13181_v25, 16 }
  0x2e   : > { %1112 = vrot.lane.b32.xlu0 %v13187_v26, %s17842_s19  ;;  %v13195_v28 = vsel %vm13173_vm2, 0, %v620_v23  ;;  %v1034_v29 = vrot.slane %v13187_v26, 1  ;;  %v791_v31 = vshll.u32 %v13187_v26, 16  ;;  %v789_v33 = vshrl.u32 %v13187_v26, 16  ;;  %v560_v23 = vld [vmem:[%s13164_s26 + $0x68] sm:$0xff] }
  0x2f   : > { %v805_v44 = vrot.slane %v803_v35, 1  ;;  %v815_v45 = vshll.u32 %v13195_v28, 16  ;;  %v798_v47 = vrot.slane %v796_v34, 1  ;;  %v765_v48 = vsel %vm13173_vm2, %v617_v20, 0 }
  0x30   : > { %v793_v36 = vrot.slane %v791_v31, 1  ;;  %v1036_v42 = vsel %vm1031_vm3, %v1034_v29, %v1035_v30  ;;  %v1039_v50 = vsel %vm1031_vm3, %v1037_v38, %v1038_v39  ;;  %v810_v51 = vrot.slane %v808_v40, 1 }
  0x31   : > { %1226 = vrot.lane.b32.xlu1 %v13195_v28, %s17832_s23  ;;  %v806_v52 = vor.u32 %v805_v44, %v801_v43  ;;  %v813_v53 = vshrl.u32 %v13195_v28, 16  ;;  %v817_v54 = vrot.slane %v815_v45, 1  ;;  %v820_v55 = vshll.u32 %v765_v48, 16 }
  0x32   : > { %1224 = vrot.lane.b32.xlu0 %v13181_v25, %s17832_s23  ;;  %v794_v46 = vor.u32 %v793_v36, %v789_v33  ;;  %v1040_v4 = vrot.slane %v13195_v28, 1  ;;  %v1041_v5 = vrot.slane %v765_v48, 1  ;;  %v627_v6 = vor.u32 %v625_v62, %v624_v61  ;;  %s17838_s23 = smov 21   ;;  %v562_v62 = vld [vmem:[%s13164_s26 + $0x78] sm:$0xff] }
  0x33   : > { %v811_v58 = vsel %vm779_vm4, %v806_v52, %v810_v51  ;;  %v818_v59 = vor.u32 %v817_v54, %v813_v53  ;;  %v822_v60 = vrot.slane %v820_v55, 1  ;;  %v766_v14 = vsel %vm13173_vm2, %v624_v61, 0  ;;  %v561_v61 = vld [vmem:[%s13164_s26 + $0x70] sm:$0xff] }
  0x34   : > { %v799_v56 = vsel %vm779_vm4, %v794_v46, %v798_v47  ;;  %v1042_v8 = vsel %vm1031_vm3, %v1040_v4, %v1041_v5  ;;  %v13235_v9 = vsel %vm13173_vm2, 0, %v627_v6  ;;  %v631_v15 = vrot.slane %v629_v10, 7 }
  0x35   : > { %1081 = vrot.lane.b32.xlu1 %v1036_v42, %s17845_s21  ;;  %v823_v3 = vsel %vm779_vm4, %v818_v59, %v822_v60  ;;  %v827_v12 = vshll.u32 %v13235_v9, 16  ;;  %v632_v16 = vshll.u32 %v588_v7, 16  ;;  %v589_v17 = vpack.c.bf16 %v558_v13, %v557_v11  ;;  %v563_v13 = vld [vmem:[%s13164_s26 + $0x80] sm:$0xff] }
  0x36   : > { %1192 = vrot.lane.b32.xlu0 %v1036_v42, %s17834_s29  ;;  %v825_v20 = vshrl.u32 %v13235_v9, 16  ;;  %v832_v22 = vshll.u32 %v766_v14, 16  ;;  %v590_v30 = vpack.c.bf16 %v560_v23, %v559_v19  ;;  %v1043_v34 = vrot.slane %v13235_v9, 1 }
  0x37   : > { %v829_v21 = vrot.slane %v827_v12, 1  ;;  %v634_v24 = vor.u32 %v632_v16, %v631_v15  ;;  %v636_v29 = vshrl.u32 %v589_v17, 16  ;;  %v1044_v35 = vrot.slane %v766_v14, 1  ;;  %v564_v14 = vld [vmem:[%s13164_s26 + $0x88] sm:$0xff] }
  0x38   : > { %v834_v32 = vrot.slane %v832_v22, 1  ;;  %v639_v36 = vshll.u32 %v589_v17, 16  ;;  %v1636_v38 = vsel %vm1634_vm5, 4294967295, %v13008_v37  ;;  %v767_v39 = vsel %vm13173_vm2, %v631_v15, 0 }
  0x39   : > { %1194 = vrot.lane.b32.xlu1 %v1039_v50, %s17834_s29  ;;  %s17836_s29 = smov 24   ;;  %v830_v31 = vor.u32 %v829_v21, %v825_v20  ;;  %v13256_v33 = vsel %vm13173_vm2, 0, %v634_v24  ;;  %v638_v40 = vrot.slane %v636_v29, 7  ;;  %v643_v41 = vshrl.u32 %v590_v30, 16 }
  0x3a   : > { %970 = vrot.lane.b32.xlu0 %v799_v56, %s13001_s22  ;;  %v1637_v42 = vsel %vm1635_vm6, %v1636_v38, 0  ;;  %v839_v44 = vshll.u32 %v13256_v33, 16  ;;  %v646_v46 = vshll.u32 %v590_v30, 16  ;;  %v1045_v48 = vsel %vm1031_vm3, %v1043_v34, %v1044_v35  ;;  %v565_v30 = vld [vmem:[%s13164_s26 + $0x90] sm:$0xff] }
  0x3b   : > { %v835_v43 = vsel %vm779_vm4, %v830_v31, %v834_v32  ;;  %v1639_v45 = vand.u32 %v12118_v27, %v1637_v42  ;;  %v645_v47 = vrot.slane %v643_v41, 7  ;;  %v837_v49 = vshrl.u32 %v13256_v33, 16  ;;  %v566_v31 = vld [vmem:[%s13164_s26 + $0x98] sm:$0xff] }
  0x3c   : > { %v844_v51 = vshll.u32 %v767_v39, 16  ;;  %v641_v52 = vor.u32 %v639_v36, %v638_v40  ;;  %v13275_v53 = vsel %vm13173_vm2, %v638_v40, 0  ;;  %v1047_v60 = vrot.slane %v767_v39, 1 }
  0x3d   : > { %1158 = vrot.lane.b32.xlu1 %v811_v58, %s17840_s30  ;;  %11870 = vmatprep.subr.bf16.mxu0 %v1639_v45  ;;  %v648_v54 = vor.u32 %v646_v46, %v645_v47  ;;  %v13286_v59 = vsel %vm13173_vm2, %v645_v47, 0  ;;  %v1046_v63 = vrot.slane %v13256_v33, 1  ;;  %v1050_v2 = vrot.slane %v13275_v53, 1 }
  0x3e   : > { %1156 = vrot.lane.b32.xlu0 %v799_v56, %s17840_s30  ;;  %12005 = vmatprep.subr.bf16.mxu1 %v1639_v45  ;;  %v846_v56 = vrot.slane %v844_v51, 1  ;;  %v13281_v57 = vsel %vm13173_vm2, 0, %v641_v52  ;;  %v868_v7 = vshll.u32 %v13286_v59, 16  ;;  %v591_v12 = vpack.c.bf16 %v562_v62, %v561_v61 }
  0x3f   : > { %11871 = vmatpush3.bf16.msra.mxu0 %v1639_v45  ;;  %12007 = vmatpush3.bf16.msra.mxu1 %v1639_v45  ;;  %v849_v5 = vshrl.u32 %v13281_v57, 16  ;;  %v851_v6 = vshll.u32 %v13281_v57, 16  ;;  %v1049_v10 = vrot.slane %v13281_v57, 1  ;;  %v1048_v15 = vsel %vm1031_vm3, %v1046_v63, %v1047_v60 }
  0x40   : > { %v870_v17 = vrot.slane %v868_v7, 1  ;;  %v1053_v21 = vrot.slane %v13286_v59, 1  ;;  %v650_v22 = vshrl.u32 %v591_v12, 16  ;;  %v592_v23 = vpack.c.bf16 %v564_v14, %v563_v13 }
  0x41   : > { %1258 = vrot.lane.b32.xlu1 %v823_v3, %s17838_s23  ;;  %v853_v19 = vrot.slane %v851_v6, 1  ;;  %v653_v24 = vshll.u32 %v591_v12, 16  ;;  %v1051_v46 = vsel %vm1031_vm3, %v1049_v10, %v1050_v2 }
  0x42   : > { %1256 = vrot.lane.b32.xlu0 %v811_v58, %s17838_s23  ;;  %s17875_s23 = smov 15   ;;  %v652_v27 = vrot.slane %v650_v22, 7  ;;  %v657_v29 = vshrl.u32 %v592_v23, 16  ;;  %v660_v40 = vshll.u32 %v592_v23, 16 }
  0x43   : > { %v854_v32 = vor.u32 %v853_v19, %v849_v5 }
  0x44   : > { %v13324_v34 = vsel %vm13173_vm2, %v652_v27, 0  ;;  %v655_v35 = vor.u32 %v653_v24, %v652_v27  ;;  %v659_v36 = vrot.slane %v657_v29, 7 }
  0x45   : > { %1290 = vrot.lane.b32.xlu1 %v1042_v8, %s17836_s29  ;;  %v880_v38 = vshll.u32 %v13324_v34, 16  ;;  %v1056_v39 = vrot.slane %v13324_v34, 1 }
  0x46   : > { %1288 = vrot.lane.b32.xlu0 %v1039_v50, %s17836_s29  ;;  %s17876_s29 = smov 18   ;;  %v13332_v41 = vsel %vm13173_vm2, %v659_v36, 0  ;;  %v662_v51 = vor.u32 %v660_v40, %v659_v36 }
  0x47   : > { %v892_v45 = vshll.u32 %v13332_v41, 16  ;;  %v1059_v47 = vrot.slane %v13332_v41, 1 }
  0x49   : > { %974 = vrot.lane.b32.xlu1 %v823_v3, %s13001_s22  ;;  %v894_v59 = vrot.slane %v892_v45, 1 }
  0x4a   : > { %972 = vrot.lane.b32.xlu0 %v811_v58, %s13001_s22  ;;  %v856_v58 = vshll.u32 %v13275_v53, 16  ;;  %v882_v53 = vrot.slane %v880_v38, 1 }
  0x4d   : > { %1085 = vrot.lane.b32.xlu1 %v1042_v8, %s17845_s21 }
  0x4e   : > { %1083 = vrot.lane.b32.xlu0 %v1039_v50, %s17845_s21  ;;  %v841_v50 = vrot.slane %v839_v44, 1  ;;  %v13339_v44 = vsel %vm13173_vm2, 0, %v655_v35 }
  0x50   : > { %v842_v55 = vor.u32 %v841_v50, %v837_v49  ;;  %v873_v49 = vshrl.u32 %v13339_v44, 16  ;;  %v875_v50 = vshll.u32 %v13339_v44, 16 }
  0x51   : > { %1118 = vrot.lane.b32.xlu1 %v13235_v9, %s17842_s19 }
  0x52   : > { %1116 = vrot.lane.b32.xlu0 %v13195_v28, %s17842_s19  ;;  %v847_v4 = vsel %vm779_vm4, %v842_v55, %v846_v56  ;;  %s17878_s19 = smov 24   ;;  %v13353_v55 = vsel %vm13173_vm2, 0, %v662_v51  ;;  %v567_v56 = vld [vmem:[%s13164_s26 + $0xa0] sm:$0xff]  ;;  %v877_v6 = vrot.slane %v875_v50, 1 }
  0x53   : > { %v885_v7 = vshrl.u32 %v13353_v55, 16 }
  0x55   : > { %1162 = vrot.lane.b32.xlu1 %v835_v43, %s17840_s30 }
  0x56   : > { %1160 = vrot.lane.b32.xlu0 %v823_v3, %s17840_s30  ;;  %v13296_v3 = vsel %vm13173_vm2, 0, %v648_v54  ;;  %s17877_s30 = smov 21   ;;  %v1055_v54 = vrot.slane %v13339_v44, 1 }
  0x57   : > { %v861_v11 = vshrl.u32 %v13296_v3, 16  ;;  %v863_v16 = vshll.u32 %v13296_v3, 16  ;;  %v1052_v20 = vrot.slane %v13296_v3, 1 }
  0x59   : > { %1198 = vrot.lane.b32.xlu1 %v1045_v48, %s17875_s23  ;;  %v865_v37 = vrot.slane %v863_v16, 1  ;;  %v1054_v5 = vsel %vm1031_vm3, %v1052_v20, %v1053_v21  ;;  %v878_v16 = vor.u32 %v877_v6, %v873_v49 }
  0x5a   : > { %1196 = vrot.lane.b32.xlu0 %v1042_v8, %s17875_s23  ;;  %v858_v8 = vrot.slane %v856_v58, 1  ;;  %v568_v58 = vld [vmem:[%s13164_s26 + $0xa8] sm:$0xff] }
  0x5b   : > { %v866_v52 = vor.u32 %v865_v37, %v861_v11  ;;  %v883_v27 = vsel %vm779_vm4, %v878_v16, %v882_v53  ;;  %v570_v53 = vld [vmem:[%s13164_s26 + $0xb8] sm:$0xff] }
  0x5c   : > { %v859_v42 = vsel %vm779_vm4, %v854_v32, %v858_v8  ;;  %v887_v8 = vshll.u32 %v13353_v55, 16  ;;  %v1057_v32 = vsel %vm1031_vm3, %v1055_v54, %v1056_v39 }
  0x5d   : > { %1230 = vrot.lane.b32.xlu1 %v13256_v33, %s17876_s29  ;;  %v871_v62 = vsel %vm779_vm4, %v866_v52, %v870_v17  ;;  %v1058_v17 = vrot.slane %v13353_v55, 1  ;;  %v569_v52 = vld [vmem:[%s13164_s26 + $0xb0] sm:$0xff] }
  0x5e   : > { %1228 = vrot.lane.b32.xlu0 %v13235_v9, %s17876_s29  ;;  %v889_v19 = vrot.slane %v887_v8, 1 }
  0x60   : > { %v890_v38 = vor.u32 %v889_v19, %v885_v7  ;;  %v595_v7 = vpack.c.bf16 %v570_v53, %v569_v52 }
  0x61   : > { %1262 = vrot.lane.b32.xlu1 %v847_v4, %s17877_s30 }
  0x62   : > { %1260 = vrot.lane.b32.xlu0 %v835_v43, %s17877_s30  ;;  %v895_v34 = vsel %vm779_vm4, %v890_v38, %v894_v59 }
  0x65   : > { %1294 = vrot.lane.b32.xlu1 %v1048_v15, %s17878_s19 }
  0x66   : > { %1292 = vrot.lane.b32.xlu0 %v1045_v48, %s17878_s19 }
  0x69   : > { %978 = vrot.lane.b32.xlu1 %v847_v4, %s13001_s22 }
  0x6a   : > { %976 = vrot.lane.b32.xlu0 %v835_v43, %s13001_s22  ;;  %v593_v43 = vpack.c.bf16 %v566_v31, %v565_v30 }
  0x6c   : > { %v667_v61 = vshll.u32 %v593_v43, 16 }
  0x6d   : > { %1089 = vrot.lane.b32.xlu1 %v1048_v15, %s17845_s21 }
  0x6e   : > { %1087 = vrot.lane.b32.xlu0 %v1045_v48, %s17845_s21  ;;  %s17880_s21 = smov 12   ;;  %v664_v48 = vshrl.u32 %v593_v43, 16 }
  0x70   : > { %v666_v60 = vrot.slane %v664_v48, 7 }
  0x71   : > { %1122 = vrot.lane.b32.xlu1 %v13281_v57, %s17879_s18 }
  0x72   : > { %1120 = vrot.lane.b32.xlu0 %v13256_v33, %s17879_s18  ;;  %v13364_v63 = vsel %vm13173_vm2, %v666_v60, 0  ;;  %v669_v2 = vor.u32 %v667_v61, %v666_v60 }
  0x73   : > { %v904_v11 = vshll.u32 %v13364_v63, 16  ;;  %v1062_v29 = vrot.slane %v13364_v63, 1 }
  0x74   : > { %v13374_v10 = vsel %vm13173_vm2, 0, %v669_v2 }
  0x75   : > { %1166 = vrot.lane.b32.xlu1 %v859_v42, %s17880_s21  ;;  %v899_v13 = vshll.u32 %v13374_v10, 16  ;;  %v897_v21 = vshrl.u32 %v13374_v10, 16  ;;  %v906_v23 = vrot.slane %v904_v11, 1  ;;  %v1061_v24 = vrot.slane %v13374_v10, 1 }
  0x76   : > { %1164 = vrot.lane.b32.xlu0 %v847_v4, %s17880_s21  ;;  %v594_v4 = vpack.c.bf16 %v568_v58, %v567_v56 }
  0x77   : > { %v901_v22 = vrot.slane %v899_v13, 1  ;;  %v1063_v13 = vsel %vm1031_vm3, %v1061_v24, %v1062_v29  ;;  %v571_v29 = vld [vmem:[%s13164_s26 + $0xc0] sm:$0xff] }
  0x78   : > { %v671_v12 = vshrl.u32 %v594_v4, 16 }
  0x79   : > { %1202 = vrot.lane.b32.xlu1 %v1051_v46, %s17875_s23  ;;  %v902_v51 = vor.u32 %v901_v22, %v897_v21 }
  0x7a   : > { %1200 = vrot.lane.b32.xlu0 %v1048_v15, %s17875_s23  ;;  %v13381_v14 = vrot.slane %v671_v12, 7  ;;  %v674_v15 = vshll.u32 %v594_v4, 16 }
  0x7b   : > { %v907_v4 = vsel %vm779_vm4, %v902_v51, %v906_v23 }
  0x7c   : > { %v676_v20 = vor.u32 %v674_v15, %v13381_v14  ;;  %v773_v6 = vsel %vm13173_vm2, %v13381_v14, 0 }
  0x7d   : > { %1234 = vrot.lane.b32.xlu1 %v13296_v3, %s17876_s29  ;;  %v916_v16 = vshll.u32 %v773_v6, 16 }
  0x7e   : > { %1232 = vrot.lane.b32.xlu0 %v13281_v57, %s17876_s29  ;;  %v13397_v30 = vsel %vm13173_vm2, 0, %v676_v20  ;;  %v678_v20 = vshrl.u32 %v595_v7, 16 }
  0x7f   : > { %v911_v36 = vshll.u32 %v13397_v30, 16  ;;  %v909_v14 = vshrl.u32 %v13397_v30, 16 }
  0x81   : > { %1266 = vrot.lane.b32.xlu1 %v871_v62, %s17877_s30  ;;  %v913_v15 = vrot.slane %v911_v36, 1  ;;  %v681_v36 = vshll.u32 %v595_v7, 16  ;;  %v574_v7 = vld [vmem:[%s13164_s26 + $0xd8] sm:$0xff] }
  0x82   : > { %1264 = vrot.lane.b32.xlu0 %v859_v42, %s17877_s30 }
  0x83   : > { %v914_v24 = vor.u32 %v913_v15, %v909_v14 }
  0x85   : > { %1298 = vrot.lane.b32.xlu1 %v1054_v5, %s17878_s19 }
  0x86   : > { %1296 = vrot.lane.b32.xlu0 %v1051_v46, %s17878_s19 }
  0x89   : > { %982 = vrot.lane.b32.xlu1 %v871_v62, %s13001_s22 }
  0x8a   : > { %980 = vrot.lane.b32.xlu0 %v859_v42, %s13001_s22  ;;  %v1060_v42 = vsel %vm1031_vm3, %v1058_v17, %v1059_v47 }
  0x8d   : > { %1093 = vrot.lane.b32.xlu1 %v1054_v5, %s17881_s0 }
  0x8e   : > { %1091 = vrot.lane.b32.xlu0 %v1051_v46, %s17881_s0 }
  0x90   : > { %v969_v31 = vpop.permute.xlu0 %968  ;;  %v1080_v37 = vpop.permute.xlu1 %1079 }
  0x91   : > { %1126 = vrot.lane.b32.xlu1 %v13339_v44, %s17879_s18  ;;  %v1322_v35 = vsel %vm1320_vm7, 0, %v969_v31  ;;  %v572_v31 = vld [vmem:[%s13164_s26 + $0xc8] sm:$0xff] }
  0x92   : > { %1124 = vrot.lane.b32.xlu0 %v13296_v3, %s17879_s18  ;;  %v1355_v54 = vsel %vm1353_vm8, %v1322_v35, %v1080_v37  ;;  %v680_v35 = vrot.slane %v678_v20, 7 }
  0x94   : > { %v774_v52 = vsel %vm13173_vm2, %v680_v35, 0 }
  0x95   : > { %1170 = vrot.lane.b32.xlu1 %v883_v27, %s17880_s21  ;;  %v1068_v15 = vrot.slane %v774_v52, 1 }
  0x96   : > { %1168 = vrot.lane.b32.xlu0 %v871_v62, %s17880_s21 }
  0x99   : > { %1206 = vrot.lane.b32.xlu1 %v1057_v32, %s17875_s23 }
  0x9a   : > { %1204 = vrot.lane.b32.xlu0 %v1054_v5, %s17875_s23 }
  0x9d   : > { %1238 = vrot.lane.b32.xlu1 %v13353_v55, %s17876_s29 }
  0x9e   : > { %1236 = vrot.lane.b32.xlu0 %v13339_v44, %s17876_s29 }
  0x9f   : > { %v1115_v40 = vpop.permute.xlu1 %1114 }
  0xa0   : > { %v1113_v39 = vpop.permute.xlu0 %1112 }
  0xa1   : > { %1270 = vrot.lane.b32.xlu1 %v895_v34, %s17877_s30  ;;  %v1388_v59 = vsel %vm1386_vm9, %v1355_v54, %v1113_v39 }
  0xa2   : > { %1268 = vrot.lane.b32.xlu0 %v883_v27, %s17877_s30 }
  0xa3   : > { %v1227_v43 = vpop.permute.xlu1 %1226 }
  0xa4   : > { %v1225_v45 = vpop.permute.xlu0 %1224 }
  0xa5   : > { %1302 = vrot.lane.b32.xlu1 %v1060_v42, %s17878_s19 }
  0xa6   : > { %1300 = vrot.lane.b32.xlu0 %v1057_v32, %s17878_s19 }
  0xa7   : > { %v1082_v46 = vpop.permute.xlu1 %1081 }
  0xa8   : > { %v1193_v48 = vpop.permute.xlu0 %1192 }
  0xa9   : > { %986 = vrot.lane.b32.xlu1 %v895_v34, %s13001_s22 }
  0xaa   : > { %984 = vrot.lane.b32.xlu0 %v883_v27, %s13001_s22  ;;  %v918_v27 = vrot.slane %v916_v16, 1 }
  0xab   : > { %v1195_v41 = vpop.permute.xlu1 %1194 }
  0xac   : > { %v971_v47 = vpop.permute.xlu0 %970  ;;  %v13469_v38 = vsel %vm779_vm4, %v914_v24, %v918_v27 }
  0xad   : > { %v1324_v49 = vsel %vm1320_vm7, %v13187_v26, %v971_v47  ;;  %1097 = vrot.lane.b32.xlu1 %v1060_v42, %s17881_s0 }
  0xae   : > { %v1357_v50 = vsel %vm1353_vm8, %v1324_v49, %v1082_v46  ;;  %1095 = vrot.lane.b32.xlu0 %v1057_v32, %s17881_s0 }
  0xaf   : > { %v1159_v56 = vpop.permute.xlu1 %1158  ;;  %v1390_v58 = vsel %vm1386_vm9, %v1357_v50, %v1115_v40  ;;  %v1065_v40 = vrot.slane %v773_v6, 1  ;;  %v573_v6 = vld [vmem:[%s13164_s26 + $0xd0] sm:$0xff] }
  0xb0   : > { %v1423_v60 = vsel %vm1419_vm10, %v1390_v58, %v1159_v56  ;;  %v1157_v61 = vpop.permute.xlu0 %1156 }
  0xb1   : > { %v1456_v26 = vsel %vm1452_vm11, %v1423_v60, %v1195_v41  ;;  %v1421_v62 = vsel %vm1419_vm10, %v1388_v59, %v1157_v61  ;;  %1130 = vrot.lane.b32.xlu1 %v13374_v10, %s17879_s18  ;;  %v928_v60 = vshll.u32 %v774_v52, 16 }
  0xb2   : > { %v1454_v2 = vsel %vm1452_vm11, %v1421_v62, %v1193_v48  ;;  %1128 = vrot.lane.b32.xlu0 %v13353_v55, %s17879_s18  ;;  %v1489_v8 = vsel %vm1485_vm12, %v1456_v26, %v1227_v43  ;;  %v596_v43 = vpack.c.bf16 %v572_v31, %v571_v29 }
  0xb3   : > { %v1259_v5 = vpop.permute.xlu1 %1258  ;;  %v1487_v12 = vsel %vm1485_vm12, %v1454_v2, %v1225_v45 }
  0xb4   : > { %v1257_v11 = vpop.permute.xlu0 %1256  ;;  %v1522_v17 = vsel %vm1518_vm13, %v1489_v8, %v1259_v5  ;;  %v685_v47 = vshrl.u32 %v596_v43, 16  ;;  %v688_v54 = vshll.u32 %v596_v43, 16  ;;  %v930_v5 = vrot.slane %v928_v60, 1 }
  0xb5   : > { %1174 = vrot.lane.b32.xlu1 %v907_v4, %s17880_s21  ;;  %v1520_v21 = vsel %vm1518_vm13, %v1487_v12, %v1257_v11 }
  0xb6   : > { %1172 = vrot.lane.b32.xlu0 %v895_v34, %s17880_s21  ;;  %v1064_v34 = vrot.slane %v13397_v30, 1  ;;  %v687_v53 = vrot.slane %v685_v47, 7 }
  0xb7   : > { %v1291_v19 = vpop.permute.xlu1 %1290 }
  0xb8   : > { %v1555_v22 = vsel %vm1551_vm14, %v1522_v17, %v1291_v19  ;;  %v1289_v63 = vpop.permute.xlu0 %1288  ;;  %v13476_v46 = vsel %vm1031_vm3, %v1064_v34, %v1065_v40  ;;  %v690_v26 = vor.u32 %v688_v54, %v687_v53 }
  0xb9   : > { %1210 = vrot.lane.b32.xlu1 %v1063_v13, %s17875_s23  ;;  %v1553_v23 = vsel %vm1551_vm14, %v1520_v21, %v1289_v63  ;;  %v597_v63 = vpack.c.bf16 %v574_v7, %v573_v6 }
  0xba   : > { %1208 = vrot.lane.b32.xlu0 %v1060_v42, %s17875_s23  ;;  %11872 = vmatprep.mubr.msk.bf16.mxu0 %vm1601_vm15, %v1553_v23  ;;  %v683_v42 = vor.u32 %v681_v36, %v680_v35 }
  0xbb   : > { %11873 = vmatmul.mubr.msk.bf16.vlgmr.msra.gmra.mrb[0].mxu0 %vm1601_vm15, %v1555_v22  ;;  %v975_v32 = vpop.permute.xlu1 %974  ;;  %v775_v22 = vsel %vm13173_vm2, %v687_v53, 0  ;;  %v692_v43 = vshrl.u32 %v597_v63, 16 }
  0xbc   : > { %v973_v37 = vpop.permute.xlu0 %972  ;;  %v13480_v41 = vsel %vm13173_vm2, 0, %v683_v42  ;;  %v1328_v12 = vsel %vm1320_vm7, %v13195_v28, %v975_v32  ;;  %v940_v34 = vshll.u32 %v775_v22, 16  ;;  %v1071_v60 = vrot.slane %v775_v22, 1 }
  0xbd   : > { %1242 = vrot.lane.b32.xlu1 %v13397_v30, %s17876_s29  ;;  %v923_v50 = vshll.u32 %v13480_v41, 16  ;;  %v921_v58 = vshrl.u32 %v13480_v41, 16  ;;  %v1067_v14 = vrot.slane %v13480_v41, 1  ;;  %v694_v54 = vrot.slane %v692_v43, 7 }
  0xbe   : > { %1240 = vrot.lane.b32.xlu0 %v13374_v10, %s17876_s29  ;;  %v942_v52 = vrot.slane %v940_v34, 1 }
  0xbf   : > { %v1086_v39 = vpop.permute.xlu1 %1085  ;;  %v925_v59 = vrot.slane %v923_v50, 1  ;;  %v1069_v31 = vsel %vm1031_vm3, %v1067_v14, %v1068_v15  ;;  %v575_v50 = vld [vmem:[%s13164_s26 + $0xe0] sm:$0xff] }
  0xc0   : > { %v1084_v45 = vpop.permute.xlu0 %1083  ;;  %v1361_v16 = vsel %vm1353_vm8, %v1328_v12, %v1086_v39 }
  0xc1   : > { %1274 = vrot.lane.b32.xlu1 %v13469_v38, %s17877_s30  ;;  %v926_v2 = vor.u32 %v925_v59, %v921_v58 }
  0xc2   : > { %1272 = vrot.lane.b32.xlu0 %v907_v4, %s17877_s30 }
  0xc3   : > { %v1119_v48 = vpop.permute.xlu1 %1118  ;;  %v13512_v17 = vsel %vm779_vm4, %v926_v2, %v930_v5 }
  0xc4   : > { %v1117_v49 = vpop.permute.xlu0 %1116  ;;  %v1394_v20 = vsel %vm1386_vm9, %v1361_v16, %v1119_v48  ;;  %v776_v16 = vsel %vm13173_vm2, %v694_v54, 0 }
  0xc5   : > { %1306 = vrot.lane.b32.xlu1 %v13476_v46, %s17878_s19 }
  0xc6   : > { %1304 = vrot.lane.b32.xlu0 %v1063_v13, %s17878_s19 }
  0xc7   : > { %v1163_v51 = vpop.permute.xlu1 %1162 }
  0xc8   : > { %v1161_v56 = vpop.permute.xlu0 %1160  ;;  %v1427_v23 = vsel %vm1419_vm10, %v1394_v20, %v1163_v51  ;;  %v576_v51 = vld [vmem:[%s13164_s26 + $0xe8] sm:$0xff] }
  0xc9   : > { %990 = vrot.lane.b32.xlu1 %v13469_v38, %s13001_s22 }
  0xca   : > { %988 = vrot.lane.b32.xlu0 %v907_v4, %s13001_s22  ;;  %v13499_v4 = vsel %vm13173_vm2, 0, %v690_v26 }
  0xcb   : > { %v1199_v61 = vpop.permute.xlu1 %1198  ;;  %v935_v19 = vshll.u32 %v13499_v4, 16  ;;  %v933_v32 = vshrl.u32 %v13499_v4, 16 }
  0xcc   : > { %v1197_v62 = vpop.permute.xlu0 %1196  ;;  %v1460_v29 = vsel %vm1452_vm11, %v1427_v23, %v1199_v61  ;;  %v598_v61 = vpack.c.bf16 %v576_v51, %v575_v50  ;;  %v577_v23 = vld [vmem:[%s13164_s26 + $0xf0] sm:$0xff] }
  0xcd   : > { %1101 = vrot.lane.b32.xlu1 %v13476_v46, %s17881_s0 }
  0xce   : > { %1099 = vrot.lane.b32.xlu0 %v1063_v13, %s17881_s0  ;;  %v1326_v13 = vsel %vm1320_vm7, %v13181_v25, %v973_v37  ;;  %v937_v37 = vrot.slane %v935_v19, 1  ;;  %v699_v6 = vshrl.u32 %v598_v61, 16  ;;  %v702_v15 = vshll.u32 %v598_v61, 16 }
  0xcf   : > { %v1231_v8 = vpop.permute.xlu1 %1230  ;;  %v1359_v28 = vsel %vm1353_vm8, %v1326_v13, %v1084_v45 }
  0xd0   : > { %v1229_v11 = vpop.permute.xlu0 %1228  ;;  %v1392_v25 = vsel %vm1386_vm9, %v1359_v28, %v1117_v49  ;;  %v1493_v36 = vsel %vm1485_vm12, %v1460_v29, %v1231_v8  ;;  %v701_v14 = vrot.slane %v699_v6, 7 }
  0xd1   : > { %1134 = vrot.lane.b32.xlu1 %v13480_v41, %s17879_s18  ;;  %v1425_v27 = vsel %vm1419_vm10, %v1392_v25, %v1161_v56  ;;  %v695_v56 = vshll.u32 %v597_v63, 16 }
  0xd2   : > { %1132 = vrot.lane.b32.xlu0 %v13397_v30, %s17879_s18  ;;  %v1458_v35 = vsel %vm1452_vm11, %v1425_v27, %v1197_v62  ;;  %v704_v22 = vor.u32 %v702_v15, %v701_v14 }
  0xd3   : > { %v1263_v21 = vpop.permute.xlu1 %1262  ;;  %v1491_v40 = vsel %vm1485_vm12, %v1458_v35, %v1229_v11  ;;  %v697_v62 = vor.u32 %v695_v56, %v694_v54 }
  0xd4   : > { %v1261_v24 = vpop.permute.xlu0 %1260  ;;  %v1526_v39 = vsel %vm1518_vm13, %v1493_v36, %v1263_v21  ;;  %v952_v21 = vshll.u32 %v776_v16, 16 }
  0xd5   : > { %1178 = vrot.lane.b32.xlu1 %v13512_v17, %s17880_s21  ;;  %v1524_v45 = vsel %vm1518_vm13, %v1491_v40, %v1261_v24  ;;  %v13560_v8 = vsel %vm13173_vm2, 0, %v697_v62  ;;  %v578_v24 = vld [vmem:[%s13164_s26 + $0xf8] sm:$0xff]  ;;  %s17849_s26 = smov 64  }
  0xd6   : > { %1176 = vrot.lane.b32.xlu0 %v13469_v38, %s17880_s21  ;;  %v938_v38 = vor.u32 %v937_v37, %v933_v32  ;;  %v947_v12 = vshll.u32 %v13560_v8, 16  ;;  %v945_v28 = vshrl.u32 %v13560_v8, 16  ;;  %v954_v29 = vrot.slane %v952_v21, 1 }
  0xd7   : > { %v1295_v42 = vpop.permute.xlu1 %1294  ;;  %v13580_v32 = vsel %vm13173_vm2, 0, %v704_v22  ;;  %v1073_v36 = vrot.slane %v13560_v8, 1  ;;  %v1074_v37 = vrot.slane %v776_v16, 1  ;;  %v599_v43 = vpack.c.bf16 %v578_v24, %v577_v23 }
  0xd8   : > { %v1559_v48 = vsel %vm1551_vm14, %v1526_v39, %v1295_v42  ;;  %v1293_v47 = vpop.permute.xlu0 %1292  ;;  %v13548_v59 = vsel %vm779_vm4, %v938_v38, %v942_v52  ;;  %v949_v20 = vrot.slane %v947_v12, 1  ;;  %v959_v40 = vshll.u32 %v13580_v32, 16 }
  0xd9   : > { %v1557_v49 = vsel %vm1551_vm14, %v1524_v45, %v1293_v47  ;;  %1214 = vrot.lane.b32.xlu1 %v1069_v31, %s17875_s23  ;;  %v777_v47 = vsel %vm13173_vm2, %v701_v14, 0  ;;  %v1075_v51 = vsel %vm1031_vm3, %v1073_v36, %v1074_v37  ;;  %v709_v15 = vshll.u32 %v599_v43, 16 }
  0xda   : > { %1212 = vrot.lane.b32.xlu0 %v13476_v46, %s17875_s23  ;;  %11876 = vmatprep.mubr.msk.bf16.mxu0 %vm1601_vm15, %v1557_v49  ;;  %v1070_v46 = vrot.slane %v13499_v4, 1  ;;  %v950_v27 = vor.u32 %v949_v20, %v945_v28  ;;  %v961_v54 = vrot.slane %v959_v40, 1  ;;  %v1077_v28 = vrot.slane %v777_v47, 1 }
  0xdb   : > { %11877 = vmatmul.mubr.msk.bf16.gmra.mrb[4].mxu0 %vm1601_vm15, %v1559_v48  ;;  %v979_v53 = vpop.permute.xlu1 %978 }
  0xdc   : > { %v977_v58 = vpop.permute.xlu0 %976  ;;  %v13556_v5 = vsel %vm1031_vm3, %v1070_v46, %v1071_v60  ;;  %v1332_v34 = vsel %vm1320_vm7, %v13256_v33, %v979_v53  ;;  %v955_v42 = vsel %vm779_vm4, %v950_v27, %v954_v29  ;;  %v957_v53 = vshrl.u32 %v13580_v32, 16 }
  0xdd   : > { %1246 = vrot.lane.b32.xlu1 %v13499_v4, %s17876_s29  ;;  %v964_v46 = vshll.u32 %v777_v47, 16  ;;  %v706_v60 = vshrl.u32 %v599_v43, 16 }
  0xde   : > { %1244 = vrot.lane.b32.xlu0 %v13480_v41, %s17876_s29 }
  0xdf   : > { %v1090_v26 = vpop.permute.xlu1 %1089  ;;  %v966_v12 = vrot.slane %v964_v46, 1  ;;  %v708_v14 = vrot.slane %v706_v60, 7 }
  0xe0   : > { %v1088_v2 = vpop.permute.xlu0 %1087  ;;  %v1365_v39 = vsel %vm1353_vm8, %v1332_v34, %v1090_v26 }
  0xe1   : > { %1278 = vrot.lane.b32.xlu1 %v13548_v59, %s17877_s30  ;;  %v711_v20 = vor.u32 %v709_v15, %v708_v14  ;;  %v778_v29 = vsel %vm13173_vm2, %v708_v14, 0 }
  0xe2   : > { %1276 = vrot.lane.b32.xlu0 %v13512_v17, %s17877_s30  ;;  %v1152_v34 = vshll.u32 %v778_v29, 16 }
  0xe3   : > { %v1123_v7 = vpop.permute.xlu1 %1122 }
  0xe4   : > { %v1121_v11 = vpop.permute.xlu0 %1120  ;;  %v1398_v33 = vsel %vm1386_vm9, %v1365_v39, %v1123_v7  ;;  %v1154_v43 = vrot.slane %v1152_v34, 1 }
  0xe5   : > { %1310 = vrot.lane.b32.xlu1 %v13556_v5, %s17878_s19 }
  0xe6   : > { %1308 = vrot.lane.b32.xlu0 %v1069_v31, %s17878_s19 }
  0xe7   : > { %v1167_v13 = vpop.permute.xlu1 %1166 }
  0xe8   : > { %v1165_v19 = vpop.permute.xlu0 %1164 }
  0xe9   : > { %994 = vrot.lane.b32.xlu1 %v13548_v59, %s13001_s22 }
  0xea   : > { %992 = vrot.lane.b32.xlu0 %v13512_v17, %s13001_s22 }
  0xeb   : > { %v1203_v63 = vpop.permute.xlu1 %1202 }
  0xec   : > { %v1201_v25 = vpop.permute.xlu0 %1200 }
  0xed   : > { %1105 = vrot.lane.b32.xlu1 %v13556_v5, %s17881_s0 }
  0xee   : > { %1103 = vrot.lane.b32.xlu0 %v1069_v31, %s17881_s0  ;;  %v1330_v31 = vsel %vm1320_vm7, %v13235_v9, %v977_v58  ;;  %v1431_v9 = vsel %vm1419_vm10, %v1398_v33, %v1167_v13 }
  0xef   : > { %v1235_v17 = vpop.permute.xlu1 %1234  ;;  %v1363_v45 = vsel %vm1353_vm8, %v1330_v31, %v1088_v2  ;;  %v1464_v52 = vsel %vm1452_vm11, %v1431_v9, %v1203_v63 }
  0xf0   : > { %v1233_v35 = vpop.permute.xlu0 %1232  ;;  %v1396_v49 = vsel %vm1386_vm9, %v1363_v45, %v1121_v11  ;;  %v1497_v58 = vsel %vm1485_vm12, %v1464_v52, %v1235_v17 }
  0xf1   : > { %1138 = vrot.lane.b32.xlu1 %v13560_v8, %s17879_s18  ;;  %v1429_v38 = vsel %vm1419_vm10, %v1396_v49, %v1165_v19 }
  0xf2   : > { %1136 = vrot.lane.b32.xlu0 %v13499_v4, %s17879_s18  ;;  %v1462_v56 = vsel %vm1452_vm11, %v1429_v38, %v1201_v25  ;;  %v762_v25 = vsel %vm13173_vm2, 0, %v711_v20 }
  0xf3   : > { %v1267_v48 = vpop.permute.xlu1 %1266  ;;  %v1495_v61 = vsel %vm1485_vm12, %v1462_v56, %v1233_v35  ;;  %v1147_v27 = vshll.u32 %v762_v25, 16  ;;  %v1145_v36 = vshrl.u32 %v762_v25, 16  ;;  %v1189_v9 = vrot.slane %v762_v25, 1 }
  0xf4   : > { %v1265_v50 = vpop.permute.xlu0 %1264  ;;  %v1530_v26 = vsel %vm1518_vm13, %v1497_v58, %v1267_v48 }
  0xf5   : > { %1182 = vrot.lane.b32.xlu1 %v955_v42, %s17880_s21  ;;  %v1528_v2 = vsel %vm1518_vm13, %v1495_v61, %v1265_v50  ;;  %v1149_v37 = vrot.slane %v1147_v27, 1  ;;  %v1190_v50 = vrot.slane %v778_v29, 1 }
  0xf6   : > { %1180 = vrot.lane.b32.xlu0 %v13548_v59, %s17880_s21  ;;  %v962_v59 = vor.u32 %v961_v54, %v957_v53 }
  0xf7   : > { %v1299_v62 = vpop.permute.xlu1 %1298  ;;  %v1150_v39 = vor.u32 %v1149_v37, %v1145_v36  ;;  %v1191_v60 = vsel %vm1031_vm3, %v1189_v9, %v1190_v50 }
  0xf8   : > { %v1563_v6 = vsel %vm1551_vm14, %v1530_v26, %v1299_v62  ;;  %v1297_v7 = vpop.permute.xlu0 %1296  ;;  %v967_v19 = vsel %vm779_vm4, %v962_v59, %v966_v12 }
  0xf9   : > { %v1561_v11 = vsel %vm1551_vm14, %v1528_v2, %v1297_v7  ;;  %1218 = vrot.lane.b32.xlu1 %v1075_v51, %s17875_s23  ;;  %v1155_v47 = vsel %vm779_vm4, %v1150_v39, %v1154_v43 }
  0xfa   : > { %1216 = vrot.lane.b32.xlu0 %v13556_v5, %s17875_s23  ;;  %11880 = vmatprep.mubr.msk.bf16.mxu0 %vm1601_vm15, %v1561_v11  ;;  %v1076_v5 = vrot.slane %v13580_v32, 1 }
  0xfb   : > { %11881 = vmatmul.mubr.msk.bf16.gmra.mrb[8].mxu0 %vm1601_vm15, %v1563_v6  ;;  %v983_v13 = vpop.permute.xlu1 %982 }
  0xfc   : > { %v981_v16 = vpop.permute.xlu0 %980  ;;  %v1078_v63 = vsel %vm1031_vm3, %v1076_v5, %v1077_v28  ;;  %v1336_v48 = vsel %vm1320_vm7, %v13296_v3, %v983_v13 }
  0xfd   : > { %1250 = vrot.lane.b32.xlu1 %v13580_v32, %s17876_s29 }
  0xfe   : > { %1248 = vrot.lane.b32.xlu0 %v13560_v8, %s17876_s29 }
  0xff   : > { %v1094_v21 = vpop.permute.xlu1 %1093 }
 0x100   : > { %v1092_v22 = vpop.permute.xlu0 %1091  ;;  %v1369_v49 = vsel %vm1353_vm8, %v1336_v48, %v1094_v21 }
 0x101   : > { %1282 = vrot.lane.b32.xlu1 %v967_v19, %s17877_s30 }
 0x102   : > { %1280 = vrot.lane.b32.xlu0 %v955_v42, %s17877_s30 }
 0x103   : > { %v1127_v23 = vpop.permute.xlu1 %1126 }
 0x104   : > { %v1125_v24 = vpop.permute.xlu0 %1124  ;;  %v1402_v38 = vsel %vm1386_vm9, %v1369_v49, %v1127_v23 }
 0x105   : > { %1314 = vrot.lane.b32.xlu1 %v1078_v63, %s17878_s19 }
 0x106   : > { %1312 = vrot.lane.b32.xlu0 %v1075_v51, %s17878_s19 }
 0x107   : > { %v1171_v17 = vpop.permute.xlu1 %1170 }
 0x108   : > { %v1169_v35 = vpop.permute.xlu0 %1168  ;;  %v1435_v53 = vsel %vm1419_vm10, %v1402_v38, %v1171_v17 }
 0x109   : > { %998 = vrot.lane.b32.xlu1 %v967_v19, %s13001_s22 }
 0x10a   : > { %996 = vrot.lane.b32.xlu0 %v955_v42, %s13001_s22  ;;  %v1334_v42 = vsel %vm1320_vm7, %v13281_v57, %v981_v16 }
 0x10b   : > { %v1207_v40 = vpop.permute.xlu1 %1206 }
 0x10c   : > { %v1205_v31 = vpop.permute.xlu0 %1204  ;;  %v1468_v57 = vsel %vm1452_vm11, %v1435_v53, %v1207_v40 }
 0x10d   : > { %1109 = vrot.lane.b32.xlu1 %v1078_v63, %s17881_s0 }
 0x10e   : > { %1107 = vrot.lane.b32.xlu0 %v1075_v51, %s17881_s0  ;;  %v1367_v51 = vsel %vm1353_vm8, %v1334_v42, %v1092_v22  ;;  %s539_s0 = sand.u32 1, %s12989_s25  }
 0x10f   : > { %v1239_v45 = vpop.permute.xlu1 %1238  ;;  %v1400_v3 = vsel %vm1386_vm9, %v1367_v51, %v1125_v24 }
 0x110   : > { %v1237_v33 = vpop.permute.xlu0 %1236  ;;  %v1433_v56 = vsel %vm1419_vm10, %v1400_v3, %v1169_v35  ;;  %v1501_v46 = vsel %vm1485_vm12, %v1468_v57, %v1239_v45 }
 0x111   : > { %1142 = vrot.lane.b32.xlu1 %v762_v25, %s17879_s18  ;;  %v1466_v58 = vsel %vm1452_vm11, %v1433_v56, %v1205_v31 }
 0x112   : > { %1140 = vrot.lane.b32.xlu0 %v13580_v32, %s17879_s18  ;;  %v1499_v61 = vsel %vm1485_vm12, %v1466_v58, %v1237_v33  ;;  %s17882_s18 = smov 64  }
 0x113   : > { %v1271_v52 = vpop.permute.xlu1 %1270 }
 0x114   : > { %v1269_v54 = vpop.permute.xlu0 %1268  ;;  %v1534_v26 = vsel %vm1518_vm13, %v1501_v46, %v1271_v52 }
 0x115   : > { %1186 = vrot.lane.b32.xlu1 %v1155_v47, %s17880_s21  ;;  %v1532_v2 = vsel %vm1518_vm13, %v1499_v61, %v1269_v54 }
 0x116   : > { %1184 = vrot.lane.b32.xlu0 %v967_v19, %s17880_s21  ;;  %s13013_s21 = smov [#allocation2]  }
 0x117   : > { %v1303_v62 = vpop.permute.xlu1 %1302  ;;  %s12939_s20 = sshll.u32 %s13013_s21, 4  ;;  %s12940_s20 = int_to_ptr.vmem [resolvable:$false] %s12939_s20 }
 0x118   : > { %v1567_v6 = vsel %vm1551_vm14, %v1534_v26, %v1303_v62  ;;  %v1301_v7 = vpop.permute.xlu0 %1300 }
 0x119   : > { %v1565_v11 = vsel %vm1551_vm14, %v1532_v2, %v1301_v7  ;;  %1222 = vrot.lane.b32.xlu1 %v1191_v60, %s17875_s23 }
 0x11a   : > { %1220 = vrot.lane.b32.xlu0 %v1078_v63, %s17875_s23  ;;  %11884 = vmatprep.mubr.msk.bf16.mxu0 %vm1601_vm15, %v1565_v11 }
 0x11b   : > { %11885 = vmatmul.mubr.msk.bf16.gmra.mrb[12].mxu0 %vm1601_vm15, %v1567_v6  ;;  %v987_v59 = vpop.permute.xlu1 %986 }
 0x11c   : > { %v985_v12 = vpop.permute.xlu0 %984  ;;  %v1340_v63 = vsel %vm1320_vm7, %v13353_v55, %v987_v59 }
 0x11d   : > { %1254 = vrot.lane.b32.xlu1 %v17852_v0, %s17876_s29  ;;  %v1338_v23 = vsel %vm1320_vm7, %v13339_v44, %v985_v12 }
 0x11e   : > { %1252 = vrot.lane.b32.xlu0 %v762_v25, %s17876_s29  ;;  %v13683_v25 = vld [vmem:[%s17815_s3 + $0x100] sm:$0xff]  }
 0x11f   : > { %v1098_v14 = vpop.permute.xlu1 %1097  ;;  %11904 = vmatprep.subr.bf16.mxu1 %v13683_v25 }
 0x120   : > { %v1096_v15 = vpop.permute.xlu0 %1095  ;;  %v1373_v24 = vsel %vm1353_vm8, %v1340_v63, %v1098_v14 }
 0x121   : > { %1286 = vrot.lane.b32.xlu1 %v13153_v1, %s17877_s30  ;;  %v1371_v27 = vsel %vm1353_vm8, %v1338_v23, %v1096_v15 }
 0x122   : > { %1284 = vrot.lane.b32.xlu0 %v1155_v47, %s17877_s30 }
 0x123   : > { %v1131_v13 = vpop.permute.xlu1 %1130 }
 0x124   : > { %v1129_v16 = vpop.permute.xlu0 %1128  ;;  %v1406_v29 = vsel %vm1386_vm9, %v1373_v24, %v1131_v13 }
 0x125   : > { %1318 = vrot.lane.b32.xlu1 %v13153_v1, %s17878_s19  ;;  %v1404_v35 = vsel %vm1386_vm9, %v1371_v27, %v1129_v16 }
 0x126   : > { %1316 = vrot.lane.b32.xlu0 %v1191_v60, %s17878_s19  ;;  %s12941_s19 = scalar_lea.vmem %s12940_s20, 32 }
 0x127   : > { %v1175_v19 = vpop.permute.xlu1 %1174 }
 0x128   : > { %v1173_v5 = vpop.permute.xlu0 %1172  ;;  %v1439_v55 = vsel %vm1419_vm10, %v1406_v29, %v1175_v19 }
 0x129   : > { %2279 = vrot.lane.b32.xlu1 %v13153_v1, %s17849_s26  ;;  %v1437_v37 = vsel %vm1419_vm10, %v1404_v35, %v1173_v5  ;;  %s11311_s26 = sshll.u32 %s13125_s28, 4  ;;  %s10522_s28 = scalar_lea.sflag [#allocation3], %s539_s0 }
 0x12a   : > { %s17770_s23 = scalar_lea.hbm %s17829_s17, %s11311_s26 }
 0x12b   : > { %v1211_v28 = vpop.permute.xlu1 %1210 }
 0x12c   : > { %v1209_v20 = vpop.permute.xlu0 %1208  ;;  %v1472_v34 = vsel %vm1452_vm11, %v1439_v55, %v1211_v28 }
 0x12d   : > { %v1470_v44 = vsel %vm1452_vm11, %v1437_v37, %v1209_v20 }
 0x12f   : > { %v1243_v21 = vpop.permute.xlu1 %1242 }
 0x130   : > { %v1241_v22 = vpop.permute.xlu0 %1240  ;;  %v1505_v40 = vsel %vm1485_vm12, %v1472_v34, %v1243_v21 }
 0x131   : > { %v1503_v31 = vsel %vm1485_vm12, %v1470_v44, %v1241_v22 }
 0x133   : > { %v1275_v17 = vpop.permute.xlu1 %1274 }
 0x134   : > { %v1273_v36 = vpop.permute.xlu0 %1272  ;;  %v1538_v39 = vsel %vm1518_vm13, %v1505_v40, %v1275_v17 }
 0x135   : > { %v1536_v45 = vsel %vm1518_vm13, %v1503_v31, %v1273_v36 }
 0x137   : > { %v1307_v43 = vpop.permute.xlu1 %1306 }
 0x138   : > { %v1571_v33 = vsel %vm1551_vm14, %v1538_v39, %v1307_v43  ;;  %v1305_v48 = vpop.permute.xlu0 %1304 }
 0x139   : > { %v1569_v47 = vsel %vm1551_vm14, %v1536_v45, %v1305_v48  ;;  %v12124_v48 = vld [vmem:[%s17815_s3] sm:$0xff]  }
 0x13a   : > { %11888 = vmatprep.mubr.msk.bf16.mxu0 %vm1601_vm15, %v1569_v47 }
 0x13b   : > { %11889 = vmatmul.mubr.msk.bf16.gmra.mrb[16].mxu0 %vm1601_vm15, %v1571_v33  ;;  %v991_v42 = vpop.permute.xlu1 %990  ;;  %v12123_v33 = vld [vmem:[%s17815_s3 + $0x40] sm:$0xff]  }
 0x13c   : > { %v989_v49 = vpop.permute.xlu0 %988  ;;  %v1344_v58 = vsel %vm1320_vm7, %v13397_v30, %v991_v42  ;;  %11333 = vmatprep.subr.bf16.mxu0 %v12123_v33 }
 0x13d   : > { %v1342_v46 = vsel %vm1320_vm7, %v13374_v10, %v989_v49  ;;  %11334 = vmatpush3.bf16.msra.mxu0 %v12124_v48 }
 0x13f   : > { %v1102_v9 = vpop.permute.xlu1 %1101 }
 0x140   : > { %v1100_v50 = vpop.permute.xlu0 %1099  ;;  %v1377_v60 = vsel %vm1353_vm8, %v1344_v58, %v1102_v9 }
 0x141   : > { %v1375_v61 = vsel %vm1353_vm8, %v1342_v46, %v1100_v50  ;;  %v12127_v46 = vld [vmem:[%s17815_s3 + $0x50] sm:$0xff]  }
 0x143   : > { %v1135_v51 = vpop.permute.xlu1 %1134 }
 0x144   : > { %v1133_v38 = vpop.permute.xlu0 %1132  ;;  %v1410_v26 = vsel %vm1386_vm9, %v1377_v60, %v1135_v51  ;;  %v12128_v60 = vld [vmem:[%s17815_s3 + $0x10] sm:$0xff]  }
 0x145   : > { %v1408_v2 = vsel %vm1386_vm9, %v1375_v61, %v1133_v38  ;;  %v12121_v61 = vld [vmem:[%s17815_s3 + $0x110] sm:$0xff]  }
 0x147   : > { %v1179_v52 = vpop.permute.xlu1 %1178 }
 0x148   : > { %v1177_v3 = vpop.permute.xlu0 %1176  ;;  %v1443_v6 = vsel %vm1419_vm10, %v1410_v26, %v1179_v52 }
 0x149   : > { %v1441_v11 = vsel %vm1419_vm10, %v1408_v2, %v1177_v3  ;;  %v12125_v3 = vld [vmem:[%s17815_s3 + $0x48] sm:$0xff]  }
 0x14a   : > { %11335 = vmatprep.subr.bf16.mxu0 %v12125_v3 }
 0x14b   : > { %v1215_v53 = vpop.permute.xlu1 %1214 }
 0x14c   : > { %v1213_v54 = vpop.permute.xlu0 %1212  ;;  %v1476_v59 = vsel %vm1452_vm11, %v1443_v6, %v1215_v53  ;;  %v12122_v6 = vld [vmem:[%s17815_s3 + $0x118] sm:$0xff]  }
 0x14d   : > { %v1474_v30 = vsel %vm1452_vm11, %v1441_v11, %v1213_v54  ;;  %v12120_v54 = vld [vmem:[%s17815_s3 + $0x108] sm:$0xff]   ;;  %v12131_v11 = vld [vmem:[%s17815_s3 + $0x60] sm:$0xff]  }
 0x14f   : > { %v1247_v56 = vpop.permute.xlu1 %1246 }
 0x150   : > { %v1245_v57 = vpop.permute.xlu0 %1244  ;;  %v1509_v10 = vsel %vm1485_vm12, %v1476_v59, %v1247_v56  ;;  %v12126_v56 = vld [vmem:[%s17815_s3 + $0x8] sm:$0xff]   ;;  %v12132_v59 = vld [vmem:[%s17815_s3 + $0x20] sm:$0xff]  }
 0x151   : > { %v1507_v12 = vsel %vm1485_vm12, %v1474_v30, %v1245_v57  ;;  %11336 = vmatpush3.bf16.msra.mxu0 %v12126_v56 }
 0x152   : > { %11337 = vmatprep.subr.bf16.mxu0 %v12127_v46 }
 0x153   : > { %v1279_v62 = vpop.permute.xlu1 %1278 }
 0x154   : > { %v1277_v7 = vpop.permute.xlu0 %1276  ;;  %v1542_v14 = vsel %vm1518_vm13, %v1509_v10, %v1279_v62  ;;  %v12130_v62 = vld [vmem:[%s17815_s3 + $0x18] sm:$0xff]   ;;  %v12133_v10 = vld [vmem:[%s17815_s3 + $0x68] sm:$0xff]  }
 0x155   : > { %v1540_v13 = vsel %vm1518_vm13, %v1507_v12, %v1277_v7  ;;  %11338 = vmatpush3.bf16.msra.mxu0 %v12128_v60 }
 0x157   : > { %v1311_v15 = vpop.permute.xlu1 %1310 }
 0x158   : > { %v1575_v16 = vsel %vm1551_vm14, %v1542_v14, %v1311_v15  ;;  %v1309_v19 = vpop.permute.xlu0 %1308  ;;  %v12134_v14 = vld [vmem:[%s17815_s3 + $0x28] sm:$0xff]  }
 0x159   : > { %v1573_v5 = vsel %vm1551_vm14, %v1540_v13, %v1309_v19  ;;  %v12135_v13 = vld [vmem:[%s17815_s3 + $0x70] sm:$0xff]  }
 0x15a   : > { %11892 = vmatprep.mubr.msk.bf16.mxu0 %vm1601_vm15, %v1573_v5  ;;  %v12136_v19 = vld [vmem:[%s17815_s3 + $0x30] sm:$0xff]  }
 0x15b   : > { %11893 = vmatmul.mubr.msk.bf16.gmra.mrb[20].mxu0 %vm1601_vm15, %v1575_v16  ;;  %v995_v28 = vpop.permute.xlu1 %994 }
 0x15c   : > { %v993_v20 = vpop.permute.xlu0 %992  ;;  %v1348_v36 = vsel %vm1320_vm7, %v13499_v4, %v995_v28  ;;  %v13799_v28 = vld [vmem:[%s17814_s2] ss:$0 sm:$0xff] }
 0x15d   : > { %v1346_v37 = vsel %vm1320_vm7, %v13480_v41, %v993_v20 }
 0x15f   : > { %v1106_v21 = vpop.permute.xlu1 %1105 }
 0x160   : > { %v1104_v22 = vpop.permute.xlu0 %1103  ;;  %v1381_v34 = vsel %vm1353_vm8, %v1348_v36, %v1106_v21  ;;  %v12138_v36 = vld [vmem:[%s17815_s3 + $0x38] sm:$0xff]  }
 0x161   : > { %v1379_v44 = vsel %vm1353_vm8, %v1346_v37, %v1104_v22 }
 0x163   : > { %v1139_v63 = vpop.permute.xlu1 %1138 }
 0x164   : > { %v1137_v23 = vpop.permute.xlu0 %1136  ;;  %v1414_v40 = vsel %vm1386_vm9, %v1381_v34, %v1139_v63 }
 0x165   : > { %v1412_v39 = vsel %vm1386_vm9, %v1379_v44, %v1137_v23 }
 0x167   : > { %v1183_v24 = vpop.permute.xlu1 %1182 }
 0x168   : > { %v1181_v27 = vpop.permute.xlu0 %1180  ;;  %v1447_v43 = vsel %vm1419_vm10, %v1414_v40, %v1183_v24 }
 0x169   : > { %v1445_v4 = vsel %vm1419_vm10, %v1412_v39, %v1181_v27 }
 0x16b   : > { %v1219_v29 = vpop.permute.xlu1 %1218 }
 0x16c   : > { %v1217_v17 = vpop.permute.xlu0 %1216  ;;  %v1480_v41 = vsel %vm1452_vm11, %v1447_v43, %v1219_v29  ;;  %v12137_v29 = vld [vmem:[%s17815_s3 + $0x78] sm:$0xff]  }
 0x16d   : > { %v1478_v47 = vsel %vm1452_vm11, %v1445_v4, %v1217_v17 }
 0x16f   : > { %v1251_v35 = vpop.permute.xlu1 %1250 }
 0x170   : > { %v1249_v55 = vpop.permute.xlu0 %1248  ;;  %v1513_v42 = vsel %vm1485_vm12, %v1480_v41, %v1251_v35 }
 0x171   : > { %v1511_v49 = vsel %vm1485_vm12, %v1478_v47, %v1249_v55 }
 0x173   : > { %v1283_v31 = vpop.permute.xlu1 %1282 }
 0x174   : > { %v1281_v45 = vpop.permute.xlu0 %1280  ;;  %v1546_v9 = vsel %vm1518_vm13, %v1513_v42, %v1283_v31 }
 0x175   : > { %v1544_v51 = vsel %vm1518_vm13, %v1511_v49, %v1281_v45 }
 0x177   : > { %v1315_v50 = vpop.permute.xlu1 %1314 }
 0x178   : > { %v1579_v38 = vsel %vm1551_vm14, %v1546_v9, %v1315_v50  ;;  %v1313_v52 = vpop.permute.xlu0 %1312 }
 0x179   : > { %v1577_v53 = vsel %vm1551_vm14, %v1544_v51, %v1313_v52 }
 0x17a   : > { %11896 = vmatprep.mubr.msk.bf16.mxu1 %vm1601_vm15, %v1577_v53 }
 0x17b   : > { %11897 = vmatmul.mubr.msk.bf16.vlgmr.msra.gmra.mrb[0].mxu1 %vm1601_vm15, %v1579_v38  ;;  %v999_v57 = vpop.permute.xlu1 %998 }
 0x17c   : > { %v997_v58 = vpop.permute.xlu0 %996  ;;  %11905 = vmatpush3.bf16.msra.mxu1 %v13683_v25  ;;  %v12129_v25 = vld [vmem:[%s17815_s3 + $0x58] sm:$0xff]   ;;  %v1352_v17 = vsel %vm1320_vm7, %v13580_v32, %v999_v57 }
 0x17d   : > { %11906 = vmatprep.subr.bf16.mxu1 %v12120_v54  ;;  %11339 = vmatprep.subr.bf16.mxu0 %v12129_v25  ;;  %v1350_v37 = vsel %vm1320_vm7, %v13560_v8, %v997_v58  ;;  %vm14017_vm7 = vmneg %vm2469_vm1 }
 0x17e   : > { %11340 = vmatpush3.bf16.msra.mxu0 %v12130_v62 }
 0x17f   : > { %v1110_v26 = vpop.permute.xlu1 %1109  ;;  %11341 = vmatprep.subr.bf16.mxu0 %v12131_v11 }
 0x180   : > { %v1108_v2 = vpop.permute.xlu0 %1107  ;;  %11907 = vmatpush3.bf16.msra.mxu1 %v12120_v54  ;;  %v1385_v34 = vsel %vm1353_vm8, %v1352_v17, %v1110_v26 }
 0x181   : > { %11908 = vmatprep.subr.bf16.mxu1 %v12121_v61  ;;  %v1383_v40 = vsel %vm1353_vm8, %v1350_v37, %v1108_v2  ;;  %vm3492_vm8 = vcmask 519170  }
 0x182   : > { %11342 = vmatpush3.bf16.msra.mxu0 %v12132_v59 }
 0x183   : > { %v1143_v7 = vpop.permute.xlu1 %1142  ;;  %11343 = vmatprep.subr.bf16.mxu0 %v12133_v10 }
 0x184   : > { %v1141_v30 = vpop.permute.xlu0 %1140  ;;  %11909 = vmatpush3.bf16.msra.mxu1 %v12121_v61  ;;  %v1418_v31 = vsel %vm1386_vm9, %v1385_v34, %v1143_v7 }
 0x185   : > { %11910 = vmatprep.subr.bf16.mxu1 %v12122_v6  ;;  %v1416_v45 = vsel %vm1386_vm9, %v1383_v40, %v1141_v30  ;;  %vm3549_vm9 = vcmask 521220  }
 0x186   : > { %11344 = vmatpush3.bf16.msra.mxu0 %v12134_v14 }
 0x187   : > { %v1187_v12 = vpop.permute.xlu1 %1186  ;;  %11345 = vmatprep.subr.bf16.mxu0 %v12135_v13 }
 0x188   : > { %v1185_v15 = vpop.permute.xlu0 %1184  ;;  %11911 = vmatpush3.bf16.msra.mxu1 %v12122_v6  ;;  %v1451_v33 = vsel %vm1419_vm10, %v1418_v31, %v1187_v12 }
 0x189   : > { %v1449_v48 = vsel %vm1419_vm10, %v1416_v45, %v1185_v15  ;;  %vm3606_vm10 = vcmask 523270  }
 0x18a   : > { %11346 = vmatpush3.bf16.msra.mxu0 %v12136_v19 }
 0x18b   : > { %v1223_v16 = vpop.permute.xlu1 %1222  ;;  %11347 = vmatprep.subr.bf16.mxu0 %v12137_v29 }
 0x18c   : > { %v1221_v5 = vpop.permute.xlu0 %1220  ;;  %v1484_v47 = vsel %vm1452_vm11, %v1451_v33, %v1223_v16 }
 0x18d   : > { %v1482_v49 = vsel %vm1452_vm11, %v1449_v48, %v1221_v5  ;;  %vm3896_vm11 = vcmask 1041408  }
 0x18e   : > { %v11874_v20 = vpop.f32.mrb[0].mxu0  ;;  %11348 = vmatpush3.bf16.msra.mxu0 %v12138_v36 }
 0x18f   : > { %v1684_v21 = vadd.f32 %v11874_v20, %v13799_v28  ;;  %v1675_v22 = vpop.f32.mrb[1].mxu0  ;;  %v1255_v63 = vpop.permute.xlu1 %1254 }
 0x190   : > { %v1676_v23 = vadd.f32 %v13799_v28, %v1675_v22  ;;  %v11875_v24 = vpop.f32.mrb[2].mxu0  ;;  %v1253_v27 = vpop.permute.xlu0 %1252  ;;  %v1517_v9 = vsel %vm1485_vm12, %v1484_v47, %v1255_v63 }
 0x191   : > { %v1687_v35 = vadd.f32 %v11875_v24, %v13799_v28  ;;  %v1678_v55 = vpop.f32.mrb[3].mxu0  ;;  %v1804_v32 = vmax.f32 %v1684_v21, 0.0  ;;  %v1515_v38 = vsel %vm1485_vm12, %v1482_v49, %v1253_v27  ;;  %vm3905_vm12 = vcmask 1042432  }
 0x192   : > { %v1679_v44 = vadd.f32 %v13799_v28, %v1678_v55  ;;  %v1802_v4 = vmax.f32 %v1676_v23, 0.0 }
 0x193   : > { %v1805_v39 = vmax.f32 %v1687_v35, 0.0  ;;  %v1287_v43 = vpop.permute.xlu1 %1286 }
 0x194   : > { %v1803_v41 = vmax.f32 %v1679_v44, 0.0  ;;  %v1285_v8 = vpop.permute.xlu0 %1284  ;;  %v1550_v52 = vsel %vm1518_vm13, %v1517_v9, %v1287_v43 }
 0x195   : > { %v1908_v42 = vpack.c.bf16 %v1805_v39, %v1804_v32  ;;  %v1548_v54 = vsel %vm1518_vm13, %v1515_v38, %v1285_v8  ;;  %vm3914_vm13 = vcmask 1043456  }
 0x196   : > { %v1907_v50 = vpack.c.bf16 %v1803_v41, %v1802_v4 }
 0x197   : > { %v1931_v51 = vshrl.u32 %v1908_v42, 16  ;;  %v1319_v3 = vpop.permute.xlu1 %1318  ;;  %v1934_v46 = vshll.u32 %v1908_v42, 16 }
 0x198   : > { %v1924_v53 = vshrl.u32 %v1907_v50, 16  ;;  %v1583_v56 = vsel %vm1551_vm14, %v1550_v52, %v1319_v3  ;;  %v1317_v57 = vpop.permute.xlu0 %1316  ;;  %v1927_v26 = vshll.u32 %v1907_v50, 16 }
 0x199   : > { %v1933_v58 = vrot.slane %v1931_v51, 7  ;;  %v1581_v60 = vsel %vm1551_vm14, %v1548_v54, %v1317_v57  ;;  %vm4102_vm14 = vsmask.f32 4352 }
 0x19a   : > { %v1926_v61 = vrot.slane %v1924_v53, 7  ;;  %11900 = vmatprep.mubr.msk.bf16.mxu1 %vm1601_vm15, %v1581_v60 }
 0x19b   : > { %v1936_v25 = vor.u32 %v1934_v46, %v1933_v58  ;;  %v2084_v62 = vsel %vm13173_vm2, %v1933_v58, 0  ;;  %11901 = vmatmul.mubr.msk.bf16.gmra.mrb[4].mxu1 %vm1601_vm15, %v1583_v56  ;;  %vm14821_vm15 = vmand %vm1634_vm5, %vm4102_vm14 }
 0x19c   : > { %v1929_v2 = vor.u32 %v1927_v26, %v1926_v61  ;;  %v13835_v6 = vsel %vm13173_vm2, %v1926_v61, 0  ;;  %v2345_v30 = vrot.slane %v2084_v62, 1  ;;  %v2119_v22 = vshll.u32 %v2084_v62, 16 }
 0x19d   : > { %v13839_v7 = vsel %vm13173_vm2, 0, %v1936_v25  ;;  %v2107_v14 = vshll.u32 %v13835_v6, 16 }
 0x19e   : > { %v13843_v11 = vsel %vm13173_vm2, 0, %v1929_v2  ;;  %v2344_v59 = vrot.slane %v13839_v7, 1  ;;  %v2114_v10 = vshll.u32 %v13839_v7, 16  ;;  %v2112_v21 = vshrl.u32 %v13839_v7, 16 }
 0x19f   : > { %2387 = vrot.lane.b32.xlu0 %v13843_v11, %s17882_s18  ;;  %v2102_v12 = vshll.u32 %v13843_v11, 16  ;;  %v2100_v13 = vshrl.u32 %v13843_v11, 16  ;;  %v2109_v20 = vrot.slane %v2107_v14, 1  ;;  %v2121_v24 = vrot.slane %v2119_v22, 1 }
 0x1a0   : > { %v13852_v15 = vsel %vm1031_vm3, %v2344_v59, %v2345_v30  ;;  %v2116_v19 = vrot.slane %v2114_v10, 1 }
 0x1a1   : > { %11912 = vmatprep.mubr.msk.bf16.mxu1 %vm2469_vm1, %v13852_v15  ;;  %v2104_v16 = vrot.slane %v2102_v12, 1 }
 0x1a2   : > { %v2117_v23 = vor.u32 %v2116_v19, %v2112_v21 }
 0x1a3   : > { %2389 = vrot.lane.b32.xlu0 %v13839_v7, %s17882_s18  ;;  %v2105_v5 = vor.u32 %v2104_v16, %v2100_v13 }
 0x1a4   : > { %v13866_v27 = vsel %vm779_vm4, %v2117_v23, %v2121_v24 }
 0x1a5   : > { %v13861_v63 = vsel %vm779_vm4, %v2105_v5, %v2109_v20 }
 0x1a6   : > { %2281 = vrot.lane.b32.xlu1 %v13861_v63, %s17882_s18 }
 0x1aa   : > { %2283 = vrot.lane.b32.xlu1 %v13866_v27, %s17882_s18 }
 0x1ae   : > { %v11878_v29 = vpop.f32.mrb[4].mxu0 }
 0x1af   : > { %v1700_v17 = vadd.f32 %v11878_v29, %v13799_v28  ;;  %v1691_v35 = vpop.f32.mrb[5].mxu0 }
 0x1b0   : > { %v1692_v55 = vadd.f32 %v13799_v28, %v1691_v35  ;;  %v11879_v36 = vpop.f32.mrb[6].mxu0 }
 0x1b1   : > { %v1703_v37 = vadd.f32 %v11879_v36, %v13799_v28  ;;  %v1694_v34 = vpop.f32.mrb[7].mxu0  ;;  %v1808_v40 = vmax.f32 %v1700_v17, 0.0 }
 0x1b2   : > { %v1695_v44 = vadd.f32 %v13799_v28, %v1694_v34  ;;  %v1806_v32 = vmax.f32 %v1692_v55, 0.0 }
 0x1b3   : > { %v1809_v31 = vmax.f32 %v1703_v37, 0.0 }
 0x1b4   : > { %v1807_v39 = vmax.f32 %v1695_v44, 0.0 }
 0x1b5   : > { %v1910_v43 = vpack.c.bf16 %v1809_v31, %v1808_v40 }
 0x1b6   : > { %v1909_v45 = vpack.c.bf16 %v1807_v39, %v1806_v32 }
 0x1b7   : > { %v1945_v33 = vshrl.u32 %v1910_v43, 16  ;;  %v1948_v8 = vshll.u32 %v1910_v43, 16 }
 0x1b8   : > { %v1938_v4 = vshrl.u32 %v1909_v45, 16  ;;  %v1941_v47 = vshll.u32 %v1909_v45, 16 }
 0x1b9   : > { %v1947_v41 = vrot.slane %v1945_v33, 7 }
 0x1ba   : > { %v1940_v48 = vrot.slane %v1938_v4, 7 }
 0x1bb   : > { %v1950_v42 = vor.u32 %v1948_v8, %v1947_v41  ;;  %v2086_v50 = vsel %vm13173_vm2, %v1947_v41, 0 }
 0x1bc   : > { %v1943_v49 = vor.u32 %v1941_v47, %v1940_v48  ;;  %v2085_v9 = vsel %vm13173_vm2, %v1940_v48, 0  ;;  %v2351_v58 = vrot.slane %v2086_v50, 1  ;;  %v2143_v30 = vshll.u32 %v2086_v50, 16 }
 0x1bd   : > { %v13880_v51 = vsel %vm13173_vm2, 0, %v1950_v42  ;;  %v2348_v53 = vrot.slane %v2085_v9, 1  ;;  %v2131_v57 = vshll.u32 %v2085_v9, 16 }
 0x1be   : > { %v13884_v38 = vsel %vm13173_vm2, 0, %v1943_v49  ;;  %v2350_v52 = vrot.slane %v13880_v51, 1  ;;  %v2138_v3 = vshll.u32 %v13880_v51, 16  ;;  %v2136_v59 = vshrl.u32 %v13880_v51, 16 }
 0x1bf   : > { %v2347_v54 = vrot.slane %v13884_v38, 1  ;;  %2391 = vrot.lane.b32.xlu0 %v13884_v38, %s17882_s18  ;;  %v2126_v56 = vshll.u32 %v13884_v38, 16  ;;  %v2124_v60 = vshrl.u32 %v13884_v38, 16  ;;  %v2133_v2 = vrot.slane %v2131_v57, 1 }
 0x1c0   : > { %v2140_v26 = vrot.slane %v2138_v3, 1  ;;  %v13899_v25 = vsel %vm1031_vm3, %v2350_v52, %v2351_v58  ;;  %v2145_v14 = vrot.slane %v2143_v30, 1 }
 0x1c1   : > { %v13893_v46 = vsel %vm1031_vm3, %v2347_v54, %v2348_v53  ;;  %v2128_v61 = vrot.slane %v2126_v56, 1 }
 0x1c2   : > { %11913 = vmatmul.mubr.msk.bf16.vlgmr.msra.gmra.mrb[8].mxu1 %vm2469_vm1, %v13893_v46  ;;  %v2141_v12 = vor.u32 %v2140_v26, %v2136_v59 }
 0x1c3   : > { %2393 = vrot.lane.b32.xlu0 %v13880_v51, %s17882_s18  ;;  %11916 = vmatprep.mubr.msk.bf16.mxu1 %vm2469_vm1, %v13899_v25  ;;  %v2129_v62 = vor.u32 %v2128_v61, %v2124_v60 }
 0x1c4   : > { %v13912_v13 = vsel %vm779_vm4, %v2141_v12, %v2145_v14 }
 0x1c5   : > { %v13907_v10 = vsel %vm779_vm4, %v2129_v62, %v2133_v2 }
 0x1c6   : > { %2285 = vrot.lane.b32.xlu1 %v13907_v10, %s17882_s18 }
 0x1ca   : > { %2287 = vrot.lane.b32.xlu1 %v13912_v13, %s17882_s18 }
 0x1ce   : > { %v11882_v16 = vpop.f32.mrb[8].mxu0 }
 0x1cf   : > { %v1716_v19 = vadd.f32 %v11882_v16, %v13799_v28  ;;  %v1707_v5 = vpop.f32.mrb[9].mxu0 }
 0x1d0   : > { %v1708_v20 = vadd.f32 %v13799_v28, %v1707_v5  ;;  %v11883_v21 = vpop.f32.mrb[10].mxu0 }
 0x1d1   : > { %v1719_v22 = vadd.f32 %v11883_v21, %v13799_v28  ;;  %v1710_v23 = vpop.f32.mrb[11].mxu0  ;;  %v1812_v29 = vmax.f32 %v1716_v19, 0.0 }
 0x1d2   : > { %v1711_v24 = vadd.f32 %v13799_v28, %v1710_v23  ;;  %v1810_v35 = vmax.f32 %v1708_v20, 0.0 }
 0x1d3   : > { %v1813_v17 = vmax.f32 %v1719_v22, 0.0 }
 0x1d4   : > { %v1811_v55 = vmax.f32 %v1711_v24, 0.0 }
 0x1d5   : > { %v1912_v36 = vpack.c.bf16 %v1813_v17, %v1812_v29 }
 0x1d6   : > { %v1911_v37 = vpack.c.bf16 %v1811_v55, %v1810_v35 }
 0x1d7   : > { %v1959_v34 = vshrl.u32 %v1912_v36, 16  ;;  %v1962_v31 = vshll.u32 %v1912_v36, 16 }
 0x1d8   : > { %v1952_v44 = vshrl.u32 %v1911_v37, 16  ;;  %v1955_v39 = vshll.u32 %v1911_v37, 16 }
 0x1d9   : > { %v1961_v40 = vrot.slane %v1959_v34, 7 }
 0x1da   : > { %v1954_v32 = vrot.slane %v1952_v44, 7 }
 0x1db   : > { %v1964_v43 = vor.u32 %v1962_v31, %v1961_v40  ;;  %v2088_v4 = vsel %vm13173_vm2, %v1961_v40, 0 }
 0x1dc   : > { %v1957_v45 = vor.u32 %v1955_v39, %v1954_v32  ;;  %v2087_v33 = vsel %vm13173_vm2, %v1954_v32, 0  ;;  %v2357_v52 = vrot.slane %v2088_v4, 1  ;;  %v2167_v26 = vshll.u32 %v2088_v4, 16 }
 0x1dd   : > { %v13926_v41 = vsel %vm13173_vm2, 0, %v1964_v43  ;;  %v2354_v49 = vrot.slane %v2087_v33, 1  ;;  %v2155_v50 = vshll.u32 %v2087_v33, 16 }
 0x1de   : > { %v13930_v8 = vsel %vm13173_vm2, 0, %v1957_v45  ;;  %v2356_v48 = vrot.slane %v13926_v41, 1  ;;  %v2162_v47 = vshll.u32 %v13926_v41, 16  ;;  %v2160_v61 = vshrl.u32 %v13926_v41, 16 }
 0x1df   : > { %2395 = vrot.lane.b32.xlu0 %v13930_v8, %s17882_s18  ;;  %v2353_v42 = vrot.slane %v13930_v8, 1  ;;  %v2150_v9 = vshll.u32 %v13930_v8, 16  ;;  %v2148_v53 = vshrl.u32 %v13930_v8, 16  ;;  %v2157_v60 = vrot.slane %v2155_v50, 1 }
 0x1e0   : > { %v2164_v56 = vrot.slane %v2162_v47, 1  ;;  %v13945_v57 = vsel %vm1031_vm3, %v2356_v48, %v2357_v52  ;;  %v2169_v59 = vrot.slane %v2167_v26, 1 }
 0x1e1   : > { %v13939_v3 = vsel %vm1031_vm3, %v2353_v42, %v2354_v49  ;;  %v2152_v54 = vrot.slane %v2150_v9, 1 }
 0x1e2   : > { %11917 = vmatmul.mubr.msk.bf16.gmra.mrb[12].mxu1 %vm2469_vm1, %v13939_v3  ;;  %v2165_v2 = vor.u32 %v2164_v56, %v2160_v61  ;;  %v12139_v61 = vld [vmem:[%s17815_s3 + $0xc0] sm:$0xff]  }
 0x1e3   : > { %2397 = vrot.lane.b32.xlu0 %v13926_v41, %s17882_s18  ;;  %11920 = vmatprep.mubr.msk.bf16.mxu1 %vm2469_vm1, %v13945_v57  ;;  %v2153_v58 = vor.u32 %v2152_v54, %v2148_v53 }
 0x1e4   : > { %v13958_v30 = vsel %vm779_vm4, %v2165_v2, %v2169_v59  ;;  %11445 = vmatprep.subr.bf16.mxu0 %v12139_v61 }
 0x1e5   : > { %v13953_v62 = vsel %vm779_vm4, %v2153_v58, %v2157_v60 }
 0x1e6   : > { %2289 = vrot.lane.b32.xlu1 %v13953_v62, %s17882_s18 }
 0x1ea   : > { %2291 = vrot.lane.b32.xlu1 %v13958_v30, %s17882_s18 }
 0x1ee   : > { %v11886_v12 = vpop.f32.mrb[12].mxu0 }
 0x1ef   : > { %v1732_v14 = vadd.f32 %v11886_v12, %v13799_v28  ;;  %v1723_v16 = vpop.f32.mrb[13].mxu0 }
 0x1f0   : > { %v1724_v19 = vadd.f32 %v13799_v28, %v1723_v16  ;;  %v11887_v5 = vpop.f32.mrb[14].mxu0 }
 0x1f1   : > { %v1735_v20 = vadd.f32 %v11887_v5, %v13799_v28  ;;  %v1726_v21 = vpop.f32.mrb[15].mxu0  ;;  %v1816_v23 = vmax.f32 %v1732_v14, 0.0 }
 0x1f2   : > { %v1727_v22 = vadd.f32 %v13799_v28, %v1726_v21  ;;  %v1814_v29 = vmax.f32 %v1724_v19, 0.0 }
 0x1f3   : > { %v1817_v24 = vmax.f32 %v1735_v20, 0.0 }
 0x1f4   : > { %v1815_v17 = vmax.f32 %v1727_v22, 0.0 }
 0x1f5   : > { %v1914_v35 = vpack.c.bf16 %v1817_v24, %v1816_v23 }
 0x1f6   : > { %v1913_v55 = vpack.c.bf16 %v1815_v17, %v1814_v29  ;;  %v14013_v29 = vpop.permute.xlu1 %2279 }
 0x1f7   : > { %v1973_v36 = vshrl.u32 %v1914_v35, 16  ;;  %v1976_v44 = vshll.u32 %v1914_v35, 16 }
 0x1f8   : > { %v1966_v37 = vshrl.u32 %v1913_v55, 16  ;;  %v1969_v31 = vshll.u32 %v1913_v55, 16 }
 0x1f9   : > { %v1975_v34 = vrot.slane %v1973_v36, 7 }
 0x1fa   : > { %v1968_v40 = vrot.slane %v1966_v37, 7  ;;  %v2341_v37 = vrot.slane %v13843_v11, 1 }
 0x1fb   : > { %v1978_v32 = vor.u32 %v1976_v44, %v1975_v34  ;;  %v2090_v45 = vsel %vm13173_vm2, %v1975_v34, 0  ;;  %v12140_v34 = vld [vmem:[%s17815_s3 + $0x80] sm:$0xff]  }
 0x1fc   : > { %v1971_v39 = vor.u32 %v1969_v31, %v1968_v40  ;;  %v2089_v43 = vsel %vm13173_vm2, %v1968_v40, 0  ;;  %v2363_v52 = vrot.slane %v2090_v45, 1  ;;  %v2191_v12 = vshll.u32 %v2090_v45, 16 }
 0x1fd   : > { %v13972_v33 = vsel %vm13173_vm2, 0, %v1978_v32  ;;  %v2360_v49 = vrot.slane %v2089_v43, 1  ;;  %v2179_v50 = vshll.u32 %v2089_v43, 16  ;;  %v12141_v43 = vld [vmem:[%s17815_s3 + $0xc8] sm:$0xff]  }
 0x1fe   : > { %v13976_v4 = vsel %vm13173_vm2, 0, %v1971_v39  ;;  %v2362_v48 = vrot.slane %v13972_v33, 1  ;;  %v2186_v47 = vshll.u32 %v13972_v33, 16  ;;  %v2184_v59 = vshrl.u32 %v13972_v33, 16 }
 0x1ff   : > { %2399 = vrot.lane.b32.xlu0 %v13976_v4, %s17882_s18  ;;  %v2359_v42 = vrot.slane %v13976_v4, 1  ;;  %v2174_v9 = vshll.u32 %v13976_v4, 16  ;;  %v2172_v54 = vshrl.u32 %v13976_v4, 16  ;;  %v2181_v2 = vrot.slane %v2179_v50, 1 }
 0x200   : > { %v2188_v58 = vrot.slane %v2186_v47, 1  ;;  %v13991_v60 = vsel %vm1031_vm3, %v2362_v48, %v2363_v52  ;;  %v2193_v19 = vrot.slane %v2191_v12, 1  ;;  %v2342_v39 = vrot.slane %v13835_v6, 1  ;;  %v12142_v6 = vld [vmem:[%s17815_s3 + $0x88] sm:$0xff]  }
 0x201   : > { %v13985_v53 = vsel %vm1031_vm3, %v2359_v42, %v2360_v49  ;;  %v2176_v56 = vrot.slane %v2174_v9, 1 }
 0x202   : > { %11921 = vmatmul.mubr.msk.bf16.gmra.mrb[16].mxu1 %vm2469_vm1, %v13985_v53  ;;  %v2189_v16 = vor.u32 %v2188_v58, %v2184_v59  ;;  %v14036_v49 = vsel %vm1031_vm3, %v2341_v37, %v2342_v39 }
 0x203   : > { %2401 = vrot.lane.b32.xlu0 %v13972_v33, %s17882_s18  ;;  %11924 = vmatprep.mubr.msk.bf16.mxu1 %vm2469_vm1, %v13991_v60  ;;  %v2177_v26 = vor.u32 %v2176_v56, %v2172_v54 }
 0x204   : > { %v14007_v5 = vsel %vm779_vm4, %v2189_v16, %v2193_v19 }
 0x205   : > { %v14002_v14 = vsel %vm779_vm4, %v2177_v26, %v2181_v2 }
 0x206   : > { %2293 = vrot.lane.b32.xlu1 %v14002_v14, %s17882_s18 }
 0x20a   : > { %2295 = vrot.lane.b32.xlu1 %v14007_v5, %s17882_s18 }
 0x20e   : > { %v11890_v20 = vpop.f32.mrb[16].mxu0 }
 0x20f   : > { %v1748_v21 = vadd.f32 %v11890_v20, %v13799_v28  ;;  %v1739_v22 = vpop.f32.mrb[17].mxu0 }
 0x210   : > { %v1740_v23 = vadd.f32 %v13799_v28, %v1739_v22  ;;  %v11891_v24 = vpop.f32.mrb[18].mxu0 }
 0x211   : > { %v1751_v17 = vadd.f32 %v11891_v24, %v13799_v28  ;;  %v1742_v35 = vpop.f32.mrb[19].mxu0  ;;  %v2388_v55 = vpop.permute.xlu0 %2387  ;;  %v1820_v31 = vmax.f32 %v1748_v21, 0.0 }
 0x212   : > { %v1743_v44 = vadd.f32 %v13799_v28, %v1742_v35  ;;  %v2520_v40 = vsel %vm2469_vm1, %v13153_v1, %v2388_v55  ;;  %v1818_v45 = vmax.f32 %v1740_v23, 0.0 }
 0x213   : > { %v1821_v32 = vmax.f32 %v1751_v17, 0.0  ;;  %2936 = vmatprep.mubr.bf16.mxu0 %v2520_v40 }
 0x214   : > { %v1819_v48 = vmax.f32 %v1743_v44, 0.0  ;;  %10652 = vmatmul.mubr.msk.bf16.vlgmr.msra.gmra.mrb[24].mxu0 %vm14017_vm7, %v14013_v29 }
 0x215   : > { %v1916_v47 = vpack.c.bf16 %v1821_v32, %v1820_v31  ;;  %v2390_v42 = vpop.permute.xlu0 %2389  ;;  %11446 = vmatpush3.bf16.msra.mxu0 %v12140_v34 }
 0x216   : > { %v1915_v9 = vpack.c.bf16 %v1819_v48, %v1818_v45  ;;  %v2524_v50 = vsel %vm2469_vm1, %v14036_v49, %v2390_v42  ;;  %11447 = vmatprep.subr.bf16.mxu0 %v12141_v43  ;;  %v12144_v42 = vld [vmem:[%s17815_s3 + $0x90] sm:$0xff]  }
 0x217   : > { %v1987_v52 = vshrl.u32 %v1916_v47, 16  ;;  %2944 = vmatprep.mubr.bf16.mxu0 %v2524_v50  ;;  %v1990_v61 = vshll.u32 %v1916_v47, 16  ;;  %v12143_v47 = vld [vmem:[%s17815_s3 + $0xd0] sm:$0xff]  }
 0x218   : > { %v1980_v54 = vshrl.u32 %v1915_v9, 16  ;;  %v2282_v56 = vpop.permute.xlu1 %2281  ;;  %v1983_v2 = vshll.u32 %v1915_v9, 16 }
 0x219   : > { %v1989_v58 = vrot.slane %v1987_v52, 7  ;;  %11448 = vmatpush3.bf16.msra.mxu0 %v12142_v6  ;;  %v2474_v12 = vsel %vm2469_vm1, %v13843_v11, %v2282_v56 }
 0x21a   : > { %v1982_v26 = vrot.slane %v1980_v54, 7  ;;  %11449 = vmatprep.subr.bf16.mxu0 %v12143_v47 }
 0x21b   : > { %v1992_v59 = vor.u32 %v1990_v61, %v1989_v58  ;;  %v2092_v20 = vsel %vm13173_vm2, %v1989_v58, 0 }
 0x21c   : > { %v1985_v16 = vor.u32 %v1983_v2, %v1982_v26  ;;  %v2091_v19 = vsel %vm13173_vm2, %v1982_v26, 0  ;;  %2945 = vmatmul.mubr.bf16.gmra.mrb[28].mxu0 %v2474_v12  ;;  %v2369_v37 = vrot.slane %v2092_v20, 1  ;;  %v2215_v48 = vshll.u32 %v2092_v20, 16  ;;  %v2284_v61 = vpop.permute.xlu1 %2283 }
 0x21d   : > { %v14051_v21 = vsel %vm13173_vm2, 0, %v1992_v59  ;;  %v2366_v17 = vrot.slane %v2091_v19, 1  ;;  %v2203_v55 = vshll.u32 %v2091_v19, 16  ;;  %11450 = vmatpush3.bf16.msra.mxu0 %v12144_v42 }
 0x21e   : > { %v14055_v22 = vsel %vm13173_vm2, 0, %v1985_v16  ;;  %v2368_v23 = vrot.slane %v14051_v21, 1  ;;  %v2210_v11 = vshll.u32 %v14051_v21, 16  ;;  %v2208_v45 = vshrl.u32 %v14051_v21, 16 }
 0x21f   : > { %2403 = vrot.lane.b32.xlu0 %v14055_v22, %s17882_s18  ;;  %v2365_v24 = vrot.slane %v14055_v22, 1  ;;  %v2198_v35 = vshll.u32 %v14055_v22, 16  ;;  %v2196_v44 = vshrl.u32 %v14055_v22, 16  ;;  %v2205_v43 = vrot.slane %v2203_v55, 1 }
 0x220   : > { %v2212_v31 = vrot.slane %v2210_v11, 1  ;;  %v14070_v32 = vsel %vm1031_vm3, %v2368_v23, %v2369_v37  ;;  %v2217_v50 = vrot.slane %v2215_v48, 1  ;;  %v12146_v37 = vld [vmem:[%s17815_s3 + $0x98] sm:$0xff]  }
 0x221   : > { %v14064_v34 = vsel %vm1031_vm3, %v2365_v24, %v2366_v17  ;;  %v2200_v40 = vrot.slane %v2198_v35, 1  ;;  %v14101_v24 = vsel %vm2469_vm1, %v13839_v7, %v2284_v61  ;;  %v12145_v17 = vld [vmem:[%s17815_s3 + $0xd8] sm:$0xff]   ;;  %v12147_v61 = vld [vmem:[%s17815_s3 + $0xe0] sm:$0xff]  }
 0x222   : > { %11925 = vmatmul.mubr.msk.bf16.gmra.mrb[20].mxu1 %vm2469_vm1, %v14064_v34  ;;  %v2213_v9 = vor.u32 %v2212_v31, %v2208_v45  ;;  %11451 = vmatprep.subr.bf16.mxu0 %v12145_v17 }
 0x223   : > { %2405 = vrot.lane.b32.xlu0 %v14051_v21, %s17882_s18  ;;  %11928 = vmatprep.mubr.msk.bf16.mxu1 %vm2469_vm1, %v14070_v32  ;;  %v2201_v39 = vor.u32 %v2200_v40, %v2196_v44 }
 0x224   : > { %v14089_v52 = vsel %vm779_vm4, %v2213_v9, %v2217_v50  ;;  %11452 = vmatpush3.bf16.msra.mxu0 %v12146_v37 }
 0x225   : > { %v14084_v6 = vsel %vm779_vm4, %v2201_v39, %v2205_v43  ;;  %11453 = vmatprep.subr.bf16.mxu0 %v12147_v61 }
 0x226   : > { %2297 = vrot.lane.b32.xlu1 %v14084_v6, %s17882_s18 }
 0x22a   : > { %2299 = vrot.lane.b32.xlu1 %v14089_v52, %s17882_s18 }
 0x22e   : > { %v11894_v54 = vpop.f32.mrb[20].mxu0 }
 0x22f   : > { %v1764_v56 = vadd.f32 %v11894_v54, %v13799_v28  ;;  %v1755_v58 = vpop.f32.mrb[21].mxu0 }
 0x230   : > { %v1756_v26 = vadd.f32 %v13799_v28, %v1755_v58  ;;  %v11895_v2 = vpop.f32.mrb[22].mxu0 }
 0x231   : > { %v1767_v59 = vadd.f32 %v11895_v2, %v13799_v28  ;;  %v1758_v12 = vpop.f32.mrb[23].mxu0  ;;  %v2392_v16 = vpop.permute.xlu0 %2391  ;;  %v1824_v23 = vmax.f32 %v1764_v56, 0.0 }
 0x232   : > { %v1759_v19 = vadd.f32 %v13799_v28, %v1758_v12  ;;  %v2528_v20 = vsel %vm2469_vm1, %v13852_v15, %v2392_v16  ;;  %v1822_v35 = vmax.f32 %v1756_v26, 0.0  ;;  %v12148_v26 = vld [vmem:[%s17815_s3 + $0xa0] sm:$0xff]  }
 0x233   : > { %v1825_v11 = vmax.f32 %v1767_v59, 0.0  ;;  %2952 = vmatprep.mubr.bf16.mxu0 %v2528_v20  ;;  %11454 = vmatpush3.bf16.msra.mxu0 %v12148_v26 }
 0x234   : > { %v1823_v55 = vmax.f32 %v1759_v19, 0.0  ;;  %2953 = vmatmul.mubr.bf16.gmra.mrb[32].mxu0 %v14101_v24 }
 0x235   : > { %v1918_v44 = vpack.c.bf16 %v1825_v11, %v1824_v23  ;;  %v2394_v40 = vpop.permute.xlu0 %2393 }
 0x236   : > { %v1917_v31 = vpack.c.bf16 %v1823_v55, %v1822_v35  ;;  %v2532_v7 = vsel %vm2469_vm1, %v13893_v46, %v2394_v40 }
 0x237   : > { %v2001_v39 = vshrl.u32 %v1918_v44, 16  ;;  %2960 = vmatprep.mubr.bf16.mxu0 %v2532_v7  ;;  %v2004_v47 = vshll.u32 %v1918_v44, 16 }
 0x238   : > { %v1994_v43 = vshrl.u32 %v1917_v31, 16  ;;  %v2286_v45 = vpop.permute.xlu1 %2285  ;;  %v1997_v9 = vshll.u32 %v1917_v31, 16 }
 0x239   : > { %v2003_v48 = vrot.slane %v2001_v39, 7  ;;  %v14114_v54 = vsel %vm2469_vm1, %v13884_v38, %v2286_v45 }
 0x23a   : > { %v1996_v42 = vrot.slane %v1994_v43, 7 }
 0x23b   : > { %v2006_v50 = vor.u32 %v2004_v47, %v2003_v48  ;;  %v2094_v2 = vsel %vm13173_vm2, %v2003_v48, 0 }
 0x23c   : > { %v1999_v56 = vor.u32 %v1997_v9, %v1996_v42  ;;  %v2093_v58 = vsel %vm13173_vm2, %v1996_v42, 0  ;;  %2961 = vmatmul.mubr.bf16.gmra.mrb[36].mxu0 %v14114_v54  ;;  %v2375_v17 = vrot.slane %v2094_v2, 1  ;;  %v2239_v43 = vshll.u32 %v2094_v2, 16 }
 0x23d   : > { %v14129_v38 = vsel %vm13173_vm2, 0, %v2006_v50  ;;  %v2372_v20 = vrot.slane %v2093_v58, 1  ;;  %v2227_v11 = vshll.u32 %v2093_v58, 16  ;;  %v2288_v58 = vpop.permute.xlu1 %2287 }
 0x23e   : > { %v14133_v59 = vsel %vm13173_vm2, 0, %v1999_v56  ;;  %v2374_v12 = vrot.slane %v14129_v38, 1  ;;  %v2234_v16 = vshll.u32 %v14129_v38, 16  ;;  %v2232_v39 = vshrl.u32 %v14129_v38, 16 }
 0x23f   : > { %2407 = vrot.lane.b32.xlu0 %v14133_v59, %s17882_s18  ;;  %v2371_v19 = vrot.slane %v14133_v59, 1  ;;  %v2222_v23 = vshll.u32 %v14133_v59, 16  ;;  %v2220_v55 = vshrl.u32 %v14133_v59, 16  ;;  %v2229_v7 = vrot.slane %v2227_v11, 1 }
 0x240   : > { %v2236_v44 = vrot.slane %v2234_v16, 1  ;;  %v14148_v40 = vsel %vm1031_vm3, %v2374_v12, %v2375_v17  ;;  %v2241_v47 = vrot.slane %v2239_v43, 1  ;;  %v14173_v17 = vsel %vm2469_vm1, %v13880_v51, %v2288_v58 }
 0x241   : > { %v14142_v35 = vsel %vm1031_vm3, %v2371_v19, %v2372_v20  ;;  %v2224_v37 = vrot.slane %v2222_v23, 1 }
 0x242   : > { %11929 = vmatmul.mubr.msk.bf16.gmra.mrb[24].mxu1 %vm2469_vm1, %v14142_v35  ;;  %v2237_v48 = vor.u32 %v2236_v44, %v2232_v39 }
 0x243   : > { %2409 = vrot.lane.b32.xlu0 %v14129_v38, %s17882_s18  ;;  %11932 = vmatprep.mubr.msk.bf16.mxu1 %vm2469_vm1, %v14148_v40  ;;  %v2225_v31 = vor.u32 %v2224_v37, %v2220_v55  ;;  %v12149_v55 = vld [vmem:[%s17815_s3 + $0xe8] sm:$0xff]  }
 0x244   : > { %v14161_v42 = vsel %vm779_vm4, %v2237_v48, %v2241_v47  ;;  %11455 = vmatprep.subr.bf16.mxu0 %v12149_v55 }
 0x245   : > { %v14156_v45 = vsel %vm779_vm4, %v2225_v31, %v2229_v7  ;;  %v12150_v31 = vld [vmem:[%s17815_s3 + $0xa8] sm:$0xff]  }
 0x246   : > { %2301 = vrot.lane.b32.xlu1 %v14156_v45, %s17882_s18  ;;  %11456 = vmatpush3.bf16.msra.mxu0 %v12150_v31 }
 0x24a   : > { %2303 = vrot.lane.b32.xlu1 %v14161_v42, %s17882_s18 }
 0x24e   : > { %v11898_v9 = vpop.f32.mrb[0].mxu1 }
 0x24f   : > { %v1780_v50 = vadd.f32 %v11898_v9, %v13799_v28  ;;  %v1771_v56 = vpop.f32.mrb[1].mxu1 }
 0x250   : > { %v1772_v61 = vadd.f32 %v13799_v28, %v1771_v56  ;;  %v11899_v26 = vpop.f32.mrb[2].mxu1 }
 0x251   : > { %v1783_v2 = vadd.f32 %v11899_v26, %v13799_v28  ;;  %v1774_v12 = vpop.f32.mrb[3].mxu1  ;;  %v2396_v16 = vpop.permute.xlu0 %2395  ;;  %v1828_v23 = vmax.f32 %v1780_v50, 0.0 }
 0x252   : > { %v1775_v19 = vadd.f32 %v13799_v28, %v1774_v12  ;;  %v2536_v20 = vsel %vm2469_vm1, %v13899_v25, %v2396_v16  ;;  %v1826_v37 = vmax.f32 %v1772_v61, 0.0 }
 0x253   : > { %v1829_v11 = vmax.f32 %v1783_v2, 0.0  ;;  %2968 = vmatprep.mubr.bf16.mxu0 %v2536_v20  ;;  %v12152_v20 = vld [vmem:[%s17815_s3 + $0xb0] sm:$0xff]  }
 0x254   : > { %v1827_v44 = vmax.f32 %v1775_v19, 0.0  ;;  %2969 = vmatmul.mubr.bf16.gmra.mrb[40].mxu0 %v14173_v17  ;;  %v12151_v19 = vld [vmem:[%s17815_s3 + $0xf0] sm:$0xff]  }
 0x255   : > { %v1920_v7 = vpack.c.bf16 %v1829_v11, %v1828_v23  ;;  %v2398_v39 = vpop.permute.xlu0 %2397  ;;  %11457 = vmatprep.subr.bf16.mxu0 %v12151_v19 }
 0x256   : > { %v1919_v43 = vpack.c.bf16 %v1827_v44, %v1826_v37  ;;  %v2540_v51 = vsel %vm2469_vm1, %v13939_v3, %v2398_v39  ;;  %11458 = vmatpush3.bf16.msra.mxu0 %v12152_v20 }
 0x257   : > { %v2015_v48 = vshrl.u32 %v1920_v7, 16  ;;  %2976 = vmatprep.mubr.bf16.mxu0 %v2540_v51  ;;  %v2018_v56 = vshll.u32 %v1920_v7, 16 }
 0x258   : > { %v2008_v47 = vshrl.u32 %v1919_v43, 16  ;;  %v2290_v9 = vpop.permute.xlu1 %2289  ;;  %v2011_v61 = vshll.u32 %v1919_v43, 16 }
 0x259   : > { %v2017_v50 = vrot.slane %v2015_v48, 7  ;;  %v14186_v2 = vsel %vm2469_vm1, %v13930_v8, %v2290_v9 }
 0x25a   : > { %v2010_v58 = vrot.slane %v2008_v47, 7 }
 0x25b   : > { %v2020_v26 = vor.u32 %v2018_v56, %v2017_v50  ;;  %v2096_v23 = vsel %vm13173_vm2, %v2017_v50, 0 }
 0x25c   : > { %v2013_v12 = vor.u32 %v2011_v61, %v2010_v58  ;;  %v2095_v16 = vsel %vm13173_vm2, %v2010_v58, 0  ;;  %2977 = vmatmul.mubr.bf16.gmra.mrb[44].mxu0 %v14186_v2  ;;  %v2381_v43 = vrot.slane %v2096_v23, 1 }
 0x25d   : > { %v14201_v8 = vsel %vm13173_vm2, 0, %v2020_v26  ;;  %v2378_v31 = vrot.slane %v2095_v16, 1  ;;  %v2251_v39 = vshll.u32 %v2095_v16, 16  ;;  %v2263_v26 = vshll.u32 %v2096_v23, 16 }
 0x25e   : > { %v14205_v11 = vsel %vm13173_vm2, 0, %v2013_v12  ;;  %v2380_v55 = vrot.slane %v14201_v8, 1  ;;  %v2258_v37 = vshll.u32 %v14201_v8, 16  ;;  %v2256_v61 = vshrl.u32 %v14201_v8, 16 }
 0x25f   : > { %2411 = vrot.lane.b32.xlu0 %v14205_v11, %s17882_s18  ;;  %v2377_v44 = vrot.slane %v14205_v11, 1  ;;  %v2246_v7 = vshll.u32 %v14205_v11, 16  ;;  %v2244_v48 = vshrl.u32 %v14205_v11, 16  ;;  %v2253_v58 = vrot.slane %v2251_v39, 1 }
 0x260   : > { %v2260_v9 = vrot.slane %v2258_v37, 1  ;;  %v14220_v50 = vsel %vm1031_vm3, %v2380_v55, %v2381_v43  ;;  %v2265_v19 = vrot.slane %v2263_v26, 1 }
 0x261   : > { %v14214_v51 = vsel %vm1031_vm3, %v2377_v44, %v2378_v31  ;;  %v2248_v47 = vrot.slane %v2246_v7, 1  ;;  %v2292_v31 = vpop.permute.xlu1 %2291 }
 0x262   : > { %11933 = vmatmul.mubr.msk.bf16.gmra.mrb[28].mxu1 %vm2469_vm1, %v14214_v51  ;;  %v2261_v16 = vor.u32 %v2260_v9, %v2256_v61  ;;  %v14245_v61 = vsel %vm2469_vm1, %v13926_v41, %v2292_v31 }
 0x263   : > { %2413 = vrot.lane.b32.xlu0 %v14201_v8, %s17882_s18  ;;  %11936 = vmatprep.mubr.msk.bf16.mxu1 %vm2469_vm1, %v14220_v50  ;;  %v2249_v56 = vor.u32 %v2248_v47, %v2244_v48 }
 0x264   : > { %v14233_v20 = vsel %vm779_vm4, %v2261_v16, %v2265_v19 }
 0x265   : > { %v14228_v12 = vsel %vm779_vm4, %v2249_v56, %v2253_v58 }
 0x266   : > { %2305 = vrot.lane.b32.xlu1 %v14228_v12, %s17882_s18 }
 0x26a   : > { %2307 = vrot.lane.b32.xlu1 %v14233_v20, %s17882_s18 }
 0x26e   : > { %v11902_v55 = vpop.f32.mrb[4].mxu1 }
 0x26f   : > { %v1796_v37 = vadd.f32 %v11902_v55, %v13799_v28  ;;  %v1787_v44 = vpop.f32.mrb[5].mxu1 }
 0x270   : > { %v1788_v23 = vadd.f32 %v13799_v28, %v1787_v44  ;;  %v11903_v7 = vpop.f32.mrb[6].mxu1 }
 0x271   : > { %v1799_v39 = vadd.f32 %v11903_v7, %v13799_v28  ;;  %v1790_v43 = vpop.f32.mrb[7].mxu1  ;;  %v2400_v48 = vpop.permute.xlu0 %2399  ;;  %v1832_v56 = vmax.f32 %v1796_v37, 0.0  ;;  %v12154_v37 = vld [vmem:[%s17815_s3 + $0xb8] sm:$0xff]  }
 0x272   : > { %v1791_v47 = vadd.f32 %v13799_v28, %v1790_v43  ;;  %v2544_v9 = vsel %vm2469_vm1, %v13945_v57, %v2400_v48  ;;  %v1830_v26 = vmax.f32 %v1788_v23, 0.0  ;;  %v12153_v28 = vld [vmem:[%s17815_s3 + $0xf8] sm:$0xff]  }
 0x273   : > { %v1833_v58 = vmax.f32 %v1799_v39, 0.0  ;;  %2984 = vmatprep.mubr.bf16.mxu0 %v2544_v9  ;;  %11459 = vmatprep.subr.bf16.mxu0 %v12153_v28 }
 0x274   : > { %v1831_v16 = vmax.f32 %v1791_v47, 0.0  ;;  %2985 = vmatmul.mubr.bf16.gmra.mrb[48].mxu0 %v14245_v61 }
 0x275   : > { %v1922_v19 = vpack.c.bf16 %v1833_v58, %v1832_v56  ;;  %v2402_v55 = vpop.permute.xlu0 %2401  ;;  %11460 = vmatpush3.bf16.msra.mxu0 %v12154_v37 }
 0x276   : > { %v1921_v44 = vpack.c.bf16 %v1831_v16, %v1830_v26  ;;  %v2548_v7 = vsel %vm2469_vm1, %v13985_v53, %v2402_v55 }
 0x277   : > { %v2029_v41 = vshrl.u32 %v1922_v19, 16  ;;  %2992 = vmatprep.mubr.bf16.mxu0 %v2548_v7  ;;  %v2032_v43 = vshll.u32 %v1922_v19, 16 }
 0x278   : > { %v2022_v31 = vshrl.u32 %v1921_v44, 16  ;;  %v2294_v23 = vpop.permute.xlu1 %2293  ;;  %v2025_v47 = vshll.u32 %v1921_v44, 16 }
 0x279   : > { %v2031_v39 = vrot.slane %v2029_v41, 7  ;;  %v14258_v56 = vsel %vm2469_vm1, %v13976_v4, %v2294_v23 }
 0x27a   : > { %v2024_v48 = vrot.slane %v2022_v31, 7 }
 0x27b   : > { %v2034_v9 = vor.u32 %v2032_v43, %v2031_v39  ;;  %v2098_v16 = vsel %vm13173_vm2, %v2031_v39, 0 }
 0x27c   : > { %v2027_v58 = vor.u32 %v2025_v47, %v2024_v48  ;;  %v2097_v26 = vsel %vm13173_vm2, %v2024_v48, 0  ;;  %2993 = vmatmul.mubr.bf16.gmra.mrb[52].mxu0 %v14258_v56  ;;  %v2433_v41 = vrot.slane %v2098_v16, 1 }
 0x27d   : > { %v14267_v55 = vsel %vm13173_vm2, 0, %v2034_v9  ;;  %v2384_v37 = vrot.slane %v2097_v26, 1  ;;  %v2275_v7 = vshll.u32 %v2097_v26, 16 }
 0x27e   : > { %v14271_v19 = vsel %vm13173_vm2, 0, %v2027_v58  ;;  %v2432_v4 = vrot.slane %v14267_v55, 1  ;;  %v2296_v58 = vpop.permute.xlu1 %2295 }
 0x27f   : > { %2415 = vrot.lane.b32.xlu0 %v14271_v19, %s17882_s18  ;;  %v2383_v28 = vrot.slane %v14271_v19, 1  ;;  %v2270_v44 = vshll.u32 %v14271_v19, 16  ;;  %v2268_v23 = vshrl.u32 %v14271_v19, 16  ;;  %v2277_v47 = vrot.slane %v2275_v7, 1 }
 0x280   : > { %v2434_v43 = vsel %vm1031_vm3, %v2432_v4, %v2433_v41 }
 0x281   : > { %v14279_v31 = vsel %vm1031_vm3, %v2383_v28, %v2384_v37  ;;  %v2272_v39 = vrot.slane %v2270_v44, 1  ;;  %v2420_v44 = vshrl.u32 %v14267_v55, 16 }
 0x282   : > { %11937 = vmatmul.mubr.msk.bf16.gmra.mrb[32].mxu1 %vm2469_vm1, %v14279_v31 }
 0x283   : > { %2417 = vrot.lane.b32.xlu0 %v14267_v55, %s17882_s18  ;;  %11940 = vmatprep.mubr.msk.bf16.mxu1 %vm2469_vm1, %v2434_v43  ;;  %v2273_v48 = vor.u32 %v2272_v39, %v2268_v23 }
 0x285   : > { %v14289_v9 = vsel %vm779_vm4, %v2273_v48, %v2277_v47 }
 0x286   : > { %2309 = vrot.lane.b32.xlu1 %v14289_v9, %s17882_s18 }
 0x287   : > { %2435 = vrot.lane.b32.xlu0 %v14036_v49, %s17882_s18 }
 0x28a   : > { %2437 = vrot.lane.b32.xlu1 %v13852_v15, %s17882_s18  ;;  %11941 = vmatmul.mubr.msk.bf16.gmra.mrb[36].mxu1 %vm2469_vm1, %v13153_v1 }
 0x28b   : > { %2439 = vrot.lane.b32.xlu0 %v13893_v46, %s17882_s18  ;;  %v14313_v46 = vsel %vm2469_vm1, %v13972_v33, %v2296_v58 }
 0x28e   : > { %2441 = vrot.lane.b32.xlu1 %v13899_v25, %s17882_s18 }
 0x28f   : > { %2443 = vrot.lane.b32.xlu0 %v13939_v3, %s17882_s18 }
 0x291   : > { %v2404_v26 = vpop.permute.xlu0 %2403 }
 0x292   : > { %2445 = vrot.lane.b32.xlu1 %v13945_v57, %s17882_s18  ;;  %v2552_v15 = vsel %vm2469_vm1, %v13991_v60, %v2404_v26 }
 0x293   : > { %2447 = vrot.lane.b32.xlu0 %v13985_v53, %s17882_s18  ;;  %3000 = vmatprep.mubr.bf16.mxu0 %v2552_v15  ;;  %v2422_v53 = vshll.u32 %v14267_v55, 16 }
 0x294   : > { %3001 = vmatmul.mubr.bf16.gmra.mrb[56].mxu0 %v14313_v46 }
 0x295   : > { %v14316_v25 = vpop.f32.mrb[8].mxu1  ;;  %v2406_v3 = vpop.permute.xlu0 %2405  ;;  %v2424_v37 = vrot.slane %v2422_v53, 1 }
 0x296   : > { %v14318_v49 = vpop.f32.mrb[9].mxu1  ;;  %2449 = vrot.lane.b32.xlu1 %v13991_v60, %s17882_s18  ;;  %v2556_v57 = vsel %vm2469_vm1, %v14064_v34, %v2406_v3 }
 0x297   : > { %v14325_v4 = vpop.f32.mrb[10].mxu1  ;;  %2451 = vrot.lane.b32.xlu0 %v14064_v34, %s17882_s18  ;;  %3008 = vmatprep.mubr.bf16.mxu0 %v2556_v57  ;;  %v2427_v34 = vshll.u32 %v2098_v16, 16  ;;  %v2425_v7 = vor.u32 %v2424_v37, %v2420_v44 }
 0x298   : > { %v2298_v33 = vpop.permute.xlu1 %2297  ;;  %v14329_v28 = vpop.f32.mrb[11].mxu1 }
 0x299   : > { %v14337_v60 = vsel %vm2469_vm1, %v14055_v22, %v2298_v33  ;;  %v2429_v41 = vrot.slane %v2427_v34, 1 }
 0x29a   : > { %2453 = vrot.lane.b32.xlu1 %v14070_v32, %s17882_s18 }
 0x29b   : > { %2455 = vrot.lane.b32.xlu0 %v14142_v35, %s17882_s18  ;;  %v14348_v23 = vsel %vm779_vm4, %v2425_v7, %v2429_v41  ;;  %vm3435_vm4 = vcmask 517120  }
 0x29c   : > { %3009 = vmatmul.mubr.bf16.gmra.mrb[60].mxu0 %v14337_v60  ;;  %v2300_v22 = vpop.permute.xlu1 %2299 }
 0x29d   : > { %v14359_v48 = vsel %vm2469_vm1, %v14051_v21, %v2300_v22 }
 0x29e   : > { %2457 = vrot.lane.b32.xlu1 %v14148_v40, %s17882_s18 }
 0x29f   : > { %2459 = vrot.lane.b32.xlu0 %v14214_v51, %s17882_s18 }
 0x2a2   : > { %2461 = vrot.lane.b32.xlu1 %v14220_v50, %s17882_s18 }
 0x2a3   : > { %2467 = vrot.lane.b32.xlu0 %v14348_v23, %s17882_s18 }
 0x2a6   : > { %2463 = vrot.lane.b32.xlu1 %v14279_v31, %s17882_s18 }
 0x2a7   : > { %2465 = vrot.lane.b32.xlu0 %v2434_v43, %s17882_s18 }
 0x2b1   : > { %v2408_v16 = vpop.permute.xlu0 %2407 }
 0x2b2   : > { %v2560_v39 = vsel %vm2469_vm1, %v14070_v32, %v2408_v16 }
 0x2b3   : > { %3016 = vmatprep.mubr.bf16.mxu0 %v2560_v39 }
 0x2b4   : > { %3017 = vmatmul.mubr.bf16.gmra.mrb[64].mxu0 %v14359_v48 }
 0x2b5   : > { %v14362_v47 = vpop.f32.mrb[12].mxu1  ;;  %v2410_v58 = vpop.permute.xlu0 %2409 }
 0x2b6   : > { %v14364_v26 = vpop.f32.mrb[13].mxu1  ;;  %v2564_v43 = vsel %vm2469_vm1, %v14142_v35, %v2410_v58 }
 0x2b7   : > { %3024 = vmatprep.mubr.bf16.mxu0 %v2564_v43  ;;  %v14368_v15 = vpop.f32.mrb[14].mxu1 }
 0x2b8   : > { %v2302_v3 = vpop.permute.xlu1 %2301  ;;  %v14370_v32 = vpop.f32.mrb[15].mxu1 }
 0x2b9   : > { %v14374_v21 = vsel %vm2469_vm1, %v14133_v59, %v2302_v3 }
 0x2bc   : > { %3025 = vmatmul.mubr.bf16.gmra.mrb[68].mxu0 %v14374_v21  ;;  %v2304_v57 = vpop.permute.xlu1 %2303 }
 0x2bd   : > { %v14381_v35 = vsel %vm2469_vm1, %v14129_v38, %v2304_v57 }
 0x2d1   : > { %v2412_v53 = vpop.permute.xlu0 %2411 }
 0x2d2   : > { %v2568_v33 = vsel %vm2469_vm1, %v14148_v40, %v2412_v53 }
 0x2d3   : > { %3032 = vmatprep.mubr.bf16.mxu0 %v2568_v33 }
 0x2d4   : > { %3033 = vmatmul.mubr.bf16.gmra.mrb[72].mxu0 %v14381_v35 }
 0x2d5   : > { %v14384_v37 = vpop.f32.mrb[16].mxu1  ;;  %v2414_v44 = vpop.permute.xlu0 %2413 }
 0x2d6   : > { %v14386_v34 = vpop.f32.mrb[17].mxu1  ;;  %v2572_v59 = vsel %vm2469_vm1, %v14214_v51, %v2414_v44 }
 0x2d7   : > { %3040 = vmatprep.mubr.bf16.mxu0 %v2572_v59  ;;  %v14390_v7 = vpop.f32.mrb[18].mxu1 }
 0x2d8   : > { %v2306_v41 = vpop.permute.xlu1 %2305  ;;  %v14392_v40 = vpop.f32.mrb[19].mxu1 }
 0x2d9   : > { %v14396_v38 = vsel %vm2469_vm1, %v14205_v11, %v2306_v41 }
 0x2dc   : > { %3041 = vmatmul.mubr.bf16.gmra.mrb[76].mxu0 %v14396_v38  ;;  %v2308_v57 = vpop.permute.xlu1 %2307 }
 0x2e7   : > { %v11349_v22 = vpop.f32.mrb[24].mxu0 }
 0x2e8   : > { %v11350_v16 = vpop.f32.mrb[25].mxu0 }
 0x2e9   : > { %v14399_v39 = vadd.f32 %v11350_v16, %v11349_v22  ;;  %v11352_v58 = vpop.f32.mrb[26].mxu0  ;;  %v14411_v22 = vsel %vm2469_vm1, %v14201_v8, %v2308_v57 }
 0x2ea   : > { %v11353_v43 = vpop.f32.mrb[27].mxu0 }
 0x2eb   : > { %v14401_v3 = vadd.f32 %v11353_v43, %v11352_v58 }
 0x2ef   : > { %v11355_v51 = vpop.f32.mrb[28].mxu0 }
 0x2f0   : > { %v11356_v53 = vpop.f32.mrb[29].mxu0 }
 0x2f1   : > { %v14403_v33 = vadd.f32 %v11356_v53, %v11355_v51  ;;  %v11358_v44 = vpop.f32.mrb[30].mxu0  ;;  %v2416_v59 = vpop.permute.xlu0 %2415 }
 0x2f2   : > { %v11359_v0 = vpop.f32.mrb[31].mxu0  ;;  %v2576_v11 = vsel %vm2469_vm1, %v14220_v50, %v2416_v59 }
 0x2f3   : > { %v14407_v41 = vadd.f32 %v11359_v0, %v11358_v44  ;;  %3048 = vmatprep.mubr.bf16.mxu0 %v2576_v11 }
 0x2f4   : > { %3049 = vmatmul.mubr.bf16.gmra.mrb[80].mxu0 %v14411_v22 }
 0x2f5   : > { %v14414_v16 = vpop.f32.mrb[20].mxu1  ;;  %v2418_v58 = vpop.permute.xlu0 %2417 }
 0x2f6   : > { %17885 = vst [vmem:[#allocation11_spill] sm:$0xff] %v14414_v16  ;;  %v14416_v43 = vpop.f32.mrb[21].mxu1  ;;  %v2580_v51 = vsel %vm2469_vm1, %v14279_v31, %v2418_v58 }
 0x2f7   : > { %3056 = vmatprep.mubr.bf16.mxu0 %v2580_v51  ;;  %v14420_v53 = vpop.f32.mrb[22].mxu1 }
 0x2f8   : > { %17886 = vst [vmem:[#allocation12_spill] sm:$0xff] %v14420_v53  ;;  %v14422_v0 = vpop.f32.mrb[23].mxu1  ;;  %v2310_v50 = vpop.permute.xlu1 %2309 }
 0x2f9   : > { %17887 = vst [vmem:[#allocation13_spill] sm:$0xff] %v14422_v0  ;;  %v14426_v8 = vsel %vm2469_vm1, %v14271_v19, %v2310_v50  ;;  %v2436_v57 = vpop.permute.xlu0 %2435 }
 0x2fa   : > { %v2584_v44 = vsel %vm2469_vm1, %v13861_v63, %v2436_v57 }
 0x2fc   : > { %3057 = vmatmul.mubr.bf16.gmra.mrb[84].mxu0 %v14426_v8  ;;  %v2438_v59 = vpop.permute.xlu1 %2437 }
 0x2fd   : > { %3097 = vmatprep.mubr.bf16.mxu0 %v14101_v24  ;;  %v2588_v50 = vsel %vm2469_vm1, %v13866_v27, %v2438_v59  ;;  %v2440_v63 = vpop.permute.xlu0 %2439 }
 0x300   : > { %v2442_v59 = vpop.permute.xlu1 %2441 }
 0x304   : > { %3098 = vmatmul.mubr.bf16.vlgmr.msra.gmra.mrb[88].mxu0 %v2584_v44 }
 0x305   : > { %3105 = vmatprep.mubr.bf16.mxu0 %v14114_v54 }
 0x307   : > { %v11361_v31 = vpop.f32.mrb[32].mxu0 }
 0x308   : > { %v11362_v11 = vpop.f32.mrb[33].mxu0 }
 0x309   : > { %v14433_v58 = vadd.f32 %v11362_v11, %v11361_v31  ;;  %v11364_v51 = vpop.f32.mrb[34].mxu0  ;;  %v2592_v31 = vsel %vm2469_vm1, %v13907_v10, %v2440_v63 }
 0x30a   : > { %v11365_v1 = vpop.f32.mrb[35].mxu0 }
 0x30b   : > { %v14435_v19 = vadd.f32 %v11365_v1, %v11364_v51  ;;  %v2596_v51 = vsel %vm2469_vm1, %v13912_v13, %v2442_v59 }
 0x30c   : > { %3106 = vmatmul.mubr.bf16.gmra.mrb[92].mxu0 %v2588_v50  ;;  %v2446_v50 = vpop.permute.xlu1 %2445 }
 0x30d   : > { %3113 = vmatprep.mubr.bf16.mxu0 %v14173_v17  ;;  %v2604_v13 = vsel %vm2469_vm1, %v13958_v30, %v2446_v50 }
 0x30f   : > { %v11367_v24 = vpop.f32.mrb[36].mxu0 }
 0x310   : > { %v11368_v57 = vpop.f32.mrb[37].mxu0  ;;  %v2450_v50 = vpop.permute.xlu1 %2449 }
 0x311   : > { %v14440_v44 = vadd.f32 %v11368_v57, %v11367_v24  ;;  %v11370_v54 = vpop.f32.mrb[38].mxu0 }
 0x312   : > { %v11371_v53 = vpop.f32.mrb[39].mxu0 }
 0x313   : > { %v14442_v18 = vadd.f32 %v11371_v53, %v11370_v54  ;;  %v2444_v53 = vpop.permute.xlu0 %2443 }
 0x314   : > { %3114 = vmatmul.mubr.bf16.gmra.mrb[96].mxu0 %v2592_v31  ;;  %v2600_v10 = vsel %vm2469_vm1, %v13953_v62, %v2444_v53 }
 0x315   : > { %3121 = vmatprep.mubr.bf16.mxu0 %v14186_v2  ;;  %v14447_v1 = vpop.f32.mrb[24].mxu1 }
 0x316   : > { %17888 = vst [vmem:[#allocation14_spill] sm:$0xff] %v14447_v1  ;;  %v14449_v27 = vpop.f32.mrb[25].mxu1 }
 0x317   : > { %17889 = vst [vmem:[#allocation15_spill] sm:$0xff] %v14449_v27  ;;  %v14451_v17 = vpop.f32.mrb[26].mxu1  ;;  %v2448_v62 = vpop.permute.xlu0 %2447 }
 0x318   : > { %17890 = vst [vmem:[#allocation16_spill] sm:$0xff] %v14451_v17  ;;  %v14453_v11 = vpop.f32.mrb[27].mxu1 }
 0x319   : > { %17891 = vst [vmem:[#allocation17_spill] sm:$0xff] %v14453_v11 }
 0x31c   : > { %3122 = vmatmul.mubr.bf16.gmra.mrb[100].mxu0 %v2596_v51 }
 0x31d   : > { %3129 = vmatprep.mubr.bf16.mxu0 %v14245_v61 }
 0x324   : > { %3130 = vmatmul.mubr.bf16.gmra.mrb[104].mxu0 %v2600_v10 }
 0x325   : > { %3137 = vmatprep.mubr.bf16.mxu0 %v14258_v56 }
 0x327   : > { %v11373_v2 = vpop.f32.mrb[40].mxu0 }
 0x328   : > { %v11374_v24 = vpop.f32.mrb[41].mxu0 }
 0x329   : > { %v14461_v63 = vadd.f32 %v11374_v24, %v11373_v2  ;;  %v11376_v57 = vpop.f32.mrb[42].mxu0  ;;  %v2608_v2 = vsel %vm2469_vm1, %v14002_v14, %v2448_v62 }
 0x32a   : > { %v11377_v54 = vpop.f32.mrb[43].mxu0 }
 0x32b   : > { %v14463_v31 = vadd.f32 %v11377_v54, %v11376_v57  ;;  %v2612_v54 = vsel %vm2469_vm1, %v14007_v5, %v2450_v50 }
 0x32c   : > { %3138 = vmatmul.mubr.bf16.gmra.mrb[108].mxu0 %v2604_v13  ;;  %v2452_v13 = vpop.permute.xlu0 %2451 }
 0x32d   : > { %3145 = vmatprep.mubr.bf16.mxu0 %v14313_v46  ;;  %v2616_v14 = vsel %vm2469_vm1, %v14084_v6, %v2452_v13 }
 0x32f   : > { %v11379_v61 = vpop.f32.mrb[44].mxu0 }
 0x330   : > { %v11380_v59 = vpop.f32.mrb[45].mxu0  ;;  %v2456_v6 = vpop.permute.xlu0 %2455 }
 0x331   : > { %v14468_v51 = vadd.f32 %v11380_v59, %v11379_v61  ;;  %v11382_v56 = vpop.f32.mrb[46].mxu0  ;;  %v2454_v61 = vpop.permute.xlu1 %2453 }
 0x332   : > { %v11383_v53 = vpop.f32.mrb[47].mxu0  ;;  %v2620_v5 = vsel %vm2469_vm1, %v14089_v52, %v2454_v61 }
 0x333   : > { %v14470_v10 = vadd.f32 %v11383_v53, %v11382_v56 }
 0x334   : > { %3146 = vmatmul.mubr.bf16.gmra.mrb[112].mxu0 %v2608_v2 }
 0x335   : > { %3153 = vmatprep.mubr.bf16.mxu0 %v14337_v60  ;;  %v14475_v24 = vpop.f32.mrb[28].mxu1  ;;  %v2458_v61 = vpop.permute.xlu1 %2457 }
 0x336   : > { %17892 = vst [vmem:[#allocation18_spill] sm:$0xff] %v14475_v24  ;;  %v14477_v30 = vpop.f32.mrb[29].mxu1 }
 0x337   : > { %17893 = vst [vmem:[#allocation19_spill] sm:$0xff] %v14477_v30  ;;  %v14479_v46 = vpop.f32.mrb[30].mxu1 }
 0x338   : > { %17894 = vst [vmem:[#allocation20_spill] sm:$0xff] %v14479_v46  ;;  %v14481_v57 = vpop.f32.mrb[31].mxu1 }
 0x339   : > { %17895 = vst [vmem:[#allocation21_spill] sm:$0xff] %v14481_v57 }
 0x33c   : > { %3154 = vmatmul.mubr.bf16.gmra.mrb[116].mxu0 %v2612_v54 }
 0x33d   : > { %3161 = vmatprep.mubr.bf16.mxu0 %v14359_v48 }
 0x344   : > { %3162 = vmatmul.mubr.bf16.gmra.mrb[120].mxu0 %v2616_v14 }
 0x345   : > { %3169 = vmatprep.mubr.bf16.mxu0 %v14374_v21 }
 0x347   : > { %v11385_v60 = vpop.f32.mrb[48].mxu0 }
 0x348   : > { %v11386_v62 = vpop.f32.mrb[49].mxu0 }
 0x349   : > { %v14489_v59 = vadd.f32 %v11386_v62, %v11385_v60  ;;  %v11388_v56 = vpop.f32.mrb[50].mxu0  ;;  %v2624_v60 = vsel %vm2469_vm1, %v14156_v45, %v2456_v6 }
 0x34a   : > { %v11389_v53 = vpop.f32.mrb[51].mxu0 }
 0x34b   : > { %v14491_v2 = vadd.f32 %v11389_v53, %v11388_v56  ;;  %v2628_v53 = vsel %vm2469_vm1, %v14161_v42, %v2458_v61 }
 0x34c   : > { %3170 = vmatmul.mubr.bf16.gmra.mrb[124].mxu0 %v2620_v5  ;;  %v2460_v5 = vpop.permute.xlu0 %2459 }
 0x34d   : > { %3177 = vmatprep.mubr.bf16.mxu0 %v14381_v35  ;;  %v2632_v45 = vsel %vm2469_vm1, %v14228_v12, %v2460_v5 }
 0x34f   : > { %v11391_v48 = vpop.f32.mrb[52].mxu0 }
 0x350   : > { %v11392_v50 = vpop.f32.mrb[53].mxu0 }
 0x351   : > { %v14496_v54 = vadd.f32 %v11392_v50, %v11391_v48  ;;  %v11394_v21 = vpop.f32.mrb[54].mxu0  ;;  %v2462_v48 = vpop.permute.xlu1 %2461 }
 0x352   : > { %v11395_v13 = vpop.f32.mrb[55].mxu0  ;;  %v2468_v50 = vpop.permute.xlu0 %2467  ;;  %v2636_v42 = vsel %vm2469_vm1, %v14233_v20, %v2462_v48 }
 0x353   : > { %v14498_v14 = vadd.f32 %v11395_v13, %v11394_v21  ;;  %v2647_v12 = vsel %vm2469_vm1, %v14267_v55, %v2468_v50 }
 0x354   : > { %3178 = vmatmul.mubr.bf16.gmra.mrb[128].mxu0 %v2624_v60 }
 0x355   : > { %3185 = vmatprep.mubr.bf16.mxu0 %v14396_v38  ;;  %v14503_v62 = vpop.f32.mrb[32].mxu1 }
 0x356   : > { %17896 = vst [vmem:[#allocation22_spill] sm:$0xff] %v14503_v62  ;;  %v14505_v52 = vpop.f32.mrb[33].mxu1  ;;  %v2466_v20 = vpop.permute.xlu0 %2465 }
 0x357   : > { %17897 = vst [vmem:[#allocation23_spill] sm:$0xff] %v14505_v52  ;;  %v14507_v35 = vpop.f32.mrb[34].mxu1  ;;  %v2644_v55 = vsel %vm2469_vm1, %v14348_v23, %v2466_v20 }
 0x358   : > { %17898 = vst [vmem:[#allocation24_spill] sm:$0xff] %v14507_v35  ;;  %v14509_v56 = vpop.f32.mrb[35].mxu1 }
 0x359   : > { %17899 = vst [vmem:[#allocation25_spill] sm:$0xff] %v14509_v56 }
 0x35c   : > { %3186 = vmatmul.mubr.bf16.gmra.mrb[132].mxu0 %v2628_v53 }
 0x35d   : > { %3193 = vmatprep.mubr.bf16.mxu0 %v14411_v22 }
 0x364   : > { %3194 = vmatmul.mubr.bf16.gmra.mrb[136].mxu0 %v2632_v45 }
 0x365   : > { %3201 = vmatprep.mubr.bf16.mxu0 %v14426_v8  ;;  %v2464_v8 = vpop.permute.xlu1 %2463 }
 0x367   : > { %v11397_v38 = vpop.f32.mrb[56].mxu0 }
 0x368   : > { %v11398_v6 = vpop.f32.mrb[57].mxu0 }
 0x369   : > { %v14517_v21 = vadd.f32 %v11398_v6, %v11397_v38  ;;  %v11400_v13 = vpop.f32.mrb[58].mxu0  ;;  %v2640_v6 = vsel %vm2469_vm1, %v14289_v9, %v2464_v8 }
 0x36a   : > { %v11401_v60 = vpop.f32.mrb[59].mxu0 }
 0x36b   : > { %v14519_v35 = vadd.f32 %v11401_v60, %v11400_v13 }
 0x36c   : > { %3202 = vmatmul.mubr.bf16.gmra.mrb[140].mxu0 %v2636_v42 }
 0x36d   : > { %3209 = vmatprep.mubr.bf16.mxu0 %v2647_v12 }
 0x36f   : > { %v11403_v22 = vpop.f32.mrb[60].mxu0 }
 0x370   : > { %v11404_v61 = vpop.f32.mrb[61].mxu0 }
 0x371   : > { %v14525_v53 = vadd.f32 %v11404_v61, %v11403_v22  ;;  %v11406_v5 = vpop.f32.mrb[62].mxu0 }
 0x372   : > { %v11407_v45 = vpop.f32.mrb[63].mxu0 }
 0x373   : > { %v14527_v38 = vadd.f32 %v11407_v45, %v11406_v5 }
 0x374   : > { %3210 = vmatmul.mubr.bf16.gmra.mrb[144].mxu0 %v2640_v6 }
 0x375   : > { %10654 = vmatprep.mubr.msk.bf16.mxu0 %vm14017_vm7, %v14013_v29 }
 0x37c   : > { %3218 = vmatmul.mubr.bf16.gmra.mrb[148].mxu0 %v2644_v55 }
 0x387   : > { %v11409_v48 = vpop.f32.mrb[64].mxu0 }
 0x388   : > { %v11410_v50 = vpop.f32.mrb[65].mxu0 }
 0x389   : > { %v14536_v13 = vadd.f32 %v11410_v50, %v11409_v48  ;;  %v11412_v60 = vpop.f32.mrb[66].mxu0 }
 0x38a   : > { %v11413_v42 = vpop.f32.mrb[67].mxu0 }
 0x38b   : > { %v14538_v12 = vadd.f32 %v11413_v42, %v11412_v60 }
 0x38f   : > { %v11415_v22 = vpop.f32.mrb[68].mxu0 }
 0x390   : > { %v11416_v9 = vpop.f32.mrb[69].mxu0 }
 0x391   : > { %v14540_v8 = vadd.f32 %v11416_v9, %v11415_v22  ;;  %v11418_v61 = vpop.f32.mrb[70].mxu0 }
 0x392   : > { %v11419_v36 = vpop.f32.mrb[71].mxu0 }
 0x393   : > { %v14542_v29 = vadd.f32 %v11419_v36, %v11418_v61 }
 0x3a7   : > { %v11421_v5 = vpop.f32.mrb[72].mxu0 }
 0x3a8   : > { %v11422_v45 = vpop.f32.mrb[73].mxu0 }
 0x3a9   : > { %v14544_v23 = vadd.f32 %v11422_v45, %v11421_v5  ;;  %v11424_v6 = vpop.f32.mrb[74].mxu0 }
 0x3aa   : > { %v11425_v20 = vpop.f32.mrb[75].mxu0 }
 0x3ab   : > { %v14546_v55 = vadd.f32 %v11425_v20, %v11424_v6 }
 0x3af   : > { %v11427_v48 = vpop.f32.mrb[76].mxu0 }
 0x3b0   : > { %v11428_v50 = vpop.f32.mrb[77].mxu0 }
 0x3b1   : > { %v14548_v60 = vadd.f32 %v11428_v50, %v11427_v48  ;;  %v11430_v42 = vpop.f32.mrb[78].mxu0 }
 0x3b2   : > { %v11431_v62 = vpop.f32.mrb[79].mxu0 }
 0x3b3   : > { %v14550_v22 = vadd.f32 %v11431_v62, %v11430_v42  ;;  %v14563_v62 = vld [vmem:[%s17816_s4] ss:$0 sm:$0xff] }
 0x3b4   : > { %v2939_v42 = vadd.f32 %v14399_v39, %v14563_v62  ;;  %v2947_v11 = vadd.f32 %v14403_v33, %v14563_v62  ;;  %v14587_v33 = vadd.f32 %v14442_v18, %v14563_v62  ;;  %v14607_v18 = vadd.f32 %v14489_v59, %v14563_v62 }
 0x3c7   : > { %v11433_v9 = vpop.f32.mrb[80].mxu0 }
 0x3c8   : > { %v11434_v56 = vpop.f32.mrb[81].mxu0 }
 0x3c9   : > { %v14552_v61 = vadd.f32 %v11434_v56, %v11433_v9  ;;  %v11436_v36 = vpop.f32.mrb[82].mxu0 }
 0x3ca   : > { %v11437_v52 = vpop.f32.mrb[83].mxu0 }
 0x3cb   : > { %v14554_v5 = vadd.f32 %v11437_v52, %v11436_v36 }
 0x3cf   : > { %v11439_v45 = vpop.f32.mrb[84].mxu0 }
 0x3d0   : > { %v11440_v46 = vpop.f32.mrb[85].mxu0 }
 0x3d1   : > { %v14556_v6 = vadd.f32 %v11440_v46, %v11439_v45  ;;  %v11442_v20 = vpop.f32.mrb[86].mxu0  ;;  %v2942_v46 = vadd.f32 %v14401_v3, %v14563_v62  ;;  %v2955_v3 = vadd.f32 %v14433_v58, %v14563_v62  ;;  %v14595_v58 = vadd.f32 %v14463_v31, %v14563_v62 }
 0x3d2   : > { %v11443_v24 = vpop.f32.mrb[87].mxu0  ;;  %v14624_v31 = vadd.f32 %v14517_v21, %v14563_v62 }
 0x3d3   : > { %v14558_v48 = vadd.f32 %v11443_v24, %v11442_v20 }
 0x3d4   : > { %17902 = vst [vmem:[#allocation28_spill] sm:$0xff] %v14624_v31 }
 0x3d7   : > { %v11461_v50 = vpop.f32.mrb[88].mxu0 }
 0x3d8   : > { %v11462_v56 = vpop.f32.mrb[89].mxu0 }
 0x3d9   : > { %v11463_v52 = vadd.f32 %v11462_v56, %v11461_v50  ;;  %v11464_v9 = vpop.f32.mrb[90].mxu0  ;;  %v2950_v50 = vadd.f32 %v14407_v41, %v14563_v62  ;;  %v14591_v41 = vadd.f32 %v14461_v63, %v14563_v62  ;;  %v14620_v63 = vadd.f32 %v14498_v14, %v14563_v62 }
 0x3da   : > { %v11465_v36 = vpop.f32.mrb[91].mxu0  ;;  %v14633_v14 = vadd.f32 %v14525_v53, %v14563_v62 }
 0x3db   : > { %v3100_v45 = vadd.f32 %v11463_v52, %v2939_v42  ;;  %v11466_v57 = vadd.f32 %v11465_v36, %v11464_v9  ;;  %17901 = vst [vmem:[#allocation27_spill] sm:$0xff] %v14620_v63 }
 0x3dc   : > { %17904 = vst [vmem:[#allocation30_spill] sm:$0xff] %v14633_v14 }
 0x3dd   : > { %v3261_v24 = vadd.f32 %v14318_v49, %v3100_v45  ;;  %v3103_v20 = vadd.f32 %v11466_v57, %v2942_v46  ;;  %v14579_v49 = vadd.f32 %v14435_v19, %v14563_v62  ;;  %v14599_v19 = vadd.f32 %v14468_v51, %v14563_v62 }
 0x3de   : > { %v14645_v46 = vadd.f32 %v14538_v12, %v14563_v62 }
 0x3df   : > { %v3264_v30 = vadd.f32 %v14329_v28, %v3103_v20  ;;  %v11467_v17 = vpop.f32.mrb[92].mxu0  ;;  %v14583_v28 = vadd.f32 %v14440_v44, %v14563_v62  ;;  %v14603_v44 = vadd.f32 %v14470_v10, %v14563_v62  ;;  %v3387_v51 = vmax.f32 %v3261_v24, 0.0 }
 0x3e0   : > { %v11468_v1 = vpop.f32.mrb[93].mxu0  ;;  %17907 = vst [vmem:[#allocation33_spill] sm:$0xff] %v14645_v46 }
 0x3e1   : > { %v11469_v27 = vadd.f32 %v11468_v1, %v11467_v17  ;;  %v11470_v39 = vpop.f32.mrb[94].mxu0  ;;  %v14612_v17 = vadd.f32 %v14491_v2, %v14563_v62  ;;  %v14629_v2 = vadd.f32 %v14519_v35, %v14563_v62  ;;  %v14641_v35 = vadd.f32 %v14536_v13, %v14563_v62 }
 0x3e2   : > { %v11471_v56 = vpop.f32.mrb[95].mxu0  ;;  %v3388_v45 = vmax.f32 %v3264_v30, 0.0  ;;  %v14653_v13 = vadd.f32 %v14540_v8, %v14563_v62 }
 0x3e3   : > { %v3108_v57 = vadd.f32 %v11469_v27, %v2947_v11  ;;  %v11472_v42 = vadd.f32 %v11471_v56, %v11470_v39  ;;  %v14616_v11 = vadd.f32 %v14496_v54, %v14563_v62  ;;  %17903 = vst [vmem:[#allocation29_spill] sm:$0xff] %v14629_v2  ;;  %17906 = vst [vmem:[#allocation32_spill] sm:$0xff] %v14641_v35 }
 0x3e4   : > { %17908 = vst [vmem:[#allocation34_spill] sm:$0xff] %v14653_v13  ;;  %v14661_v2 = vadd.f32 %v14542_v29, %v14563_v62 }
 0x3e5   : > { %v3269_v1 = vadd.f32 %v14316_v25, %v3108_v57  ;;  %v3111_v27 = vadd.f32 %v11472_v42, %v2950_v50  ;;  %17900 = vst [vmem:[#allocation26_spill] sm:$0xff] %v14616_v11 }
 0x3e6   : > { %17909 = vst [vmem:[#allocation35_spill] sm:$0xff] %v14661_v2 }
 0x3e7   : > { %v3389_v25 = vmax.f32 %v3269_v1, 0.0  ;;  %v3272_v10 = vadd.f32 %v14325_v4, %v3111_v27  ;;  %v11473_v59 = vpop.f32.mrb[96].mxu0  ;;  %v14637_v4 = vadd.f32 %v14527_v38, %v14563_v62 }
 0x3e8   : > { %v11474_v54 = vpop.f32.mrb[97].mxu0 }
 0x3e9   : > { %v3419_v52 = vmax.f32 %v3387_v51, %v3389_v25  ;;  %v3390_v21 = vmax.f32 %v3272_v10, 0.0  ;;  %v11475_v9 = vadd.f32 %v11474_v54, %v11473_v59  ;;  %v11476_v36 = vpop.f32.mrb[98].mxu0  ;;  %17905 = vst [vmem:[#allocation31_spill] sm:$0xff] %v14637_v4 }
 0x3ea   : > { %v11477_v24 = vpop.f32.mrb[99].mxu0 }
 0x3eb   : > { %v3436_v53 = vsel %vm3435_vm4, %v3419_v52, -inf  ;;  %v3493_v20 = vsel %vm3492_vm8, %v3419_v52, -inf  ;;  %v3550_v39 = vsel %vm3549_vm9, %v3419_v52, -inf  ;;  %v3607_v50 = vsel %vm3606_vm10, %v3419_v52, -inf }
 0x3ec   : > { %v3437_v38 = vrot.slane %v3436_v53, 4  ;;  %v3494_v56 = vrot.slane %v3493_v20, 4  ;;  %v3551_v57 = vrot.slane %v3550_v39, 4  ;;  %v3608_v42 = vrot.slane %v3607_v50, 4 }
 0x3ed   : > { %v3420_v12 = vmax.f32 %v3388_v45, %v3390_v21  ;;  %v3116_v1 = vadd.f32 %v11475_v9, %v2955_v3  ;;  %v11478_v30 = vadd.f32 %v11477_v24, %v11476_v36 }
 0x3ee   : > { %v3438_v27 = vmax.f32 %v3436_v53, %v3437_v38  ;;  %v3495_v51 = vmax.f32 %v3493_v20, %v3494_v56  ;;  %v3552_v25 = vmax.f32 %v3550_v39, %v3551_v57  ;;  %v3609_v10 = vmax.f32 %v3607_v50, %v3608_v42 }
 0x3ef   : > { %v3663_v59 = vsel %vm3435_vm4, %v3420_v12, -inf  ;;  %v3719_v54 = vsel %vm3492_vm8, %v3420_v12, -inf  ;;  %v3775_v52 = vsel %vm3549_vm9, %v3420_v12, -inf  ;;  %v3831_v46 = vsel %vm3606_vm10, %v3420_v12, -inf  ;;  %v11479_v35 = vpop.f32.mrb[100].mxu0 }
 0x3f0   : > { %v3439_v4 = vrot.slane %v3438_v27, 2  ;;  %v3496_v14 = vrot.slane %v3495_v51, 2  ;;  %v3553_v8 = vrot.slane %v3552_v25, 2  ;;  %v3610_v13 = vrot.slane %v3609_v10, 2  ;;  %v11480_v21 = vpop.f32.mrb[101].mxu0 }
 0x3f1   : > { %v3664_v3 = vrot.slane %v3663_v59, 4  ;;  %v3720_v9 = vrot.slane %v3719_v54, 4  ;;  %v3776_v36 = vrot.slane %v3775_v52, 4  ;;  %v3832_v45 = vrot.slane %v3831_v46, 4  ;;  %v11482_v24 = vpop.f32.mrb[102].mxu0 }
 0x3f2   : > { %v3440_v53 = vmax.f32 %v3438_v27, %v3439_v4  ;;  %v3497_v20 = vmax.f32 %v3495_v51, %v3496_v14  ;;  %v3554_v39 = vmax.f32 %v3552_v25, %v3553_v8  ;;  %v3611_v50 = vmax.f32 %v3609_v10, %v3610_v13  ;;  %v11483_v38 = vpop.f32.mrb[103].mxu0 }
 0x3f3   : > { %v3665_v56 = vmax.f32 %v3663_v59, %v3664_v3  ;;  %v3721_v57 = vmax.f32 %v3719_v54, %v3720_v9  ;;  %v3777_v42 = vmax.f32 %v3775_v52, %v3776_v36  ;;  %v3833_v12 = vmax.f32 %v3831_v46, %v3832_v45 }
 0x3f4   : > { %v3441_v31 = vrot.slane %v3440_v53, 1  ;;  %v3498_v63 = vrot.slane %v3497_v20, 1  ;;  %v3555_v16 = vrot.slane %v3554_v39, 1  ;;  %v3612_v0 = vrot.slane %v3611_v50, 1 }
 0x3f5   : > { %v3666_v4 = vrot.slane %v3665_v56, 2  ;;  %v3722_v14 = vrot.slane %v3721_v57, 2  ;;  %v3778_v27 = vrot.slane %v3777_v42, 2  ;;  %v14665_v13 = vadd.f32 %v14544_v23, %v14563_v62 }
 0x3f6   : > { %v14669_v46 = vadd.f32 %v14546_v55, %v14563_v62  ;;  %v3442_v51 = vmax.f32 %v3440_v53, %v3441_v31  ;;  %v3499_v25 = vmax.f32 %v3497_v20, %v3498_v63  ;;  %v3834_v54 = vrot.slane %v3833_v12, 2 }
 0x3f7   : > { %17910 = vst [vmem:[#allocation36_spill] sm:$0xff] %v14665_v13  ;;  %v3667_v29 = vmax.f32 %v3665_v56, %v3666_v4  ;;  %v3723_v10 = vmax.f32 %v3721_v57, %v3722_v14  ;;  %v3779_v59 = vmax.f32 %v3777_v42, %v3778_v27  ;;  %v11485_v52 = vpop.f32.mrb[104].mxu0  ;;  %v3556_v8 = vmax.f32 %v3554_v39, %v3555_v16 }
 0x3f8   : > { %v3277_v3 = vadd.f32 %v14364_v26, %v3116_v1  ;;  %v3119_v9 = vadd.f32 %v11478_v30, %v14579_v49  ;;  %v11481_v36 = vadd.f32 %v11480_v21, %v11479_v35  ;;  %v11486_v45 = vpop.f32.mrb[105].mxu0  ;;  %v3613_v23 = vmax.f32 %v3611_v50, %v3612_v0 }
 0x3f9   : > { %v3668_v13 = vrot.slane %v3667_v29, 1  ;;  %v3724_v2 = vrot.slane %v3723_v10, 1  ;;  %v11484_v11 = vadd.f32 %v11483_v38, %v11482_v24  ;;  %v11488_v55 = vpop.f32.mrb[106].mxu0  ;;  %v3888_v31 = vsel %vm744_vm0, %v3442_v51, %v3499_v25 }
 0x3fa   : > { %v3280_v63 = vadd.f32 %v14370_v32, %v3119_v9  ;;  %v3124_v53 = vadd.f32 %v11481_v36, %v14583_v28  ;;  %v11487_v20 = vadd.f32 %v11486_v45, %v11485_v52  ;;  %v11489_v56 = vpop.f32.mrb[107].mxu0  ;;  %v3780_v39 = vrot.slane %v3779_v59, 1 }
 0x3fb   : > { %v3669_v16 = vmax.f32 %v3667_v29, %v3668_v13  ;;  %v3127_v26 = vadd.f32 %v11484_v11, %v14587_v33  ;;  %v11490_v49 = vadd.f32 %v11489_v56, %v11488_v55  ;;  %v14677_v35 = vmax.f32 %v3833_v12, %v3834_v54 }
 0x3fc   : > { %v3391_v0 = vmax.f32 %v3277_v3, 0.0  ;;  %v3285_v1 = vadd.f32 %v14362_v47, %v3124_v53  ;;  %v3132_v30 = vadd.f32 %v11487_v20, %v14591_v41  ;;  %v3725_v21 = vmax.f32 %v3723_v10, %v3724_v2 }
 0x3fd   : > { %v3288_v24 = vadd.f32 %v14368_v15, %v3127_v26  ;;  %v3135_v32 = vadd.f32 %v11490_v49, %v14595_v58  ;;  %v3897_v28 = vsel %vm3896_vm11, %v3888_v31, %v3556_v8  ;;  %v3392_v50 = vmax.f32 %v3280_v63, 0.0 }
 0x3fe   : > { %v3393_v38 = vmax.f32 %v3285_v1, 0.0  ;;  %v14685_v57 = vadd.f32 %v14386_v34, %v3132_v30  ;;  %v3906_v33 = vsel %vm3905_vm12, %v3897_v28, %v3613_v23  ;;  %v3781_v41 = vmax.f32 %v3779_v59, %v3780_v39  ;;  %v14717_v39 = vpop.f32.mrb[36].mxu1 }
 0x3ff   : > { %v3394_v11 = vmax.f32 %v3288_v24, 0.0  ;;  %v14689_v42 = vadd.f32 %v14392_v40, %v3135_v32  ;;  %v11491_v47 = vpop.f32.mrb[108].mxu0  ;;  %v3915_v2 = vsel %vm3914_vm13, %v3906_v33, %v3669_v16  ;;  %v14694_v15 = vadd.f32 %v14548_v60, %v14563_v62  ;;  %17911 = vst [vmem:[#allocation37_spill] sm:$0xff] %v14717_v39 }
 0x400   : > { %v14698_v58 = vadd.f32 %v14550_v22, %v14563_v62  ;;  %v3421_v34 = vmax.f32 %v3391_v0, %v3393_v38  ;;  %v11492_v12 = vpop.f32.mrb[109].mxu0  ;;  %v3923_v4 = vsel %vm1634_vm5, %v3915_v2, %v3725_v21  ;;  %v3836_v13 = vrot.slane %v14677_v35, 1  ;;  %v14719_v21 = vpop.f32.mrb[37].mxu1 }
 0x401   : > { %v3422_v14 = vmax.f32 %v3392_v50, %v3394_v11  ;;  %v14701_v27 = vadd.f32 %v11492_v12, %v11491_v47  ;;  %v14703_v40 = vpop.f32.mrb[110].mxu0  ;;  %v14707_v51 = vsel %vm1635_vm6, %v3923_v4, %v3781_v41  ;;  %v14721_v33 = vpop.f32.mrb[38].mxu1 }
 0x402   : > { %v3443_v60 = vsel %vm3435_vm4, %v3421_v34, -inf  ;;  %v3500_v25 = vsel %vm3492_vm8, %v3421_v34, -inf  ;;  %v3557_v22 = vsel %vm3549_vm9, %v3421_v34, -inf  ;;  %v3614_v29 = vsel %vm3606_vm10, %v3421_v34, -inf  ;;  %v11495_v10 = vpop.f32.mrb[111].mxu0  ;;  %17912 = vst [vmem:[#allocation38_spill] sm:$0xff] %v14721_v33 }
 0x403   : > { %v3444_v59 = vrot.slane %v3443_v60, 4  ;;  %v3501_v54 = vrot.slane %v3500_v25, 4  ;;  %v3558_v52 = vrot.slane %v3557_v22, 4  ;;  %v3615_v8 = vrot.slane %v3614_v29, 4 }
 0x404   : > { %v3670_v3 = vsel %vm3435_vm4, %v3422_v14, -inf  ;;  %v3726_v9 = vsel %vm3492_vm8, %v3422_v14, -inf  ;;  %v3782_v36 = vsel %vm3549_vm9, %v3422_v14, -inf  ;;  %v3838_v45 = vsel %vm3606_vm10, %v3422_v14, -inf }
 0x405   : > { %v3445_v23 = vmax.f32 %v3443_v60, %v3444_v59  ;;  %v3502_v55 = vmax.f32 %v3500_v25, %v3501_v54  ;;  %v3559_v31 = vmax.f32 %v3557_v22, %v3558_v52  ;;  %v3616_v63 = vmax.f32 %v3614_v29, %v3615_v8  ;;  %v14723_v22 = vpop.f32.mrb[39].mxu1 }
 0x406   : > { %v3671_v53 = vrot.slane %v3670_v3, 4  ;;  %v3727_v20 = vrot.slane %v3726_v9, 4  ;;  %v3783_v56 = vrot.slane %v3782_v36, 4  ;;  %v3839_v16 = vrot.slane %v3838_v45, 4  ;;  %17913 = vst [vmem:[#allocation39_spill] sm:$0xff] %v14723_v22 }
 0x407   : > { %v3446_v26 = vrot.slane %v3445_v23, 2  ;;  %v3503_v49 = vrot.slane %v3502_v55, 2  ;;  %v3560_v0 = vrot.slane %v3559_v31, 2  ;;  %v3617_v1 = vrot.slane %v3616_v63, 2  ;;  %v11497_v30 = vpop.f32.mrb[112].mxu0 }
 0x408   : > { %v3672_v24 = vmax.f32 %v3670_v3, %v3671_v53  ;;  %v3728_v32 = vmax.f32 %v3726_v9, %v3727_v20  ;;  %v3784_v28 = vmax.f32 %v3782_v36, %v3783_v56  ;;  %v3840_v50 = vmax.f32 %v3838_v45, %v3839_v16  ;;  %v11498_v38 = vpop.f32.mrb[113].mxu0 }
 0x409   : > { %v3447_v11 = vmax.f32 %v3445_v23, %v3446_v26  ;;  %v3504_v47 = vmax.f32 %v3502_v55, %v3503_v49  ;;  %v3561_v41 = vmax.f32 %v3559_v31, %v3560_v0  ;;  %v3618_v2 = vmax.f32 %v3616_v63, %v3617_v1  ;;  %v11500_v34 = vpop.f32.mrb[114].mxu0 }
 0x40a   : > { %v3673_v12 = vrot.slane %v3672_v24, 2  ;;  %v3729_v4 = vrot.slane %v3728_v32, 2  ;;  %v3785_v14 = vrot.slane %v3784_v28, 2  ;;  %v3841_v60 = vrot.slane %v3840_v50, 2  ;;  %v11501_v25 = vpop.f32.mrb[115].mxu0 }
 0x40b   : > { %v14727_v29 = vadd.f32 %v14552_v61, %v14563_v62  ;;  %v14731_v59 = vadd.f32 %v14554_v5, %v14563_v62  ;;  %v14735_v54 = vadd.f32 %v14556_v6, %v14563_v62  ;;  %v3448_v52 = vrot.slane %v3447_v11, 1 }
 0x40c   : > { %v14739_v8 = vadd.f32 %v14558_v48, %v14563_v62  ;;  %v3505_v3 = vrot.slane %v3504_v47, 1  ;;  %v3562_v9 = vrot.slane %v3561_v41, 1  ;;  %v3837_v36 = vmax.f32 %v14677_v35, %v3836_v13 }
 0x40d   : > { %17914 = vst [vmem:[#allocation40_spill] sm:$0xff] %v14735_v54  ;;  %v3619_v45 = vrot.slane %v3618_v2, 1  ;;  %v3674_v61 = vmax.f32 %v3672_v24, %v3673_v12  ;;  %v3395_v23 = vmax.f32 %v14685_v57, 0.0  ;;  %v3396_v5 = vmax.f32 %v14689_v42, 0.0 }
 0x40e   : > { %17915 = vst [vmem:[#allocation41_spill] sm:$0xff] %v14739_v8  ;;  %v14744_v55 = vmax.f32 %v3728_v32, %v3729_v4  ;;  %v14746_v31 = vmax.f32 %v3784_v28, %v3785_v14  ;;  %v14748_v6 = vmax.f32 %v3840_v50, %v3841_v60  ;;  %v3140_v48 = vadd.f32 %v14701_v27, %v14599_v19 }
 0x40f   : > { %v3449_v62 = vmax.f32 %v3447_v11, %v3448_v52  ;;  %v11496_v63 = vadd.f32 %v11495_v10, %v14703_v40  ;;  %v11499_v53 = vadd.f32 %v11498_v38, %v11497_v30  ;;  %v3940_v35 = vsel %vm1031_vm3, %v14707_v51, %v3837_v36  ;;  %v11503_v13 = vpop.f32.mrb[116].mxu0 }
 0x410   : > { %v3506_v57 = vmax.f32 %v3504_v47, %v3505_v3  ;;  %v14755_v20 = vmax.f32 %v3561_v41, %v3562_v9  ;;  %v3301_v42 = vadd.f32 %v14384_v37, %v3140_v48  ;;  %v14758_v56 = vpack.c.bf16 %v3940_v35, %v3940_v35  ;;  %v11504_v16 = vpop.f32.mrb[117].mxu0 }
 0x411   : > { %v3143_v26 = vadd.f32 %v11496_v63, %v14603_v44  ;;  %v3148_v19 = vadd.f32 %v11499_v53, %v14607_v18  ;;  %v11502_v27 = vadd.f32 %v11501_v25, %v11500_v34  ;;  %v11505_v49 = vadd.f32 %v11504_v16, %v11503_v13  ;;  %v11506_v40 = vpop.f32.mrb[118].mxu0  ;;  %v17916_v44 = vld [vmem:[#allocation26_spill] sm:$0xff] }
 0x412   : > { %v14762_v10 = vmax.f32 %v3618_v2, %v3619_v45  ;;  %v3675_v0 = vrot.slane %v3674_v61, 1  ;;  %v3731_v51 = vrot.slane %v14744_v55, 1  ;;  %v3397_v1 = vmax.f32 %v3301_v42, 0.0  ;;  %v11507_v30 = vpop.f32.mrb[119].mxu0  ;;  %v17917_v2 = vld [vmem:[#allocation13_spill] sm:$0xff] }
 0x413   : > { %v3304_v24 = vadd.f32 %v14390_v7, %v3143_v26  ;;  %v14767_v37 = vadd.f32 %v14416_v43, %v3148_v19  ;;  %v3151_v32 = vadd.f32 %v11502_v27, %v14612_v17  ;;  %v3156_v28 = vadd.f32 %v11505_v49, %v17916_v44  ;;  %v17918_v43 = vld [vmem:[#allocation11_spill] sm:$0xff] }
 0x414   : > { %v3787_v18 = vrot.slane %v14746_v31, 1  ;;  %v3423_v50 = vmax.f32 %v3395_v23, %v3397_v1  ;;  %v4030_v38 = vshrl.u32 %v14758_v56, 16  ;;  %v14773_v11 = vadd.f32 %v11507_v30, %v11506_v40 }
 0x415   : > { %v14776_v47 = vsel %vm744_vm0, %v3449_v62, %v3506_v57  ;;  %v3398_v41 = vmax.f32 %v3304_v24, 0.0  ;;  %v14779_v7 = vadd.f32 %v17917_v2, %v3151_v32  ;;  %v14782_v34 = vadd.f32 %v17918_v43, %v3156_v28  ;;  %v12155_v24 = vld [vmem:[%s17817_s5 + $0x40] sm:$0xff]  }
 0x416   : > { %v3450_v17 = vsel %vm3435_vm4, %v3423_v50, -inf  ;;  %v3507_v12 = vsel %vm3492_vm8, %v3423_v50, -inf  ;;  %v3564_v4 = vsel %vm3549_vm9, %v3423_v50, -inf  ;;  %v3621_v14 = vsel %vm3606_vm10, %v3423_v50, -inf  ;;  %v12156_v32 = vld [vmem:[%s17817_s5] sm:$0xff]   ;;  %11577 = vmatprep.subr.bf16.mxu0 %v12155_v24 }
 0x417   : > { %v3451_v60 = vrot.slane %v3450_v17, 4  ;;  %v3508_v25 = vrot.slane %v3507_v12, 4  ;;  %v3565_v52 = vrot.slane %v3564_v4, 4  ;;  %v3622_v3 = vrot.slane %v3621_v14, 4  ;;  %v14788_v9 = vpop.f32.mrb[120].mxu0  ;;  %11578 = vmatpush3.bf16.msra.mxu0 %v12156_v32 }
 0x418   : > { %v14790_v36 = vmax.f32 %v3674_v61, %v3675_v0  ;;  %v3424_v45 = vmax.f32 %v3396_v5, %v3398_v41  ;;  %v4032_v23 = vrot.slane %v4030_v38, 7  ;;  %v4033_v48 = vshll.u32 %v14758_v56, 16  ;;  %v14793_v62 = vpop.f32.mrb[121].mxu0 }
 0x419   : > { %v3452_v63 = vmax.f32 %v3450_v17, %v3451_v60  ;;  %v3509_v53 = vmax.f32 %v3507_v12, %v3508_v25  ;;  %v3566_v35 = vmax.f32 %v3564_v4, %v3565_v52  ;;  %v3623_v13 = vmax.f32 %v3621_v14, %v3622_v3  ;;  %v14795_v57 = vpop.f32.mrb[122].mxu0 }
 0x41a   : > { %v3677_v42 = vsel %vm3435_vm4, %v3424_v45, -inf  ;;  %v3733_v16 = vsel %vm3492_vm8, %v3424_v45, -inf  ;;  %v3789_v26 = vsel %vm3549_vm9, %v3424_v45, -inf  ;;  %v3845_v61 = vsel %vm3606_vm10, %v3424_v45, -inf  ;;  %v14801_v5 = vpop.f32.mrb[123].mxu0 }
 0x41b   : > { %v3453_v19 = vrot.slane %v3452_v63, 2  ;;  %v3510_v56 = vrot.slane %v3509_v53, 2  ;;  %v3567_v27 = vrot.slane %v3566_v35, 2  ;;  %v3624_v49 = vrot.slane %v3623_v13, 2 }
 0x41c   : > { %v3678_v40 = vrot.slane %v3677_v42, 4  ;;  %v3734_v0 = vrot.slane %v3733_v16, 4  ;;  %v3790_v1 = vrot.slane %v3789_v26, 4  ;;  %v3846_v30 = vrot.slane %v3845_v61, 4 }
 0x41d   : > { %v3454_v44 = vmax.f32 %v3452_v63, %v3453_v19  ;;  %v3511_v28 = vmax.f32 %v3509_v53, %v3510_v56  ;;  %v3568_v50 = vmax.f32 %v3566_v35, %v3567_v27  ;;  %v3625_v38 = vmax.f32 %v3623_v13, %v3624_v49  ;;  %v17922_v27 = vld [vmem:[#allocation27_spill] sm:$0xff]  ;;  %v12242_v35 = vld [vmem:[%s17819_s7 + $0x120] sm:$0xff]  }
 0x41e   : > { %v3679_v41 = vmax.f32 %v3677_v42, %v3678_v40  ;;  %v3735_v2 = vmax.f32 %v3733_v16, %v3734_v0  ;;  %v3791_v43 = vmax.f32 %v3789_v26, %v3790_v1  ;;  %v3847_v17 = vmax.f32 %v3845_v61, %v3846_v30 }
 0x41f   : > { %v3455_v12 = vrot.slane %v3454_v44, 1  ;;  %v3512_v4 = vrot.slane %v3511_v28, 1  ;;  %v4035_v14 = vor.u32 %v4033_v48, %v4032_v23  ;;  %v3401_v60 = vmax.f32 %v14782_v34, 0.0  ;;  %v14810_v25 = vpop.f32.mrb[124].mxu0 }
 0x420   : > { %v14815_v52 = vmax.f32 %v14744_v55, %v3731_v51  ;;  %v3569_v3 = vrot.slane %v3568_v50, 1  ;;  %v3626_v45 = vrot.slane %v3625_v38, 1  ;;  %v3680_v63 = vrot.slane %v3679_v41, 2  ;;  %v14817_v53 = vpop.f32.mrb[125].mxu0 }
 0x421   : > { %v3399_v34 = vmax.f32 %v14767_v37, 0.0  ;;  %v3400_v23 = vmax.f32 %v14779_v7, 0.0  ;;  %v14830_v55 = vmax.f32 %v14746_v31, %v3787_v18  ;;  %v14833_v48 = vpop.f32.mrb[126].mxu0  ;;  %v14835_v13 = vmax.f32 %v3454_v44, %v3455_v12  ;;  %v12157_v37 = vld [vmem:[%s17817_s5 + $0x48] sm:$0xff]  }
 0x422   : > { %v3736_v42 = vrot.slane %v3735_v2, 2  ;;  %v3792_v16 = vrot.slane %v3791_v43, 2  ;;  %v3848_v26 = vrot.slane %v3847_v17, 2  ;;  %v14837_v61 = vpop.f32.mrb[127].mxu0  ;;  %v12158_v31 = vld [vmem:[%s17817_s5 + $0x8] sm:$0xff]   ;;  %v3513_v18 = vmax.f32 %v3511_v28, %v3512_v4  ;;  %11579 = vmatprep.subr.bf16.mxu0 %v12157_v37 }
 0x423   : > { %v4093_v19 = vsel %vm13173_vm2, 0, %v4035_v14  ;;  %v3425_v56 = vmax.f32 %v3399_v34, %v3401_v60  ;;  %v3159_v49 = vadd.f32 %v14773_v11, %v17922_v27  ;;  %v14849_v40 = vmax.f32 %v3568_v50, %v3569_v3  ;;  %11580 = vmatpush3.bf16.msra.mxu0 %v12158_v31  ;;  %v17924_v14 = vld [vmem:[#allocation12_spill] sm:$0xff]  ;;  %v17926_v27 = vld [vmem:[#allocation9_spill] sm:$0xff] }
 0x424   : > { %v14851_v0 = vmax.f32 %v3625_v38, %v3626_v45  ;;  %v3681_v1 = vmax.f32 %v3679_v41, %v3680_v63  ;;  %v14855_v30 = vsel %vm14821_vm15, %v4093_v19, 0  ;;  %v3737_v28 = vmax.f32 %v3735_v2, %v3736_v42  ;;  %v17925_v19 = vld [vmem:[#allocation28_spill] sm:$0xff] }
 0x425   : > { %17923 = vst [vmem:[#allocation26_spill] sm:$0xff] %v14855_v30  ;;  %4192 = vrot.lane.b32.xlu1 %v14855_v30, %s17882_s18  ;;  %v3457_v24 = vsel %vm3435_vm4, %v3425_v56, -inf  ;;  %v3514_v32 = vsel %vm3492_vm8, %v3425_v56, -inf  ;;  %v3571_v44 = vsel %vm3549_vm9, %v3425_v56, -inf  ;;  %v3628_v11 = vsel %vm3606_vm10, %v3425_v56, -inf }
 0x426   : > { %v14863_v50 = vmax.f32 %v3791_v43, %v3792_v16  ;;  %v3458_v38 = vrot.slane %v3457_v24, 4  ;;  %v3515_v41 = vrot.slane %v3514_v32, 4  ;;  %v3572_v12 = vrot.slane %v3571_v44, 4 }
 0x427   : > { %v3629_v4 = vrot.slane %v3628_v11, 4  ;;  %v3320_v60 = vadd.f32 %v17924_v14, %v3159_v49  ;;  %v11511_v3 = vadd.f32 %v14793_v62, %v14788_v9  ;;  %v14868_v45 = vpop.f32.mrb[128].mxu0  ;;  %v14870_v63 = vmax.f32 %v3847_v17, %v3848_v26 }
 0x428   : > { %v3459_v34 = vmax.f32 %v3457_v24, %v3458_v38  ;;  %v3516_v37 = vmax.f32 %v3514_v32, %v3515_v41  ;;  %v3898_v2 = vsel %vm3896_vm11, %v14776_v47, %v14755_v20  ;;  %v14875_v43 = vpop.f32.mrb[129].mxu0  ;;  %v3573_v42 = vmax.f32 %v3571_v44, %v3572_v12  ;;  %v17927_v44 = vld [vmem:[#allocation15_spill] sm:$0xff] }
 0x429   : > { %v3630_v16 = vmax.f32 %v3628_v11, %v3629_v4  ;;  %v3402_v31 = vmax.f32 %v3320_v60, 0.0  ;;  %v3164_v56 = vadd.f32 %v11511_v3, %v17925_v19  ;;  %4161 = vrot.lane.b32.xlu1 %v17926_v27, %s17882_s18  ;;  %v14880_v9 = vpop.f32.mrb[130].mxu0  ;;  %v3907_v26 = vsel %vm3905_vm12, %v3898_v2, %v14762_v10  ;;  %v17928_v4 = vld [vmem:[#allocation29_spill] sm:$0xff]  ;;  %v12161_v27 = vld [vmem:[%s17817_s5 + $0x58] sm:$0xff]  }
 0x42a   : > { %v3460_v62 = vrot.slane %v3459_v34, 2  ;;  %v3517_v17 = vrot.slane %v3516_v37, 2  ;;  %v11514_v20 = vadd.f32 %v14801_v5, %v14795_v57  ;;  %v14886_v47 = vpop.f32.mrb[131].mxu0  ;;  %v3574_v49 = vrot.slane %v3573_v42, 2 }
 0x42b   : > { %v3631_v24 = vrot.slane %v3630_v16, 2  ;;  %v3426_v32 = vmax.f32 %v3400_v23, %v3402_v31  ;;  %v14889_v11 = vadd.f32 %v17927_v44, %v3164_v56  ;;  %v3682_v38 = vrot.slane %v3681_v1, 1 }
 0x42c   : > { %v3461_v41 = vmax.f32 %v3459_v34, %v3460_v62  ;;  %v3916_v12 = vsel %vm3914_vm13, %v3907_v26, %v14790_v36  ;;  %v3167_v14 = vadd.f32 %v11514_v20, %v17928_v4  ;;  %v3518_v60 = vmax.f32 %v3516_v37, %v3517_v17 }
 0x42d   : > { %v3575_v10 = vmax.f32 %v3573_v42, %v3574_v49  ;;  %v3684_v3 = vsel %vm3435_vm4, %v3426_v32, -inf  ;;  %v3740_v57 = vsel %vm3492_vm8, %v3426_v32, -inf  ;;  %v3738_v5 = vrot.slane %v3737_v28, 1 }
 0x42e   : > { %v3632_v2 = vmax.f32 %v3630_v16, %v3631_v24  ;;  %v3685_v19 = vrot.slane %v3684_v3, 4  ;;  %v3741_v23 = vrot.slane %v3740_v57, 4  ;;  %v14898_v31 = vsel %vm744_vm0, %v14835_v13, %v3513_v18 }
 0x42f   : > { %v3796_v36 = vsel %vm3549_vm9, %v3426_v32, -inf  ;;  %v3852_v56 = vsel %vm3606_vm10, %v3426_v32, -inf  ;;  %v14903_v37 = vpop.f32.mrb[132].mxu0  ;;  %v14905_v42 = vmax.f32 %v3681_v1, %v3682_v38  ;;  %v3462_v62 = vrot.slane %v3461_v41, 1  ;;  %v12159_v1 = vld [vmem:[%s17817_s5 + $0x50] sm:$0xff]  }
 0x430   : > { %v3686_v17 = vmax.f32 %v3684_v3, %v3685_v19  ;;  %v3742_v26 = vmax.f32 %v3740_v57, %v3741_v23  ;;  %v14907_v16 = vpop.f32.mrb[133].mxu0  ;;  %v3519_v20 = vrot.slane %v3518_v60, 1  ;;  %v3576_v49 = vrot.slane %v3575_v10, 1  ;;  %v12160_v38 = vld [vmem:[%s17817_s5 + $0x10] sm:$0xff]   ;;  %v17930_v19 = vld [vmem:[#allocation17_spill] sm:$0xff]  ;;  %11581 = vmatprep.subr.bf16.mxu0 %v12159_v1 }
 0x431   : > { %v3797_v24 = vrot.slane %v3796_v36, 4  ;;  %v3853_v13 = vrot.slane %v3852_v56, 4  ;;  %v14909_v18 = vpop.f32.mrb[134].mxu0  ;;  %v14911_v44 = vmax.f32 %v3737_v28, %v3738_v5  ;;  %v3633_v4 = vrot.slane %v3632_v2, 1  ;;  %11582 = vmatpush3.bf16.msra.mxu0 %v12160_v38  ;;  %v17931_v1 = vld [vmem:[#allocation30_spill] sm:$0xff] }
 0x432   : > { %v3687_v34 = vrot.slane %v3686_v17, 2  ;;  %v3743_v32 = vrot.slane %v3742_v26, 2  ;;  %v14913_v51 = vpop.f32.mrb[135].mxu0  ;;  %v17929_v57 = vrot.slane %v14748_v6, 1  ;;  %v3924_v5 = vsel %vm1634_vm5, %v3916_v12, %v14815_v52  ;;  %11583 = vmatprep.subr.bf16.mxu0 %v12161_v27 }
 0x433   : > { %v14921_v3 = vmax.f32 %v3796_v36, %v3797_v24  ;;  %v14929_v23 = vadd.f32 %v17930_v19, %v3167_v14  ;;  %v14934_v33 = vmax.f32 %v3461_v41, %v3462_v62  ;;  %v14938_v36 = vmax.f32 %v3852_v56, %v3853_v13 }
 0x434   : > { %v3844_v28 = vmax.f32 %v14748_v6, %v17929_v57  ;;  %v14936_v8 = vmax.f32 %v3686_v17, %v3687_v34  ;;  %v3932_v24 = vsel %vm1635_vm6, %v3924_v5, %v14830_v55  ;;  %v14942_v6 = vmax.f32 %v3518_v60, %v3519_v20  ;;  %v12162_v55 = vld [vmem:[%s17817_s5 + $0x18] sm:$0xff]   ;;  %v12163_v60 = vld [vmem:[%s17817_s5 + $0x60] sm:$0xff]  }
 0x435   : > { %v14944_v52 = vmax.f32 %v3575_v10, %v3576_v49  ;;  %v14946_v12 = vmax.f32 %v3742_v26, %v3743_v32  ;;  %v14949_v57 = vmax.f32 %v3632_v2, %v3633_v4  ;;  %v3403_v41 = vmax.f32 %v14889_v11, 0.0  ;;  %11584 = vmatpush3.bf16.msra.mxu0 %v12162_v55 }
 0x436   : > { %v3941_v14 = vsel %vm1031_vm3, %v3932_v24, %v3844_v28  ;;  %v4115_v56 = vshll.u32 %v14855_v30, 16  ;;  %v3799_v10 = vrot.slane %v14921_v3, 2  ;;  %v4113_v62 = vshrl.u32 %v14855_v30, 16  ;;  %11585 = vmatprep.subr.bf16.mxu0 %v12163_v60  ;;  %v12164_v24 = vld [vmem:[%s17817_s5 + $0x20] sm:$0xff]  }
 0x437   : > { %v4022_v34 = vpack.c.bf16 %v3941_v14, %v3941_v14  ;;  %v11517_v2 = vadd.f32 %v14817_v53, %v14810_v25  ;;  %v11520_v11 = vadd.f32 %v14837_v61, %v14833_v48  ;;  %v14965_v17 = vpop.f32.mrb[136].mxu0  ;;  %v3404_v49 = vmax.f32 %v14929_v23, 0.0  ;;  %v17932_v25 = vld [vmem:[#allocation31_spill] sm:$0xff]  ;;  %v12165_v14 = vld [vmem:[%s17817_s5 + $0x68] sm:$0xff]  }
 0x438   : > { %v14970_v13 = vpop.f32.mrb[137].mxu0  ;;  %v4117_v61 = vrot.slane %v4115_v56, 1  ;;  %v11523_v5 = vadd.f32 %v14875_v43, %v14868_v45  ;;  %v3850_v19 = vrot.slane %v14870_v63, 1  ;;  %v3899_v43 = vsel %vm3896_vm11, %v14898_v31, %v14849_v40  ;;  %v12166_v40 = vld [vmem:[%s17817_s5 + $0x28] sm:$0xff]  }
 0x439   : > { %v4037_v20 = vshrl.u32 %v4022_v34, 16  ;;  %v4040_v32 = vshll.u32 %v4022_v34, 16  ;;  %v3172_v38 = vadd.f32 %v11517_v2, %v17931_v1  ;;  %v3175_v53 = vadd.f32 %v11520_v11, %v17932_v25  ;;  %v14975_v28 = vpop.f32.mrb[138].mxu0  ;;  %v17933_v34 = vld [vmem:[#allocation14_spill] sm:$0xff]  ;;  %v17934_v2 = vld [vmem:[#allocation16_spill] sm:$0xff]  ;;  %11586 = vmatpush3.bf16.msra.mxu0 %v12164_v24  ;;  %v17939_v24 = vld [vmem:[#allocation33_spill] sm:$0xff] }
 0x43a   : > { %v14980_v23 = vpop.f32.mrb[139].mxu0  ;;  %v17935_v11 = vrot.slane %v14863_v50, 1  ;;  %v3851_v25 = vmax.f32 %v14870_v63, %v3850_v19  ;;  %v3908_v4 = vsel %vm3905_vm12, %v3899_v43, %v14851_v0  ;;  %v17937_v63 = vld [vmem:[#allocation19_spill] sm:$0xff]  ;;  %11587 = vmatprep.subr.bf16.mxu0 %v12165_v14 }
 0x43b   : > { %v4039_v48 = vrot.slane %v4037_v20, 7  ;;  %v3333_v55 = vadd.f32 %v17933_v34, %v3172_v38  ;;  %v3336_v56 = vadd.f32 %v17934_v2, %v3175_v53  ;;  %v17936_v20 = vld [vmem:[#allocation32_spill] sm:$0xff]  ;;  %v3917_v53 = vsel %vm3914_vm13, %v3908_v4, %v14905_v42 }
 0x43c   : > { %v3795_v45 = vmax.f32 %v14863_v50, %v17935_v11  ;;  %v3180_v1 = vadd.f32 %v11523_v5, %v17936_v20  ;;  %v11526_v50 = vadd.f32 %v14886_v47, %v14880_v9  ;;  %v3925_v0 = vsel %vm1634_vm5, %v3917_v53, %v14911_v44  ;;  %v12167_v9 = vld [vmem:[%s17817_s5 + $0x70] sm:$0xff]  }
 0x43d   : > { %v4042_v60 = vor.u32 %v4040_v32, %v4039_v48  ;;  %v3405_v26 = vmax.f32 %v3333_v55, 0.0  ;;  %v3406_v38 = vmax.f32 %v3336_v56, 0.0  ;;  %v15016_v42 = vadd.f32 %v14907_v16, %v14903_v37  ;;  %11588 = vmatpush3.bf16.msra.mxu0 %v12166_v40 }
 0x43e   : > { %v15010_v32 = vadd.f32 %v17937_v63, %v3180_v1  ;;  %v3933_v5 = vsel %vm1635_vm6, %v3925_v0, %v3795_v45  ;;  %v15029_v44 = vmax.f32 %v14921_v3, %v3799_v10  ;;  %v15033_v37 = vor.u32 %v4117_v61, %v4113_v62  ;;  %v12168_v62 = vld [vmem:[%s17817_s5 + $0x30] sm:$0xff]   ;;  %11589 = vmatprep.subr.bf16.mxu0 %v12167_v9  ;;  %v12169_v45 = vld [vmem:[%s17817_s5 + $0x78] sm:$0xff]  }
 0x43f   : > { %v4094_v31 = vsel %vm13173_vm2, 0, %v4042_v60  ;;  %v3427_v4 = vmax.f32 %v3403_v41, %v3405_v26  ;;  %v3428_v48 = vmax.f32 %v3404_v49, %v3406_v38  ;;  %v15026_v19 = vpop.f32.mrb[140].mxu0  ;;  %v15036_v16 = vsel %vm1031_vm3, %v3933_v5, %v3851_v25  ;;  %v12170_v9 = vld [vmem:[%s17817_s5 + $0x38] sm:$0xff]  }
 0x440   : > { %v15023_v47 = vsel %vm14821_vm15, %v4094_v31, 0  ;;  %17938 = vst [vmem:[#allocation13_spill] sm:$0xff] %v15033_v37  ;;  %v15039_v14 = vadd.f32 %v11526_v50, %v17939_v24  ;;  %v15041_v41 = vpop.f32.mrb[141].mxu0 }
 0x441   : > { %4194 = vrot.lane.b32.xlu0 %v15023_v47, %s17882_s18  ;;  %v3464_v26 = vsel %vm3435_vm4, %v3427_v4, -inf  ;;  %v3521_v49 = vsel %vm3492_vm8, %v3427_v4, -inf  ;;  %v3578_v3 = vsel %vm3549_vm9, %v3427_v4, -inf  ;;  %v3635_v10 = vsel %vm3606_vm10, %v3427_v4, -inf  ;;  %v15047_v34 = vpop.f32.mrb[142].mxu0  ;;  %11590 = vmatpush3.bf16.msra.mxu0 %v12168_v62 }
 0x442   : > { %v3465_v61 = vrot.slane %v3464_v26, 4  ;;  %v3522_v55 = vrot.slane %v3521_v49, 4  ;;  %v3579_v2 = vrot.slane %v3578_v3, 4  ;;  %v3636_v56 = vrot.slane %v3635_v10, 4  ;;  %v15052_v11 = vpop.f32.mrb[143].mxu0  ;;  %11591 = vmatprep.subr.bf16.mxu0 %v12169_v45 }
 0x443   : > { %v3691_v43 = vsel %vm3435_vm4, %v3428_v48, -inf  ;;  %v3747_v60 = vsel %vm3492_vm8, %v3428_v48, -inf  ;;  %v3803_v20 = vsel %vm3549_vm9, %v3428_v48, -inf  ;;  %v3859_v1 = vsel %vm3606_vm10, %v3428_v48, -inf }
 0x444   : > { %v3466_v25 = vmax.f32 %v3464_v26, %v3465_v61  ;;  %v3523_v38 = vmax.f32 %v3521_v49, %v3522_v55  ;;  %v3580_v53 = vmax.f32 %v3578_v3, %v3579_v2  ;;  %v3637_v50 = vmax.f32 %v3635_v10, %v3636_v56 }
 0x445   : > { %4163 = vrot.lane.b32.xlu0 %v15033_v37, %s17882_s18  ;;  %v3692_v40 = vrot.slane %v3691_v43, 4  ;;  %v3748_v31 = vrot.slane %v3747_v60, 4  ;;  %v3804_v63 = vrot.slane %v3803_v20, 4  ;;  %v3860_v0 = vrot.slane %v3859_v1, 4  ;;  %11592 = vmatpush3.bf16.msra.mxu0 %v12170_v9 }
 0x446   : > { %v3467_v4 = vrot.slane %v3466_v25, 2  ;;  %v3524_v5 = vrot.slane %v3523_v38, 2  ;;  %v3581_v24 = vrot.slane %v3580_v53, 2  ;;  %v3638_v48 = vrot.slane %v3637_v50, 2 }
 0x447   : > { %v3693_v27 = vmax.f32 %v3691_v43, %v3692_v40  ;;  %v3749_v37 = vmax.f32 %v3747_v60, %v3748_v31  ;;  %v3805_v26 = vmax.f32 %v3803_v20, %v3804_v63  ;;  %v3861_v49 = vmax.f32 %v3859_v1, %v3860_v0  ;;  %v15066_v3 = vpop.f32.mrb[144].mxu0 }
 0x448   : > { %v3468_v10 = vmax.f32 %v3466_v25, %v3467_v4  ;;  %v3525_v61 = vmax.f32 %v3523_v38, %v3524_v5  ;;  %v3582_v55 = vmax.f32 %v3580_v53, %v3581_v24  ;;  %v3639_v2 = vmax.f32 %v3637_v50, %v3638_v48  ;;  %v15068_v62 = vpop.f32.mrb[145].mxu0  ;;  %v17943_v24 = vld [vmem:[#allocation21_spill] sm:$0xff] }
 0x449   : > { %v3694_v56 = vrot.slane %v3693_v27, 2  ;;  %v3750_v30 = vrot.slane %v3749_v37, 2  ;;  %v3806_v39 = vrot.slane %v3805_v26, 2  ;;  %v3862_v54 = vrot.slane %v3861_v49, 2  ;;  %v15070_v22 = vpop.f32.mrb[146].mxu0 }
 0x44a   : > { %v3891_v45 = vsel %vm744_vm0, %v14934_v33, %v14942_v6  ;;  %v17940_v43 = vrot.slane %v14936_v8, 1  ;;  %v17941_v20 = vrot.slane %v14938_v36, 2  ;;  %v3469_v25 = vrot.slane %v3468_v10, 1  ;;  %v15081_v38 = vpop.f32.mrb[147].mxu0 }
 0x44b   : > { %v17942_v53 = vrot.slane %v14946_v12, 1  ;;  %v3526_v40 = vrot.slane %v3525_v61, 1  ;;  %v3583_v31 = vrot.slane %v3582_v55, 1  ;;  %v3640_v63 = vrot.slane %v3639_v2, 1 }
 0x44c   : > { %v3690_v60 = vmax.f32 %v14936_v8, %v17940_v43  ;;  %v3856_v1 = vmax.f32 %v14938_v36, %v17941_v20  ;;  %v3801_v33 = vrot.slane %v15029_v44, 1  ;;  %v15087_v6 = vmax.f32 %v3693_v27, %v3694_v56  ;;  %v17944_v56 = vld [vmem:[#allocation34_spill] sm:$0xff] }
 0x44d   : > { %v3746_v50 = vmax.f32 %v14946_v12, %v17942_v53  ;;  %v3407_v8 = vmax.f32 %v15010_v32, 0.0  ;;  %v4120_v0 = vshrl.u32 %v15023_v47, 16  ;;  %v15091_v9 = vmax.f32 %v3749_v37, %v3750_v30 }
 0x44e   : > { %v15093_v36 = vmax.f32 %v3805_v26, %v3806_v39  ;;  %v15095_v4 = vmax.f32 %v3861_v49, %v3862_v54  ;;  %v4023_v12 = vpack.c.bf16 %v15036_v16, %v15036_v16  ;;  %v15099_v5 = vmax.f32 %v3468_v10, %v3469_v25  ;;  %v17945_v49 = vld [vmem:[#allocation18_spill] sm:$0xff] }
 0x44f   : > { %v3344_v48 = vadd.f32 %v17943_v24, %v15039_v14  ;;  %v4122_v27 = vshll.u32 %v15023_v47, 16  ;;  %v3188_v32 = vadd.f32 %v15016_v42, %v17944_v56  ;;  %v15106_v43 = vmax.f32 %v3525_v61, %v3526_v40  ;;  %v15112_v37 = vpop.f32.mrb[148].mxu0  ;;  %v17946_v40 = vld [vmem:[#allocation35_spill] sm:$0xff]  ;;  %v17948_v56 = vld [vmem:[#allocation20_spill] sm:$0xff] }
 0x450   : > { %v15108_v30 = vmax.f32 %v3582_v55, %v3583_v31  ;;  %v15110_v39 = vmax.f32 %v3639_v2, %v3640_v63  ;;  %v4044_v54 = vshrl.u32 %v4023_v12, 16  ;;  %v4047_v16 = vshll.u32 %v4023_v12, 16  ;;  %v15117_v20 = vpop.f32.mrb[149].mxu0 }
 0x451   : > { %v3408_v26 = vmax.f32 %v3344_v48, 0.0  ;;  %v3349_v10 = vadd.f32 %v17945_v49, %v3188_v32  ;;  %v11532_v14 = vadd.f32 %v14913_v51, %v14909_v18  ;;  %v4124_v42 = vrot.slane %v4122_v27, 1  ;;  %v15121_v2 = vpop.f32.mrb[150].mxu0  ;;  %v17947_v18 = vld [vmem:[#allocation36_spill] sm:$0xff] }
 0x452   : > { %v4046_v25 = vrot.slane %v4044_v54, 7  ;;  %v11535_v61 = vadd.f32 %v14970_v13, %v14965_v17  ;;  %v3857_v55 = vrot.slane %v3856_v1, 1  ;;  %v3802_v63 = vmax.f32 %v15029_v44, %v3801_v33  ;;  %v15127_v24 = vpop.f32.mrb[151].mxu0 }
 0x453   : > { %v3409_v53 = vmax.f32 %v3349_v10, 0.0  ;;  %v3191_v31 = vadd.f32 %v11532_v14, %v17946_v40  ;;  %v3900_v12 = vsel %vm3896_vm11, %v3891_v45, %v14944_v52  ;;  %v11538_v44 = vadd.f32 %v14980_v23, %v14975_v28  ;;  %v17949_v45 = vld [vmem:[#allocation23_spill] sm:$0xff] }
 0x454   : > { %v4049_v51 = vor.u32 %v4047_v16, %v4046_v25  ;;  %v3196_v48 = vadd.f32 %v11535_v61, %v17947_v18  ;;  %v3858_v27 = vmax.f32 %v3856_v1, %v3857_v55  ;;  %v3909_v17 = vsel %vm3905_vm12, %v3900_v12, %v14949_v57 }
 0x455   : > { %v3429_v13 = vmax.f32 %v3407_v8, %v3409_v53  ;;  %v3352_v32 = vadd.f32 %v17948_v56, %v3191_v31  ;;  %v3918_v54 = vsel %vm3914_vm13, %v3909_v17, %v3690_v60  ;;  %v15144_v1 = vadd.f32 %v15041_v41, %v15026_v19 }
 0x456   : > { %v4095_v52 = vsel %vm13173_vm2, 0, %v4049_v51  ;;  %v15139_v33 = vadd.f32 %v17949_v45, %v3196_v48  ;;  %v3926_v16 = vsel %vm1634_vm5, %v3918_v54, %v3746_v50  ;;  %v15156_v19 = vor.u32 %v4124_v42, %v4120_v0 }
 0x457   : > { %v15148_v57 = vsel %vm14821_vm15, %v4095_v52, 0  ;;  %v3471_v60 = vsel %vm3435_vm4, %v3429_v13, -inf  ;;  %v3528_v28 = vsel %vm3492_vm8, %v3429_v13, -inf  ;;  %v3585_v23 = vsel %vm3549_vm9, %v3429_v13, -inf }
 0x458   : > { %4196 = vrot.lane.b32.xlu1 %v15148_v57, %s17882_s18  ;;  %v3472_v8 = vrot.slane %v3471_v60, 4  ;;  %v3529_v49 = vrot.slane %v3528_v28, 4  ;;  %v3586_v50 = vrot.slane %v3585_v23, 4  ;;  %v3642_v10 = vsel %vm3606_vm10, %v3429_v13, -inf }
 0x459   : > { %v3643_v41 = vrot.slane %v3642_v10, 4  ;;  %v3410_v14 = vmax.f32 %v3352_v32, 0.0  ;;  %v3934_v25 = vsel %vm1635_vm6, %v3926_v16, %v3802_v63  ;;  %v3696_v31 = vrot.slane %v15087_v6, 1 }
 0x45a   : > { %v3473_v61 = vmax.f32 %v3471_v60, %v3472_v8  ;;  %v3530_v55 = vmax.f32 %v3528_v28, %v3529_v49  ;;  %v3587_v53 = vmax.f32 %v3585_v23, %v3586_v50  ;;  %v3943_v40 = vsel %vm1031_vm3, %v3934_v25, %v3858_v27 }
 0x45b   : > { %v3644_v12 = vmax.f32 %v3642_v10, %v3643_v41  ;;  %v3430_v51 = vmax.f32 %v3408_v26, %v3410_v14  ;;  %v3199_v18 = vadd.f32 %v11538_v44, %v14669_v46  ;;  %v3752_v48 = vrot.slane %v15091_v9, 1 }
 0x45c   : > { %4165 = vrot.lane.b32.xlu1 %v15156_v19, %s17882_s18  ;;  %v3474_v0 = vrot.slane %v3473_v61, 2  ;;  %v3531_v42 = vrot.slane %v3530_v55, 2  ;;  %v3588_v17 = vrot.slane %v3587_v53, 2  ;;  %v4024_v8 = vpack.c.bf16 %v3943_v40, %v3943_v40 }
 0x45d   : > { %v3645_v63 = vrot.slane %v3644_v12, 2  ;;  %v3698_v13 = vsel %vm3435_vm4, %v3430_v51, -inf  ;;  %v3754_v56 = vsel %vm3492_vm8, %v3430_v51, -inf  ;;  %v3810_v27 = vsel %vm3549_vm9, %v3430_v51, -inf }
 0x45e   : > { %v3475_v32 = vmax.f32 %v3473_v61, %v3474_v0  ;;  %v3532_v54 = vmax.f32 %v3530_v55, %v3531_v42  ;;  %v3589_v26 = vmax.f32 %v3587_v53, %v3588_v17  ;;  %v3699_v52 = vrot.slane %v3698_v13, 4 }
 0x45f   : > { %v3646_v46 = vmax.f32 %v3644_v12, %v3645_v63  ;;  %v3755_v44 = vrot.slane %v3754_v56, 4  ;;  %v3811_v45 = vrot.slane %v3810_v27, 4  ;;  %v3866_v16 = vsel %vm3606_vm10, %v3430_v51, -inf }
 0x460   : > { %v3476_v60 = vrot.slane %v3475_v32, 1  ;;  %v3533_v28 = vrot.slane %v3532_v54, 1  ;;  %v3700_v23 = vmax.f32 %v3698_v13, %v3699_v52  ;;  %v3808_v49 = vrot.slane %v15093_v36, 1 }
 0x461   : > { %v3756_v50 = vmax.f32 %v3754_v56, %v3755_v44  ;;  %v3812_v10 = vmax.f32 %v3810_v27, %v3811_v45  ;;  %v3867_v41 = vrot.slane %v3866_v16, 4  ;;  %v3892_v14 = vsel %vm744_vm0, %v15099_v5, %v15106_v43  ;;  %v17950_v5 = vld [vmem:[#allocation25_spill] sm:$0xff] }
 0x462   : > { %v3697_v25 = vmax.f32 %v15087_v6, %v3696_v31  ;;  %v15175_v61 = vmax.f32 %v15091_v9, %v3752_v48  ;;  %v3701_v55 = vrot.slane %v3700_v23, 2  ;;  %v3590_v53 = vrot.slane %v3589_v26, 1 }
 0x463   : > { %v3647_v12 = vrot.slane %v3646_v46, 1  ;;  %v3757_v51 = vrot.slane %v3756_v50, 2  ;;  %v3813_v0 = vrot.slane %v3812_v10, 2  ;;  %v3477_v40 = vmax.f32 %v3475_v32, %v3476_v60  ;;  %v12171_v32 = vld [vmem:[%s17817_s5 + $0xc0] sm:$0xff]   ;;  %v17951_v60 = vld [vmem:[#allocation22_spill] sm:$0xff] }
 0x464   : > { %v3534_v42 = vmax.f32 %v3532_v54, %v3533_v28  ;;  %v3868_v17 = vmax.f32 %v3866_v16, %v3867_v41  ;;  %v4051_v63 = vshrl.u32 %v4024_v8, 16  ;;  %v15177_v13 = vmax.f32 %v3700_v23, %v3701_v55  ;;  %v12172_v54 = vld [vmem:[%s17817_s5 + $0x80] sm:$0xff]   ;;  %11617 = vmatprep.subr.bf16.mxu1 %v12171_v32 }
 0x465   : > { %v15179_v56 = vmax.f32 %v3756_v50, %v3757_v51  ;;  %v4054_v27 = vshll.u32 %v4024_v8, 16  ;;  %v3360_v43 = vadd.f32 %v17950_v5, %v3199_v18  ;;  %v15182_v6 = vmax.f32 %v3812_v10, %v3813_v0  ;;  %11618 = vmatpush3.bf16.msra.mxu1 %v12172_v54 }
 0x466   : > { %v4053_v9 = vrot.slane %v4051_v63, 7  ;;  %v4129_v31 = vshll.u32 %v15148_v57, 16  ;;  %v3204_v48 = vadd.f32 %v15144_v1, %v14694_v15  ;;  %v15193_v52 = vmax.f32 %v3589_v26, %v3590_v53 }
 0x467   : > { %v15195_v44 = vmax.f32 %v3646_v46, %v3647_v12  ;;  %v3411_v18 = vmax.f32 %v15139_v33, 0.0  ;;  %v4127_v45 = vshrl.u32 %v15148_v57, 16  ;;  %v15200_v16 = vsel %vm744_vm0, %v3477_v40, %v3534_v42  ;;  %v17952_v40 = vld [vmem:[#allocation24_spill] sm:$0xff] }
 0x468   : > { %v3869_v15 = vrot.slane %v3868_v17, 2  ;;  %v4056_v1 = vor.u32 %v4054_v27, %v4053_v9  ;;  %v3365_v28 = vadd.f32 %v17951_v60, %v3204_v48  ;;  %v3703_v23 = vrot.slane %v15177_v13, 1 }
 0x469   : > { %v4131_v8 = vrot.slane %v4129_v31, 1  ;;  %v11544_v26 = vadd.f32 %v15052_v11, %v15047_v34  ;;  %v11547_v46 = vadd.f32 %v15068_v62, %v15066_v3  ;;  %v3759_v33 = vrot.slane %v15179_v56, 1 }
 0x46a   : > { %v3815_v50 = vrot.slane %v15182_v6, 1  ;;  %v4096_v10 = vsel %vm13173_vm2, 0, %v4056_v1  ;;  %v3413_v41 = vmax.f32 %v3365_v28, 0.0  ;;  %v3901_v34 = vsel %vm3896_vm11, %v3892_v14, %v15108_v30 }
 0x46b   : > { %v15214_v55 = vsel %vm14821_vm15, %v4096_v10, 0  ;;  %v3207_v53 = vadd.f32 %v11544_v26, %v14698_v58  ;;  %v15221_v11 = vadd.f32 %v15081_v38, %v15070_v22  ;;  %v15223_v3 = vmax.f32 %v3868_v17, %v3869_v15 }
 0x46c   : > { %4198 = vrot.lane.b32.xlu0 %v15214_v55, %s17882_s18  ;;  %v3431_v62 = vmax.f32 %v3411_v18, %v3413_v41  ;;  %v3910_v12 = vsel %vm3905_vm12, %v3901_v34, %v15110_v39  ;;  %v3212_v51 = vadd.f32 %v11547_v46, %v14727_v29  ;;  %v3412_v0 = vmax.f32 %v3360_v43, 0.0 }
 0x46d   : > { %v15230_v58 = vor.u32 %v4131_v8, %v4127_v45  ;;  %v3368_v30 = vadd.f32 %v17952_v40, %v3207_v53  ;;  %v3919_v14 = vsel %vm3914_vm13, %v3910_v12, %v3697_v25  ;;  %v3809_v25 = vmax.f32 %v15093_v36, %v3808_v49 }
 0x46e   : > { %v3478_v22 = vsel %vm3435_vm4, %v3431_v62, -inf  ;;  %v3535_v38 = vsel %vm3492_vm8, %v3431_v62, -inf  ;;  %v3592_v42 = vsel %vm3549_vm9, %v3431_v62, -inf  ;;  %v3649_v17 = vsel %vm3606_vm10, %v3431_v62, -inf }
 0x46f   : > { %v3479_v63 = vrot.slane %v3478_v22, 4  ;;  %v3536_v27 = vrot.slane %v3535_v38, 4  ;;  %v3593_v39 = vrot.slane %v3592_v42, 4  ;;  %v3650_v5 = vrot.slane %v3649_v17, 4 }
 0x470   : > { %4167 = vrot.lane.b32.xlu0 %v15230_v58, %s17882_s18  ;;  %v3414_v29 = vmax.f32 %v3368_v30, 0.0  ;;  %v3927_v43 = vsel %vm1634_vm5, %v3919_v14, %v15175_v61  ;;  %v15246_v9 = vadd.f32 %v14719_v21, %v3212_v51  ;;  %v3864_v45 = vrot.slane %v15095_v4, 1 }
 0x471   : > { %v3480_v31 = vmax.f32 %v3478_v22, %v3479_v63  ;;  %v3537_v48 = vmax.f32 %v3535_v38, %v3536_v27  ;;  %v3594_v32 = vmax.f32 %v3592_v42, %v3593_v39  ;;  %v3651_v54 = vmax.f32 %v3649_v17, %v3650_v5 }
 0x472   : > { %v3432_v18 = vmax.f32 %v3412_v0, %v3414_v29  ;;  %v3935_v15 = vsel %vm1635_vm6, %v3927_v43, %v3809_v25  ;;  %v4136_v1 = vshll.u32 %v15214_v55, 16  ;;  %v3704_v0 = vmax.f32 %v15177_v13, %v3703_v23  ;;  %v12173_v13 = vld [vmem:[%s17817_s5 + $0xc8] sm:$0xff]  }
 0x473   : > { %v3481_v60 = vrot.slane %v3480_v31, 2  ;;  %v3538_v28 = vrot.slane %v3537_v48, 2  ;;  %v3595_v36 = vrot.slane %v3594_v32, 2  ;;  %v3652_v49 = vrot.slane %v3651_v54, 2  ;;  %11619 = vmatprep.subr.bf16.mxu1 %v12173_v13 }
 0x474   : > { %v3705_v61 = vsel %vm3435_vm4, %v3432_v18, -inf  ;;  %v3761_v21 = vsel %vm3492_vm8, %v3432_v18, -inf  ;;  %v3817_v8 = vsel %vm3549_vm9, %v3432_v18, -inf  ;;  %v3873_v26 = vsel %vm3606_vm10, %v3432_v18, -inf }
 0x475   : > { %v3482_v46 = vmax.f32 %v3480_v31, %v3481_v60  ;;  %v3539_v10 = vmax.f32 %v3537_v48, %v3538_v28  ;;  %v3596_v41 = vmax.f32 %v3594_v32, %v3595_v36  ;;  %v3653_v53 = vmax.f32 %v3651_v54, %v3652_v49  ;;  %v17953_v60 = vld [vmem:[#allocation39_spill] sm:$0xff]  ;;  %v17954_v36 = vld [vmem:[#allocation40_spill] sm:$0xff] }
 0x476   : > { %v3706_v34 = vrot.slane %v3705_v61, 4  ;;  %v3762_v62 = vrot.slane %v3761_v21, 4  ;;  %v3818_v12 = vrot.slane %v3817_v8, 4  ;;  %v3874_v51 = vrot.slane %v3873_v26, 4 }
 0x477   : > { %v15257_v40 = vmax.f32 %v15179_v56, %v3759_v33  ;;  %v3483_v30 = vrot.slane %v3482_v46, 1  ;;  %v3540_v14 = vrot.slane %v3539_v10, 1  ;;  %v3597_v63 = vrot.slane %v3596_v41, 1  ;;  %v12174_v56 = vld [vmem:[%s17817_s5 + $0x88] sm:$0xff]  }
 0x478   : > { %v3707_v22 = vmax.f32 %v3705_v61, %v3706_v34  ;;  %v3763_v38 = vmax.f32 %v3761_v21, %v3762_v62  ;;  %v3819_v42 = vmax.f32 %v3817_v8, %v3818_v12  ;;  %v3875_v17 = vmax.f32 %v3873_v26, %v3874_v51  ;;  %11620 = vmatpush3.bf16.msra.mxu1 %v12174_v56  ;;  %v12175_v61 = vld [vmem:[%s17817_s5 + $0xd0] sm:$0xff]   ;;  %v17955_v26 = vld [vmem:[#allocation37_spill] sm:$0xff] }
 0x479   : > { %v3654_v27 = vrot.slane %v3653_v53, 1  ;;  %v3865_v39 = vmax.f32 %v15095_v4, %v3864_v45  ;;  %v4138_v5 = vrot.slane %v4136_v1, 1  ;;  %v3484_v29 = vmax.f32 %v3482_v46, %v3483_v30  ;;  %v12176_v21 = vld [vmem:[%s17817_s5 + $0x90] sm:$0xff]   ;;  %v17956_v34 = vld [vmem:[#allocation41_spill] sm:$0xff]  ;;  %11621 = vmatprep.subr.bf16.mxu1 %v12175_v61 }
 0x47a   : > { %v3708_v25 = vrot.slane %v3707_v22, 2  ;;  %v3764_v43 = vrot.slane %v3763_v38, 2  ;;  %v3820_v31 = vrot.slane %v3819_v42, 2  ;;  %v3541_v23 = vmax.f32 %v3539_v10, %v3540_v14 }
 0x47b   : > { %v3944_v33 = vsel %vm1031_vm3, %v3935_v15, %v3865_v39  ;;  %v3215_v48 = vadd.f32 %v15221_v11, %v14731_v59  ;;  %v11553_v4 = vadd.f32 %v15117_v20, %v15112_v37  ;;  %v3876_v18 = vrot.slane %v3875_v17, 2 }
 0x47c   : > { %v3709_v32 = vmax.f32 %v3707_v22, %v3708_v25  ;;  %v15271_v54 = vmax.f32 %v3763_v38, %v3764_v43  ;;  %v4134_v45 = vshrl.u32 %v15214_v55, 16  ;;  %v4025_v1 = vpack.c.bf16 %v3944_v33, %v3944_v33  ;;  %11622 = vmatpush3.bf16.msra.mxu1 %v12176_v21  ;;  %v17957_v22 = vld [vmem:[#allocation38_spill] sm:$0xff] }
 0x47d   : > { %v3376_v28 = vadd.f32 %v17953_v60, %v3215_v48  ;;  %v3220_v49 = vadd.f32 %v11553_v4, %v17954_v36  ;;  %v11556_v15 = vadd.f32 %v15127_v24, %v15121_v2  ;;  %v3598_v59 = vmax.f32 %v3596_v41, %v3597_v63 }
 0x47e   : > { %v15278_v11 = vmax.f32 %v3819_v42, %v3820_v31  ;;  %v3415_v37 = vmax.f32 %v15246_v9, 0.0  ;;  %v15281_v20 = vor.u32 %v4138_v5, %v4134_v45  ;;  %v15289_v8 = vmax.f32 %v3653_v53, %v3654_v27 }
 0x47f   : > { %v3894_v2 = vsel %vm744_vm0, %v3484_v29, %v3541_v23  ;;  %v4058_v24 = vshrl.u32 %v4025_v1, 16  ;;  %v3381_v46 = vadd.f32 %v17955_v26, %v3220_v49  ;;  %v3710_v10 = vrot.slane %v3709_v32, 1 }
 0x480   : > { %v3766_v9 = vrot.slane %v15271_v54, 1  ;;  %v15294_v41 = vmax.f32 %v3875_v17, %v3876_v18  ;;  %v3223_v62 = vadd.f32 %v11556_v15, %v17956_v34  ;;  %v4061_v51 = vshll.u32 %v4025_v1, 16 }
 0x481   : > { %v4060_v12 = vrot.slane %v4058_v24, 7  ;;  %v3417_v30 = vmax.f32 %v3381_v46, 0.0  ;;  %v3902_v53 = vsel %vm3896_vm11, %v15200_v16, %v15193_v52  ;;  %v3822_v14 = vrot.slane %v15278_v11, 1 }
 0x482   : > { %v3384_v38 = vadd.f32 %v17957_v22, %v3223_v62  ;;  %v3816_v42 = vmax.f32 %v15182_v6, %v3815_v50  ;;  %v3911_v17 = vsel %vm3905_vm12, %v3902_v53, %v15195_v44  ;;  %v3416_v27 = vmax.f32 %v3376_v28, 0.0 }
 0x483   : > { %v4063_v63 = vor.u32 %v4061_v51, %v4060_v12  ;;  %v3433_v39 = vmax.f32 %v3415_v37, %v3417_v30  ;;  %v3920_v5 = vsel %vm3914_vm13, %v3911_v17, %v3704_v0  ;;  %v15308_v29 = vmax.f32 %v3709_v32, %v3710_v10 }
 0x484   : > { %v3418_v52 = vmax.f32 %v3384_v38, 0.0  ;;  %v3871_v16 = vrot.slane %v15223_v3, 1  ;;  %v3928_v25 = vsel %vm1634_vm5, %v3920_v5, %v15257_v40  ;;  %v3903_v48 = vsel %vm3896_vm11, %v3894_v2, %v3598_v59 }
 0x485   : > { %v4097_v43 = vsel %vm13173_vm2, 0, %v4063_v63  ;;  %v3485_v6 = vsel %vm3435_vm4, %v3433_v39, -inf  ;;  %v3542_v44 = vsel %vm3492_vm8, %v3433_v39, -inf  ;;  %v3599_v50 = vsel %vm3549_vm9, %v3433_v39, -inf }
 0x486   : > { %v15320_v0 = vsel %vm14821_vm15, %v4097_v43, 0  ;;  %v3486_v31 = vrot.slane %v3485_v6, 4  ;;  %v3543_v13 = vrot.slane %v3542_v44, 4  ;;  %v3600_v56 = vrot.slane %v3599_v50, 4 }
 0x487   : > { %4200 = vrot.lane.b32.xlu1 %v15320_v0, %s17882_s18  ;;  %v3656_v40 = vsel %vm3606_vm10, %v3433_v39, -inf  ;;  %v3434_v23 = vmax.f32 %v3416_v27, %v3418_v52  ;;  %v3936_v33 = vsel %vm1635_vm6, %v3928_v25, %v3816_v42  ;;  %v3872_v25 = vmax.f32 %v15223_v3, %v3871_v16 }
 0x488   : > { %v3487_v4 = vmax.f32 %v3485_v6, %v3486_v31  ;;  %v3544_v32 = vmax.f32 %v3542_v44, %v3543_v13  ;;  %v3601_v18 = vmax.f32 %v3599_v50, %v3600_v56  ;;  %v3657_v45 = vrot.slane %v3656_v40, 4  ;;  %v12177_v13 = vld [vmem:[%s17817_s5 + $0xd8] sm:$0xff]  }
 0x489   : > { %v3712_v1 = vsel %vm3435_vm4, %v3434_v23, -inf  ;;  %v3768_v60 = vsel %vm3492_vm8, %v3434_v23, -inf  ;;  %v3824_v28 = vsel %vm3549_vm9, %v3434_v23, -inf  ;;  %v3880_v36 = vsel %vm3606_vm10, %v3434_v23, -inf  ;;  %11623 = vmatprep.subr.bf16.mxu1 %v12177_v13 }
 0x48a   : > { %v3488_v49 = vrot.slane %v3487_v4, 2  ;;  %v3545_v15 = vrot.slane %v3544_v32, 2  ;;  %v3602_v37 = vrot.slane %v3601_v18, 2  ;;  %v3658_v61 = vmax.f32 %v3656_v40, %v3657_v45 }
 0x48b   : > { %4169 = vrot.lane.b32.xlu1 %v15281_v20, %s17882_s18  ;;  %v3713_v59 = vrot.slane %v3712_v1, 4  ;;  %v3769_v21 = vrot.slane %v3768_v60, 4  ;;  %v3825_v2 = vrot.slane %v3824_v28, 4  ;;  %v3881_v24 = vrot.slane %v3880_v36, 4 }
 0x48c   : > { %v3489_v26 = vmax.f32 %v3487_v4, %v3488_v49  ;;  %v3546_v46 = vmax.f32 %v3544_v32, %v3545_v15  ;;  %v3603_v10 = vmax.f32 %v3601_v18, %v3602_v37  ;;  %v3659_v34 = vrot.slane %v3658_v61, 2 }
 0x48d   : > { %v3714_v62 = vmax.f32 %v3712_v1, %v3713_v59  ;;  %v3770_v12 = vmax.f32 %v3768_v60, %v3769_v21  ;;  %v3826_v51 = vmax.f32 %v3824_v28, %v3825_v2  ;;  %v3882_v30 = vmax.f32 %v3880_v36, %v3881_v24 }
 0x48e   : > { %v3490_v53 = vrot.slane %v3489_v26, 1  ;;  %v3547_v22 = vrot.slane %v3546_v46, 1  ;;  %v3604_v38 = vrot.slane %v3603_v10, 1  ;;  %v3660_v42 = vmax.f32 %v3658_v61, %v3659_v34 }
 0x48f   : > { %v3715_v17 = vrot.slane %v3714_v62, 2  ;;  %v3771_v63 = vrot.slane %v3770_v12, 2  ;;  %v3827_v27 = vrot.slane %v3826_v51, 2  ;;  %v3883_v39 = vrot.slane %v3882_v30, 2 }
 0x490   : > { %v3491_v5 = vmax.f32 %v3489_v26, %v3490_v53  ;;  %v3548_v52 = vmax.f32 %v3546_v46, %v3547_v22  ;;  %v3878_v43 = vrot.slane %v15294_v41, 1  ;;  %v3912_v31 = vsel %vm3905_vm12, %v3903_v48, %v15289_v8  ;;  %v12178_v8 = vld [vmem:[%s17817_s5 + $0x98] sm:$0xff]   ;;  %v12182_v26 = vld [vmem:[%s17817_s5 + $0xe8] sm:$0xff]  }
 0x491   : > { %v3716_v6 = vmax.f32 %v3714_v62, %v3715_v17  ;;  %v3772_v44 = vmax.f32 %v3770_v12, %v3771_v63  ;;  %v3828_v50 = vmax.f32 %v3826_v51, %v3827_v27  ;;  %v3767_v56 = vmax.f32 %v15271_v54, %v3766_v9  ;;  %11624 = vmatpush3.bf16.msra.mxu1 %v12178_v8 }
 0x492   : > { %v3661_v40 = vrot.slane %v3660_v42, 1  ;;  %v3945_v23 = vsel %vm1031_vm3, %v3936_v33, %v3872_v25  ;;  %v3605_v3 = vmax.f32 %v3603_v10, %v3604_v38  ;;  %v3884_v4 = vmax.f32 %v3882_v30, %v3883_v39  ;;  %v12183_v30 = vld [vmem:[%s17817_s5 + $0xa8] sm:$0xff]  }
 0x493   : > { %v3717_v16 = vrot.slane %v3716_v6, 1  ;;  %v4026_v32 = vpack.c.bf16 %v3945_v23, %v3945_v23  ;;  %v3895_v48 = vsel %vm744_vm0, %v3491_v5, %v3548_v52  ;;  %v3773_v18 = vrot.slane %v3772_v44, 1 }
 0x494   : > { %v3823_v45 = vmax.f32 %v15278_v11, %v3822_v14  ;;  %v3921_v54 = vsel %vm3914_vm13, %v3912_v31, %v15308_v29  ;;  %v3829_v33 = vrot.slane %v3828_v50, 1  ;;  %v3879_v60 = vmax.f32 %v15294_v41, %v3878_v43  ;;  %v12179_v14 = vld [vmem:[%s17817_s5 + $0xe0] sm:$0xff]   ;;  %v12185_v43 = vld [vmem:[%s17817_s5 + $0xf0] sm:$0xff]  }
 0x495   : > { %v3718_v9 = vmax.f32 %v3716_v6, %v3717_v16  ;;  %v4065_v1 = vshrl.u32 %v4026_v32, 16  ;;  %v3662_v28 = vmax.f32 %v3660_v42, %v3661_v40  ;;  %v4068_v36 = vshll.u32 %v4026_v32, 16  ;;  %v12180_v41 = vld [vmem:[%s17817_s5 + $0xa0] sm:$0xff]   ;;  %11625 = vmatprep.subr.bf16.mxu1 %v12179_v14  ;;  %v12186_v6 = vld [vmem:[%s17817_s5 + $0xb0] sm:$0xff]  }
 0x496   : > { %v4143_v49 = vshll.u32 %v15320_v0, 16  ;;  %v3929_v15 = vsel %vm1634_vm5, %v3921_v54, %v3767_v56  ;;  %v3885_v59 = vrot.slane %v3884_v4, 1  ;;  %v3904_v11 = vsel %vm3896_vm11, %v3895_v48, %v3605_v3  ;;  %v15367_v29 = vld [vmem:[%s17817_s5 + $0x100] sm:$0xff]   ;;  %11626 = vmatpush3.bf16.msra.mxu1 %v12180_v41  ;;  %v12188_v54 = vld [vmem:[%s17817_s5 + $0xf8] sm:$0xff]  }
 0x497   : > { %v4067_v37 = vrot.slane %v4065_v1, 7  ;;  %v3937_v61 = vsel %vm1635_vm6, %v3929_v15, %v3823_v45  ;;  %v3774_v21 = vmax.f32 %v3772_v44, %v3773_v18  ;;  %v3913_v24 = vsel %vm3905_vm12, %v3904_v11, %v3662_v28  ;;  %11944 = vmatprep.subr.bf16.mxu0 %v15367_v29  ;;  %11627 = vmatprep.subr.bf16.mxu1 %v12182_v26  ;;  %v17958_v1 = vld [vmem:[#allocation26_spill] sm:$0xff] }
 0x498   : > { %v3946_v2 = vsel %vm1031_vm3, %v3937_v61, %v3879_v60  ;;  %v3830_v34 = vmax.f32 %v3828_v50, %v3829_v33  ;;  %v3922_v62 = vsel %vm3914_vm13, %v3913_v24, %v3718_v9  ;;  %v3886_v12 = vmax.f32 %v3884_v4, %v3885_v59  ;;  %v12189_v9 = vld [vmem:[%s17817_s5 + $0xb8] sm:$0xff]   ;;  %v17959_v24 = vld [vmem:[#allocation9_spill] sm:$0xff] }
 0x499   : > { %v4070_v46 = vor.u32 %v4068_v36, %v4067_v37  ;;  %v4027_v10 = vpack.c.bf16 %v3946_v2, %v3946_v2  ;;  %v3930_v51 = vsel %vm1634_vm5, %v3922_v62, %v3774_v21  ;;  %v4145_v22 = vrot.slane %v4143_v49, 1  ;;  %v4193_v37 = vpop.permute.xlu1 %4192 }
 0x49a   : > { %v3938_v42 = vsel %vm1635_vm6, %v3930_v51, %v3830_v34  ;;  %v4141_v63 = vshrl.u32 %v15320_v0, 16  ;;  %11628 = vmatpush3.bf16.msra.mxu1 %v12183_v30  ;;  %v4184_v60 = vrot.slane %v17958_v1, 1  ;;  %v15439_v49 = vrot.slane %v15148_v57, 1 }
 0x49b   : > { %v4098_v53 = vsel %vm13173_vm2, 0, %v4070_v46  ;;  %v4072_v38 = vshrl.u32 %v4027_v10, 16  ;;  %v3947_v27 = vsel %vm1031_vm3, %v3938_v42, %v3886_v12  ;;  %v4075_v5 = vshll.u32 %v4027_v10, 16  ;;  %11629 = vmatprep.subr.bf16.mxu1 %v12185_v43  ;;  %v12187_v42 = vld [vmem:[%s17817_s5 + $0x110] sm:$0xff]  }
 0x49c   : > { %v15385_v17 = vsel %vm14821_vm15, %v4098_v53, 0  ;;  %v4028_v25 = vpack.c.bf16 %v3947_v27, %v3947_v27  ;;  %v15398_v44 = vor.u32 %v4145_v22, %v4141_v63  ;;  %v15442_v15 = vrot.slane %v15023_v47, 1  ;;  %v12190_v63 = vld [vmem:[%s17817_s5 + $0x118] sm:$0xff]  }
 0x49d   : > { %4202 = vrot.lane.b32.xlu0 %v15385_v17, %s17882_s18  ;;  %v4074_v39 = vrot.slane %v4072_v38, 7  ;;  %v4150_v52 = vshll.u32 %v15385_v17, 16  ;;  %v4148_v16 = vshrl.u32 %v15385_v17, 16  ;;  %v15449_v59 = vrot.slane %v15320_v0, 1  ;;  %v4162_v2 = vpop.permute.xlu1 %4161  ;;  %v12184_v38 = vld [vmem:[%s17817_s5 + $0x108] sm:$0xff]  }
 0x49e   : > { %v4079_v31 = vshrl.u32 %v4028_v25, 16  ;;  %v4082_v23 = vshll.u32 %v4028_v25, 16  ;;  %11630 = vmatpush3.bf16.msra.mxu1 %v12186_v6  ;;  %v15453_v14 = vrot.slane %v15214_v55, 1  ;;  %v4252_v26 = vsel %vm2469_vm1, %v17959_v24, %v4193_v37 }
 0x49f   : > { %v4077_v50 = vor.u32 %v4075_v5, %v4074_v39  ;;  %v4152_v56 = vrot.slane %v4150_v52, 1  ;;  %11631 = vmatprep.subr.bf16.mxu1 %v12188_v54  ;;  %v15465_v10 = vrot.slane %v15385_v17, 1  ;;  %v15468_v62 = vsel %vm2469_vm1, 0, %v4162_v2  ;;  %v17960_v2 = vld [vmem:[#allocation13_spill] sm:$0xff] }
 0x4a0   : > { %v4081_v40 = vrot.slane %v4079_v31, 7  ;;  %vm6013_vm3 = vcmask 1043458   ;;  %vm6042_vm5 = vcmask 1045508   ;;  %vm6071_vm6 = vcmask 1047558  }
 0x4a1   : > { %4171 = vrot.lane.b32.xlu0 %v15398_v44, %s17882_s18  ;;  %v4099_v13 = vsel %vm13173_vm2, 0, %v4077_v50  ;;  %v15412_v8 = vor.u32 %v4152_v56, %v4148_v16 }
 0x4a2   : > { %v15406_v3 = vsel %vm14821_vm15, %v4099_v13, 0  ;;  %v4084_v4 = vor.u32 %v4082_v23, %v4081_v40  ;;  %11632 = vmatpush3.bf16.msra.mxu1 %v12189_v9 }
 0x4a3   : > { %4204 = vrot.lane.b32.xlu1 %v15406_v3, %s17882_s18  ;;  %v4157_v32 = vshll.u32 %v15406_v3, 16  ;;  %v4155_v33 = vshrl.u32 %v15406_v3, 16  ;;  %v15478_v53 = vrot.slane %v15406_v3, 1 }
 0x4a4   : > { %v4100_v48 = vsel %vm13173_vm2, 0, %v4084_v4 }
 0x4a5   : > { %v4159_v18 = vrot.slane %v4157_v32, 1  ;;  %v15418_v45 = vsel %vm14821_vm15, %v4100_v48, 0 }
 0x4a6   : > { %4206 = vrot.lane.b32.xlu0 %v15418_v45, %s17882_s18  ;;  %v4211_v36 = vshll.u32 %v15418_v45, 16  ;;  %v4209_v11 = vshrl.u32 %v15418_v45, 16  ;;  %v4215_v30 = vrot.slane %v15418_v45, 1 }
 0x4a7   : > { %4173 = vrot.lane.b32.xlu1 %v15412_v8, %s17882_s18  ;;  %v15432_v28 = vor.u32 %v4159_v18, %v4155_v33 }
 0x4a8   : > { %v4213_v61 = vrot.slane %v4211_v36, 1 }
 0x4aa   : > { %4175 = vrot.lane.b32.xlu0 %v15432_v28, %s17882_s18  ;;  %v15457_v41 = vor.u32 %v4213_v61, %v4209_v11  ;;  %v10676_v11 = vcombine.low %v15442_v15, %v15439_v49 }
 0x4ab   : > { %4216 = vrot.lane.b32.xlu1 %v4184_v60, %s17882_s18 }
 0x4ae   : > { %4218 = vrot.lane.b32.xlu0 %v15442_v15, %s17882_s18 }
 0x4af   : > { %4220 = vrot.lane.b32.xlu1 %v15439_v49, %s17882_s18 }
 0x4b2   : > { %4222 = vrot.lane.b32.xlu0 %v15453_v14, %s17882_s18 }
 0x4b3   : > { %4224 = vrot.lane.b32.xlu1 %v15449_v59, %s17882_s18  ;;  %v4195_v21 = vpop.permute.xlu0 %4194 }
 0x4b4   : > { %v4255_v46 = vsel %vm2469_vm1, %v4184_v60, %v4195_v21 }
 0x4b5   : > { %v10673_v34 = vcombine.low %v4252_v26, %v4255_v46 }
 0x4b6   : > { %4226 = vrot.lane.b32.xlu0 %v15465_v10, %s17882_s18 }
 0x4b7   : > { %4232 = vrot.lane.b32.xlu1 %v15457_v41, %s17882_s18  ;;  %v4164_v12 = vpop.permute.xlu0 %4163  ;;  %4654 = vmatprep.mubr.bf16.mxu0 %v10673_v34 }
 0x4b8   : > { %v4237_v51 = vsel %vm2469_vm1, %v17958_v1, %v4164_v12 }
 0x4b9   : > { %v10672_v22 = vcombine.low %v15468_v62, %v4237_v51 }
 0x4ba   : > { %4228 = vrot.lane.b32.xlu0 %v15478_v53, %s17882_s18 }
 0x4bb   : > { %4230 = vrot.lane.b32.xlu1 %v4215_v30, %s17882_s18  ;;  %4655 = vmatmul.mubr.bf16.vlgmr.msra.gmra.mrb[152].mxu0 %v10672_v22  ;;  %s540_s18 = scalar_lea.vmem [#allocation2], %s539_s0 }
 0x4bc   : > { %11945 = vmatpush3.bf16.msra.mxu0 %v15367_v29  ;;  %s10534_s22 = sshll.u32 %s540_s18, 4  ;;  %s17772_s22 = int_to_ptr.vmem [resolvable:$true] %s10534_s22 }
 0x4bd   : > { %11946 = vmatprep.subr.bf16.mxu0 %v12184_v38  ;;  %s12935_s29 = scalar_lea.vmem %s17772_s22, 16  ;;  %p12942_p0 = scmp.lt.s32.totalorder %s17772_s22, %s12940_s20 }
 0x4be   : > { %p12936_p11 = scmp.ne.s32.totalorder %s17772_s22, %s12935_s29  ;;  %p12943_p1 = scmp.lt.s32.totalorder %s12941_s19, %s12935_s29 }
 0x4c0   : > { %11947 = vmatpush3.bf16.msra.mxu0 %v12184_v38  ;;  %p12937_p12 = pnand %p12936_p11, %p13142_p5  ;;  %p12944_p2 = por %p12943_p1, %p12942_p0 }
 0x4c1   : > { %11948 = vmatprep.subr.bf16.mxu0 %v12187_v42 }
 0x4c2   : > { %p12938_p13 = pneg %p12937_p12 }
 0x4c4   : > { %11949 = vmatpush3.bf16.msra.mxu0 %v12187_v42  ;;  %p12945_p3 = pnand %p12944_p2, %p12938_p13 }
 0x4c5   : > { %11950 = vmatprep.subr.bf16.mxu0 %v12190_v63 }
 0x4c8   : > { %11951 = vmatpush3.bf16.msra.mxu0 %v12190_v63 }
 0x4ca   : > { %v4197_v27 = vpop.permute.xlu1 %4196 }
 0x4cb   : > { %v4258_v5 = vsel %vm2469_vm1, %v15442_v15, %v4197_v27  ;;  %v10684_v15 = vcombine.low %v15465_v10, %v15478_v53 }
 0x4ce   : > { %v4166_v52 = vpop.permute.xlu1 %4165 }
 0x4cf   : > { %v4239_v6 = vsel %vm2469_vm1, %v15023_v47, %v4166_v52  ;;  %v12198_v52 = vld [vmem:[%s17819_s7 + $0x8] sm:$0xff]  }
 0x4de   : > { %v4199_v39 = vpop.permute.xlu0 %4198 }
 0x4df   : > { %v4261_v29 = vsel %vm2469_vm1, %v15439_v49, %v4199_v39 }
 0x4e0   : > { %v10677_v25 = vcombine.low %v4258_v5, %v4261_v29  ;;  %v12196_v5 = vld [vmem:[%s17819_s7 + $0x88] sm:$0xff]  }
 0x4e1   : > { %v12197_v29 = vld [vmem:[%s17819_s7 + $0x48] sm:$0xff]  }
 0x4e2   : > { %4662 = vmatprep.mubr.bf16.mxu0 %v10677_v25  ;;  %v4168_v43 = vpop.permute.xlu0 %4167  ;;  %v12199_v25 = vld [vmem:[%s17819_s7 + $0xd0] sm:$0xff]  }
 0x4e3   : > { %v4241_v50 = vsel %vm2469_vm1, %v15148_v57, %v4168_v43  ;;  %v12200_v43 = vld [vmem:[%s17819_s7 + $0x90] sm:$0xff]  }
 0x4e4   : > { %v10675_v31 = vcombine.low %v4239_v6, %v4241_v50  ;;  %v12201_v6 = vld [vmem:[%s17819_s7 + $0x50] sm:$0xff]  }
 0x4e5   : > { %v12202_v50 = vld [vmem:[%s17819_s7 + $0x10] sm:$0xff]  }
 0x4e6   : > { %4663 = vmatmul.mubr.bf16.gmra.mrb[156].mxu0 %v10675_v31  ;;  %4719 = vmatprep.mubr.bf16.mxu1 %v10675_v31  ;;  %v12203_v31 = vld [vmem:[%s17819_s7 + $0xd8] sm:$0xff]  }
 0x4f9   : > { %v4201_v13 = vpop.permute.xlu1 %4200 }
 0x4fa   : > { %v4264_v40 = vsel %vm2469_vm1, %v15453_v14, %v4201_v13  ;;  %v12204_v13 = vld [vmem:[%s17819_s7 + $0x98] sm:$0xff]  }
 0x4fd   : > { %v4170_v16 = vpop.permute.xlu1 %4169 }
 0x4fe   : > { %v4243_v47 = vsel %vm2469_vm1, %v15214_v55, %v4170_v16  ;;  %v12206_v16 = vld [vmem:[%s17819_s7 + $0x18] sm:$0xff]  }
 0x50f   : > { %v4203_v56 = vpop.permute.xlu0 %4202 }
 0x510   : > { %v4267_v23 = vsel %vm2469_vm1, %v15449_v59, %v4203_v56  ;;  %v12205_v56 = vld [vmem:[%s17819_s7 + $0x58] sm:$0xff]  }
 0x511   : > { %v10681_v4 = vcombine.low %v4264_v40, %v4267_v23 }
 0x513   : > { %4670 = vmatprep.mubr.bf16.mxu0 %v10681_v4  ;;  %v4172_v32 = vpop.permute.xlu0 %4171  ;;  %v12207_v4 = vld [vmem:[%s17819_s7 + $0xe0] sm:$0xff]  }
 0x514   : > { %v4245_v57 = vsel %vm2469_vm1, %v15320_v0, %v4172_v32  ;;  %v12208_v32 = vld [vmem:[%s17819_s7 + $0xa0] sm:$0xff]  }
 0x515   : > { %v10679_v48 = vcombine.low %v4243_v47, %v4245_v57  ;;  %v4205_v18 = vpop.permute.xlu1 %4204 }
 0x516   : > { %v4270_v33 = vsel %vm2469_vm1, %v15465_v10, %v4205_v18 }
 0x517   : > { %4671 = vmatmul.mubr.bf16.gmra.mrb[160].mxu0 %v10679_v48 }
 0x518   : > { %v4207_v9 = vpop.permute.xlu0 %4206 }
 0x519   : > { %v4174_v54 = vpop.permute.xlu1 %4173  ;;  %v4273_v1 = vsel %vm2469_vm1, %v15478_v53, %v4207_v9  ;;  %v12210_v9 = vld [vmem:[%s17819_s7 + $0x20] sm:$0xff]  }
 0x51a   : > { %v10685_v60 = vcombine.low %v4270_v33, %v4273_v1  ;;  %v4247_v55 = vsel %vm2469_vm1, %v15385_v17, %v4174_v54  ;;  %v12209_v54 = vld [vmem:[%s17819_s7 + $0x60] sm:$0xff]   ;;  %v12211_v33 = vld [vmem:[%s17819_s7 + $0xe8] sm:$0xff]  }
 0x51b   : > { %v12212_v1 = vld [vmem:[%s17819_s7 + $0xa8] sm:$0xff]  }
 0x51c   : > { %4678 = vmatprep.mubr.bf16.mxu0 %v10685_v60  ;;  %v4176_v36 = vpop.permute.xlu0 %4175  ;;  %v12213_v60 = vld [vmem:[%s17819_s7 + $0x68] sm:$0xff]  }
 0x51d   : > { %v4217_v37 = vpop.permute.xlu1 %4216  ;;  %v4249_v0 = vsel %vm2469_vm1, %v15406_v3, %v4176_v36  ;;  %v10680_v3 = vcombine.low %v15453_v14, %v15449_v59  ;;  %v12214_v36 = vld [vmem:[%s17819_s7 + $0x28] sm:$0xff]  }
 0x51e   : > { %v10683_v61 = vcombine.low %v4247_v55, %v4249_v0  ;;  %v4276_v26 = vsel %vm2469_vm1, %v17960_v2, %v4217_v37  ;;  %v12215_v55 = vld [vmem:[%s17819_s7 + $0xf0] sm:$0xff]   ;;  %v12221_v2 = vld [vmem:[%s17819_s7 + $0x78] sm:$0xff]  }
 0x51f   : > { %v12216_v37 = vld [vmem:[%s17819_s7 + $0xb0] sm:$0xff]  }
 0x520   : > { %4679 = vmatmul.mubr.bf16.gmra.mrb[164].mxu0 %v10683_v61  ;;  %v4219_v21 = vpop.permute.xlu0 %4218  ;;  %v12217_v0 = vld [vmem:[%s17819_s7 + $0x70] sm:$0xff]  }
 0x521   : > { %v4279_v46 = vsel %vm2469_vm1, %v15156_v19, %v4219_v21  ;;  %11952 = vmatprep.mubr.msk.bf16.mxu0 %vm2469_vm1, %v10676_v11  ;;  %v4221_v17 = vpop.permute.xlu1 %4220  ;;  %v12219_v11 = vld [vmem:[%s17819_s7 + $0xf8] sm:$0xff]  }
 0x522   : > { %v10674_v34 = vcombine.low %v4276_v26, %v4279_v46  ;;  %v4282_v19 = vsel %vm2469_vm1, %v15230_v58, %v4221_v17  ;;  %v12220_v21 = vld [vmem:[%s17819_s7 + $0xb8] sm:$0xff]   ;;  %v12223_v46 = vld [vmem:[%s17819_s7 + $0x1c0] sm:$0xff]  }
 0x523   : > { %v12222_v26 = vld [vmem:[%s17819_s7 + $0x38] sm:$0xff]  }
 0x524   : > { %4720 = vmatmul.mubr.bf16.vlgmr.msra.gmra.mrb[40].mxu1 %v10674_v34  ;;  %v4223_v12 = vpop.permute.xlu0 %4222  ;;  %v12225_v34 = vld [vmem:[%s17819_s7 + $0x140] sm:$0xff]  }
 0x525   : > { %4727 = vmatprep.mubr.bf16.mxu1 %v10679_v48  ;;  %v4285_v49 = vsel %vm2469_vm1, %v15281_v20, %v4223_v12  ;;  %v4225_v51 = vpop.permute.xlu1 %4224  ;;  %v10688_v20 = vcombine.low %v4215_v30, %v17959_v24 }
 0x526   : > { %v10678_v22 = vcombine.low %v4282_v19, %v4285_v49  ;;  %v4288_v58 = vsel %vm2469_vm1, %v15398_v44, %v4225_v51  ;;  %v12192_v44 = vld [vmem:[%s17819_s7 + $0x80] sm:$0xff]  }
 0x528   : > { %11953 = vmatmul.mubr.msk.bf16.vlgmr.msra.gmra.mrb[168].mxu0 %vm2469_vm1, %v10680_v3  ;;  %v4227_v38 = vpop.permute.xlu0 %4226 }
 0x529   : > { %11956 = vmatprep.mubr.msk.bf16.mxu0 %vm2469_vm1, %v10684_v15  ;;  %v4233_v42 = vpop.permute.xlu1 %4232  ;;  %v4291_v59 = vsel %vm2469_vm1, %v15412_v8, %v4227_v38 }
 0x52a   : > { %v4299_v14 = vsel %vm2469_vm1, %v15418_v45, %v4233_v42  ;;  %v10682_v10 = vcombine.low %v4288_v58, %v4291_v59  ;;  %v12191_v45 = vld [vmem:[%s17819_s7 + $0xc0] sm:$0xff]  }
 0x52b   : > { %v10687_v53 = vcombine.low %v4299_v14, %v15468_v62  ;;  %11705 = vmatprep.subr.bf16.mxu0 %v12191_v45  ;;  %v12193_v62 = vld [vmem:[%s17819_s7 + $0x40] sm:$0xff]  }
 0x52c   : > { %4728 = vmatmul.mubr.bf16.gmra.mrb[44].mxu1 %v10678_v22  ;;  %v4229_v63 = vpop.permute.xlu0 %4228  ;;  %11706 = vmatpush3.bf16.msra.mxu0 %v12192_v44 }
 0x52d   : > { %4735 = vmatprep.mubr.bf16.mxu1 %v10683_v61  ;;  %v4231_v27 = vpop.permute.xlu1 %4230  ;;  %v4294_v30 = vsel %vm2469_vm1, %v15432_v28, %v4229_v63  ;;  %11665 = vmatprep.subr.bf16.mxu1 %v12193_v62  ;;  %v12194_v28 = vld [vmem:[%s17819_s7] sm:$0xff]   ;;  %v12218_v61 = vld [vmem:[%s17819_s7 + $0x30] sm:$0xff]  }
 0x52e   : > { %v4297_v8 = vsel %vm2469_vm1, %v15457_v41, %v4231_v27  ;;  %v12195_v41 = vld [vmem:[%s17819_s7 + $0xc8] sm:$0xff]   ;;  %11666 = vmatpush3.bf16.msra.mxu1 %v12194_v28  ;;  %v10671_v63 = vld [vmem:[%s17818_s6] ss:$0 sm:$0xff] }
 0x52f   : > { %v10686_v39 = vcombine.low %v4294_v30, %v4297_v8  ;;  %11707 = vmatprep.subr.bf16.mxu0 %v12195_v41  ;;  %11667 = vmatprep.subr.bf16.mxu1 %v12197_v29 }
 0x530   : > { %11957 = vmatmul.mubr.msk.bf16.gmra.mrb[172].mxu0 %vm2469_vm1, %v10688_v20  ;;  %vm6298_vm1 = vsmask.f32 2304 }
 0x531   : > { %11708 = vmatpush3.bf16.msra.mxu0 %v12196_v5  ;;  %vm16114_vm7 = vmand %vm3905_vm12, %vm6298_vm1 }
 0x532   : > { %11709 = vmatprep.subr.bf16.mxu0 %v12199_v25  ;;  %11668 = vmatpush3.bf16.msra.mxu1 %v12198_v52 }
 0x533   : > { %11669 = vmatprep.subr.bf16.mxu1 %v12201_v6 }
 0x534   : > { %4736 = vmatmul.mubr.bf16.gmra.mrb[48].mxu1 %v10682_v10 }
 0x535   : > { %4743 = vmatprep.mubr.bf16.mxu1 %v10687_v53  ;;  %11710 = vmatpush3.bf16.msra.mxu0 %v12200_v43 }
 0x536   : > { %11670 = vmatpush3.bf16.msra.mxu1 %v12202_v50  ;;  %11711 = vmatprep.subr.bf16.mxu0 %v12203_v31 }
 0x537   : > { %11671 = vmatprep.subr.bf16.mxu1 %v12205_v56 }
 0x539   : > { %11712 = vmatpush3.bf16.msra.mxu0 %v12204_v13 }
 0x53a   : > { %11672 = vmatpush3.bf16.msra.mxu1 %v12206_v16  ;;  %11713 = vmatprep.subr.bf16.mxu0 %v12207_v4 }
 0x53b   : > { %11673 = vmatprep.subr.bf16.mxu1 %v12209_v54 }
 0x53c   : > { %4744 = vmatmul.mubr.bf16.gmra.mrb[52].mxu1 %v10686_v39 }
 0x53d   : > { %11714 = vmatpush3.bf16.msra.mxu0 %v12208_v32 }
 0x53e   : > { %11715 = vmatprep.subr.bf16.mxu0 %v12211_v33  ;;  %11674 = vmatpush3.bf16.msra.mxu1 %v12210_v9 }
 0x53f   : > { %11675 = vmatprep.subr.bf16.mxu1 %v12213_v60 }
 0x541   : > { %11716 = vmatpush3.bf16.msra.mxu0 %v12212_v1 }
 0x542   : > { %11676 = vmatpush3.bf16.msra.mxu1 %v12214_v36  ;;  %11717 = vmatprep.subr.bf16.mxu0 %v12215_v55 }
 0x543   : > { %11677 = vmatprep.subr.bf16.mxu1 %v12217_v0 }
 0x545   : > { %11718 = vmatpush3.bf16.msra.mxu0 %v12216_v37 }
 0x546   : > { %11719 = vmatprep.subr.bf16.mxu0 %v12219_v11  ;;  %11678 = vmatpush3.bf16.msra.mxu1 %v12218_v61 }
 0x547   : > { %11679 = vmatprep.subr.bf16.mxu1 %v12221_v2 }
 0x549   : > { %11720 = vmatpush3.bf16.msra.mxu0 %v12220_v21 }
 0x54a   : > { %11680 = vmatpush3.bf16.msra.mxu1 %v12222_v26  ;;  %11785 = vmatprep.subr.bf16.mxu0 %v12223_v46 }
 0x54b   : > { %11745 = vmatprep.subr.bf16.mxu1 %v12225_v34 }
 0x58e   : > { %v11593_v40 = vpop.f32.mrb[152].mxu0 }
 0x58f   : > { %v11594_v23 = vpop.f32.mrb[153].mxu0 }
 0x590   : > { %v11595_v47 = vadd.f32 %v11594_v23, %v11593_v40  ;;  %v11596_v57 = vpop.f32.mrb[154].mxu0 }
 0x591   : > { %v11597_v48 = vpop.f32.mrb[155].mxu0 }
 0x592   : > { %v11598_v18 = vadd.f32 %v11597_v48, %v11596_v57  ;;  %v4657_v45 = vadd.f32 %v11595_v47, %v10671_v63 }
 0x594   : > { %v4660_v41 = vadd.f32 %v11598_v18, %v10671_v63 }
 0x5b9   : > { %v11599_v17 = vpop.f32.mrb[156].mxu0 }
 0x5ba   : > { %v11600_v12 = vpop.f32.mrb[157].mxu0 }
 0x5bb   : > { %v11601_v3 = vadd.f32 %v11600_v12, %v11599_v17  ;;  %v11602_v49 = vpop.f32.mrb[158].mxu0 }
 0x5bc   : > { %v11603_v15 = vpop.f32.mrb[159].mxu0 }
 0x5bd   : > { %v11604_v19 = vadd.f32 %v11603_v15, %v11602_v49  ;;  %v4665_v16 = vadd.f32 %v11601_v3, %v10671_v63 }
 0x5bf   : > { %v4668_v1 = vadd.f32 %v11604_v19, %v10671_v63 }
 0x5ea   : > { %v11605_v51 = vpop.f32.mrb[160].mxu0 }
 0x5eb   : > { %v11606_v22 = vpop.f32.mrb[161].mxu0 }
 0x5ec   : > { %v11607_v38 = vadd.f32 %v11606_v22, %v11605_v51  ;;  %v11608_v42 = vpop.f32.mrb[162].mxu0 }
 0x5ed   : > { %v11609_v20 = vpop.f32.mrb[163].mxu0 }
 0x5ee   : > { %v11610_v59 = vadd.f32 %v11609_v20, %v11608_v42  ;;  %v4673_v3 = vadd.f32 %v11607_v38, %v10671_v63 }
 0x5f0   : > { %v4676_v49 = vadd.f32 %v11610_v59, %v10671_v63 }
 0x5f3   : > { %v11611_v14 = vpop.f32.mrb[164].mxu0 }
 0x5f4   : > { %v11612_v58 = vpop.f32.mrb[165].mxu0 }
 0x5f5   : > { %v11613_v10 = vadd.f32 %v11612_v58, %v11611_v14  ;;  %v11614_v53 = vpop.f32.mrb[166].mxu0 }
 0x5f6   : > { %v11615_v27 = vpop.f32.mrb[167].mxu0 }
 0x5f7   : > { %v11616_v30 = vadd.f32 %v11615_v27, %v11614_v53  ;;  %v11633_v8 = vpop.f32.mrb[40].mxu1  ;;  %v4681_v58 = vadd.f32 %v11613_v10, %v10671_v63 }
 0x5f8   : > { %v11634_v39 = vpop.f32.mrb[41].mxu1 }
 0x5f9   : > { %v11635_v44 = vadd.f32 %v11634_v39, %v11633_v8  ;;  %v11636_v62 = vpop.f32.mrb[42].mxu1  ;;  %v4684_v53 = vadd.f32 %v11616_v30, %v10671_v63 }
 0x5fa   : > { %v11637_v28 = vpop.f32.mrb[43].mxu1 }
 0x5fb   : > { %v11638_v5 = vadd.f32 %v11637_v28, %v11636_v62  ;;  %v11954_v29 = vpop.f32.mrb[168].mxu0  ;;  %v4722_v52 = vadd.f32 %v11635_v44, %v4657_v45 }
 0x5fc   : > { %v4786_v25 = vpop.f32.mrb[169].mxu0 }
 0x5fd   : > { %v4787_v43 = vadd.f32 %v4786_v25, %v4722_v52  ;;  %v11955_v6 = vpop.f32.mrb[170].mxu0  ;;  %v4725_v50 = vadd.f32 %v11638_v5, %v4660_v41 }
 0x5fe   : > { %v4789_v31 = vpop.f32.mrb[171].mxu0 }
 0x5ff   : > { %v4817_v13 = vmax.f32 %v4787_v43, 0.0  ;;  %v4790_v56 = vadd.f32 %v4789_v31, %v4725_v50  ;;  %v11639_v40 = vpop.f32.mrb[44].mxu1  ;;  %v12227_v31 = vld [vmem:[%s17819_s7 + $0x1c8] sm:$0xff]  }
 0x600   : > { %v11640_v23 = vpop.f32.mrb[45].mxu1 }
 0x601   : > { %v4970_v4 = vpack.c.bf16 %v4817_v13, %v4817_v13  ;;  %v4818_v32 = vmax.f32 %v4790_v56, 0.0  ;;  %v11641_v47 = vadd.f32 %v11640_v23, %v11639_v40  ;;  %v11642_v57 = vpop.f32.mrb[46].mxu1 }
 0x602   : > { %v11643_v48 = vpop.f32.mrb[47].mxu1 }
 0x603   : > { %v4979_v54 = vshrl.u32 %v4970_v4, 16  ;;  %v4971_v18 = vpack.c.bf16 %v4818_v32, %v4818_v32  ;;  %v4730_v9 = vadd.f32 %v11641_v47, %v4665_v16  ;;  %v15657_v33 = vpop.f32.mrb[172].mxu0  ;;  %v11644_v60 = vadd.f32 %v11643_v48, %v11642_v57 }
 0x604   : > { %v4802_v36 = vpop.f32.mrb[173].mxu0  ;;  %v4982_v37 = vshll.u32 %v4970_v4, 16  ;;  %v17961_v16 = vmov 0  }
 0x605   : > { %v4981_v55 = vrot.slane %v4979_v54, 7  ;;  %v4986_v0 = vshrl.u32 %v4971_v18, 16  ;;  %v4795_v61 = vadd.f32 %v11954_v29, %v4730_v9  ;;  %v15659_v11 = vpop.f32.mrb[174].mxu0  ;;  %v4733_v21 = vadd.f32 %v11644_v60, %v4668_v1  ;;  %v12224_v29 = vld [vmem:[%s17819_s7 + $0x180] sm:$0xff]  }
 0x606   : > { %v4805_v2 = vpop.f32.mrb[175].mxu0  ;;  %v4989_v34 = vshll.u32 %v4971_v18, 16 }
 0x607   : > { %v4984_v26 = vor.u32 %v4982_v37, %v4981_v55  ;;  %v4988_v46 = vrot.slane %v4986_v0, 7  ;;  %v4819_v17 = vmax.f32 %v4795_v61, 0.0  ;;  %v11645_v12 = vpop.f32.mrb[48].mxu1  ;;  %v4798_v15 = vadd.f32 %v11955_v6, %v4733_v21 }
 0x608   : > { %v11646_v51 = vpop.f32.mrb[49].mxu1 }
 0x609   : > { %v5042_v19 = vsel %vm13173_vm2, 0, %v4984_v26  ;;  %v4991_v22 = vor.u32 %v4989_v34, %v4988_v46  ;;  %v4972_v42 = vpack.c.bf16 %v4819_v17, %v4819_v17  ;;  %v11647_v20 = vadd.f32 %v11646_v51, %v11645_v12  ;;  %v11648_v14 = vpop.f32.mrb[50].mxu1 }
 0x60a   : > { %v15665_v27 = vsel %vm14821_vm15, %v5042_v19, 0  ;;  %v4820_v8 = vmax.f32 %v4798_v15, 0.0  ;;  %v11649_v39 = vpop.f32.mrb[51].mxu1 }
 0x60b   : > { %v5043_v38 = vsel %vm13173_vm2, 0, %v4991_v22  ;;  %v4993_v59 = vshrl.u32 %v4972_v42, 16  ;;  %v4996_v45 = vshll.u32 %v4972_v42, 16  ;;  %v4738_v44 = vadd.f32 %v11647_v20, %v4673_v3 }
 0x60c   : > { %v15671_v62 = vsel %vm14821_vm15, %v5043_v38, 0  ;;  %v4973_v28 = vpack.c.bf16 %v4820_v8, %v4820_v8  ;;  %v11650_v41 = vadd.f32 %v11649_v39, %v11648_v14  ;;  %v5114_v10 = vrot.slane %v15665_v27, 1  ;;  %v12226_v39 = vld [vmem:[%s17819_s7 + $0x100] sm:$0xff]  }
 0x60d   : > { %v4995_v63 = vrot.slane %v4993_v59, 7  ;;  %v4803_v30 = vadd.f32 %v4802_v36, %v4738_v44  ;;  %v10733_v5 = vcombine.low %v15665_v27, %v15671_v62  ;;  %v5059_v52 = vshrl.u32 %v15665_v27, 16  ;;  %v12228_v36 = vld [vmem:[%s17819_s7 + $0x188] sm:$0xff]  }
 0x60e   : > { %v5000_v25 = vshrl.u32 %v4973_v28, 16  ;;  %v5003_v43 = vshll.u32 %v4973_v28, 16  ;;  %v4741_v6 = vadd.f32 %v11650_v41, %v4676_v49  ;;  %v10732_v50 = vcombine.low %v17959_v24, %v5114_v10  ;;  %v12229_v44 = vld [vmem:[%s17819_s7 + $0x148] sm:$0xff]   ;;  %v12235_v41 = vld [vmem:[%s17819_s7 + $0x1d8] sm:$0xff]  }
 0x60f   : > { %v4998_v13 = vor.u32 %v4996_v45, %v4995_v63  ;;  %v4821_v56 = vmax.f32 %v4803_v30, 0.0  ;;  %v11651_v40 = vpop.f32.mrb[52].mxu1  ;;  %5745 = vmatprep.mubr.bf16.mxu0 %v10733_v5  ;;  %v5061_v23 = vshll.u32 %v15665_v27, 16  ;;  %v10730_v4 = vcombine.low %v17961_v16, %v15665_v27 }
 0x610   : > { %v5002_v32 = vrot.slane %v5000_v25, 7  ;;  %v4806_v47 = vadd.f32 %v4805_v2, %v4741_v6  ;;  %v11652_v57 = vpop.f32.mrb[53].mxu1  ;;  %5746 = vmatmul.mubr.bf16.vlgmr.msra.gmra.mrb[176].mxu0 %v10732_v50  ;;  %v5115_v48 = vrot.slane %v15671_v62, 1  ;;  %v5066_v54 = vshrl.u32 %v15671_v62, 16  ;;  %v12231_v2 = vld [vmem:[%s17819_s7 + $0x1d0] sm:$0xff]   ;;  %v12230_v50 = vld [vmem:[%s17819_s7 + $0x108] sm:$0xff]  }
 0x611   : > { %v4974_v18 = vpack.c.bf16 %v4821_v56, %v4821_v56  ;;  %v11653_v9 = vadd.f32 %v11652_v57, %v11651_v40  ;;  %v11654_v1 = vpop.f32.mrb[54].mxu1  ;;  %11786 = vmatpush3.bf16.msra.mxu0 %v12224_v29  ;;  %v5063_v60 = vrot.slane %v5061_v23, 1  ;;  %v5044_v55 = vsel %vm13173_vm2, 0, %v4998_v13  ;;  %v12236_v56 = vld [vmem:[%s17819_s7 + $0x198] sm:$0xff]  }
 0x612   : > { %v5005_v37 = vor.u32 %v5003_v43, %v5002_v32  ;;  %v4822_v0 = vmax.f32 %v4806_v47, 0.0  ;;  %v11655_v61 = vpop.f32.mrb[55].mxu1  ;;  %11787 = vmatprep.subr.bf16.mxu0 %v12227_v31  ;;  %v15698_v21 = vsel %vm14821_vm15, %v5044_v55, 0  ;;  %v5068_v26 = vshll.u32 %v15671_v62, 16  ;;  %v12233_v47 = vld [vmem:[%s17819_s7 + $0x150] sm:$0xff]  }
 0x613   : > { %v5007_v46 = vshrl.u32 %v4974_v18, 16  ;;  %v5010_v34 = vshll.u32 %v4974_v18, 16  ;;  %v4746_v17 = vadd.f32 %v11653_v9, %v4681_v58  ;;  %v11656_v12 = vadd.f32 %v11655_v61, %v11654_v1 }
 0x614   : > { %v4975_v3 = vpack.c.bf16 %v4822_v0, %v4822_v0  ;;  %v15704_v49 = vor.u32 %v5063_v60, %v5059_v52  ;;  %v5045_v15 = vsel %vm13173_vm2, 0, %v5005_v37  ;;  %v5116_v51 = vrot.slane %v15698_v21, 1 }
 0x615   : > { %v5009_v19 = vrot.slane %v5007_v46, 7  ;;  %v4811_v22 = vadd.f32 %v15657_v33, %v4746_v17  ;;  %v4749_v42 = vadd.f32 %v11656_v12, %v4684_v53  ;;  %11788 = vmatpush3.bf16.msra.mxu0 %v12228_v36  ;;  %v15712_v20 = vsel %vm14821_vm15, %v5045_v15, 0  ;;  %v12232_v33 = vld [vmem:[%s17819_s7 + $0x190] sm:$0xff]   ;;  %v12237_v15 = vld [vmem:[%s17819_s7 + $0x158] sm:$0xff]  }
 0x616   : > { %v5014_v14 = vshrl.u32 %v4975_v3, 16  ;;  %v5017_v58 = vshll.u32 %v4975_v3, 16  ;;  %v10731_v8 = vcombine.low %v17959_v24, %v15704_v49  ;;  %v10739_v38 = vcombine.low %v15698_v21, %v15712_v20  ;;  %11789 = vmatprep.subr.bf16.mxu0 %v12231_v2  ;;  %v12234_v2 = vld [vmem:[%s17819_s7 + $0x110] sm:$0xff]  }
 0x617   : > { %v5012_v53 = vor.u32 %v5010_v34, %v5009_v19  ;;  %v4823_v59 = vmax.f32 %v4811_v22, 0.0  ;;  %v4814_v45 = vadd.f32 %v15659_v11, %v4749_v42  ;;  %v15732_v28 = vcombine.low %v5115_v48, %v5116_v51  ;;  %v12240_v34 = vld [vmem:[%s17819_s7 + $0x1a0] sm:$0xff]   ;;  %v12243_v42 = vld [vmem:[%s17819_s7 + $0x1e8] sm:$0xff]  }
 0x618   : > { %v5016_v63 = vrot.slane %v5014_v14, 7  ;;  %5680 = vmatprep.mubr.bf16.mxu1 %v10731_v8  ;;  %5753 = vmatprep.mubr.bf16.mxu0 %v10739_v38  ;;  %v5070_v30 = vrot.slane %v5068_v26, 1  ;;  %v5073_v11 = vshrl.u32 %v15698_v21, 16  ;;  %v5075_v5 = vshll.u32 %v15698_v21, 16 }
 0x619   : > { %v4976_v29 = vpack.c.bf16 %v4823_v59, %v4823_v59  ;;  %v4824_v52 = vmax.f32 %v4814_v45, 0.0  ;;  %5681 = vmatmul.mubr.bf16.vlgmr.msra.gmra.mrb[56].mxu1 %v10730_v4  ;;  %5754 = vmatmul.mubr.bf16.gmra.mrb[180].mxu0 %v15732_v28  ;;  %v15742_v25 = vcombine.low %v15671_v62, %v15698_v21  ;;  %v5046_v43 = vsel %vm13173_vm2, 0, %v5012_v53  ;;  %v12238_v45 = vld [vmem:[%s17819_s7 + $0x118] sm:$0xff]  }
 0x61a   : > { %v5019_v6 = vor.u32 %v5017_v58, %v5016_v63  ;;  %11746 = vmatpush3.bf16.msra.mxu1 %v12226_v39  ;;  %11790 = vmatpush3.bf16.msra.mxu0 %v12232_v33  ;;  %v15749_v31 = vor.u32 %v5070_v30, %v5066_v54  ;;  %v5077_v13 = vrot.slane %v5075_v5, 1  ;;  %v15756_v40 = vsel %vm14821_vm15, %v5046_v43, 0  ;;  %v12239_v54 = vld [vmem:[%s17819_s7 + $0x1e0] sm:$0xff]  }
 0x61b   : > { %v5021_v23 = vshrl.u32 %v4976_v29, 16  ;;  %v5024_v4 = vshll.u32 %v4976_v29, 16  ;;  %v4977_v32 = vpack.c.bf16 %v4824_v52, %v4824_v52  ;;  %11747 = vmatprep.subr.bf16.mxu1 %v12229_v44  ;;  %11791 = vmatprep.subr.bf16.mxu0 %v12235_v41  ;;  %v5117_v57 = vrot.slane %v15712_v20, 1  ;;  %v12244_v44 = vld [vmem:[%s17819_s7 + $0x1a8] sm:$0xff]   ;;  %v12241_v5 = vld [vmem:[%s17819_s7 + $0x160] sm:$0xff]  }
 0x61c   : > { %v15765_v18 = vor.u32 %v5077_v13, %v5073_v11  ;;  %v10734_v9 = vcombine.low %v15704_v49, %v15749_v31  ;;  %v5047_v1 = vsel %vm13173_vm2, 0, %v5019_v6  ;;  %v5118_v60 = vrot.slane %v15756_v40, 1 }
 0x61d   : > { %v5023_v36 = vrot.slane %v5021_v23, 7  ;;  %v5028_v55 = vshrl.u32 %v4977_v32, 16  ;;  %v5031_v37 = vshll.u32 %v4977_v32, 16  ;;  %v5055_v0 = vsel %vm14821_vm15, %v5047_v1, 0  ;;  %v12248_v23 = vld [vmem:[%s17819_s7 + $0x1b0] sm:$0xff]  }
 0x61e   : > { %11748 = vmatpush3.bf16.msra.mxu1 %v12230_v50  ;;  %v15776_v61 = vcombine.low %v15749_v31, %v15765_v18  ;;  %11792 = vmatpush3.bf16.msra.mxu0 %v12236_v56  ;;  %v10745_v26 = vcombine.low %v15756_v40, %v5055_v0  ;;  %v15784_v46 = vcombine.low %v5117_v57, %v5118_v60  ;;  %v5080_v17 = vshrl.u32 %v15712_v20, 16  ;;  %v12259_v31 = vld [vmem:[%s17819_s7 + $0x220] sm:$0xff]  }
 0x61f   : > { %v5026_v12 = vor.u32 %v5024_v4, %v5023_v36  ;;  %v5030_v3 = vrot.slane %v5028_v55, 7  ;;  %11749 = vmatprep.subr.bf16.mxu1 %v12233_v47  ;;  %11793 = vmatprep.subr.bf16.mxu0 %v12239_v54  ;;  %v5082_v19 = vshll.u32 %v15712_v20, 16  ;;  %v5087_v22 = vshrl.u32 %v15756_v40, 16 }
 0x620   : > { %5688 = vmatprep.mubr.bf16.mxu1 %v15776_v61  ;;  %5761 = vmatprep.mubr.bf16.mxu0 %v10745_v26  ;;  %v5089_v14 = vshll.u32 %v15756_v40, 16  ;;  %v15802_v58 = vcombine.low %v15712_v20, %v15756_v40  ;;  %v5119_v8 = vrot.slane %v5055_v0, 1  ;;  %v5094_v39 = vshrl.u32 %v5055_v0, 16  ;;  %v12251_v40 = vld [vmem:[%s17819_s7 + $0x1f8] sm:$0xff]  }
 0x621   : > { %v5033_v38 = vor.u32 %v5031_v37, %v5030_v3  ;;  %5689 = vmatmul.mubr.bf16.gmra.mrb[60].mxu1 %v15742_v25  ;;  %5762 = vmatmul.mubr.bf16.gmra.mrb[184].mxu0 %v15784_v46  ;;  %v5084_v33 = vrot.slane %v5082_v19, 1  ;;  %v5048_v53 = vsel %vm13173_vm2, 0, %v5026_v12  ;;  %v5096_v59 = vshll.u32 %v5055_v0, 16  ;;  %v12252_v26 = vld [vmem:[%s17819_s7 + $0x1b8] sm:$0xff]   ;;  %v12250_v3 = vld [vmem:[%s17819_s7 + $0x130] sm:$0xff]   ;;  %v12255_v19 = vld [vmem:[%s17819_s7 + $0x200] sm:$0xff]  }
 0x622   : > { %11750 = vmatpush3.bf16.msra.mxu1 %v12234_v2  ;;  %11794 = vmatpush3.bf16.msra.mxu0 %v12240_v34  ;;  %v5091_v20 = vrot.slane %v5089_v14, 1  ;;  %v5056_v41 = vsel %vm14821_vm15, %v5048_v53, 0  ;;  %v10735_v63 = vcombine.low %v5114_v10, %v5115_v48  ;;  %v15822_v30 = vcombine.low %v5116_v51, %v5117_v57  ;;  %v12247_v10 = vld [vmem:[%s17819_s7 + $0x1f0] sm:$0xff]   ;;  %v12245_v57 = vld [vmem:[%s17819_s7 + $0x168] sm:$0xff]  }
 0x623   : > { %11751 = vmatprep.subr.bf16.mxu1 %v12237_v15  ;;  %v15824_v11 = vor.u32 %v5084_v33, %v5080_v17  ;;  %11795 = vmatprep.subr.bf16.mxu0 %v12243_v42  ;;  %v5049_v29 = vsel %vm13173_vm2, 0, %v5033_v38  ;;  %v5120_v52 = vrot.slane %v5056_v41, 1  ;;  %v5098_v62 = vrot.slane %v5096_v59, 1  ;;  %v12249_v34 = vld [vmem:[%s17819_s7 + $0x170] sm:$0xff]   ;;  %v12254_v15 = vld [vmem:[%s17819_s7 + $0x138] sm:$0xff]  }
 0x624   : > { %v15831_v43 = vor.u32 %v5091_v20, %v5087_v22  ;;  %v15835_v27 = vsel %vm14821_vm15, %v5049_v29, 0  ;;  %v5101_v48 = vshrl.u32 %v5056_v41, 16  ;;  %v5103_v21 = vshll.u32 %v5056_v41, 16  ;;  %v12256_v22 = vld [vmem:[%s17819_s7 + $0x208] sm:$0xff]   ;;  %v12258_v42 = vld [vmem:[%s17819_s7 + $0x218] sm:$0xff]  }
 0x625   : > { %v10751_v51 = vcombine.low %v5056_v41, %v15835_v27  ;;  %v15841_v6 = vcombine.low %v5119_v8, %v5120_v52  ;;  %v15843_v50 = vor.u32 %v5098_v62, %v5094_v39  ;;  %v10748_v13 = vcombine.low %v5055_v0, %v5056_v41  ;;  %v12246_v0 = vld [vmem:[%s17819_s7 + $0x128] sm:$0xff]   ;;  %v12272_v20 = vld [vmem:[%s17821_s9 + $0x30] ss:$8 sps:$4 sm:$0xff]   ;;  %v12280_v29 = vld [vmem:[%s17821_s9 + $0x54] ss:$8 sps:$4 sm:$0xff]  }
 0x626   : > { %11752 = vmatpush3.bf16.msra.mxu1 %v12238_v45  ;;  %v10743_v56 = vcombine.low %v15824_v11, %v15831_v43  ;;  %11796 = vmatpush3.bf16.msra.mxu0 %v12244_v44  ;;  %v5105_v4 = vrot.slane %v5103_v21, 1  ;;  %v10740_v32 = vcombine.low %v15765_v18, %v15824_v11  ;;  %v10747_v47 = vcombine.low %v5118_v60, %v5119_v8  ;;  %v12262_v8 = vld [vmem:[%s17819_s7 + $0x238] sm:$0xff]   ;;  %v12263_v38 = vld [vmem:[%s17821_s9] ss:$8 sps:$4 sm:$0xff]   ;;  %v12265_v33 = vld [vmem:[%s17821_s9 + $0x4] ss:$8 sps:$4 sm:$0xff]  }
 0x627   : > { %11753 = vmatprep.subr.bf16.mxu1 %v12241_v5  ;;  %5769 = vmatprep.mubr.bf16.mxu0 %v10751_v51  ;;  %v5124_v54 = vshll.u32 %v15835_v27, 16  ;;  %v10746_v1 = vcombine.low %v15831_v43, %v15843_v50  ;;  %v5129_v36 = vrot.slane %v15835_v27, 1  ;;  %v5122_v18 = vshrl.u32 %v15835_v27, 16  ;;  %v12269_v53 = vld [vmem:[%s17821_s9 + $0x20] ss:$8 sps:$4 sm:$0xff]  }
 0x628   : > { %5696 = vmatprep.mubr.bf16.mxu1 %v10743_v56  ;;  %11797 = vmatprep.subr.bf16.mxu0 %v12247_v10  ;;  %v15864_v55 = vor.u32 %v5105_v4, %v5101_v48  ;;  %v10754_v14 = vcombine.low %v15835_v27, %v17961_v16  ;;  %v12271_v59 = vld [vmem:[%s17821_s9 + $0x24] ss:$8 sps:$4 sm:$0xff]   ;;  %v12274_v45 = vld [vmem:[%s17821_s9 + $0x34] ss:$8 sps:$4 sm:$0xff]   ;;  %v12278_v43 = vld [vmem:[%s17821_s9 + $0x50] ss:$8 sps:$4 sm:$0xff]  }
 0x629   : > { %5697 = vmatmul.mubr.bf16.gmra.mrb[64].mxu1 %v15802_v58  ;;  %5770 = vmatmul.mubr.bf16.gmra.mrb[188].mxu0 %v15841_v6  ;;  %v5126_v60 = vrot.slane %v5124_v54, 1  ;;  %v10753_v37 = vcombine.low %v5120_v52, %v5129_v36  ;;  %v10756_v39 = vcombine.low %v5129_v36, %v17959_v24  ;;  %v12283_v27 = vld [vmem:[%s17821_s9 + $0x64] ss:$8 sps:$4 sm:$0xff]   ;;  %v12281_v10 = vld [vmem:[%s17821_s9 + $0x60] ss:$8 sps:$4 sm:$0xff]  }
 0x62a   : > { %11754 = vmatpush3.bf16.msra.mxu1 %v12242_v35  ;;  %11798 = vmatpush3.bf16.msra.mxu0 %v12248_v23  ;;  %v10749_v2 = vcombine.low %v15843_v50, %v15864_v55  ;;  %v12286_v51 = vld [vmem:[%s17821_s9 + $0x74] ss:$8 sps:$4 sm:$0xff]  }
 0x62b   : > { %11755 = vmatprep.subr.bf16.mxu1 %v12245_v57  ;;  %5875 = vmatprep.mubr.bf16.mxu0 %v15776_v61  ;;  %v5127_v17 = vor.u32 %v5126_v60, %v5122_v18  ;;  %v12253_v61 = vld [vmem:[%s17819_s7 + $0x178] sm:$0xff]   ;;  %v12287_v60 = vld [vmem:[%s17821_s9 + $0x80] ss:$8 sps:$4 sm:$0xff]  }
 0x62c   : > { %5704 = vmatprep.mubr.bf16.mxu1 %v10749_v2  ;;  %11799 = vmatprep.subr.bf16.mxu0 %v12251_v40  ;;  %v12284_v57 = vld [vmem:[%s17821_s9 + $0x70] ss:$8 sps:$4 sm:$0xff]  }
 0x62d   : > { %v10752_v12 = vcombine.low %v15864_v55, %v5127_v17  ;;  %v10755_v49 = vcombine.low %v5127_v17, %v17959_v24  ;;  %v12289_v55 = vld [vmem:[%s17821_s9 + $0x84] ss:$8 sps:$4 sm:$0xff]  }
 0x62e   : > { %11756 = vmatpush3.bf16.msra.mxu1 %v12246_v0  ;;  %11800 = vmatpush3.bf16.msra.mxu0 %v12252_v26  ;;  %v12292_v26 = vld [vmem:[%s17821_s9 + $0x94] ss:$8 sps:$4 sm:$0xff]  }
 0x62f   : > { %11757 = vmatprep.subr.bf16.mxu1 %v12249_v34  ;;  %7309 = vmatprep.subr.bf16.mxu0 %v12265_v33 }
 0x631   : > { %5705 = vmatmul.mubr.bf16.gmra.mrb[68].mxu1 %v10748_v13  ;;  %5876 = vmatmul.mubr.bf16.vlgmr.msra.gmra.mrb[192].mxu0 %v15742_v25  ;;  %v12257_v25 = vld [vmem:[%s17819_s7 + $0x210] sm:$0xff]  }
 0x632   : > { %11758 = vmatpush3.bf16.msra.mxu1 %v12250_v3  ;;  %5810 = vmatprep.mubr.bf16.mxu1 %v10735_v63  ;;  %v12275_v63 = vld [vmem:[%s17821_s9 + $0x40] ss:$8 sps:$4 sm:$0xff]  }
 0x633   : > { %11759 = vmatprep.subr.bf16.mxu1 %v12253_v61  ;;  %5883 = vmatprep.mubr.bf16.mxu0 %v10743_v56 }
 0x634   : > { %7310 = vmatpush1.bf16.msra.mxu0 %v12263_v38 }
 0x636   : > { %11760 = vmatpush3.bf16.msra.mxu1 %v12254_v15 }
 0x637   : > { %11960 = vmatprep.subr.bf16.mxu1 %v12255_v19 }
 0x639   : > { %5811 = vmatmul.mubr.bf16.vlgmr.msra.gmra.mrb[72].mxu1 %v10734_v9  ;;  %5884 = vmatmul.mubr.bf16.gmra.mrb[196].mxu0 %v15802_v58  ;;  %v12260_v9 = vld [vmem:[%s17819_s7 + $0x228] sm:$0xff]   ;;  %v12261_v58 = vld [vmem:[%s17819_s7 + $0x230] sm:$0xff]  }
 0x63a   : > { %11961 = vmatpush3.bf16.msra.mxu1 %v12255_v19  ;;  %5818 = vmatprep.mubr.bf16.mxu1 %v15822_v30  ;;  %v12277_v30 = vld [vmem:[%s17821_s9 + $0x44] ss:$8 sps:$4 sm:$0xff]  }
 0x63b   : > { %11962 = vmatprep.subr.bf16.mxu1 %v12256_v22  ;;  %5891 = vmatprep.mubr.bf16.mxu0 %v10749_v2 }
 0x63e   : > { %11963 = vmatpush3.bf16.msra.mxu1 %v12256_v22 }
 0x63f   : > { %11964 = vmatprep.subr.bf16.mxu1 %v12257_v25 }
 0x641   : > { %5819 = vmatmul.mubr.bf16.gmra.mrb[76].mxu1 %v10740_v32  ;;  %5892 = vmatmul.mubr.bf16.gmra.mrb[200].mxu0 %v10748_v13 }
 0x642   : > { %11965 = vmatpush3.bf16.msra.mxu1 %v12257_v25  ;;  %5826 = vmatprep.mubr.bf16.mxu1 %v10747_v47  ;;  %v12290_v25 = vld [vmem:[%s17821_s9 + $0x90] ss:$8 sps:$4 sm:$0xff]  }
 0x643   : > { %11966 = vmatprep.subr.bf16.mxu1 %v12258_v42  ;;  %5899 = vmatprep.mubr.bf16.mxu0 %v10755_v49 }
 0x646   : > { %11967 = vmatpush3.bf16.msra.mxu1 %v12258_v42 }
 0x647   : > { %11968 = vmatprep.subr.bf16.mxu1 %v12259_v31 }
 0x649   : > { %5827 = vmatmul.mubr.bf16.gmra.mrb[80].mxu1 %v10746_v1  ;;  %5900 = vmatmul.mubr.bf16.gmra.mrb[204].mxu0 %v10754_v14 }
 0x64a   : > { %11969 = vmatpush3.bf16.msra.mxu1 %v12259_v31  ;;  %5834 = vmatprep.mubr.bf16.mxu1 %v10753_v37 }
 0x64b   : > { %11970 = vmatprep.subr.bf16.mxu1 %v12260_v9 }
 0x64e   : > { %11971 = vmatpush3.bf16.msra.mxu1 %v12260_v9  ;;  %v12295_v9 = vld [vmem:[%s17821_s9 + $0xa4] ss:$8 sps:$4 sm:$0xff]  }
 0x64f   : > { %11972 = vmatprep.subr.bf16.mxu1 %v12261_v58 }
 0x651   : > { %5835 = vmatmul.mubr.bf16.gmra.mrb[84].mxu1 %v10752_v12 }
 0x652   : > { %11973 = vmatpush3.bf16.msra.mxu1 %v12261_v58  ;;  %11976 = vmatprep.mubr.bf16.mxu1 %v15732_v28  ;;  %v12266_v28 = vld [vmem:[%s17821_s9 + $0x10] ss:$8 sps:$4 sm:$0xff]  }
 0x653   : > { %11974 = vmatprep.subr.bf16.mxu1 %v12262_v8 }
 0x656   : > { %11975 = vmatpush3.bf16.msra.mxu1 %v12262_v8  ;;  %v12293_v8 = vld [vmem:[%s17821_s9 + $0xa0] ss:$8 sps:$4 sm:$0xff]  }
 0x659   : > { %11977 = vmatmul.mubr.bf16.vlgmr.msra.gmra.mrb[88].mxu1 %v15784_v46  ;;  %v12268_v46 = vld [vmem:[%s17821_s9 + $0x14] ss:$8 sps:$4 sm:$0xff]  }
 0x65a   : > { %11980 = vmatprep.mubr.bf16.mxu1 %v15841_v6  ;;  %7311 = vmatprep.subr.bf16.mxu0 %v12268_v46  ;;  %v15983_v6 = vld [vmem:[%s17820_s8] ss:$0 sm:$0xff] }
 0x65b   : > { %7312 = vmatpush1.bf16.msra.mxu0 %v12266_v28  ;;  %v12298_v28 = vld [vmem:[%s17821_s9 + $0xb4] ss:$8 sps:$4 sm:$0xff]  }
 0x65c   : > { %7313 = vmatprep.subr.bf16.mxu0 %v12271_v59 }
 0x65f   : > { %7314 = vmatpush1.bf16.msra.mxu0 %v12269_v53 }
 0x660   : > { %7315 = vmatprep.subr.bf16.mxu0 %v12274_v45 }
 0x661   : > { %11981 = vmatmul.mubr.bf16.gmra.mrb[92].mxu1 %v10756_v39 }
 0x663   : > { %7316 = vmatpush1.bf16.msra.mxu0 %v12272_v20 }
 0x664   : > { %7317 = vmatprep.subr.bf16.mxu0 %v12277_v30  ;;  %v12296_v30 = vld [vmem:[%s17821_s9 + $0xb0] ss:$8 sps:$4 sm:$0xff]  }
 0x667   : > { %7318 = vmatpush1.bf16.msra.mxu0 %v12275_v63 }
 0x668   : > { %7319 = vmatprep.subr.bf16.mxu0 %v12280_v29 }
 0x66b   : > { %7320 = vmatpush1.bf16.msra.mxu0 %v12278_v43 }
 0x66c   : > { %7321 = vmatprep.subr.bf16.mxu0 %v12283_v27  ;;  %v12299_v27 = vld [vmem:[%s17821_s9 + $0xc0] ss:$8 sps:$4 sm:$0xff]  }
 0x66f   : > { %7322 = vmatpush1.bf16.msra.mxu0 %v12281_v10 }
 0x670   : > { %7323 = vmatprep.subr.bf16.mxu0 %v12286_v51  ;;  %v12304_v51 = vld [vmem:[%s17821_s9 + $0xd4] ss:$8 sps:$4 sm:$0xff]  }
 0x673   : > { %7324 = vmatpush1.bf16.msra.mxu0 %v12284_v57  ;;  %v12302_v57 = vld [vmem:[%s17821_s9 + $0xd0] ss:$8 sps:$4 sm:$0xff]  }
 0x674   : > { %7325 = vmatprep.subr.bf16.mxu0 %v12289_v55  ;;  %v12307_v55 = vld [vmem:[%s17821_s9 + $0xe4] ss:$8 sps:$4 sm:$0xff]  }
 0x677   : > { %7326 = vmatpush1.bf16.msra.mxu0 %v12287_v60 }
 0x678   : > { %7327 = vmatprep.subr.bf16.mxu0 %v12292_v26 }
 0x67b   : > { %7328 = vmatpush1.bf16.msra.mxu0 %v12290_v25 }
 0x67c   : > { %7329 = vmatprep.subr.bf16.mxu0 %v12295_v9 }
 0x67f   : > { %7330 = vmatpush1.bf16.msra.mxu0 %v12293_v8 }
 0x680   : > { %7331 = vmatprep.subr.bf16.mxu0 %v12298_v28 }
 0x683   : > { %7332 = vmatpush1.bf16.msra.mxu0 %v12296_v30 }
 0x6e3   : > { %v11721_v44 = vpop.f32.mrb[176].mxu0 }
 0x6e4   : > { %v11722_v41 = vpop.f32.mrb[177].mxu0 }
 0x6e5   : > { %v11723_v11 = vadd.f32 %v11722_v41, %v11721_v44  ;;  %v11724_v5 = vpop.f32.mrb[178].mxu0 }
 0x6e6   : > { %v11725_v52 = vpop.f32.mrb[179].mxu0 }
 0x6e7   : > { %v11726_v62 = vadd.f32 %v11725_v52, %v11724_v5  ;;  %v12301_v52 = vld [vmem:[%s17821_s9 + $0xc4] ss:$8 sps:$4 sm:$0xff]  }
 0x6e8   : > { %7333 = vmatprep.subr.bf16.mxu0 %v12301_v52 }
 0x6e9   : > { %7334 = vmatpush1.bf16.msra.mxu0 %v12299_v27 }
 0x6ea   : > { %7335 = vmatprep.subr.bf16.mxu0 %v12304_v51 }
 0x6ec   : > { %v11681_v48 = vpop.f32.mrb[56].mxu1  ;;  %v11727_v21 = vpop.f32.mrb[180].mxu0 }
 0x6ed   : > { %v11682_v50 = vpop.f32.mrb[57].mxu1  ;;  %v11728_v13 = vpop.f32.mrb[181].mxu0  ;;  %7336 = vmatpush1.bf16.msra.mxu0 %v12302_v57 }
 0x6ee   : > { %v11683_v56 = vadd.f32 %v11682_v50, %v11681_v48  ;;  %v11684_v35 = vpop.f32.mrb[58].mxu1  ;;  %v11729_v23 = vadd.f32 %v11728_v13, %v11727_v21  ;;  %v11730_v4 = vpop.f32.mrb[182].mxu0  ;;  %7337 = vmatprep.subr.bf16.mxu0 %v12307_v55 }
 0x6ef   : > { %v11685_v32 = vpop.f32.mrb[59].mxu1  ;;  %v11731_v47 = vpop.f32.mrb[183].mxu0 }
 0x6f0   : > { %v5683_v54 = vadd.f32 %v11683_v56, %v15983_v6  ;;  %v11686_v1 = vadd.f32 %v11685_v32, %v11684_v35  ;;  %v11732_v36 = vadd.f32 %v11731_v47, %v11730_v4 }
 0x6f2   : > { %v5686_v40 = vadd.f32 %v11686_v1, %v15983_v6  ;;  %v15993_v18 = vadd.f32 %v11723_v11, %v5683_v54 }
 0x6f4   : > { %v11687_v37 = vpop.f32.mrb[60].mxu1  ;;  %v11733_v0 = vpop.f32.mrb[184].mxu0  ;;  %v15998_v2 = vadd.f32 %v11726_v62, %v5686_v40 }
 0x6f5   : > { %v11688_v34 = vpop.f32.mrb[61].mxu1  ;;  %v11734_v17 = vpop.f32.mrb[185].mxu0 }
 0x6f6   : > { %v11689_v12 = vadd.f32 %v11688_v34, %v11687_v37  ;;  %v11690_v3 = vpop.f32.mrb[62].mxu1  ;;  %v11735_v61 = vadd.f32 %v11734_v17, %v11733_v0  ;;  %v11736_v15 = vpop.f32.mrb[186].mxu0  ;;  %v12305_v37 = vld [vmem:[%s17821_s9 + $0xe0] ss:$8 sps:$4 sm:$0xff]   ;;  %v12310_v17 = vld [vmem:[%s17821_s9 + $0xf4] ss:$8 sps:$4 sm:$0xff]  }
 0x6f7   : > { %v11691_v19 = vpop.f32.mrb[63].mxu1  ;;  %v11737_v22 = vpop.f32.mrb[187].mxu0  ;;  %7338 = vmatpush1.bf16.msra.mxu0 %v12305_v37 }
 0x6f8   : > { %v5691_v42 = vadd.f32 %v11689_v12, %v15983_v6  ;;  %v11692_v49 = vadd.f32 %v11691_v19, %v11690_v3  ;;  %v11738_v31 = vadd.f32 %v11737_v22, %v11736_v15  ;;  %7339 = vmatprep.subr.bf16.mxu0 %v12310_v17 }
 0x6fa   : > { %v5694_v14 = vadd.f32 %v11692_v49, %v15983_v6  ;;  %v16011_v58 = vadd.f32 %v11729_v23, %v5691_v42  ;;  %v12308_v42 = vld [vmem:[%s17821_s9 + $0xf0] ss:$8 sps:$4 sm:$0xff]  }
 0x6fb   : > { %7340 = vmatpush1.bf16.msra.mxu0 %v12308_v42 }
 0x6fc   : > { %v11693_v39 = vpop.f32.mrb[64].mxu1  ;;  %v11739_v38 = vpop.f32.mrb[188].mxu0  ;;  %v16016_v33 = vadd.f32 %v11732_v36, %v5694_v14  ;;  %v12313_v14 = vld [vmem:[%s17821_s9 + $0x104] ss:$8 sps:$4 sm:$0xff]  }
 0x6fd   : > { %v11694_v46 = vpop.f32.mrb[65].mxu1  ;;  %v11740_v53 = vpop.f32.mrb[189].mxu0  ;;  %7352 = vmatprep.subr.bf16.mxu0 %v12313_v14  ;;  %v13010_v14 = vmov 1983009808  }
 0x6fe   : > { %v11695_v59 = vadd.f32 %v11694_v46, %v11693_v39  ;;  %v11696_v45 = vpop.f32.mrb[66].mxu1  ;;  %v11741_v20 = vadd.f32 %v11740_v53, %v11739_v38  ;;  %v11742_v44 = vpop.f32.mrb[190].mxu0 }
 0x6ff   : > { %v11697_v41 = vpop.f32.mrb[67].mxu1  ;;  %v11743_v63 = vpop.f32.mrb[191].mxu0 }
 0x700   : > { %v5699_v11 = vadd.f32 %v11695_v59, %v15983_v6  ;;  %v11698_v5 = vadd.f32 %v11697_v41, %v11696_v45  ;;  %v11744_v29 = vadd.f32 %v11743_v63, %v11742_v44 }
 0x702   : > { %v5702_v62 = vadd.f32 %v11698_v5, %v15983_v6  ;;  %v16029_v43 = vadd.f32 %v11735_v61, %v5699_v11 }
 0x704   : > { %v11699_v10 = vpop.f32.mrb[68].mxu1  ;;  %v11801_v48 = vpop.f32.mrb[192].mxu0  ;;  %v16034_v21 = vadd.f32 %v11738_v31, %v5702_v62 }
 0x705   : > { %v11700_v50 = vpop.f32.mrb[69].mxu1  ;;  %v11802_v13 = vpop.f32.mrb[193].mxu0 }
 0x706   : > { %v11701_v56 = vadd.f32 %v11700_v50, %v11699_v10  ;;  %v11702_v35 = vpop.f32.mrb[70].mxu1  ;;  %v11803_v23 = vadd.f32 %v11802_v13, %v11801_v48  ;;  %v11804_v4 = vpop.f32.mrb[194].mxu0 }
 0x707   : > { %v11703_v32 = vpop.f32.mrb[71].mxu1  ;;  %v11805_v47 = vpop.f32.mrb[195].mxu0 }
 0x708   : > { %v5707_v54 = vadd.f32 %v11701_v56, %v15983_v6  ;;  %v11704_v1 = vadd.f32 %v11703_v32, %v11702_v35  ;;  %v11806_v36 = vadd.f32 %v11805_v47, %v11804_v4 }
 0x70a   : > { %v5710_v40 = vadd.f32 %v11704_v1, %v15983_v6  ;;  %v16047_v60 = vadd.f32 %v11741_v20, %v5707_v54 }
 0x70c   : > { %v11761_v0 = vpop.f32.mrb[72].mxu1  ;;  %v11807_v26 = vpop.f32.mrb[196].mxu0  ;;  %v5775_v34 = vadd.f32 %v11744_v29, %v5710_v40 }
 0x70d   : > { %v11762_v12 = vpop.f32.mrb[73].mxu1  ;;  %v11808_v3 = vpop.f32.mrb[197].mxu0 }
 0x70e   : > { %v11763_v61 = vadd.f32 %v11762_v12, %v11761_v0  ;;  %v11764_v15 = vpop.f32.mrb[74].mxu1  ;;  %v11809_v6 = vadd.f32 %v11808_v3, %v11807_v26  ;;  %v11810_v19 = vpop.f32.mrb[198].mxu0 }
 0x70f   : > { %v11765_v22 = vpop.f32.mrb[75].mxu1  ;;  %v11811_v25 = vpop.f32.mrb[199].mxu0 }
 0x710   : > { %v5813_v49 = vadd.f32 %v11763_v61, %v15993_v18  ;;  %v11766_v31 = vadd.f32 %v11765_v22, %v11764_v15  ;;  %v11812_v9 = vadd.f32 %v11811_v25, %v11810_v19 }
 0x712   : > { %v5816_v8 = vadd.f32 %v11766_v31, %v15998_v2  ;;  %v5878_v39 = vadd.f32 %v11803_v23, %v5813_v49 }
 0x714   : > { %v11767_v38 = vpop.f32.mrb[76].mxu1  ;;  %v11813_v28 = vpop.f32.mrb[200].mxu0  ;;  %v5881_v46 = vadd.f32 %v11806_v36, %v5816_v8  ;;  %v16076_v8 = vunpack.c.l.s4 %v13010_v14 }
 0x715   : > { %v11768_v53 = vpop.f32.mrb[77].mxu1  ;;  %v11814_v59 = vpop.f32.mrb[201].mxu0 }
 0x716   : > { %v11769_v45 = vadd.f32 %v11768_v53, %v11767_v38  ;;  %v11770_v20 = vpop.f32.mrb[78].mxu1  ;;  %v11815_v18 = vadd.f32 %v11814_v59, %v11813_v28  ;;  %v11816_v44 = vpop.f32.mrb[202].mxu0  ;;  %v6345_v38 = vlaneseq }
 0x717   : > { %v11771_v41 = vpop.f32.mrb[79].mxu1  ;;  %v11817_v63 = vpop.f32.mrb[203].mxu0 }
 0x718   : > { %v5821_v30 = vadd.f32 %v11769_v45, %v16011_v58  ;;  %v11772_v11 = vadd.f32 %v11771_v41, %v11770_v20  ;;  %v11818_v5 = vadd.f32 %v11817_v63, %v11816_v44 }
 0x71a   : > { %v5824_v2 = vadd.f32 %v11772_v11, %v16016_v33  ;;  %v5886_v29 = vadd.f32 %v11809_v6, %v5821_v30 }
 0x71c   : > { %v11773_v52 = vpop.f32.mrb[80].mxu1  ;;  %v11819_v62 = vpop.f32.mrb[204].mxu0  ;;  %v5889_v27 = vadd.f32 %v11812_v9, %v5824_v2 }
 0x71d   : > { %v11774_v10 = vpop.f32.mrb[81].mxu1  ;;  %v11820_v48 = vpop.f32.mrb[205].mxu0 }
 0x71e   : > { %v11775_v51 = vadd.f32 %v11774_v10, %v11773_v52  ;;  %v11776_v50 = vpop.f32.mrb[82].mxu1  ;;  %v11821_v13 = vadd.f32 %v11820_v48, %v11819_v62  ;;  %v11822_v56 = vpop.f32.mrb[206].mxu0 }
 0x71f   : > { %v11777_v35 = vpop.f32.mrb[83].mxu1  ;;  %v11823_v23 = vpop.f32.mrb[207].mxu0 }
 0x720   : > { %v5829_v4 = vadd.f32 %v11775_v51, %v16029_v43  ;;  %v11778_v32 = vadd.f32 %v11777_v35, %v11776_v50  ;;  %v11824_v58 = vadd.f32 %v11823_v23, %v11822_v56 }
 0x722   : > { %v5832_v47 = vadd.f32 %v11778_v32, %v16034_v21  ;;  %v16067_v57 = vadd.f32 %v11815_v18, %v5829_v4 }
 0x724   : > { %v11779_v33 = vpop.f32.mrb[84].mxu1  ;;  %v16069_v54 = vadd.f32 %v11818_v5, %v5832_v47 }
 0x725   : > { %v11780_v1 = vpop.f32.mrb[85].mxu1 }
 0x726   : > { %v11781_v36 = vadd.f32 %v11780_v1, %v11779_v33  ;;  %v11782_v55 = vpop.f32.mrb[86].mxu1 }
 0x727   : > { %v11783_v40 = vpop.f32.mrb[87].mxu1 }
 0x728   : > { %v5837_v37 = vadd.f32 %v11781_v36, %v16047_v60  ;;  %v11784_v0 = vadd.f32 %v11783_v40, %v11782_v55 }
 0x72a   : > { %v5840_v26 = vadd.f32 %v11784_v0, %v5775_v34  ;;  %v16072_v17 = vadd.f32 %v11821_v13, %v5837_v37 }
 0x72c   : > { %v11978_v43 = vpop.f32.mrb[88].mxu1  ;;  %v16074_v12 = vadd.f32 %v11824_v58, %v5840_v26 }
 0x72d   : > { %v5951_v3 = vadd.f32 %v11978_v43, %v5886_v29  ;;  %v5942_v21 = vpop.f32.mrb[89].mxu1 }
 0x72e   : > { %v5943_v61 = vadd.f32 %v5942_v21, %v5878_v39  ;;  %v11979_v15 = vpop.f32.mrb[90].mxu1 }
 0x72f   : > { %v5954_v6 = vadd.f32 %v11979_v15, %v5889_v27  ;;  %v5945_v19 = vpop.f32.mrb[91].mxu1  ;;  %v5975_v25 = vmax.f32 %v5951_v3, 0.0 }
 0x730   : > { %v5946_v22 = vadd.f32 %v5945_v19, %v5881_v46  ;;  %v5973_v49 = vmax.f32 %v5943_v61, 0.0 }
 0x731   : > { %v5976_v42 = vmax.f32 %v5954_v6, 0.0 }
 0x732   : > { %v5974_v60 = vmax.f32 %v5946_v22, 0.0 }
 0x733   : > { %v5982_v34 = vmax.f32 %v5975_v25, %v5976_v42 }
 0x734   : > { %v5981_v31 = vmax.f32 %v5973_v49, %v5974_v60  ;;  %v11982_v9 = vpop.f32.mrb[92].mxu1 }
 0x735   : > { %v5992_v39 = vsel %vm3896_vm11, %v5982_v34, -inf  ;;  %v6021_v28 = vsel %vm6013_vm3, %v5982_v34, -inf  ;;  %v6050_v46 = vsel %vm6042_vm5, %v5982_v34, -inf  ;;  %v6079_v53 = vsel %vm6071_vm6, %v5982_v34, -inf  ;;  %v5958_v59 = vpop.f32.mrb[93].mxu1 }
 0x736   : > { %v5993_v45 = vrot.slane %v5992_v39, 4  ;;  %v6022_v20 = vrot.slane %v6021_v28, 4  ;;  %v6051_v18 = vrot.slane %v6050_v46, 4  ;;  %v6080_v44 = vrot.slane %v6079_v53, 4  ;;  %v11983_v41 = vpop.f32.mrb[94].mxu1 }
 0x737   : > { %v5985_v63 = vsel %vm3896_vm11, %v5981_v31, -inf  ;;  %v6014_v30 = vsel %vm6013_vm3, %v5981_v31, -inf  ;;  %v6043_v11 = vsel %vm6042_vm5, %v5981_v31, -inf  ;;  %v6072_v5 = vsel %vm6071_vm6, %v5981_v31, -inf  ;;  %v5961_v2 = vpop.f32.mrb[95].mxu1 }
 0x738   : > { %v5994_v29 = vmax.f32 %v5992_v39, %v5993_v45  ;;  %v6023_v52 = vmax.f32 %v6021_v28, %v6022_v20  ;;  %v6052_v62 = vmax.f32 %v6050_v46, %v6051_v18  ;;  %v6081_v27 = vmax.f32 %v6079_v53, %v6080_v44 }
 0x739   : > { %v5986_v10 = vrot.slane %v5985_v63, 4  ;;  %v6015_v48 = vrot.slane %v6014_v30, 4  ;;  %v6044_v51 = vrot.slane %v6043_v11, 4  ;;  %v6073_v50 = vrot.slane %v6072_v5, 4 }
 0x73a   : > { %v5995_v13 = vrot.slane %v5994_v29, 2  ;;  %v6024_v56 = vrot.slane %v6023_v52, 2  ;;  %v6053_v35 = vrot.slane %v6052_v62, 2  ;;  %v6082_v23 = vrot.slane %v6081_v27, 2 }
 0x73b   : > { %v5987_v4 = vmax.f32 %v5985_v63, %v5986_v10  ;;  %v6016_v32 = vmax.f32 %v6014_v30, %v6015_v48  ;;  %v6045_v58 = vmax.f32 %v6043_v11, %v6044_v51  ;;  %v6074_v47 = vmax.f32 %v6072_v5, %v6073_v50 }
 0x73c   : > { %v5996_v33 = vmax.f32 %v5994_v29, %v5995_v13  ;;  %v6025_v1 = vmax.f32 %v6023_v52, %v6024_v56  ;;  %v6054_v36 = vmax.f32 %v6052_v62, %v6053_v35  ;;  %v6083_v55 = vmax.f32 %v6081_v27, %v6082_v23 }
 0x73d   : > { %v5988_v40 = vrot.slane %v5987_v4, 2  ;;  %v6017_v37 = vrot.slane %v6016_v32, 2  ;;  %v6046_v0 = vrot.slane %v6045_v58, 2  ;;  %v6075_v26 = vrot.slane %v6074_v47, 2 }
 0x73e   : > { %v5997_v43 = vrot.slane %v5996_v33, 1  ;;  %v6026_v3 = vrot.slane %v6025_v1, 1  ;;  %v6055_v21 = vrot.slane %v6054_v36, 1  ;;  %v6084_v61 = vrot.slane %v6083_v55, 1 }
 0x73f   : > { %v5989_v15 = vmax.f32 %v5987_v4, %v5988_v40  ;;  %v6018_v6 = vmax.f32 %v6016_v32, %v6017_v37  ;;  %v6047_v19 = vmax.f32 %v6045_v58, %v6046_v0  ;;  %v6076_v22 = vmax.f32 %v6074_v47, %v6075_v26 }
 0x740   : > { %v5998_v25 = vmax.f32 %v5996_v33, %v5997_v43  ;;  %v6027_v42 = vmax.f32 %v6025_v1, %v6026_v3  ;;  %v6056_v49 = vmax.f32 %v6054_v36, %v6055_v21  ;;  %v6085_v60 = vmax.f32 %v6083_v55, %v6084_v61 }
 0x741   : > { %v5990_v34 = vrot.slane %v5989_v15, 1  ;;  %v6019_v31 = vrot.slane %v6018_v6, 1  ;;  %v6048_v14 = vrot.slane %v6047_v19, 1  ;;  %v6077_v39 = vrot.slane %v6076_v22, 1 }
 0x742   : > { %v6101_v28 = vsel %vm744_vm0, %v5998_v25, %v6027_v42  ;;  %v5967_v46 = vadd.f32 %v11982_v9, %v16072_v17  ;;  %v5959_v53 = vadd.f32 %v5958_v59, %v16067_v57  ;;  %v5970_v45 = vadd.f32 %v11983_v41, %v16074_v12 }
 0x743   : > { %v6105_v20 = vsel %vm3896_vm11, %v6101_v28, %v6056_v49  ;;  %v5991_v18 = vmax.f32 %v5989_v15, %v5990_v34  ;;  %v6020_v44 = vmax.f32 %v6018_v6, %v6019_v31  ;;  %v6049_v63 = vmax.f32 %v6047_v19, %v6048_v14 }
 0x744   : > { %v6109_v30 = vsel %vm3905_vm12, %v6105_v20, %v6085_v60  ;;  %v6078_v11 = vmax.f32 %v6076_v22, %v6077_v39  ;;  %v5979_v5 = vmax.f32 %v5967_v46, 0.0  ;;  %v5980_v62 = vmax.f32 %v5970_v45, 0.0 }
 0x745   : > { %v6258_v29 = vpack.c.bf16 %v6109_v30, %v6109_v30  ;;  %v6100_v52 = vsel %vm744_vm0, %v5991_v18, %v6020_v44  ;;  %v5962_v27 = vadd.f32 %v5961_v2, %v16069_v54  ;;  %v16096_v57 = vshrl.u32 %v6345_v38, 7 }
 0x746   : > { %v6104_v17 = vsel %vm3896_vm11, %v6100_v52, %v6049_v63  ;;  %v5984_v59 = vmax.f32 %v5979_v5, %v5980_v62  ;;  %v6344_v41 = vunpack.c.0.s8 %v16076_v8  ;;  %v5977_v51 = vmax.f32 %v5959_v53, 0.0 }
 0x747   : > { %v6269_v12 = vshrl.u32 %v6258_v29, 16  ;;  %v6108_v9 = vsel %vm3905_vm12, %v6104_v17, %v6078_v11  ;;  %v6272_v10 = vshll.u32 %v6258_v29, 16  ;;  %v5978_v50 = vmax.f32 %v5962_v27, 0.0 }
 0x748   : > { %v6257_v48 = vpack.c.bf16 %v6108_v9, %v6108_v9  ;;  %v6006_v56 = vsel %vm3896_vm11, %v5984_v59, -inf  ;;  %v6035_v54 = vsel %vm6013_vm3, %v5984_v59, -inf  ;;  %v6064_v2 = vsel %vm6042_vm5, %v5984_v59, -inf }
 0x749   : > { %v6271_v13 = vrot.slane %v6269_v12, 7  ;;  %v6007_v23 = vrot.slane %v6006_v56, 4  ;;  %v6036_v4 = vrot.slane %v6035_v54, 4  ;;  %v6065_v58 = vrot.slane %v6064_v2, 4 }
 0x74a   : > { %v6262_v35 = vshrl.u32 %v6257_v48, 16  ;;  %v6265_v38 = vshll.u32 %v6257_v48, 16  ;;  %v6093_v47 = vsel %vm6071_vm6, %v5984_v59, -inf  ;;  %v5983_v33 = vmax.f32 %v5977_v51, %v5978_v50 }
 0x74b   : > { %v16103_v32 = vor.u32 %v6272_v10, %v6271_v13  ;;  %v6008_v1 = vmax.f32 %v6006_v56, %v6007_v23  ;;  %v6037_v36 = vmax.f32 %v6035_v54, %v6036_v4  ;;  %v6094_v55 = vrot.slane %v6093_v47, 4 }
 0x74c   : > { %v6264_v40 = vrot.slane %v6262_v35, 7  ;;  %v6066_v37 = vmax.f32 %v6064_v2, %v6065_v58  ;;  %v5999_v0 = vsel %vm3896_vm11, %v5983_v33, -inf  ;;  %v6028_v26 = vsel %vm6013_vm3, %v5983_v33, -inf }
 0x74d   : > { %v6057_v43 = vsel %vm6042_vm5, %v5983_v33, -inf  ;;  %v6009_v3 = vrot.slane %v6008_v1, 2  ;;  %v6038_v21 = vrot.slane %v6037_v36, 2  ;;  %v6095_v61 = vmax.f32 %v6093_v47, %v6094_v55 }
 0x74e   : > { %v6000_v15 = vrot.slane %v5999_v0, 4  ;;  %v6067_v6 = vrot.slane %v6066_v37, 2  ;;  %v6029_v19 = vrot.slane %v6028_v26, 4  ;;  %v6058_v22 = vrot.slane %v6057_v43, 4 }
 0x74f   : > { %v6086_v25 = vsel %vm6071_vm6, %v5983_v33, -inf  ;;  %v6010_v42 = vmax.f32 %v6008_v1, %v6009_v3  ;;  %v6039_v49 = vmax.f32 %v6037_v36, %v6038_v21  ;;  %v6096_v60 = vrot.slane %v6095_v61, 2 }
 0x750   : > { %v6001_v34 = vmax.f32 %v5999_v0, %v6000_v15  ;;  %v6068_v31 = vmax.f32 %v6066_v37, %v6067_v6  ;;  %v6030_v14 = vmax.f32 %v6028_v26, %v6029_v19  ;;  %v6059_v39 = vmax.f32 %v6057_v43, %v6058_v22 }
 0x751   : > { %v6087_v28 = vrot.slane %v6086_v25, 4  ;;  %v6011_v46 = vrot.slane %v6010_v42, 1  ;;  %v6040_v53 = vrot.slane %v6039_v49, 1  ;;  %v6097_v45 = vmax.f32 %v6095_v61, %v6096_v60 }
 0x752   : > { %v6002_v20 = vrot.slane %v6001_v34, 2  ;;  %v6069_v18 = vrot.slane %v6068_v31, 1  ;;  %v6031_v44 = vrot.slane %v6030_v14, 2  ;;  %v6060_v63 = vrot.slane %v6059_v39, 2 }
 0x753   : > { %v6088_v30 = vmax.f32 %v6086_v25, %v6087_v28  ;;  %v6012_v11 = vmax.f32 %v6010_v42, %v6011_v46  ;;  %v6041_v5 = vmax.f32 %v6039_v49, %v6040_v53  ;;  %v6098_v29 = vrot.slane %v6097_v45, 1 }
 0x754   : > { %v6003_v52 = vmax.f32 %v6001_v34, %v6002_v20  ;;  %v6070_v62 = vmax.f32 %v6068_v31, %v6069_v18  ;;  %v6032_v27 = vmax.f32 %v6030_v14, %v6031_v44  ;;  %v6061_v17 = vmax.f32 %v6059_v39, %v6060_v63 }
 0x755   : > { %v6089_v12 = vrot.slane %v6088_v30, 2  ;;  %v6099_v9 = vmax.f32 %v6097_v45, %v6098_v29  ;;  %v6103_v59 = vsel %vm744_vm0, %v6012_v11, %v6041_v5  ;;  %v6267_v48 = vor.u32 %v6265_v38, %v6264_v40 }
 0x756   : > { %v6004_v10 = vrot.slane %v6003_v52, 1  ;;  %v6107_v51 = vsel %vm3896_vm11, %v6103_v59, %v6070_v62  ;;  %v6033_v50 = vrot.slane %v6032_v27, 1  ;;  %v6062_v13 = vrot.slane %v6061_v17, 1 }
 0x757   : > { %v6090_v56 = vmax.f32 %v6088_v30, %v6089_v12  ;;  %v6111_v2 = vsel %vm3905_vm12, %v6107_v51, %v6099_v9  ;;  %v6293_v23 = vsel %vm13173_vm2, 0, %v6267_v48  ;;  %v6294_v38 = vsel %vm13173_vm2, 0, %v16103_v32 }
 0x758   : > { %v6005_v35 = vmax.f32 %v6003_v52, %v6004_v10  ;;  %v6260_v4 = vpack.c.bf16 %v6111_v2, %v6111_v2  ;;  %v6034_v58 = vmax.f32 %v6032_v27, %v6033_v50  ;;  %v6063_v47 = vmax.f32 %v6061_v17, %v6062_v13 }
 0x759   : > { %v6091_v33 = vrot.slane %v6090_v56, 1  ;;  %v16126_v1 = vsel %vm16114_vm7, %v6293_v23, 0  ;;  %v16130_v36 = vsel %vm16114_vm7, %v6294_v38, 0  ;;  %v16138_v43 = vsub.s32 %v6344_v41, %v16096_v57 }
 0x75a   : > { %v6283_v55 = vshrl.u32 %v6260_v4, 16  ;;  %v6102_v37 = vsel %vm744_vm0, %v6005_v35, %v6034_v58  ;;  %v6286_v0 = vshll.u32 %v6260_v4, 16  ;;  %v6307_v32 = vshll.u32 %v16126_v1, 16 }
 0x75b   : > { %v6092_v40 = vmax.f32 %v6090_v56, %v6091_v33  ;;  %v6106_v26 = vsel %vm3896_vm11, %v6102_v37, %v6063_v47  ;;  %v6314_v21 = vshll.u32 %v16130_v36, 16  ;;  %v6328_v15 = vrot.slane %v16126_v1, 1 }
 0x75c   : > { %v6285_v61 = vrot.slane %v6283_v55, 7  ;;  %v6305_v19 = vshrl.u32 %v16126_v1, 16  ;;  %v6309_v22 = vrot.slane %v6307_v32, 1  ;;  %v6341_v25 = vcombine.low %v17959_v24, %v16126_v1 }
 0x75d   : > { %v6110_v3 = vsel %vm3905_vm12, %v6106_v26, %v6092_v40  ;;  %v6312_v42 = vshrl.u32 %v16130_v36, 16  ;;  %v6316_v49 = vrot.slane %v6314_v21, 1  ;;  %v6382_v41 = vcombine.low %v6328_v15, %v16130_v36 }
 0x75e   : > { %v6259_v6 = vpack.c.bf16 %v6110_v3, %v6110_v3  ;;  %v6288_v8 = vor.u32 %v6286_v0, %v6285_v61  ;;  %v6310_v34 = vor.u32 %v6309_v22, %v6305_v19  ;;  %v6340_v31 = vcombine.low %v17961_v16, %v17959_v24 }
 0x75f   : > { %v6317_v14 = vor.u32 %v6316_v49, %v6312_v42  ;;  %v6355_v28 = vrot.slane %v6341_v25, %v16138_v43  ;;  %v6396_v46 = vrot.slane %v6382_v41, %v16138_v43  ;;  %v6329_v44 = vrot.slane %v16130_v36, 1 }
 0x760   : > { %v6276_v60 = vshrl.u32 %v6259_v6, 16  ;;  %v6296_v39 = vsel %vm13173_vm2, 0, %v6288_v8  ;;  %v6279_v45 = vshll.u32 %v6259_v6, 16  ;;  %v6357_v18 = vcombine.low %v6310_v34, %v6328_v15 }
 0x761   : > { %v6303_v20 = vsel %vm16114_vm7, %v6296_v39, 0  ;;  %v10830_v63 = vcombine.low %v6355_v28, %v6396_v46  ;;  %v6398_v27 = vcombine.low %v6317_v14, %v6329_v44  ;;  %v6348_v12 = vrot.slane %v6340_v31, %v16138_v43 }
 0x762   : > { %v6278_v53 = vrot.slane %v6276_v60, 7  ;;  %v6334_v30 = vshll.u32 %v6303_v20, 16  ;;  %v6339_v5 = vrot.slane %v6303_v20, 1  ;;  %v6332_v29 = vshrl.u32 %v6303_v20, 16 }
 0x763   : > { %v6365_v62 = vrot.slane %v6357_v18, %v16138_v43  ;;  %v6479_v59 = vrot.slane %v17959_v24, %v16138_v43  ;;  %v6381_v48 = vcombine.low %v16126_v1, %v6310_v34  ;;  %v6406_v50 = vrot.slane %v6398_v27, %v16138_v43 }
 0x764   : > { %v6281_v11 = vor.u32 %v6279_v45, %v6278_v53  ;;  %v6336_v52 = vrot.slane %v6334_v30, 1  ;;  %v6454_v9 = vrot.slane %v6339_v5, %v16138_v43  ;;  %v6380_v35 = vrot.slane %v6329_v44, %v16138_v43 }
 0x765   : > { %v10833_v4 = vcombine.low %v6365_v62, %v6406_v50  ;;  %v6358_v37 = vcombine.low %v16130_v36, %v6317_v14  ;;  %v6389_v1 = vrot.slane %v6381_v48, %v16138_v43  ;;  %v16180_v8 = vrot.slane %v10830_v63, %v16138_v43  ;;  %v12325_v48 = vld [vmem:[%s17821_s9 + $0x144] ss:$8 sps:$4 sm:$0xff]   ;;  %v12328_v50 = vld [vmem:[%s17821_s9 + $0x154] ss:$8 sps:$4 sm:$0xff]  }
 0x766   : > { %v6295_v17 = vsel %vm13173_vm2, 0, %v6281_v11  ;;  %v6337_v51 = vor.u32 %v6336_v52, %v6332_v29  ;;  %v6564_v40 = vcombine.low %v6454_v9, %v6479_v59  ;;  %v12311_v11 = vld [vmem:[%s17821_s9 + $0x100] ss:$8 sps:$4 sm:$0xff]   ;;  %v12316_v52 = vld [vmem:[%s17821_s9 + $0x114] ss:$8 sps:$4 sm:$0xff]  }
 0x767   : > { %v6302_v10 = vsel %vm16114_vm7, %v6295_v17, 0  ;;  %v6372_v42 = vrot.slane %v6358_v37, %v16138_v43  ;;  %v10829_v49 = vcombine.low %v6348_v12, %v6389_v1  ;;  %v16201_v18 = vrot.slane %v10833_v4, %v16138_v43  ;;  %v12314_v17 = vld [vmem:[%s17821_s9 + $0x110] ss:$8 sps:$4 sm:$0xff]   ;;  %v12317_v9 = vld [vmem:[%s17821_s9 + $0x120] ss:$8 sps:$4 sm:$0xff]  }
 0x768   : > { %v6319_v13 = vshrl.u32 %v6302_v10, 16  ;;  %v6321_v56 = vshll.u32 %v6302_v10, 16  ;;  %v6330_v2 = vrot.slane %v6302_v10, 1  ;;  %v6422_v23 = vcombine.low %v6329_v44, %v6302_v10  ;;  %v12322_v59 = vld [vmem:[%s17821_s9 + $0x134] ss:$8 sps:$4 sm:$0xff]  }
 0x769   : > { %v6464_v38 = vcombine.low %v6337_v51, %v6339_v5  ;;  %v6432_v58 = vcombine.low %v6303_v20, %v6337_v51  ;;  %v6578_v61 = vrot.slane %v6564_v40, %v16138_v43  ;;  %v6501_v45 = vrot.slane %v10829_v49, %v16138_v43  ;;  %v12323_v51 = vld [vmem:[%s17821_s9 + $0x140] ss:$8 sps:$4 sm:$0xff]   ;;  %v12346_v40 = vld [vmem:[%s17821_s9 + $0x1b4] ss:$8 sps:$4 sm:$0xff]   ;;  %v12344_v37 = vld [vmem:[%s17821_s9 + $0x1b0] ss:$8 sps:$4 sm:$0xff]  }
 0x76a   : > { %v6323_v47 = vrot.slane %v6321_v56, 1  ;;  %v6455_v33 = vcombine.low %v6330_v2, %v6303_v20  ;;  %v6421_v55 = vrot.slane %v6330_v2, %v16138_v43  ;;  %v6429_v0 = vrot.slane %v6422_v23, %v16138_v43  ;;  %v12331_v56 = vld [vmem:[%s17821_s9 + $0x164] ss:$8 sps:$4 sm:$0xff]   ;;  %v12332_v23 = vld [vmem:[%s17821_s9 + $0x170] ss:$8 sps:$4 sm:$0xff]  }
 0x76b   : > { %v6446_v26 = vrot.slane %v6432_v58, %v16138_v43  ;;  %v6471_v15 = vrot.slane %v6464_v38, %v16138_v43  ;;  %v12337_v38 = vld [vmem:[%s17821_s9 + $0x184] ss:$8 sps:$4 sm:$0xff]   ;;  %v12335_v4 = vld [vmem:[%s17821_s9 + $0x180] ss:$8 sps:$4 sm:$0xff]   ;;  %v12340_v58 = vld [vmem:[%s17821_s9 + $0x194] ss:$8 sps:$4 sm:$0xff]  }
 0x76c   : > { %v6324_v32 = vor.u32 %v6323_v47, %v6319_v13  ;;  %v6462_v3 = vrot.slane %v6455_v33, %v16138_v43  ;;  %v6563_v21 = vcombine.low %v6380_v35, %v6421_v55  ;;  %v12326_v13 = vld [vmem:[%s17821_s9 + $0x150] ss:$8 sps:$4 sm:$0xff]   ;;  %v12334_v35 = vld [vmem:[%s17821_s9 + $0x174] ss:$8 sps:$4 sm:$0xff]   ;;  %v12343_v33 = vld [vmem:[%s17821_s9 + $0x1a4] ss:$8 sps:$4 sm:$0xff]  }
 0x76d   : > { %v10836_v6 = vcombine.low %v6446_v26, %v6348_v12  ;;  %v12319_v12 = vld [vmem:[%s17821_s9 + $0x124] ss:$8 sps:$4 sm:$0xff]   ;;  %v12338_v47 = vld [vmem:[%s17821_s9 + $0x190] ss:$8 sps:$4 sm:$0xff]   ;;  %v12341_v55 = vld [vmem:[%s17821_s9 + $0x1a0] ss:$8 sps:$4 sm:$0xff]  }
 0x76e   : > { %v6399_v19 = vcombine.low %v6302_v10, %v6324_v32  ;;  %v10832_v22 = vcombine.low %v6429_v0, %v6462_v3  ;;  %v6431_v25 = vcombine.low %v6324_v32, %v6330_v2  ;;  %v6571_v36 = vrot.slane %v6563_v21, %v16138_v43  ;;  %v12320_v10 = vld [vmem:[%s17821_s9 + $0x130] ss:$8 sps:$4 sm:$0xff]   ;;  %v12329_v2 = vld [vmem:[%s17821_s9 + $0x160] ss:$8 sps:$4 sm:$0xff]   ;;  %v12349_v1 = vld [vmem:[%s17821_s9 + $0x1c4] ss:$8 sps:$4 sm:$0xff]  }
 0x76f   : > { %v16194_v53 = vrot.slane %v10836_v6, %v16138_v43  ;;  %v12347_v0 = vld [vmem:[%s17821_s9 + $0x1c0] ss:$8 sps:$4 sm:$0xff]   ;;  %v12352_v26 = vld [vmem:[%s17821_s9 + $0x1d4] ss:$8 sps:$4 sm:$0xff]   ;;  %v12350_v32 = vld [vmem:[%s17821_s9 + $0x1d0] ss:$8 sps:$4 sm:$0xff]  }
 0x770   : > { %v6413_v41 = vrot.slane %v6399_v19, %v16138_v43  ;;  %v16184_v60 = vrot.slane %v10832_v22, %v16138_v43  ;;  %v6439_v34 = vrot.slane %v6431_v25, %v16138_v43  ;;  %v16187_v31 = vcombine.low %v6571_v36, %v6578_v61  ;;  %v12355_v3 = vld [vmem:[%s17821_s9 + $0x1e4] ss:$8 sps:$4 sm:$0xff]   ;;  %v12353_v21 = vld [vmem:[%s17821_s9 + $0x1e0] ss:$8 sps:$4 sm:$0xff]   ;;  %v12358_v61 = vld [vmem:[%s17821_s9 + $0x1f4] ss:$8 sps:$4 sm:$0xff]  }
 0x771   : > { %v12361_v6 = vld [vmem:[%s17821_s9 + $0x204] ss:$8 sps:$4 sm:$0xff]   ;;  %v12359_v19 = vld [vmem:[%s17821_s9 + $0x200] ss:$8 sps:$4 sm:$0xff]   ;;  %v12364_v22 = vld [vmem:[%s17821_s9 + $0x214] ss:$8 sps:$4 sm:$0xff]  }
 0x772   : > { %v10831_v14 = vcombine.low %v6372_v42, %v6413_v41  ;;  %v6526_v39 = vcombine.high %v16180_v8, %v16184_v60  ;;  %v6525_v28 = vcombine.low %v16180_v8, %v16184_v60  ;;  %v10835_v46 = vcombine.low %v6439_v34, %v6471_v15  ;;  %v12356_v15 = vld [vmem:[%s17821_s9 + $0x1f0] ss:$8 sps:$4 sm:$0xff]   ;;  %v12367_v36 = vld [vmem:[%s17821_s9 + $0x224] ss:$8 sps:$4 sm:$0xff]   ;;  %v12365_v42 = vld [vmem:[%s17821_s9 + $0x220] ss:$8 sps:$4 sm:$0xff]  }
 0x773   : > { %v12362_v25 = vld [vmem:[%s17821_s9 + $0x210] ss:$8 sps:$4 sm:$0xff]   ;;  %v12370_v49 = vld [vmem:[%s17821_s9 + $0x234] ss:$8 sps:$4 sm:$0xff]   ;;  %v12373_v41 = vld [vmem:[%s17821_s9 + $0x244] ss:$8 sps:$4 sm:$0xff]  }
 0x774   : > { %v16198_v20 = vrot.slane %v10831_v14, %v16138_v43  ;;  %v16204_v44 = vrot.slane %v10835_v46, %v16138_v43  ;;  %v12368_v8 = vld [vmem:[%s17821_s9 + $0x230] ss:$8 sps:$4 sm:$0xff]   ;;  %v12371_v60 = vld [vmem:[%s17821_s9 + $0x240] ss:$8 sps:$4 sm:$0xff]   ;;  %v12376_v34 = vld [vmem:[%s17821_s9 + $0x254] ss:$8 sps:$4 sm:$0xff]  }
 0x775   : > { %v12374_v14 = vld [vmem:[%s17821_s9 + $0x250] ss:$8 sps:$4 sm:$0xff]   ;;  %v12382_v46 = vld [vmem:[%s17821_s9 + $0x274] ss:$8 sps:$4 sm:$0xff]  }
 0x776   : > { %v6523_v63 = vcombine.low %v6501_v45, %v16198_v20  ;;  %v6524_v30 = vcombine.high %v6501_v45, %v16198_v20  ;;  %v6560_v5 = vcombine.high %v16201_v18, %v16204_v44  ;;  %v6559_v29 = vcombine.low %v16201_v18, %v16204_v44  ;;  %v12380_v45 = vld [vmem:[%s17821_s9 + $0x270] ss:$8 sps:$4 sm:$0xff]   ;;  %v12413_v18 = vld [vmem:[%s17821_s9 + $0x320] ss:$8 sps:$4 sm:$0xff]   ;;  %v12418_v44 = vld [vmem:[%s17821_s9 + $0x334] ss:$8 sps:$4 sm:$0xff]  }
 0x777   : > { %v6562_v62 = vcombine.high %v16198_v20, %v16194_v53  ;;  %v6561_v27 = vcombine.low %v16198_v20, %v16194_v53  ;;  %v12466_v53 = vld [vmem:[%s17821_s9 + $0x434] ss:$8 sps:$4 sm:$0xff]   ;;  %v12464_v20 = vld [vmem:[%s17821_s9 + $0x430] ss:$8 sps:$4 sm:$0xff]  }
 0x778   : > { %7341 = vmatprep.mubr.bf16.mxu0 %v6524_v30  ;;  %v12383_v30 = vld [vmem:[%s17821_s9 + $0x280] ss:$8 sps:$4 sm:$0xff]  }
 0x779   : > { %7342 = vmatmul.mubr.bf16.vlgmr.msra.gmra.mrb[208].mxu0 %v6523_v63  ;;  %v12385_v63 = vld [vmem:[%s17821_s9 + $0x284] ss:$8 sps:$4 sm:$0xff]  }
 0x77a   : > { %7353 = vmatpush1.bf16.msra.mxu0 %v12311_v11  ;;  %7384 = vmatprep.mubr.bf16.mxu0 %v6526_v39  ;;  %v12379_v39 = vld [vmem:[%s17821_s9 + $0x264] ss:$8 sps:$4 sm:$0xff]   ;;  %v12388_v11 = vld [vmem:[%s17821_s9 + $0x294] ss:$8 sps:$4 sm:$0xff]  }
 0x77b   : > { %7354 = vmatprep.subr.bf16.mxu0 %v12316_v52  ;;  %v12481_v52 = vld [vmem:[%s17823_s11 + $0x4] ss:$8 sps:$4 sm:$0xff]  }
 0x77c   : > { %9745 = vmatprep.subr.bf16.mxu1 %v12481_v52  ;;  %v12445_v52 = vld [vmem:[%s17821_s9 + $0x3c4] ss:$8 sps:$4 sm:$0xff]  }
 0x77e   : > { %7355 = vmatpush1.bf16.msra.mxu0 %v12314_v17  ;;  %v12386_v17 = vld [vmem:[%s17821_s9 + $0x290] ss:$8 sps:$4 sm:$0xff]  }
 0x77f   : > { %7356 = vmatprep.subr.bf16.mxu0 %v12319_v12  ;;  %v12484_v12 = vld [vmem:[%s17823_s11 + $0x14] ss:$8 sps:$4 sm:$0xff]  }
 0x782   : > { %7357 = vmatpush1.bf16.msra.mxu0 %v12317_v9  ;;  %v12391_v9 = vld [vmem:[%s17821_s9 + $0x2a4] ss:$8 sps:$4 sm:$0xff]  }
 0x783   : > { %7358 = vmatprep.subr.bf16.mxu0 %v12322_v59  ;;  %v12482_v59 = vld [vmem:[%s17823_s11 + $0x10] ss:$8 sps:$4 sm:$0xff]  }
 0x786   : > { %7359 = vmatpush1.bf16.msra.mxu0 %v12320_v10  ;;  %v12487_v10 = vld [vmem:[%s17823_s11 + $0x24] ss:$8 sps:$4 sm:$0xff]  }
 0x787   : > { %7360 = vmatprep.subr.bf16.mxu0 %v12325_v48  ;;  %v12389_v48 = vld [vmem:[%s17821_s9 + $0x2a0] ss:$8 sps:$4 sm:$0xff]  }
 0x78a   : > { %7361 = vmatpush1.bf16.msra.mxu0 %v12323_v51  ;;  %v12394_v51 = vld [vmem:[%s17821_s9 + $0x2b4] ss:$8 sps:$4 sm:$0xff]  }
 0x78b   : > { %7362 = vmatprep.subr.bf16.mxu0 %v12328_v50  ;;  %v12485_v50 = vld [vmem:[%s17823_s11 + $0x20] ss:$8 sps:$4 sm:$0xff]  }
 0x78e   : > { %7363 = vmatpush1.bf16.msra.mxu0 %v12326_v13  ;;  %v12490_v13 = vld [vmem:[%s17823_s11 + $0x34] ss:$8 sps:$4 sm:$0xff]  }
 0x78f   : > { %7364 = vmatprep.subr.bf16.mxu0 %v12331_v56  ;;  %v12392_v56 = vld [vmem:[%s17821_s9 + $0x2b0] ss:$8 sps:$4 sm:$0xff]  }
 0x792   : > { %7365 = vmatpush1.bf16.msra.mxu0 %v12329_v2  ;;  %v12397_v2 = vld [vmem:[%s17821_s9 + $0x2c4] ss:$8 sps:$4 sm:$0xff]  }
 0x793   : > { %7366 = vmatprep.subr.bf16.mxu0 %v12334_v35  ;;  %v12488_v35 = vld [vmem:[%s17823_s11 + $0x30] ss:$8 sps:$4 sm:$0xff]  }
 0x796   : > { %7367 = vmatpush1.bf16.msra.mxu0 %v12332_v23  ;;  %v12493_v23 = vld [vmem:[%s17823_s11 + $0x44] ss:$8 sps:$4 sm:$0xff]  }
 0x797   : > { %7368 = vmatprep.subr.bf16.mxu0 %v12337_v38  ;;  %v12395_v38 = vld [vmem:[%s17821_s9 + $0x2c0] ss:$8 sps:$4 sm:$0xff]  }
 0x79a   : > { %7369 = vmatpush1.bf16.msra.mxu0 %v12335_v4  ;;  %v12400_v4 = vld [vmem:[%s17821_s9 + $0x2d4] ss:$8 sps:$4 sm:$0xff]  }
 0x79b   : > { %7370 = vmatprep.subr.bf16.mxu0 %v12340_v58  ;;  %v12491_v58 = vld [vmem:[%s17823_s11 + $0x40] ss:$8 sps:$4 sm:$0xff]  }
 0x79e   : > { %7371 = vmatpush1.bf16.msra.mxu0 %v12338_v47  ;;  %v12496_v47 = vld [vmem:[%s17823_s11 + $0x54] ss:$8 sps:$4 sm:$0xff]  }
 0x79f   : > { %7372 = vmatprep.subr.bf16.mxu0 %v12343_v33  ;;  %v12398_v33 = vld [vmem:[%s17821_s9 + $0x2d0] ss:$8 sps:$4 sm:$0xff]  }
 0x7a2   : > { %7373 = vmatpush1.bf16.msra.mxu0 %v12341_v55  ;;  %v12403_v55 = vld [vmem:[%s17821_s9 + $0x2e4] ss:$8 sps:$4 sm:$0xff]  }
 0x7a3   : > { %7374 = vmatprep.subr.bf16.mxu0 %v12346_v40  ;;  %v12494_v40 = vld [vmem:[%s17823_s11 + $0x50] ss:$8 sps:$4 sm:$0xff]  }
 0x7a6   : > { %7375 = vmatpush1.bf16.msra.mxu0 %v12344_v37  ;;  %v12499_v37 = vld [vmem:[%s17823_s11 + $0x64] ss:$8 sps:$4 sm:$0xff]  }
 0x7a7   : > { %7376 = vmatprep.subr.bf16.mxu0 %v12349_v1  ;;  %v12401_v1 = vld [vmem:[%s17821_s9 + $0x2e0] ss:$8 sps:$4 sm:$0xff]  }
 0x7aa   : > { %7377 = vmatpush1.bf16.msra.mxu0 %v12347_v0  ;;  %v12406_v0 = vld [vmem:[%s17821_s9 + $0x2f4] ss:$8 sps:$4 sm:$0xff]  }
 0x7ab   : > { %7378 = vmatprep.subr.bf16.mxu0 %v12352_v26  ;;  %v12497_v26 = vld [vmem:[%s17823_s11 + $0x60] ss:$8 sps:$4 sm:$0xff]  }
 0x7ae   : > { %7379 = vmatpush1.bf16.msra.mxu0 %v12350_v32  ;;  %v12502_v32 = vld [vmem:[%s17823_s11 + $0x74] ss:$8 sps:$4 sm:$0xff]  }
 0x7af   : > { %7380 = vmatprep.subr.bf16.mxu0 %v12355_v3  ;;  %v12404_v3 = vld [vmem:[%s17821_s9 + $0x2f0] ss:$8 sps:$4 sm:$0xff]  }
 0x7b2   : > { %7381 = vmatpush1.bf16.msra.mxu0 %v12353_v21  ;;  %v12409_v21 = vld [vmem:[%s17821_s9 + $0x304] ss:$8 sps:$4 sm:$0xff]  }
 0x7b3   : > { %7382 = vmatprep.subr.bf16.mxu0 %v12358_v61  ;;  %v12500_v61 = vld [vmem:[%s17823_s11 + $0x70] ss:$8 sps:$4 sm:$0xff]  }
 0x7b6   : > { %7383 = vmatpush1.bf16.msra.mxu0 %v12356_v15  ;;  %v12505_v15 = vld [vmem:[%s17823_s11 + $0x84] ss:$8 sps:$4 sm:$0xff]  }
 0x7b7   : > { %7395 = vmatprep.subr.bf16.mxu0 %v12361_v6  ;;  %v12407_v6 = vld [vmem:[%s17821_s9 + $0x300] ss:$8 sps:$4 sm:$0xff]  }
 0x7b9   : > { %7385 = vmatmul.mubr.bf16.vlgmr.msra.gmra.mrb[208].mxu0 %v6525_v28  ;;  %v12377_v28 = vld [vmem:[%s17821_s9 + $0x260] ss:$8 sps:$4 sm:$0xff]  }
 0x7ba   : > { %7396 = vmatpush1.bf16.msra.mxu0 %v12359_v19  ;;  %7427 = vmatprep.mubr.bf16.mxu0 %v6560_v5  ;;  %v12479_v5 = vld [vmem:[%s17823_s11] ss:$8 sps:$4 sm:$0xff]   ;;  %v12412_v19 = vld [vmem:[%s17821_s9 + $0x314] ss:$8 sps:$4 sm:$0xff]  }
 0x7bb   : > { %7397 = vmatprep.subr.bf16.mxu0 %v12364_v22  ;;  %9746 = vmatpush1.bf16.msra.mxu1 %v12479_v5  ;;  %v12503_v22 = vld [vmem:[%s17823_s11 + $0x80] ss:$8 sps:$4 sm:$0xff]   ;;  %v12440_v5 = vld [vmem:[%s17821_s9 + $0x3b0] ss:$8 sps:$4 sm:$0xff]  }
 0x7bc   : > { %9747 = vmatprep.subr.bf16.mxu1 %v12484_v12  ;;  %v12448_v12 = vld [vmem:[%s17821_s9 + $0x3d4] ss:$8 sps:$4 sm:$0xff]  }
 0x7be   : > { %7398 = vmatpush1.bf16.msra.mxu0 %v12362_v25  ;;  %v12410_v25 = vld [vmem:[%s17821_s9 + $0x310] ss:$8 sps:$4 sm:$0xff]  }
 0x7bf   : > { %7399 = vmatprep.subr.bf16.mxu0 %v12367_v36  ;;  %9748 = vmatpush1.bf16.msra.mxu1 %v12482_v59  ;;  %v12415_v36 = vld [vmem:[%s17821_s9 + $0x324] ss:$8 sps:$4 sm:$0xff]  }
 0x7c0   : > { %9749 = vmatprep.subr.bf16.mxu1 %v12487_v10  ;;  %v12451_v59 = vld [vmem:[%s17821_s9 + $0x3e4] ss:$8 sps:$4 sm:$0xff]   ;;  %v12449_v10 = vld [vmem:[%s17821_s9 + $0x3e0] ss:$8 sps:$4 sm:$0xff]  }
 0x7c2   : > { %7400 = vmatpush1.bf16.msra.mxu0 %v12365_v42  ;;  %v12419_v42 = vld [vmem:[%s17821_s9 + $0x340] ss:$8 sps:$4 sm:$0xff]  }
 0x7c3   : > { %7401 = vmatprep.subr.bf16.mxu0 %v12370_v49  ;;  %9750 = vmatpush1.bf16.msra.mxu1 %v12485_v50  ;;  %v12424_v49 = vld [vmem:[%s17821_s9 + $0x354] ss:$8 sps:$4 sm:$0xff]   ;;  %v12457_v50 = vld [vmem:[%s17821_s9 + $0x404] ss:$8 sps:$4 sm:$0xff]  }
 0x7c4   : > { %9751 = vmatprep.subr.bf16.mxu1 %v12490_v13  ;;  %v12455_v13 = vld [vmem:[%s17821_s9 + $0x400] ss:$8 sps:$4 sm:$0xff]  }
 0x7c6   : > { %7402 = vmatpush1.bf16.msra.mxu0 %v12368_v8  ;;  %v12422_v8 = vld [vmem:[%s17821_s9 + $0x350] ss:$8 sps:$4 sm:$0xff]  }
 0x7c7   : > { %7403 = vmatprep.subr.bf16.mxu0 %v12373_v41  ;;  %9752 = vmatpush1.bf16.msra.mxu1 %v12488_v35  ;;  %v12427_v41 = vld [vmem:[%s17821_s9 + $0x364] ss:$8 sps:$4 sm:$0xff]  }
 0x7c8   : > { %9753 = vmatprep.subr.bf16.mxu1 %v12493_v23  ;;  %v12463_v35 = vld [vmem:[%s17821_s9 + $0x424] ss:$8 sps:$4 sm:$0xff]   ;;  %v12461_v23 = vld [vmem:[%s17821_s9 + $0x420] ss:$8 sps:$4 sm:$0xff]  }
 0x7ca   : > { %7404 = vmatpush1.bf16.msra.mxu0 %v12371_v60  ;;  %v12425_v60 = vld [vmem:[%s17821_s9 + $0x360] ss:$8 sps:$4 sm:$0xff]  }
 0x7cb   : > { %7405 = vmatprep.subr.bf16.mxu0 %v12376_v34  ;;  %9754 = vmatpush1.bf16.msra.mxu1 %v12491_v58  ;;  %v12430_v34 = vld [vmem:[%s17821_s9 + $0x374] ss:$8 sps:$4 sm:$0xff]   ;;  %v12470_v58 = vld [vmem:[%s17821_s9 + $0x450] ss:$8 sps:$4 sm:$0xff]  }
 0x7cc   : > { %9755 = vmatprep.subr.bf16.mxu1 %v12496_v47  ;;  %v12475_v47 = vld [vmem:[%s17821_s9 + $0x464] ss:$8 sps:$4 sm:$0xff]  }
 0x7ce   : > { %7406 = vmatpush1.bf16.msra.mxu0 %v12374_v14  ;;  %v12428_v14 = vld [vmem:[%s17821_s9 + $0x370] ss:$8 sps:$4 sm:$0xff]  }
 0x7cf   : > { %7407 = vmatprep.subr.bf16.mxu0 %v12379_v39  ;;  %9756 = vmatpush1.bf16.msra.mxu1 %v12494_v40  ;;  %v12433_v39 = vld [vmem:[%s17821_s9 + $0x384] ss:$8 sps:$4 sm:$0xff]   ;;  %v12476_v40 = vld [vmem:[%s17821_s9 + $0x470] ss:$8 sps:$4 sm:$0xff]  }
 0x7d0   : > { %9757 = vmatprep.subr.bf16.mxu1 %v12499_v37  ;;  %v12506_v37 = vld [vmem:[%s17823_s11 + $0x90] ss:$8 sps:$4 sm:$0xff]  }
 0x7d2   : > { %7408 = vmatpush1.bf16.msra.mxu0 %v12377_v28  ;;  %v12431_v28 = vld [vmem:[%s17821_s9 + $0x380] ss:$8 sps:$4 sm:$0xff]  }
 0x7d3   : > { %7409 = vmatprep.subr.bf16.mxu0 %v12382_v46  ;;  %9758 = vmatpush1.bf16.msra.mxu1 %v12497_v26  ;;  %v12436_v46 = vld [vmem:[%s17821_s9 + $0x394] ss:$8 sps:$4 sm:$0xff]   ;;  %v12511_v26 = vld [vmem:[%s17823_s11 + $0xa4] ss:$8 sps:$4 sm:$0xff]  }
 0x7d4   : > { %9759 = vmatprep.subr.bf16.mxu1 %v12502_v32  ;;  %v12512_v32 = vld [vmem:[%s17823_s11 + $0xb0] ss:$8 sps:$4 sm:$0xff]  }
 0x7d6   : > { %7410 = vmatpush1.bf16.msra.mxu0 %v12380_v45  ;;  %v12434_v45 = vld [vmem:[%s17821_s9 + $0x390] ss:$8 sps:$4 sm:$0xff]  }
 0x7d7   : > { %7411 = vmatprep.subr.bf16.mxu0 %v12385_v63  ;;  %9760 = vmatpush1.bf16.msra.mxu1 %v12500_v61  ;;  %v12439_v63 = vld [vmem:[%s17821_s9 + $0x3a4] ss:$8 sps:$4 sm:$0xff]   ;;  %v12520_v61 = vld [vmem:[%s17823_s11 + $0xd4] ss:$8 sps:$4 sm:$0xff]  }
 0x7d8   : > { %9761 = vmatprep.subr.bf16.mxu1 %v12505_v15  ;;  %v12518_v15 = vld [vmem:[%s17823_s11 + $0xd0] ss:$8 sps:$4 sm:$0xff]  }
 0x7da   : > { %7412 = vmatpush1.bf16.msra.mxu0 %v12383_v30  ;;  %v12437_v30 = vld [vmem:[%s17821_s9 + $0x3a0] ss:$8 sps:$4 sm:$0xff]  }
 0x7db   : > { %7413 = vmatprep.subr.bf16.mxu0 %v12388_v11  ;;  %9762 = vmatpush1.bf16.msra.mxu1 %v12503_v22  ;;  %v12442_v11 = vld [vmem:[%s17821_s9 + $0x3b4] ss:$8 sps:$4 sm:$0xff]  }
 0x7dc   : > { %v12526_v22 = vld [vmem:[%s17823_s11 + $0xf4] ss:$8 sps:$4 sm:$0xff]  }
 0x7de   : > { %7414 = vmatpush1.bf16.msra.mxu0 %v12386_v17  ;;  %v12443_v17 = vld [vmem:[%s17821_s9 + $0x3c0] ss:$8 sps:$4 sm:$0xff]  }
 0x7df   : > { %7415 = vmatprep.subr.bf16.mxu0 %v12391_v9  ;;  %v12446_v9 = vld [vmem:[%s17821_s9 + $0x3d0] ss:$8 sps:$4 sm:$0xff]  }
 0x7e2   : > { %7416 = vmatpush1.bf16.msra.mxu0 %v12389_v48  ;;  %v12454_v48 = vld [vmem:[%s17821_s9 + $0x3f4] ss:$8 sps:$4 sm:$0xff]  }
 0x7e3   : > { %7417 = vmatprep.subr.bf16.mxu0 %v12394_v51  ;;  %v12452_v51 = vld [vmem:[%s17821_s9 + $0x3f0] ss:$8 sps:$4 sm:$0xff]  }
 0x7e6   : > { %7418 = vmatpush1.bf16.msra.mxu0 %v12392_v56  ;;  %v12460_v56 = vld [vmem:[%s17821_s9 + $0x414] ss:$8 sps:$4 sm:$0xff]  }
 0x7e7   : > { %7419 = vmatprep.subr.bf16.mxu0 %v12397_v2  ;;  %v12458_v2 = vld [vmem:[%s17821_s9 + $0x410] ss:$8 sps:$4 sm:$0xff]  }
 0x7ea   : > { %7420 = vmatpush1.bf16.msra.mxu0 %v12395_v38  ;;  %v12467_v38 = vld [vmem:[%s17821_s9 + $0x440] ss:$8 sps:$4 sm:$0xff]  }
 0x7eb   : > { %7421 = vmatprep.subr.bf16.mxu0 %v12400_v4  ;;  %v12472_v4 = vld [vmem:[%s17821_s9 + $0x454] ss:$8 sps:$4 sm:$0xff]  }
 0x7ee   : > { %7422 = vmatpush1.bf16.msra.mxu0 %v12398_v33  ;;  %v12473_v33 = vld [vmem:[%s17821_s9 + $0x460] ss:$8 sps:$4 sm:$0xff]  }
 0x7ef   : > { %7423 = vmatprep.subr.bf16.mxu0 %v12403_v55  ;;  %v12478_v55 = vld [vmem:[%s17821_s9 + $0x474] ss:$8 sps:$4 sm:$0xff]  }
 0x7f2   : > { %7424 = vmatpush1.bf16.msra.mxu0 %v12401_v1  ;;  %v12508_v1 = vld [vmem:[%s17823_s11 + $0x94] ss:$8 sps:$4 sm:$0xff]  }
 0x7f3   : > { %7425 = vmatprep.subr.bf16.mxu0 %v12406_v0  ;;  %9763 = vmatprep.subr.bf16.mxu1 %v12508_v1  ;;  %v12509_v0 = vld [vmem:[%s17823_s11 + $0xa0] ss:$8 sps:$4 sm:$0xff]  }
 0x7f4   : > { %9764 = vmatpush1.bf16.msra.mxu1 %v12506_v37 }
 0x7f5   : > { %9765 = vmatprep.subr.bf16.mxu1 %v12511_v26 }
 0x7f6   : > { %7426 = vmatpush1.bf16.msra.mxu0 %v12404_v3  ;;  %v12517_v3 = vld [vmem:[%s17823_s11 + $0xc4] ss:$8 sps:$4 sm:$0xff]  }
 0x7f7   : > { %7438 = vmatprep.subr.bf16.mxu0 %v12409_v21  ;;  %v12515_v21 = vld [vmem:[%s17823_s11 + $0xc0] ss:$8 sps:$4 sm:$0xff]  }
 0x7f8   : > { %9766 = vmatpush1.bf16.msra.mxu1 %v12509_v0 }
 0x7f9   : > { %7428 = vmatmul.mubr.bf16.vlgmr.msra.gmra.mrb[208].mxu0 %v6559_v29  ;;  %v12416_v29 = vld [vmem:[%s17821_s9 + $0x330] ss:$8 sps:$4 sm:$0xff]  }
 0x7fa   : > { %7439 = vmatpush1.bf16.msra.mxu0 %v12407_v6  ;;  %7470 = vmatprep.mubr.bf16.mxu0 %v6562_v62  ;;  %v12421_v62 = vld [vmem:[%s17821_s9 + $0x344] ss:$8 sps:$4 sm:$0xff]  }
 0x7fb   : > { %7440 = vmatprep.subr.bf16.mxu0 %v12412_v19  ;;  %v12523_v6 = vld [vmem:[%s17823_s11 + $0xe4] ss:$8 sps:$4 sm:$0xff]   ;;  %v12521_v19 = vld [vmem:[%s17823_s11 + $0xe0] ss:$8 sps:$4 sm:$0xff]  }
 0x7fe   : > { %7441 = vmatpush1.bf16.msra.mxu0 %v12410_v25  ;;  %v12524_v25 = vld [vmem:[%s17823_s11 + $0xf0] ss:$8 sps:$4 sm:$0xff]  }
 0x7ff   : > { %7442 = vmatprep.subr.bf16.mxu0 %v12415_v36  ;;  %v12529_v36 = vld [vmem:[%s17823_s11 + $0x104] ss:$8 sps:$4 sm:$0xff]  }
 0x802   : > { %7443 = vmatpush1.bf16.msra.mxu0 %v12413_v18  ;;  %v6483_v18 = vsub.s32 0, %v16096_v57 }
 0x803   : > { %7444 = vmatprep.subr.bf16.mxu0 %v12418_v44  ;;  %v6256_v44 = vld [vmem:[%s17822_s10] sm:$0x3] }
 0x806   : > { %7445 = vmatpush1.bf16.msra.mxu0 %v12416_v29  ;;  %v6487_v29 = vsub.s32 1, %v16096_v57 }
 0x807   : > { %7446 = vmatprep.subr.bf16.mxu0 %v12421_v62  ;;  %v6484_v62 = vrot.slane %v6256_v44, %v6483_v18 }
 0x80a   : > { %7447 = vmatpush1.bf16.msra.mxu0 %v12419_v42  ;;  %v6488_v42 = vrot.slane %v6256_v44, %v6487_v29 }
 0x80b   : > { %7448 = vmatprep.subr.bf16.mxu0 %v12424_v49 }
 0x80e   : > { %7449 = vmatpush1.bf16.msra.mxu0 %v12422_v8 }
 0x80f   : > { %7450 = vmatprep.subr.bf16.mxu0 %v12427_v41 }
 0x812   : > { %7451 = vmatpush1.bf16.msra.mxu0 %v12425_v60 }
 0x813   : > { %7452 = vmatprep.subr.bf16.mxu0 %v12430_v34 }
 0x816   : > { %7453 = vmatpush1.bf16.msra.mxu0 %v12428_v14 }
 0x817   : > { %7454 = vmatprep.subr.bf16.mxu0 %v12433_v39 }
 0x81a   : > { %7455 = vmatpush1.bf16.msra.mxu0 %v12431_v28 }
 0x81b   : > { %7456 = vmatprep.subr.bf16.mxu0 %v12436_v46  ;;  %v7997_v46 = vcombine.low %v17961_v16, %v17961_v16 }
 0x81e   : > { %7457 = vmatpush1.bf16.msra.mxu0 %v12434_v45  ;;  %v7998_v45 = vcombine.low %v17959_v24, %v17959_v24 }
 0x81f   : > { %7458 = vmatprep.subr.bf16.mxu0 %v12439_v63 }
 0x822   : > { %7459 = vmatpush1.bf16.msra.mxu0 %v12437_v30 }
 0x823   : > { %7460 = vmatprep.subr.bf16.mxu0 %v12442_v11 }
 0x826   : > { %7461 = vmatpush1.bf16.msra.mxu0 %v12440_v5 }
 0x827   : > { %7462 = vmatprep.subr.bf16.mxu0 %v12445_v52 }
 0x82a   : > { %7463 = vmatpush1.bf16.msra.mxu0 %v12443_v17 }
 0x82b   : > { %7464 = vmatprep.subr.bf16.mxu0 %v12448_v12 }
 0x82e   : > { %7465 = vmatpush1.bf16.msra.mxu0 %v12446_v9 }
 0x82f   : > { %7466 = vmatprep.subr.bf16.mxu0 %v12451_v59  ;;  %v16679_v59 = vrot.slane %v7997_v46, %v16138_v43 }
 0x832   : > { %7467 = vmatpush1.bf16.msra.mxu0 %v12449_v10  ;;  %v16682_v10 = vrot.slane %v7998_v45, %v16138_v43 }
 0x833   : > { %7468 = vmatprep.subr.bf16.mxu0 %v12454_v48 }
 0x836   : > { %7469 = vmatpush1.bf16.msra.mxu0 %v12452_v51 }
 0x837   : > { %7481 = vmatprep.subr.bf16.mxu0 %v12457_v50 }
 0x839   : > { %7471 = vmatmul.mubr.bf16.vlgmr.msra.gmra.mrb[208].mxu0 %v6561_v27  ;;  %v12469_v27 = vld [vmem:[%s17821_s9 + $0x444] ss:$8 sps:$4 sm:$0xff]  }
 0x83a   : > { %7482 = vmatpush1.bf16.msra.mxu0 %v12455_v13  ;;  %7513 = vmatprep.mubr.bf16.mxu0 %v17961_v16 }
 0x83b   : > { %7483 = vmatprep.subr.bf16.mxu0 %v12460_v56 }
 0x83e   : > { %7484 = vmatpush1.bf16.msra.mxu0 %v12458_v2 }
 0x83f   : > { %7485 = vmatprep.subr.bf16.mxu0 %v12463_v35 }
 0x842   : > { %7486 = vmatpush1.bf16.msra.mxu0 %v12461_v23 }
 0x843   : > { %7487 = vmatprep.subr.bf16.mxu0 %v12466_v53 }
 0x846   : > { %7488 = vmatpush1.bf16.msra.mxu0 %v12464_v20 }
 0x847   : > { %7489 = vmatprep.subr.bf16.mxu0 %v12469_v27 }
 0x84a   : > { %7490 = vmatpush1.bf16.msra.mxu0 %v12467_v38 }
 0x84b   : > { %7491 = vmatprep.subr.bf16.mxu0 %v12472_v4 }
 0x84e   : > { %7492 = vmatpush1.bf16.msra.mxu0 %v12470_v58 }
 0x84f   : > { %7493 = vmatprep.subr.bf16.mxu0 %v12475_v47 }
 0x852   : > { %7494 = vmatpush1.bf16.msra.mxu0 %v12473_v33 }
 0x853   : > { %7495 = vmatprep.subr.bf16.mxu0 %v12478_v55 }
 0x856   : > { %7496 = vmatpush1.bf16.msra.mxu0 %v12476_v40 }
 0x859   : > { %7514 = vmatmul.mubr.bf16.vlgmr.msra.gmra.mrb[208].mxu0 %v16187_v31  ;;  %v12514_v31 = vld [vmem:[%s17823_s11 + $0xb4] ss:$8 sps:$4 sm:$0xff]  }
 0x85a   : > { %9767 = vmatprep.subr.bf16.mxu1 %v12514_v31 }
 0x85b   : > { %9768 = vmatpush1.bf16.msra.mxu1 %v12512_v32 }
 0x85c   : > { %9769 = vmatprep.subr.bf16.mxu1 %v12517_v3 }
 0x85f   : > { %9770 = vmatpush1.bf16.msra.mxu1 %v12515_v21 }
 0x860   : > { %9771 = vmatprep.subr.bf16.mxu1 %v12520_v61 }
 0x863   : > { %9772 = vmatpush1.bf16.msra.mxu1 %v12518_v15 }
 0x864   : > { %9773 = vmatprep.subr.bf16.mxu1 %v12523_v6 }
 0x867   : > { %9774 = vmatpush1.bf16.msra.mxu1 %v12521_v19 }
 0x868   : > { %9775 = vmatprep.subr.bf16.mxu1 %v12526_v22 }
 0x86b   : > { %9776 = vmatpush1.bf16.msra.mxu1 %v12524_v25 }
 0x86c   : > { %9788 = vmatprep.subr.bf16.mxu1 %v12529_v36 }
 0x92c   : > { %v7515_v49 = vpop.f32.mrb[208].mxu0 }
 0x92d   : > { %v12008_v8 = vadd.f32 %v7515_v49, %v6484_v62  ;;  %v7517_v41 = vpop.f32.mrb[209].mxu0 }
 0x92e   : > { %v12009_v60 = vadd.f32 %v7517_v41, %v6488_v42  ;;  %v7519_v34 = vpop.f32.mrb[210].mxu0 }
 0x92f   : > { %v7524_v14 = vmax.f32 %v12008_v8, 0.0  ;;  %v12010_v39 = vadd.f32 %v7519_v34, %v6484_v62  ;;  %v7521_v28 = vpop.f32.mrb[211].mxu0 }
 0x930   : > { %v7525_v63 = vmax.f32 %v12009_v60, 0.0  ;;  %v12011_v30 = vadd.f32 %v7521_v28, %v6488_v42 }
 0x931   : > { %v7526_v11 = vmax.f32 %v12010_v39, 0.0 }
 0x932   : > { %v7532_v5 = vcombine.low %v7524_v14, %v7525_v63  ;;  %v7533_v52 = vcombine.high %v7524_v14, %v7525_v63  ;;  %v10981_v17 = vcombine.low %v7525_v63, %v7525_v63  ;;  %v10982_v12 = vcombine.high %v7525_v63, %v7525_v63 }
 0x933   : > { %v7527_v9 = vmax.f32 %v12011_v30, 0.0 }
 0x934   : > { %v7837_v48 = vpack.c.bf16 %v7532_v5, %v7532_v5  ;;  %v7838_v51 = vpack.c.bf16 %v10981_v17, %v10981_v17  ;;  %v7839_v16 = vpack.c.bf16 %v7533_v52, %v7533_v52  ;;  %v7840_v50 = vpack.c.bf16 %v10982_v12, %v10982_v12 }
 0x935   : > { %v7534_v13 = vcombine.low %v7526_v11, %v7527_v9  ;;  %v7535_v24 = vcombine.high %v7526_v11, %v7527_v9  ;;  %v10983_v56 = vcombine.low %v7527_v9, %v7527_v9  ;;  %v10984_v2 = vcombine.high %v7527_v9, %v7527_v9 }
 0x936   : > { %v7846_v35 = vshrl.u32 %v7837_v48, 16  ;;  %v7849_v23 = vshll.u32 %v7837_v48, 16  ;;  %v7853_v53 = vshrl.u32 %v7838_v51, 16  ;;  %v7856_v20 = vshll.u32 %v7838_v51, 16 }
 0x937   : > { %v7860_v27 = vshrl.u32 %v7839_v16, 16  ;;  %v7863_v38 = vshll.u32 %v7839_v16, 16  ;;  %v7867_v4 = vshrl.u32 %v7840_v50, 16  ;;  %v7870_v58 = vshll.u32 %v7840_v50, 16 }
 0x938   : > { %v7848_v47 = vrot.slane %v7846_v35, 7  ;;  %v7855_v33 = vrot.slane %v7853_v53, 7  ;;  %v7841_v55 = vpack.c.bf16 %v7534_v13, %v7534_v13  ;;  %v7842_v40 = vpack.c.bf16 %v10983_v56, %v10983_v56 }
 0x939   : > { %v7862_v37 = vrot.slane %v7860_v27, 7  ;;  %v7869_v1 = vrot.slane %v7867_v4, 7  ;;  %v7843_v0 = vpack.c.bf16 %v7535_v24, %v7535_v24  ;;  %v7844_v26 = vpack.c.bf16 %v10984_v2, %v10984_v2 }
 0x93a   : > { %v7851_v31 = vor.u32 %v7849_v23, %v7848_v47  ;;  %v7858_v32 = vor.u32 %v7856_v20, %v7855_v33  ;;  %v7874_v3 = vshrl.u32 %v7841_v55, 16  ;;  %v7877_v21 = vshll.u32 %v7841_v55, 16 }
 0x93b   : > { %v7865_v61 = vor.u32 %v7863_v38, %v7862_v37  ;;  %v7872_v15 = vor.u32 %v7870_v58, %v7869_v1  ;;  %v7881_v6 = vshrl.u32 %v7842_v40, 16  ;;  %v7884_v19 = vshll.u32 %v7842_v40, 16 }
 0x93c   : > { %v7909_v22 = vsel %vm13173_vm2, 0, %v7851_v31  ;;  %v7910_v25 = vsel %vm13173_vm2, 0, %v7858_v32  ;;  %v7876_v36 = vrot.slane %v7874_v3, 7  ;;  %v7888_v44 = vshrl.u32 %v7843_v0, 16 }
 0x93d   : > { %v7911_v62 = vsel %vm13173_vm2, 0, %v7865_v61  ;;  %v7912_v42 = vsel %vm13173_vm2, 0, %v7872_v15  ;;  %v7883_v49 = vrot.slane %v7881_v6, 7  ;;  %v7891_v8 = vshll.u32 %v7843_v0, 16 }
 0x93e   : > { %v16694_v41 = vsel %vm16114_vm7, %v7911_v62, 0  ;;  %v16698_v60 = vsel %vm16114_vm7, %v7912_v42, 0  ;;  %v7879_v34 = vor.u32 %v7877_v21, %v7876_v36  ;;  %v7890_v14 = vrot.slane %v7888_v44, 7 }
 0x93f   : > { %v7940_v39 = vshrl.u32 %v16694_v41, 16  ;;  %v7942_v28 = vshll.u32 %v16694_v41, 16  ;;  %v7947_v46 = vshrl.u32 %v16698_v60, 16  ;;  %v7949_v45 = vshll.u32 %v16698_v60, 16 }
 0x940   : > { %v7886_v63 = vor.u32 %v7884_v19, %v7883_v49  ;;  %v7893_v30 = vor.u32 %v7891_v8, %v7890_v14  ;;  %v7895_v11 = vshrl.u32 %v7844_v26, 16  ;;  %v7898_v5 = vshll.u32 %v7844_v26, 16 }
 0x941   : > { %v7944_v52 = vrot.slane %v7942_v28, 1  ;;  %v7951_v17 = vrot.slane %v7949_v45, 1  ;;  %v7913_v12 = vsel %vm13173_vm2, 0, %v7879_v34  ;;  %v7917_v9 = vsel %vm16114_vm7, %v7909_v22, 0  ;;  %v12527_v45 = vld [vmem:[%s17823_s11 + $0x100] ss:$8 sps:$4 sm:$0xff]  }
 0x942   : > { %v7897_v48 = vrot.slane %v7895_v11, 7  ;;  %v7914_v51 = vsel %vm13173_vm2, 0, %v7886_v63  ;;  %v7915_v16 = vsel %vm13173_vm2, 0, %v7893_v30  ;;  %v7921_v50 = vsel %vm16114_vm7, %v7913_v12, 0  ;;  %v12532_v11 = vld [vmem:[%s17823_s11 + $0x114] ss:$8 sps:$4 sm:$0xff]  }
 0x943   : > { %v7922_v13 = vsel %vm16114_vm7, %v7914_v51, 0  ;;  %v7954_v24 = vshrl.u32 %v7921_v50, 16  ;;  %v7956_v56 = vshll.u32 %v7921_v50, 16  ;;  %v7918_v2 = vsel %vm16114_vm7, %v7910_v25, 0 }
 0x944   : > { %v7900_v35 = vor.u32 %v7898_v5, %v7897_v48  ;;  %v7961_v23 = vshrl.u32 %v7922_v13, 16  ;;  %v7963_v53 = vshll.u32 %v7922_v13, 16  ;;  %v8015_v20 = vcombine.low %v7917_v9, %v7918_v2 }
 0x945   : > { %v7958_v27 = vrot.slane %v7956_v56, 1  ;;  %v8048_v38 = vcombine.low %v16694_v41, %v16698_v60  ;;  %v8076_v4 = vcombine.low %v7921_v50, %v7922_v13  ;;  %v7926_v58 = vshrl.u32 %v7917_v9, 16 }
 0x946   : > { %v7916_v47 = vsel %vm13173_vm2, 0, %v7900_v35  ;;  %v7965_v33 = vrot.slane %v7963_v53, 1  ;;  %v8029_v55 = vrot.slane %v8015_v20, %v16138_v43  ;;  %v7928_v40 = vshll.u32 %v7917_v9, 16  ;;  %v12535_v35 = vld [vmem:[%s17823_s11 + $0x124] ss:$8 sps:$4 sm:$0xff]  }
 0x947   : > { %v8056_v37 = vrot.slane %v8048_v38, %v16138_v43  ;;  %v16725_v1 = vrot.slane %v8076_v4, %v16138_v43  ;;  %v7933_v0 = vshrl.u32 %v7918_v2, 16  ;;  %v7935_v26 = vshll.u32 %v7918_v2, 16 }
 0x948   : > { %v10985_v31 = vcombine.low %v16679_v59, %v8029_v55  ;;  %v7930_v32 = vrot.slane %v7928_v40, 1  ;;  %v7945_v3 = vor.u32 %v7944_v52, %v7940_v39  ;;  %v7952_v21 = vor.u32 %v7951_v17, %v7947_v46 }
 0x949   : > { %v10987_v61 = vcombine.low %v8056_v37, %v16725_v1  ;;  %v7937_v7 = vrot.slane %v7935_v26, 1  ;;  %v7959_v15 = vor.u32 %v7958_v27, %v7954_v24  ;;  %v7966_v6 = vor.u32 %v7965_v33, %v7961_v23  ;;  %v12533_v26 = vld [vmem:[%s17823_s11 + $0x120] ss:$8 sps:$4 sm:$0xff]  }
 0x94a   : > { %v8151_v19 = vrot.slane %v10985_v31, %v16138_v43  ;;  %v7931_v22 = vor.u32 %v7930_v32, %v7926_v58  ;;  %v8049_v25 = vcombine.low %v7945_v3, %v7952_v21  ;;  %v7973_v36 = vrot.slane %v7917_v9, 1 }
 0x94b   : > { %v16731_v44 = vrot.slane %v10987_v61, %v16138_v43  ;;  %v7938_v62 = vor.u32 %v7937_v7, %v7933_v0  ;;  %v8077_v42 = vcombine.low %v7959_v15, %v7966_v6  ;;  %v7974_v49 = vrot.slane %v7918_v2, 1 }
 0x94c   : > { %v16734_v8 = vrot.slane %v8049_v25, %v16138_v43  ;;  %v7975_v34 = vrot.slane %v16694_v41, 1  ;;  %v7976_v14 = vrot.slane %v16698_v60, 1  ;;  %v7977_v39 = vrot.slane %v7921_v50, 1 }
 0x94d   : > { %v8173_v28 = vcombine.low %v8151_v19, %v16731_v44  ;;  %v8174_v46 = vcombine.high %v8151_v19, %v16731_v44  ;;  %v8031_v63 = vcombine.low %v7931_v22, %v7938_v62  ;;  %v16744_v30 = vrot.slane %v8077_v42, %v16138_v43 }
 0x94e   : > { %v7978_v41 = vrot.slane %v7922_v13, 1  ;;  %v8032_v5 = vcombine.low %v7973_v36, %v7974_v49  ;;  %v8065_v60 = vcombine.low %v7975_v34, %v7976_v14  ;;  %v7923_v52 = vsel %vm16114_vm7, %v7915_v16, 0  ;;  %v12530_v16 = vld [vmem:[%s17823_s11 + $0x110] ss:$8 sps:$4 sm:$0xff]  }
 0x94f   : > { %9777 = vmatprep.mubr.bf16.mxu1 %v8174_v46  ;;  %v16752_v17 = vrot.slane %v8031_v63, %v16138_v43  ;;  %v10988_v12 = vcombine.low %v16734_v8, %v16744_v30  ;;  %v7924_v9 = vsel %vm16114_vm7, %v7916_v47, 0  ;;  %v10990_v48 = vcombine.low %v8029_v55, %v8056_v37 }
 0x950   : > { %9778 = vmatmul.mubr.bf16.vlgmr.msra.gmra.mrb[96].mxu1 %v8173_v28  ;;  %v16759_v51 = vrot.slane %v8032_v5, %v16138_v43  ;;  %v8093_v50 = vcombine.low %v7977_v39, %v7978_v41  ;;  %v8103_v13 = vcombine.low %v7923_v52, %v7924_v9  ;;  %v8072_v54 = vrot.slane %v8065_v60, %v16138_v43  ;;  %v12541_v39 = vld [vmem:[%s17823_s11 + $0x144] ss:$8 sps:$4 sm:$0xff]  }
 0x951   : > { %9789 = vmatpush1.bf16.msra.mxu1 %v12527_v45  ;;  %v10986_v24 = vcombine.low %v16682_v10, %v16752_v17  ;;  %v16767_v56 = vrot.slane %v10988_v12, %v16138_v43  ;;  %v16771_v2 = vrot.slane %v10990_v48, %v16138_v43  ;;  %v7982_v27 = vshll.u32 %v7923_v52, 16 }
 0x952   : > { %9790 = vmatprep.subr.bf16.mxu1 %v12532_v11  ;;  %v8100_v23 = vrot.slane %v8093_v50, %v16138_v43  ;;  %v10989_v53 = vcombine.low %v16682_v10, %v16759_v51  ;;  %v8111_v20 = vrot.slane %v8103_v13, %v16138_v43  ;;  %v7980_v4 = vshrl.u32 %v7923_v52, 16  ;;  %v12539_v11 = vld [vmem:[%s17823_s11 + $0x140] ss:$8 sps:$4 sm:$0xff]   ;;  %v12542_v50 = vld [vmem:[%s17823_s11 + $0x150] ss:$8 sps:$4 sm:$0xff]  }
 0x953   : > { %v16781_v38 = vrot.slane %v10986_v24, %v16138_v43  ;;  %v7989_v58 = vshll.u32 %v7924_v9, 16  ;;  %v10993_v47 = vcombine.low %v16752_v17, %v16734_v8  ;;  %v7984_v40 = vrot.slane %v7982_v27, 1  ;;  %v12536_v8 = vld [vmem:[%s17823_s11 + $0x130] ss:$8 sps:$4 sm:$0xff]   ;;  %v12544_v17 = vld [vmem:[%s17823_s11 + $0x154] ss:$8 sps:$4 sm:$0xff]  }
 0x954   : > { %v10991_v33 = vcombine.low %v8072_v54, %v8100_v23  ;;  %v10992_v55 = vcombine.low %v16725_v1, %v8111_v20  ;;  %v7987_v37 = vshrl.u32 %v7924_v9, 16  ;;  %v16794_v32 = vrot.slane %v10989_v53, %v16138_v43  ;;  %v12538_v1 = vld [vmem:[%s17823_s11 + $0x134] ss:$8 sps:$4 sm:$0xff]   ;;  %v12545_v27 = vld [vmem:[%s17823_s11 + $0x160] ss:$8 sps:$4 sm:$0xff]  }
 0x955   : > { %9791 = vmatpush1.bf16.msra.mxu1 %v12530_v16  ;;  %v8176_v0 = vcombine.high %v16781_v38, %v16767_v56  ;;  %v8175_v31 = vcombine.low %v16781_v38, %v16767_v56  ;;  %v7991_v3 = vrot.slane %v7989_v58, 1  ;;  %v7985_v7 = vor.u32 %v7984_v40, %v7980_v4  ;;  %v12550_v4 = vld [vmem:[%s17823_s11 + $0x174] ss:$8 sps:$4 sm:$0xff]   ;;  %v12548_v58 = vld [vmem:[%s17823_s11 + $0x170] ss:$8 sps:$4 sm:$0xff]  }
 0x956   : > { %9792 = vmatprep.subr.bf16.mxu1 %v12535_v35  ;;  %v16800_v21 = vrot.slane %v10991_v33, %v16138_v43  ;;  %v16803_v61 = vrot.slane %v10992_v55, %v16138_v43  ;;  %v7995_v15 = vrot.slane %v7923_v52, 1  ;;  %v7996_v19 = vrot.slane %v7924_v9, 1  ;;  %v12551_v33 = vld [vmem:[%s17823_s11 + $0x180] ss:$8 sps:$4 sm:$0xff]   ;;  %v12556_v55 = vld [vmem:[%s17823_s11 + $0x194] ss:$8 sps:$4 sm:$0xff]  }
 0x957   : > { %9820 = vmatprep.mubr.bf16.mxu1 %v8176_v0  ;;  %v7992_v6 = vor.u32 %v7991_v3, %v7987_v37  ;;  %v10994_v22 = vcombine.low %v16759_v51, %v8072_v54  ;;  %v10997_v25 = vcombine.low %v8111_v20, %v16679_v59  ;;  %v16840_v12 = vrot.slane %v10993_v47, %v16138_v43  ;;  %v12553_v47 = vld [vmem:[%s17823_s11 + $0x184] ss:$8 sps:$4 sm:$0xff]   ;;  %v12554_v40 = vld [vmem:[%s17823_s11 + $0x190] ss:$8 sps:$4 sm:$0xff]   ;;  %v12557_v0 = vld [vmem:[%s17823_s11 + $0x1a0] ss:$8 sps:$4 sm:$0xff]  }
 0x958   : > { %v8210_v36 = vcombine.high %v16794_v32, %v16800_v21  ;;  %v8209_v62 = vcombine.low %v16794_v32, %v16800_v21  ;;  %v8212_v42 = vcombine.high %v16771_v2, %v16803_v61  ;;  %v8211_v49 = vcombine.low %v16771_v2, %v16803_v61  ;;  %v12559_v37 = vld [vmem:[%s17823_s11 + $0x1a4] ss:$8 sps:$4 sm:$0xff]   ;;  %v12560_v3 = vld [vmem:[%s17823_s11 + $0x1b0] ss:$8 sps:$4 sm:$0xff]   ;;  %v12581_v38 = vld [vmem:[%s17823_s11 + $0x220] ss:$8 sps:$4 sm:$0xff]  }
 0x959   : > { %9793 = vmatpush1.bf16.msra.mxu1 %v12533_v26  ;;  %v8104_v34 = vcombine.low %v7985_v7, %v7992_v6  ;;  %v8120_v14 = vcombine.low %v7995_v15, %v7996_v19  ;;  %v16819_v59 = vrot.slane %v10997_v25, %v16138_v43  ;;  %v16843_v9 = vrot.slane %v10994_v22, %v16138_v43  ;;  %v12562_v26 = vld [vmem:[%s17823_s11 + $0x1b4] ss:$8 sps:$4 sm:$0xff]   ;;  %v12563_v7 = vld [vmem:[%s17823_s11 + $0x1c0] ss:$8 sps:$4 sm:$0xff]   ;;  %v12566_v6 = vld [vmem:[%s17823_s11 + $0x1d0] ss:$8 sps:$4 sm:$0xff]  }
 0x95a   : > { %9794 = vmatprep.subr.bf16.mxu1 %v12538_v1  ;;  %v12565_v1 = vld [vmem:[%s17823_s11 + $0x1c4] ss:$8 sps:$4 sm:$0xff]   ;;  %v12568_v15 = vld [vmem:[%s17823_s11 + $0x1d4] ss:$8 sps:$4 sm:$0xff]   ;;  %v12569_v22 = vld [vmem:[%s17823_s11 + $0x1e0] ss:$8 sps:$4 sm:$0xff]  }
 0x95b   : > { %v8118_v28 = vrot.slane %v8104_v34, %v16138_v43  ;;  %v8127_v46 = vrot.slane %v8120_v14, %v16138_v43  ;;  %v8266_v45 = vcombine.high %v16731_v44, %v16819_v59  ;;  %v8265_v63 = vcombine.low %v16731_v44, %v16819_v59  ;;  %v12571_v19 = vld [vmem:[%s17823_s11 + $0x1e4] ss:$8 sps:$4 sm:$0xff]   ;;  %v12574_v25 = vld [vmem:[%s17823_s11 + $0x1f4] ss:$8 sps:$4 sm:$0xff]   ;;  %v12575_v14 = vld [vmem:[%s17823_s11 + $0x200] ss:$8 sps:$4 sm:$0xff]  }
 0x95c   : > { %v12577_v34 = vld [vmem:[%s17823_s11 + $0x204] ss:$8 sps:$4 sm:$0xff]   ;;  %v12629_v32 = vld [vmem:[%s17823_s11 + $0x320] ss:$8 sps:$4 sm:$0xff]   ;;  %v12682_v61 = vld [vmem:[%s17823_s11 + $0x434] ss:$8 sps:$4 sm:$0xff]  }
 0x95d   : > { %9795 = vmatpush1.bf16.msra.mxu1 %v12536_v8  ;;  %v10995_v41 = vcombine.low %v16744_v30, %v8118_v28  ;;  %v10996_v5 = vcombine.low %v8100_v23, %v8127_v46  ;;  %v10998_v60 = vcombine.low %v8118_v28, %v16682_v10  ;;  %v8270_v52 = vcombine.low %v8127_v46, %v16682_v10  ;;  %v12572_v8 = vld [vmem:[%s17823_s11 + $0x1f0] ss:$8 sps:$4 sm:$0xff]   ;;  %v12583_v46 = vld [vmem:[%s17823_s11 + $0x224] ss:$8 sps:$4 sm:$0xff]   ;;  %v12677_v2 = vld [vmem:[%s17823_s11 + $0x420] ss:$8 sps:$4 sm:$0xff]  }
 0x95e   : > { %9796 = vmatprep.subr.bf16.mxu1 %v12541_v39  ;;  %v12580_v39 = vld [vmem:[%s17823_s11 + $0x214] ss:$8 sps:$4 sm:$0xff]   ;;  %v12578_v28 = vld [vmem:[%s17823_s11 + $0x210] ss:$8 sps:$4 sm:$0xff]   ;;  %v12821_v44 = vld [vmem:[%s17823_s11 + $0x720] ss:$8 sps:$4 sm:$0xff]  }
 0x95f   : > { %v16846_v48 = vrot.slane %v10995_v41, %v16138_v43  ;;  %v16849_v30 = vrot.slane %v10996_v5, %v16138_v43  ;;  %v16852_v51 = vrot.slane %v10998_v60, %v16138_v43  ;;  %v16855_v10 = vrot.slane %v8270_v52, %v16138_v43  ;;  %v12547_v43 = vld [vmem:[%s17823_s11 + $0x164] ss:$8 sps:$4 sm:$0xff]   ;;  %v12587_v41 = vld [vmem:[%s17823_s11 + $0x240] ss:$8 sps:$4 sm:$0xff]   ;;  %v12592_v5 = vld [vmem:[%s17823_s11 + $0x254] ss:$8 sps:$4 sm:$0xff]  }
 0x960   : > { %v12590_v60 = vld [vmem:[%s17823_s11 + $0x250] ss:$8 sps:$4 sm:$0xff]   ;;  %v12595_v52 = vld [vmem:[%s17823_s11 + $0x264] ss:$8 sps:$4 sm:$0xff]   ;;  %v12826_v59 = vld [vmem:[%s17823_s11 + $0x734] ss:$8 sps:$4 sm:$0xff]  }
 0x961   : > { %9797 = vmatpush1.bf16.msra.mxu1 %v12539_v11  ;;  %v8246_v13 = vcombine.high %v16840_v12, %v16846_v48  ;;  %v8245_v16 = vcombine.low %v16840_v12, %v16846_v48  ;;  %v8248_v24 = vcombine.high %v16843_v9, %v16849_v30  ;;  %v8247_v54 = vcombine.low %v16843_v9, %v16849_v30  ;;  %v12589_v11 = vld [vmem:[%s17823_s11 + $0x244] ss:$8 sps:$4 sm:$0xff]   ;;  %v12725_v12 = vld [vmem:[%s17823_s11 + $0x520] ss:$8 sps:$4 sm:$0xff]   ;;  %v12730_v48 = vld [vmem:[%s17823_s11 + $0x534] ss:$8 sps:$4 sm:$0xff]  }
 0x962   : > { %9798 = vmatprep.subr.bf16.mxu1 %v12544_v17  ;;  %v8268_v35 = vcombine.high %v16767_v56, %v16852_v51  ;;  %v8267_v23 = vcombine.low %v16767_v56, %v16852_v51  ;;  %v8286_v53 = vcombine.high %v16800_v21, %v16855_v10  ;;  %v8285_v20 = vcombine.low %v16800_v21, %v16855_v10  ;;  %v12593_v17 = vld [vmem:[%s17823_s11 + $0x260] ss:$8 sps:$4 sm:$0xff]   ;;  %v12778_v30 = vld [vmem:[%s17823_s11 + $0x634] ss:$8 sps:$4 sm:$0xff]  }
 0x963   : > { %v12773_v9 = vld [vmem:[%s17823_s11 + $0x620] ss:$8 sps:$4 sm:$0xff]   ;;  %v12874_v51 = vld [vmem:[%s17823_s11 + $0x834] ss:$8 sps:$4 sm:$0xff]   ;;  %vm10519_vm2 = vcmask 24576  }
 0x964   : > { %v12869_v56 = vld [vmem:[%s17823_s11 + $0x820] ss:$8 sps:$4 sm:$0xff]   ;;  %v12915_v21 = vld [vmem:[%s17825_s13 + $0x50] sm:$0xff]  }
 0x965   : > { %9799 = vmatpush1.bf16.msra.mxu1 %v12542_v50  ;;  %v12598_v50 = vld [vmem:[%s17823_s11 + $0x274] ss:$8 sps:$4 sm:$0xff]  }
 0x966   : > { %9800 = vmatprep.subr.bf16.mxu1 %v12547_v43  ;;  %v12596_v43 = vld [vmem:[%s17823_s11 + $0x270] ss:$8 sps:$4 sm:$0xff]  }
 0x967   : > { %v12916_v10 = vld [vmem:[%s17825_s13 + $0x10] sm:$0xff]  }
 0x969   : > { %9801 = vmatpush1.bf16.msra.mxu1 %v12545_v27  ;;  %v12601_v27 = vld [vmem:[%s17823_s11 + $0x284] ss:$8 sps:$4 sm:$0xff]  }
 0x96a   : > { %9802 = vmatprep.subr.bf16.mxu1 %v12550_v4  ;;  %v12599_v4 = vld [vmem:[%s17823_s11 + $0x280] ss:$8 sps:$4 sm:$0xff]  }
 0x96d   : > { %9803 = vmatpush1.bf16.msra.mxu1 %v12548_v58  ;;  %v12604_v58 = vld [vmem:[%s17823_s11 + $0x294] ss:$8 sps:$4 sm:$0xff]  }
 0x96e   : > { %9804 = vmatprep.subr.bf16.mxu1 %v12553_v47  ;;  %v12602_v47 = vld [vmem:[%s17823_s11 + $0x290] ss:$8 sps:$4 sm:$0xff]  }
 0x971   : > { %9805 = vmatpush1.bf16.msra.mxu1 %v12551_v33  ;;  %v12607_v33 = vld [vmem:[%s17823_s11 + $0x2a4] ss:$8 sps:$4 sm:$0xff]  }
 0x972   : > { %9806 = vmatprep.subr.bf16.mxu1 %v12556_v55  ;;  %v12605_v55 = vld [vmem:[%s17823_s11 + $0x2a0] ss:$8 sps:$4 sm:$0xff]  }
 0x975   : > { %9807 = vmatpush1.bf16.msra.mxu1 %v12554_v40  ;;  %v12610_v40 = vld [vmem:[%s17823_s11 + $0x2b4] ss:$8 sps:$4 sm:$0xff]  }
 0x976   : > { %9808 = vmatprep.subr.bf16.mxu1 %v12559_v37  ;;  %v12608_v37 = vld [vmem:[%s17823_s11 + $0x2b0] ss:$8 sps:$4 sm:$0xff]  }
 0x979   : > { %9809 = vmatpush1.bf16.msra.mxu1 %v12557_v0  ;;  %v12613_v0 = vld [vmem:[%s17823_s11 + $0x2c4] ss:$8 sps:$4 sm:$0xff]  }
 0x97a   : > { %9810 = vmatprep.subr.bf16.mxu1 %v12562_v26  ;;  %v12611_v26 = vld [vmem:[%s17823_s11 + $0x2c0] ss:$8 sps:$4 sm:$0xff]  }
 0x97d   : > { %9811 = vmatpush1.bf16.msra.mxu1 %v12560_v3  ;;  %v12616_v3 = vld [vmem:[%s17823_s11 + $0x2d4] ss:$8 sps:$4 sm:$0xff]  }
 0x97e   : > { %9812 = vmatprep.subr.bf16.mxu1 %v12565_v1  ;;  %v12614_v1 = vld [vmem:[%s17823_s11 + $0x2d0] ss:$8 sps:$4 sm:$0xff]  }
 0x981   : > { %9813 = vmatpush1.bf16.msra.mxu1 %v12563_v7  ;;  %v12619_v7 = vld [vmem:[%s17823_s11 + $0x2e4] ss:$8 sps:$4 sm:$0xff]  }
 0x982   : > { %9814 = vmatprep.subr.bf16.mxu1 %v12568_v15  ;;  %v12617_v15 = vld [vmem:[%s17823_s11 + $0x2e0] ss:$8 sps:$4 sm:$0xff]  }
 0x985   : > { %9815 = vmatpush1.bf16.msra.mxu1 %v12566_v6  ;;  %v12622_v6 = vld [vmem:[%s17823_s11 + $0x2f4] ss:$8 sps:$4 sm:$0xff]  }
 0x986   : > { %9816 = vmatprep.subr.bf16.mxu1 %v12571_v19  ;;  %v12620_v19 = vld [vmem:[%s17823_s11 + $0x2f0] ss:$8 sps:$4 sm:$0xff]  }
 0x989   : > { %9817 = vmatpush1.bf16.msra.mxu1 %v12569_v22  ;;  %v12625_v22 = vld [vmem:[%s17823_s11 + $0x304] ss:$8 sps:$4 sm:$0xff]  }
 0x98a   : > { %9818 = vmatprep.subr.bf16.mxu1 %v12574_v25  ;;  %v12623_v25 = vld [vmem:[%s17823_s11 + $0x300] ss:$8 sps:$4 sm:$0xff]  }
 0x98d   : > { %9819 = vmatpush1.bf16.msra.mxu1 %v12572_v8  ;;  %v12628_v8 = vld [vmem:[%s17823_s11 + $0x314] ss:$8 sps:$4 sm:$0xff]  }
 0x98e   : > { %9831 = vmatprep.subr.bf16.mxu1 %v12577_v34  ;;  %v12626_v34 = vld [vmem:[%s17823_s11 + $0x310] ss:$8 sps:$4 sm:$0xff]  }
 0x990   : > { %9821 = vmatmul.mubr.bf16.vlgmr.msra.gmra.mrb[96].mxu1 %v8175_v31  ;;  %v12586_v31 = vld [vmem:[%s17823_s11 + $0x234] ss:$8 sps:$4 sm:$0xff]  }
 0x991   : > { %9832 = vmatpush1.bf16.msra.mxu1 %v12575_v14  ;;  %9863 = vmatprep.mubr.bf16.mxu1 %v8210_v36  ;;  %v12584_v36 = vld [vmem:[%s17823_s11 + $0x230] ss:$8 sps:$4 sm:$0xff]   ;;  %v12631_v14 = vld [vmem:[%s17823_s11 + $0x324] ss:$8 sps:$4 sm:$0xff]  }
 0x992   : > { %9833 = vmatprep.subr.bf16.mxu1 %v12580_v39  ;;  %v12637_v39 = vld [vmem:[%s17823_s11 + $0x344] ss:$8 sps:$4 sm:$0xff]  }
 0x995   : > { %9834 = vmatpush1.bf16.msra.mxu1 %v12578_v28  ;;  %v12635_v28 = vld [vmem:[%s17823_s11 + $0x340] ss:$8 sps:$4 sm:$0xff]  }
 0x996   : > { %9835 = vmatprep.subr.bf16.mxu1 %v12583_v46  ;;  %v12640_v46 = vld [vmem:[%s17823_s11 + $0x354] ss:$8 sps:$4 sm:$0xff]  }
 0x999   : > { %9836 = vmatpush1.bf16.msra.mxu1 %v12581_v38  ;;  %v12638_v38 = vld [vmem:[%s17823_s11 + $0x350] ss:$8 sps:$4 sm:$0xff]  }
 0x99a   : > { %9837 = vmatprep.subr.bf16.mxu1 %v12586_v31  ;;  %v12643_v31 = vld [vmem:[%s17823_s11 + $0x364] ss:$8 sps:$4 sm:$0xff]  }
 0x99d   : > { %9838 = vmatpush1.bf16.msra.mxu1 %v12584_v36  ;;  %v12641_v36 = vld [vmem:[%s17823_s11 + $0x360] ss:$8 sps:$4 sm:$0xff]  }
 0x99e   : > { %9839 = vmatprep.subr.bf16.mxu1 %v12589_v11  ;;  %v12646_v11 = vld [vmem:[%s17823_s11 + $0x374] ss:$8 sps:$4 sm:$0xff]  }
 0x9a1   : > { %9840 = vmatpush1.bf16.msra.mxu1 %v12587_v41  ;;  %v12644_v41 = vld [vmem:[%s17823_s11 + $0x370] ss:$8 sps:$4 sm:$0xff]  }
 0x9a2   : > { %9841 = vmatprep.subr.bf16.mxu1 %v12592_v5  ;;  %v12649_v5 = vld [vmem:[%s17823_s11 + $0x384] ss:$8 sps:$4 sm:$0xff]  }
 0x9a5   : > { %9842 = vmatpush1.bf16.msra.mxu1 %v12590_v60  ;;  %v12647_v60 = vld [vmem:[%s17823_s11 + $0x380] ss:$8 sps:$4 sm:$0xff]  }
 0x9a6   : > { %9843 = vmatprep.subr.bf16.mxu1 %v12595_v52  ;;  %v12652_v52 = vld [vmem:[%s17823_s11 + $0x394] ss:$8 sps:$4 sm:$0xff]  }
 0x9a9   : > { %9844 = vmatpush1.bf16.msra.mxu1 %v12593_v17  ;;  %v12650_v17 = vld [vmem:[%s17823_s11 + $0x390] ss:$8 sps:$4 sm:$0xff]  }
 0x9aa   : > { %9845 = vmatprep.subr.bf16.mxu1 %v12598_v50  ;;  %v12655_v50 = vld [vmem:[%s17823_s11 + $0x3a4] ss:$8 sps:$4 sm:$0xff]  }
 0x9ad   : > { %9846 = vmatpush1.bf16.msra.mxu1 %v12596_v43  ;;  %v12653_v43 = vld [vmem:[%s17823_s11 + $0x3a0] ss:$8 sps:$4 sm:$0xff]  }
 0x9ae   : > { %9847 = vmatprep.subr.bf16.mxu1 %v12601_v27  ;;  %v12658_v27 = vld [vmem:[%s17823_s11 + $0x3b4] ss:$8 sps:$4 sm:$0xff]  }
 0x9b1   : > { %9848 = vmatpush1.bf16.msra.mxu1 %v12599_v4  ;;  %v12656_v4 = vld [vmem:[%s17823_s11 + $0x3b0] ss:$8 sps:$4 sm:$0xff]  }
 0x9b2   : > { %9849 = vmatprep.subr.bf16.mxu1 %v12604_v58  ;;  %v12661_v58 = vld [vmem:[%s17823_s11 + $0x3c4] ss:$8 sps:$4 sm:$0xff]  }
 0x9b5   : > { %9850 = vmatpush1.bf16.msra.mxu1 %v12602_v47  ;;  %v12659_v47 = vld [vmem:[%s17823_s11 + $0x3c0] ss:$8 sps:$4 sm:$0xff]  }
 0x9b6   : > { %9851 = vmatprep.subr.bf16.mxu1 %v12607_v33  ;;  %v12664_v33 = vld [vmem:[%s17823_s11 + $0x3d4] ss:$8 sps:$4 sm:$0xff]  }
 0x9b9   : > { %9852 = vmatpush1.bf16.msra.mxu1 %v12605_v55  ;;  %v12662_v55 = vld [vmem:[%s17823_s11 + $0x3d0] ss:$8 sps:$4 sm:$0xff]  }
 0x9ba   : > { %9853 = vmatprep.subr.bf16.mxu1 %v12610_v40  ;;  %v12667_v40 = vld [vmem:[%s17823_s11 + $0x3e4] ss:$8 sps:$4 sm:$0xff]  }
 0x9bd   : > { %9854 = vmatpush1.bf16.msra.mxu1 %v12608_v37  ;;  %v12665_v37 = vld [vmem:[%s17823_s11 + $0x3e0] ss:$8 sps:$4 sm:$0xff]  }
 0x9be   : > { %9855 = vmatprep.subr.bf16.mxu1 %v12613_v0  ;;  %v12670_v0 = vld [vmem:[%s17823_s11 + $0x3f4] ss:$8 sps:$4 sm:$0xff]  }
 0x9c1   : > { %9856 = vmatpush1.bf16.msra.mxu1 %v12611_v26  ;;  %v12668_v26 = vld [vmem:[%s17823_s11 + $0x3f0] ss:$8 sps:$4 sm:$0xff]  }
 0x9c2   : > { %9857 = vmatprep.subr.bf16.mxu1 %v12616_v3  ;;  %v12673_v3 = vld [vmem:[%s17823_s11 + $0x404] ss:$8 sps:$4 sm:$0xff]  }
 0x9c5   : > { %9858 = vmatpush1.bf16.msra.mxu1 %v12614_v1  ;;  %v12671_v1 = vld [vmem:[%s17823_s11 + $0x400] ss:$8 sps:$4 sm:$0xff]  }
 0x9c6   : > { %9859 = vmatprep.subr.bf16.mxu1 %v12619_v7  ;;  %v12676_v7 = vld [vmem:[%s17823_s11 + $0x414] ss:$8 sps:$4 sm:$0xff]  }
 0x9c9   : > { %9860 = vmatpush1.bf16.msra.mxu1 %v12617_v15  ;;  %v12674_v15 = vld [vmem:[%s17823_s11 + $0x410] ss:$8 sps:$4 sm:$0xff]  }
 0x9ca   : > { %9861 = vmatprep.subr.bf16.mxu1 %v12622_v6  ;;  %v12679_v6 = vld [vmem:[%s17823_s11 + $0x424] ss:$8 sps:$4 sm:$0xff]  }
 0x9cd   : > { %9862 = vmatpush1.bf16.msra.mxu1 %v12620_v19  ;;  %v12683_v19 = vld [vmem:[%s17823_s11 + $0x440] ss:$8 sps:$4 sm:$0xff]  }
 0x9ce   : > { %9874 = vmatprep.subr.bf16.mxu1 %v12625_v22  ;;  %v12688_v22 = vld [vmem:[%s17823_s11 + $0x454] ss:$8 sps:$4 sm:$0xff]  }
 0x9d0   : > { %9864 = vmatmul.mubr.bf16.vlgmr.msra.gmra.mrb[96].mxu1 %v8209_v62  ;;  %v12634_v62 = vld [vmem:[%s17823_s11 + $0x334] ss:$8 sps:$4 sm:$0xff]  }
 0x9d1   : > { %9875 = vmatpush1.bf16.msra.mxu1 %v12623_v25  ;;  %9906 = vmatprep.mubr.bf16.mxu1 %v8212_v42  ;;  %v12632_v42 = vld [vmem:[%s17823_s11 + $0x330] ss:$8 sps:$4 sm:$0xff]  }
 0x9d2   : > { %9876 = vmatprep.subr.bf16.mxu1 %v12628_v8  ;;  %v12686_v25 = vld [vmem:[%s17823_s11 + $0x450] ss:$8 sps:$4 sm:$0xff]   ;;  %v12691_v8 = vld [vmem:[%s17823_s11 + $0x464] ss:$8 sps:$4 sm:$0xff]  }
 0x9d5   : > { %9877 = vmatpush1.bf16.msra.mxu1 %v12626_v34  ;;  %v12689_v34 = vld [vmem:[%s17823_s11 + $0x460] ss:$8 sps:$4 sm:$0xff]  }
 0x9d6   : > { %9878 = vmatprep.subr.bf16.mxu1 %v12631_v14  ;;  %v12694_v14 = vld [vmem:[%s17823_s11 + $0x474] ss:$8 sps:$4 sm:$0xff]  }
 0x9d9   : > { %9879 = vmatpush1.bf16.msra.mxu1 %v12629_v32  ;;  %v12692_v32 = vld [vmem:[%s17823_s11 + $0x470] ss:$8 sps:$4 sm:$0xff]  }
 0x9da   : > { %9880 = vmatprep.subr.bf16.mxu1 %v12634_v62  ;;  %v12697_v62 = vld [vmem:[%s17823_s11 + $0x484] ss:$8 sps:$4 sm:$0xff]  }
 0x9dd   : > { %9881 = vmatpush1.bf16.msra.mxu1 %v12632_v42  ;;  %v12695_v42 = vld [vmem:[%s17823_s11 + $0x480] ss:$8 sps:$4 sm:$0xff]  }
 0x9de   : > { %9882 = vmatprep.subr.bf16.mxu1 %v12637_v39  ;;  %v12700_v39 = vld [vmem:[%s17823_s11 + $0x494] ss:$8 sps:$4 sm:$0xff]  }
 0x9e1   : > { %9883 = vmatpush1.bf16.msra.mxu1 %v12635_v28  ;;  %v12698_v28 = vld [vmem:[%s17823_s11 + $0x490] ss:$8 sps:$4 sm:$0xff]  }
 0x9e2   : > { %9884 = vmatprep.subr.bf16.mxu1 %v12640_v46  ;;  %v12703_v46 = vld [vmem:[%s17823_s11 + $0x4a4] ss:$8 sps:$4 sm:$0xff]  }
 0x9e5   : > { %9885 = vmatpush1.bf16.msra.mxu1 %v12638_v38  ;;  %v12701_v38 = vld [vmem:[%s17823_s11 + $0x4a0] ss:$8 sps:$4 sm:$0xff]  }
 0x9e6   : > { %9886 = vmatprep.subr.bf16.mxu1 %v12643_v31  ;;  %v12706_v31 = vld [vmem:[%s17823_s11 + $0x4b4] ss:$8 sps:$4 sm:$0xff]  }
 0x9e9   : > { %9887 = vmatpush1.bf16.msra.mxu1 %v12641_v36  ;;  %v12704_v36 = vld [vmem:[%s17823_s11 + $0x4b0] ss:$8 sps:$4 sm:$0xff]  }
 0x9ea   : > { %9888 = vmatprep.subr.bf16.mxu1 %v12646_v11  ;;  %v12709_v11 = vld [vmem:[%s17823_s11 + $0x4c4] ss:$8 sps:$4 sm:$0xff]  }
 0x9ed   : > { %9889 = vmatpush1.bf16.msra.mxu1 %v12644_v41  ;;  %v12707_v41 = vld [vmem:[%s17823_s11 + $0x4c0] ss:$8 sps:$4 sm:$0xff]  }
 0x9ee   : > { %9890 = vmatprep.subr.bf16.mxu1 %v12649_v5  ;;  %v12712_v5 = vld [vmem:[%s17823_s11 + $0x4d4] ss:$8 sps:$4 sm:$0xff]  }
 0x9f1   : > { %9891 = vmatpush1.bf16.msra.mxu1 %v12647_v60  ;;  %v12710_v60 = vld [vmem:[%s17823_s11 + $0x4d0] ss:$8 sps:$4 sm:$0xff]  }
 0x9f2   : > { %9892 = vmatprep.subr.bf16.mxu1 %v12652_v52  ;;  %v12715_v52 = vld [vmem:[%s17823_s11 + $0x4e4] ss:$8 sps:$4 sm:$0xff]  }
 0x9f5   : > { %9893 = vmatpush1.bf16.msra.mxu1 %v12650_v17  ;;  %v12713_v17 = vld [vmem:[%s17823_s11 + $0x4e0] ss:$8 sps:$4 sm:$0xff]  }
 0x9f6   : > { %9894 = vmatprep.subr.bf16.mxu1 %v12655_v50  ;;  %v12718_v50 = vld [vmem:[%s17823_s11 + $0x4f4] ss:$8 sps:$4 sm:$0xff]  }
 0x9f9   : > { %9895 = vmatpush1.bf16.msra.mxu1 %v12653_v43  ;;  %v12716_v43 = vld [vmem:[%s17823_s11 + $0x4f0] ss:$8 sps:$4 sm:$0xff]  }
 0x9fa   : > { %9896 = vmatprep.subr.bf16.mxu1 %v12658_v27  ;;  %v12721_v27 = vld [vmem:[%s17823_s11 + $0x504] ss:$8 sps:$4 sm:$0xff]  }
 0x9fd   : > { %9897 = vmatpush1.bf16.msra.mxu1 %v12656_v4  ;;  %v12719_v4 = vld [vmem:[%s17823_s11 + $0x500] ss:$8 sps:$4 sm:$0xff]  }
 0x9fe   : > { %9898 = vmatprep.subr.bf16.mxu1 %v12661_v58  ;;  %v12724_v58 = vld [vmem:[%s17823_s11 + $0x514] ss:$8 sps:$4 sm:$0xff]  }
 0xa01   : > { %9899 = vmatpush1.bf16.msra.mxu1 %v12659_v47  ;;  %v12722_v47 = vld [vmem:[%s17823_s11 + $0x510] ss:$8 sps:$4 sm:$0xff]  }
 0xa02   : > { %9900 = vmatprep.subr.bf16.mxu1 %v12664_v33  ;;  %v12727_v33 = vld [vmem:[%s17823_s11 + $0x524] ss:$8 sps:$4 sm:$0xff]  }
 0xa05   : > { %9901 = vmatpush1.bf16.msra.mxu1 %v12662_v55  ;;  %v12731_v55 = vld [vmem:[%s17823_s11 + $0x540] ss:$8 sps:$4 sm:$0xff]  }
 0xa06   : > { %9902 = vmatprep.subr.bf16.mxu1 %v12667_v40  ;;  %v12736_v40 = vld [vmem:[%s17823_s11 + $0x554] ss:$8 sps:$4 sm:$0xff]  }
 0xa09   : > { %9903 = vmatpush1.bf16.msra.mxu1 %v12665_v37  ;;  %v12734_v37 = vld [vmem:[%s17823_s11 + $0x550] ss:$8 sps:$4 sm:$0xff]  }
 0xa0a   : > { %9904 = vmatprep.subr.bf16.mxu1 %v12670_v0  ;;  %v12739_v0 = vld [vmem:[%s17823_s11 + $0x564] ss:$8 sps:$4 sm:$0xff]  }
 0xa0d   : > { %9905 = vmatpush1.bf16.msra.mxu1 %v12668_v26  ;;  %v12737_v26 = vld [vmem:[%s17823_s11 + $0x560] ss:$8 sps:$4 sm:$0xff]  }
 0xa0e   : > { %9917 = vmatprep.subr.bf16.mxu1 %v12673_v3  ;;  %v12742_v3 = vld [vmem:[%s17823_s11 + $0x574] ss:$8 sps:$4 sm:$0xff]  }
 0xa10   : > { %9907 = vmatmul.mubr.bf16.vlgmr.msra.gmra.mrb[96].mxu1 %v8211_v49  ;;  %v12680_v49 = vld [vmem:[%s17823_s11 + $0x430] ss:$8 sps:$4 sm:$0xff]  }
 0xa11   : > { %9918 = vmatpush1.bf16.msra.mxu1 %v12671_v1  ;;  %9949 = vmatprep.mubr.bf16.mxu1 %v8246_v13  ;;  %v12685_v13 = vld [vmem:[%s17823_s11 + $0x444] ss:$8 sps:$4 sm:$0xff]   ;;  %v12740_v1 = vld [vmem:[%s17823_s11 + $0x570] ss:$8 sps:$4 sm:$0xff]  }
 0xa12   : > { %9919 = vmatprep.subr.bf16.mxu1 %v12676_v7  ;;  %v12745_v7 = vld [vmem:[%s17823_s11 + $0x584] ss:$8 sps:$4 sm:$0xff]  }
 0xa15   : > { %9920 = vmatpush1.bf16.msra.mxu1 %v12674_v15  ;;  %v12743_v15 = vld [vmem:[%s17823_s11 + $0x580] ss:$8 sps:$4 sm:$0xff]  }
 0xa16   : > { %9921 = vmatprep.subr.bf16.mxu1 %v12679_v6  ;;  %v12748_v6 = vld [vmem:[%s17823_s11 + $0x594] ss:$8 sps:$4 sm:$0xff]  }
 0xa19   : > { %9922 = vmatpush1.bf16.msra.mxu1 %v12677_v2  ;;  %v12746_v2 = vld [vmem:[%s17823_s11 + $0x590] ss:$8 sps:$4 sm:$0xff]  }
 0xa1a   : > { %9923 = vmatprep.subr.bf16.mxu1 %v12682_v61  ;;  %v12751_v61 = vld [vmem:[%s17823_s11 + $0x5a4] ss:$8 sps:$4 sm:$0xff]  }
 0xa1d   : > { %9924 = vmatpush1.bf16.msra.mxu1 %v12680_v49  ;;  %v12749_v49 = vld [vmem:[%s17823_s11 + $0x5a0] ss:$8 sps:$4 sm:$0xff]  }
 0xa1e   : > { %9925 = vmatprep.subr.bf16.mxu1 %v12685_v13  ;;  %v12754_v13 = vld [vmem:[%s17823_s11 + $0x5b4] ss:$8 sps:$4 sm:$0xff]  }
 0xa21   : > { %9926 = vmatpush1.bf16.msra.mxu1 %v12683_v19  ;;  %v12752_v19 = vld [vmem:[%s17823_s11 + $0x5b0] ss:$8 sps:$4 sm:$0xff]  }
 0xa22   : > { %9927 = vmatprep.subr.bf16.mxu1 %v12688_v22  ;;  %v12757_v22 = vld [vmem:[%s17823_s11 + $0x5c4] ss:$8 sps:$4 sm:$0xff]  }
 0xa25   : > { %9928 = vmatpush1.bf16.msra.mxu1 %v12686_v25  ;;  %v12755_v25 = vld [vmem:[%s17823_s11 + $0x5c0] ss:$8 sps:$4 sm:$0xff]  }
 0xa26   : > { %9929 = vmatprep.subr.bf16.mxu1 %v12691_v8  ;;  %v12760_v8 = vld [vmem:[%s17823_s11 + $0x5d4] ss:$8 sps:$4 sm:$0xff]  }
 0xa29   : > { %9930 = vmatpush1.bf16.msra.mxu1 %v12689_v34  ;;  %v12758_v34 = vld [vmem:[%s17823_s11 + $0x5d0] ss:$8 sps:$4 sm:$0xff]  }
 0xa2a   : > { %9931 = vmatprep.subr.bf16.mxu1 %v12694_v14  ;;  %v12763_v14 = vld [vmem:[%s17823_s11 + $0x5e4] ss:$8 sps:$4 sm:$0xff]  }
 0xa2d   : > { %9932 = vmatpush1.bf16.msra.mxu1 %v12692_v32  ;;  %v12761_v32 = vld [vmem:[%s17823_s11 + $0x5e0] ss:$8 sps:$4 sm:$0xff]  }
 0xa2e   : > { %9933 = vmatprep.subr.bf16.mxu1 %v12697_v62  ;;  %v12766_v62 = vld [vmem:[%s17823_s11 + $0x5f4] ss:$8 sps:$4 sm:$0xff]  }
 0xa31   : > { %9934 = vmatpush1.bf16.msra.mxu1 %v12695_v42  ;;  %v12764_v42 = vld [vmem:[%s17823_s11 + $0x5f0] ss:$8 sps:$4 sm:$0xff]  }
 0xa32   : > { %9935 = vmatprep.subr.bf16.mxu1 %v12700_v39  ;;  %v12769_v39 = vld [vmem:[%s17823_s11 + $0x604] ss:$8 sps:$4 sm:$0xff]  }
 0xa35   : > { %9936 = vmatpush1.bf16.msra.mxu1 %v12698_v28  ;;  %v12767_v28 = vld [vmem:[%s17823_s11 + $0x600] ss:$8 sps:$4 sm:$0xff]  }
 0xa36   : > { %9937 = vmatprep.subr.bf16.mxu1 %v12703_v46  ;;  %v12772_v46 = vld [vmem:[%s17823_s11 + $0x614] ss:$8 sps:$4 sm:$0xff]  }
 0xa39   : > { %9938 = vmatpush1.bf16.msra.mxu1 %v12701_v38  ;;  %v12770_v38 = vld [vmem:[%s17823_s11 + $0x610] ss:$8 sps:$4 sm:$0xff]  }
 0xa3a   : > { %9939 = vmatprep.subr.bf16.mxu1 %v12706_v31  ;;  %v12775_v31 = vld [vmem:[%s17823_s11 + $0x624] ss:$8 sps:$4 sm:$0xff]  }
 0xa3d   : > { %9940 = vmatpush1.bf16.msra.mxu1 %v12704_v36  ;;  %v12779_v36 = vld [vmem:[%s17823_s11 + $0x640] ss:$8 sps:$4 sm:$0xff]  }
 0xa3e   : > { %9941 = vmatprep.subr.bf16.mxu1 %v12709_v11  ;;  %v12784_v11 = vld [vmem:[%s17823_s11 + $0x654] ss:$8 sps:$4 sm:$0xff]  }
 0xa41   : > { %9942 = vmatpush1.bf16.msra.mxu1 %v12707_v41  ;;  %v12782_v41 = vld [vmem:[%s17823_s11 + $0x650] ss:$8 sps:$4 sm:$0xff]  }
 0xa42   : > { %9943 = vmatprep.subr.bf16.mxu1 %v12712_v5  ;;  %v12787_v5 = vld [vmem:[%s17823_s11 + $0x664] ss:$8 sps:$4 sm:$0xff]  }
 0xa45   : > { %9944 = vmatpush1.bf16.msra.mxu1 %v12710_v60  ;;  %v12785_v60 = vld [vmem:[%s17823_s11 + $0x660] ss:$8 sps:$4 sm:$0xff]  }
 0xa46   : > { %9945 = vmatprep.subr.bf16.mxu1 %v12715_v52  ;;  %v12790_v52 = vld [vmem:[%s17823_s11 + $0x674] ss:$8 sps:$4 sm:$0xff]  }
 0xa49   : > { %9946 = vmatpush1.bf16.msra.mxu1 %v12713_v17  ;;  %v12788_v17 = vld [vmem:[%s17823_s11 + $0x670] ss:$8 sps:$4 sm:$0xff]  }
 0xa4a   : > { %9947 = vmatprep.subr.bf16.mxu1 %v12718_v50  ;;  %v12793_v50 = vld [vmem:[%s17823_s11 + $0x684] ss:$8 sps:$4 sm:$0xff]  }
 0xa4d   : > { %9948 = vmatpush1.bf16.msra.mxu1 %v12716_v43  ;;  %v12791_v43 = vld [vmem:[%s17823_s11 + $0x680] ss:$8 sps:$4 sm:$0xff]  }
 0xa4e   : > { %9960 = vmatprep.subr.bf16.mxu1 %v12721_v27  ;;  %v12796_v27 = vld [vmem:[%s17823_s11 + $0x694] ss:$8 sps:$4 sm:$0xff]  }
 0xa50   : > { %9950 = vmatmul.mubr.bf16.vlgmr.msra.gmra.mrb[96].mxu1 %v8245_v16  ;;  %v12728_v16 = vld [vmem:[%s17823_s11 + $0x530] ss:$8 sps:$4 sm:$0xff]  }
 0xa51   : > { %9961 = vmatpush1.bf16.msra.mxu1 %v12719_v4  ;;  %9992 = vmatprep.mubr.bf16.mxu1 %v8248_v24  ;;  %v12733_v24 = vld [vmem:[%s17823_s11 + $0x544] ss:$8 sps:$4 sm:$0xff]   ;;  %v12794_v4 = vld [vmem:[%s17823_s11 + $0x690] ss:$8 sps:$4 sm:$0xff]  }
 0xa52   : > { %9962 = vmatprep.subr.bf16.mxu1 %v12724_v58  ;;  %v12799_v58 = vld [vmem:[%s17823_s11 + $0x6a4] ss:$8 sps:$4 sm:$0xff]  }
 0xa55   : > { %9963 = vmatpush1.bf16.msra.mxu1 %v12722_v47  ;;  %v12797_v47 = vld [vmem:[%s17823_s11 + $0x6a0] ss:$8 sps:$4 sm:$0xff]  }
 0xa56   : > { %9964 = vmatprep.subr.bf16.mxu1 %v12727_v33  ;;  %v12802_v33 = vld [vmem:[%s17823_s11 + $0x6b4] ss:$8 sps:$4 sm:$0xff]  }
 0xa59   : > { %9965 = vmatpush1.bf16.msra.mxu1 %v12725_v12  ;;  %v12800_v12 = vld [vmem:[%s17823_s11 + $0x6b0] ss:$8 sps:$4 sm:$0xff]  }
 0xa5a   : > { %9966 = vmatprep.subr.bf16.mxu1 %v12730_v48  ;;  %v12805_v48 = vld [vmem:[%s17823_s11 + $0x6c4] ss:$8 sps:$4 sm:$0xff]  }
 0xa5d   : > { %9967 = vmatpush1.bf16.msra.mxu1 %v12728_v16  ;;  %v12803_v16 = vld [vmem:[%s17823_s11 + $0x6c0] ss:$8 sps:$4 sm:$0xff]  }
 0xa5e   : > { %9968 = vmatprep.subr.bf16.mxu1 %v12733_v24  ;;  %v12808_v24 = vld [vmem:[%s17823_s11 + $0x6d4] ss:$8 sps:$4 sm:$0xff]  }
 0xa61   : > { %9969 = vmatpush1.bf16.msra.mxu1 %v12731_v55  ;;  %v12806_v55 = vld [vmem:[%s17823_s11 + $0x6d0] ss:$8 sps:$4 sm:$0xff]  }
 0xa62   : > { %9970 = vmatprep.subr.bf16.mxu1 %v12736_v40  ;;  %v12811_v40 = vld [vmem:[%s17823_s11 + $0x6e4] ss:$8 sps:$4 sm:$0xff]  }
 0xa65   : > { %9971 = vmatpush1.bf16.msra.mxu1 %v12734_v37  ;;  %v12809_v37 = vld [vmem:[%s17823_s11 + $0x6e0] ss:$8 sps:$4 sm:$0xff]  }
 0xa66   : > { %9972 = vmatprep.subr.bf16.mxu1 %v12739_v0  ;;  %v12814_v0 = vld [vmem:[%s17823_s11 + $0x6f4] ss:$8 sps:$4 sm:$0xff]  }
 0xa69   : > { %9973 = vmatpush1.bf16.msra.mxu1 %v12737_v26  ;;  %v12812_v26 = vld [vmem:[%s17823_s11 + $0x6f0] ss:$8 sps:$4 sm:$0xff]  }
 0xa6a   : > { %9974 = vmatprep.subr.bf16.mxu1 %v12742_v3  ;;  %v12817_v3 = vld [vmem:[%s17823_s11 + $0x704] ss:$8 sps:$4 sm:$0xff]  }
 0xa6d   : > { %9975 = vmatpush1.bf16.msra.mxu1 %v12740_v1  ;;  %v12815_v1 = vld [vmem:[%s17823_s11 + $0x700] ss:$8 sps:$4 sm:$0xff]  }
 0xa6e   : > { %9976 = vmatprep.subr.bf16.mxu1 %v12745_v7  ;;  %v12820_v7 = vld [vmem:[%s17823_s11 + $0x714] ss:$8 sps:$4 sm:$0xff]  }
 0xa71   : > { %9977 = vmatpush1.bf16.msra.mxu1 %v12743_v15  ;;  %v12818_v15 = vld [vmem:[%s17823_s11 + $0x710] ss:$8 sps:$4 sm:$0xff]  }
 0xa72   : > { %9978 = vmatprep.subr.bf16.mxu1 %v12748_v6  ;;  %v12823_v6 = vld [vmem:[%s17823_s11 + $0x724] ss:$8 sps:$4 sm:$0xff]  }
 0xa75   : > { %9979 = vmatpush1.bf16.msra.mxu1 %v12746_v2  ;;  %v12827_v2 = vld [vmem:[%s17823_s11 + $0x740] ss:$8 sps:$4 sm:$0xff]  }
 0xa76   : > { %9980 = vmatprep.subr.bf16.mxu1 %v12751_v61  ;;  %v12832_v61 = vld [vmem:[%s17823_s11 + $0x754] ss:$8 sps:$4 sm:$0xff]  }
 0xa79   : > { %9981 = vmatpush1.bf16.msra.mxu1 %v12749_v49  ;;  %v12830_v49 = vld [vmem:[%s17823_s11 + $0x750] ss:$8 sps:$4 sm:$0xff]  }
 0xa7a   : > { %9982 = vmatprep.subr.bf16.mxu1 %v12754_v13  ;;  %v12835_v13 = vld [vmem:[%s17823_s11 + $0x764] ss:$8 sps:$4 sm:$0xff]  }
 0xa7d   : > { %9983 = vmatpush1.bf16.msra.mxu1 %v12752_v19  ;;  %v12833_v19 = vld [vmem:[%s17823_s11 + $0x760] ss:$8 sps:$4 sm:$0xff]  }
 0xa7e   : > { %9984 = vmatprep.subr.bf16.mxu1 %v12757_v22  ;;  %v12838_v22 = vld [vmem:[%s17823_s11 + $0x774] ss:$8 sps:$4 sm:$0xff]  }
 0xa81   : > { %9985 = vmatpush1.bf16.msra.mxu1 %v12755_v25  ;;  %v12836_v25 = vld [vmem:[%s17823_s11 + $0x770] ss:$8 sps:$4 sm:$0xff]  }
 0xa82   : > { %9986 = vmatprep.subr.bf16.mxu1 %v12760_v8  ;;  %v12841_v8 = vld [vmem:[%s17823_s11 + $0x784] ss:$8 sps:$4 sm:$0xff]  }
 0xa85   : > { %9987 = vmatpush1.bf16.msra.mxu1 %v12758_v34  ;;  %v12839_v34 = vld [vmem:[%s17823_s11 + $0x780] ss:$8 sps:$4 sm:$0xff]  }
 0xa86   : > { %9988 = vmatprep.subr.bf16.mxu1 %v12763_v14  ;;  %v12844_v14 = vld [vmem:[%s17823_s11 + $0x794] ss:$8 sps:$4 sm:$0xff]  }
 0xa89   : > { %9989 = vmatpush1.bf16.msra.mxu1 %v12761_v32  ;;  %v12842_v32 = vld [vmem:[%s17823_s11 + $0x790] ss:$8 sps:$4 sm:$0xff]  }
 0xa8a   : > { %9990 = vmatprep.subr.bf16.mxu1 %v12766_v62  ;;  %v12847_v62 = vld [vmem:[%s17823_s11 + $0x7a4] ss:$8 sps:$4 sm:$0xff]  }
 0xa8d   : > { %9991 = vmatpush1.bf16.msra.mxu1 %v12764_v42  ;;  %v12845_v42 = vld [vmem:[%s17823_s11 + $0x7a0] ss:$8 sps:$4 sm:$0xff]  }
 0xa8e   : > { %10003 = vmatprep.subr.bf16.mxu1 %v12769_v39  ;;  %v12850_v39 = vld [vmem:[%s17823_s11 + $0x7b4] ss:$8 sps:$4 sm:$0xff]  }
 0xa90   : > { %9993 = vmatmul.mubr.bf16.vlgmr.msra.gmra.mrb[96].mxu1 %v8247_v54  ;;  %v12781_v54 = vld [vmem:[%s17823_s11 + $0x644] ss:$8 sps:$4 sm:$0xff]  }
 0xa91   : > { %10004 = vmatpush1.bf16.msra.mxu1 %v12767_v28  ;;  %10035 = vmatprep.mubr.bf16.mxu1 %v8266_v45  ;;  %v12776_v45 = vld [vmem:[%s17823_s11 + $0x630] ss:$8 sps:$4 sm:$0xff]  }
 0xa92   : > { %10005 = vmatprep.subr.bf16.mxu1 %v12772_v46  ;;  %v12848_v28 = vld [vmem:[%s17823_s11 + $0x7b0] ss:$8 sps:$4 sm:$0xff]   ;;  %v12853_v46 = vld [vmem:[%s17823_s11 + $0x7c4] ss:$8 sps:$4 sm:$0xff]  }
 0xa95   : > { %10006 = vmatpush1.bf16.msra.mxu1 %v12770_v38  ;;  %v12851_v38 = vld [vmem:[%s17823_s11 + $0x7c0] ss:$8 sps:$4 sm:$0xff]  }
 0xa96   : > { %10007 = vmatprep.subr.bf16.mxu1 %v12775_v31  ;;  %v12856_v31 = vld [vmem:[%s17823_s11 + $0x7d4] ss:$8 sps:$4 sm:$0xff]  }
 0xa99   : > { %10008 = vmatpush1.bf16.msra.mxu1 %v12773_v9  ;;  %v12854_v9 = vld [vmem:[%s17823_s11 + $0x7d0] ss:$8 sps:$4 sm:$0xff]  }
 0xa9a   : > { %10009 = vmatprep.subr.bf16.mxu1 %v12778_v30  ;;  %v12859_v30 = vld [vmem:[%s17823_s11 + $0x7e4] ss:$8 sps:$4 sm:$0xff]  }
 0xa9d   : > { %10010 = vmatpush1.bf16.msra.mxu1 %v12776_v45  ;;  %v12857_v45 = vld [vmem:[%s17823_s11 + $0x7e0] ss:$8 sps:$4 sm:$0xff]  }
 0xa9e   : > { %10011 = vmatprep.subr.bf16.mxu1 %v12781_v54  ;;  %v12862_v54 = vld [vmem:[%s17823_s11 + $0x7f4] ss:$8 sps:$4 sm:$0xff]  }
 0xaa1   : > { %10012 = vmatpush1.bf16.msra.mxu1 %v12779_v36  ;;  %v12860_v36 = vld [vmem:[%s17823_s11 + $0x7f0] ss:$8 sps:$4 sm:$0xff]  }
 0xaa2   : > { %10013 = vmatprep.subr.bf16.mxu1 %v12784_v11  ;;  %v12865_v11 = vld [vmem:[%s17823_s11 + $0x804] ss:$8 sps:$4 sm:$0xff]  }
 0xaa5   : > { %10014 = vmatpush1.bf16.msra.mxu1 %v12782_v41  ;;  %v12863_v41 = vld [vmem:[%s17823_s11 + $0x800] ss:$8 sps:$4 sm:$0xff]  }
 0xaa6   : > { %10015 = vmatprep.subr.bf16.mxu1 %v12787_v5  ;;  %v12868_v5 = vld [vmem:[%s17823_s11 + $0x814] ss:$8 sps:$4 sm:$0xff]  }
 0xaa9   : > { %10016 = vmatpush1.bf16.msra.mxu1 %v12785_v60  ;;  %v12866_v60 = vld [vmem:[%s17823_s11 + $0x810] ss:$8 sps:$4 sm:$0xff]  }
 0xaaa   : > { %10017 = vmatprep.subr.bf16.mxu1 %v12790_v52  ;;  %v12871_v52 = vld [vmem:[%s17823_s11 + $0x824] ss:$8 sps:$4 sm:$0xff]  }
 0xaad   : > { %10018 = vmatpush1.bf16.msra.mxu1 %v12788_v17  ;;  %v12875_v17 = vld [vmem:[%s17823_s11 + $0x840] ss:$8 sps:$4 sm:$0xff]  }
 0xaae   : > { %10019 = vmatprep.subr.bf16.mxu1 %v12793_v50  ;;  %v12880_v50 = vld [vmem:[%s17823_s11 + $0x854] ss:$8 sps:$4 sm:$0xff]  }
 0xab1   : > { %10020 = vmatpush1.bf16.msra.mxu1 %v12791_v43  ;;  %v12878_v43 = vld [vmem:[%s17823_s11 + $0x850] ss:$8 sps:$4 sm:$0xff]  }
 0xab2   : > { %10021 = vmatprep.subr.bf16.mxu1 %v12796_v27  ;;  %v12883_v27 = vld [vmem:[%s17823_s11 + $0x864] ss:$8 sps:$4 sm:$0xff]  }
 0xab5   : > { %10022 = vmatpush1.bf16.msra.mxu1 %v12794_v4  ;;  %v12881_v4 = vld [vmem:[%s17823_s11 + $0x860] ss:$8 sps:$4 sm:$0xff]  }
 0xab6   : > { %10023 = vmatprep.subr.bf16.mxu1 %v12799_v58  ;;  %v12886_v58 = vld [vmem:[%s17823_s11 + $0x874] ss:$8 sps:$4 sm:$0xff]  }
 0xab9   : > { %10024 = vmatpush1.bf16.msra.mxu1 %v12797_v47  ;;  %v12884_v47 = vld [vmem:[%s17823_s11 + $0x870] ss:$8 sps:$4 sm:$0xff]  }
 0xaba   : > { %10025 = vmatprep.subr.bf16.mxu1 %v12802_v33  ;;  %v12889_v33 = vld [vmem:[%s17823_s11 + $0x884] ss:$8 sps:$4 sm:$0xff]  }
 0xabd   : > { %10026 = vmatpush1.bf16.msra.mxu1 %v12800_v12  ;;  %v12887_v12 = vld [vmem:[%s17823_s11 + $0x880] ss:$8 sps:$4 sm:$0xff]  }
 0xabe   : > { %10027 = vmatprep.subr.bf16.mxu1 %v12805_v48  ;;  %v12892_v48 = vld [vmem:[%s17823_s11 + $0x894] ss:$8 sps:$4 sm:$0xff]  }
 0xac1   : > { %10028 = vmatpush1.bf16.msra.mxu1 %v12803_v16  ;;  %v12890_v16 = vld [vmem:[%s17823_s11 + $0x890] ss:$8 sps:$4 sm:$0xff]  }
 0xac2   : > { %10029 = vmatprep.subr.bf16.mxu1 %v12808_v24  ;;  %v12895_v24 = vld [vmem:[%s17823_s11 + $0x8a4] ss:$8 sps:$4 sm:$0xff]  }
 0xac5   : > { %10030 = vmatpush1.bf16.msra.mxu1 %v12806_v55  ;;  %v12893_v55 = vld [vmem:[%s17823_s11 + $0x8a0] ss:$8 sps:$4 sm:$0xff]  }
 0xac6   : > { %10031 = vmatprep.subr.bf16.mxu1 %v12811_v40  ;;  %v12898_v40 = vld [vmem:[%s17823_s11 + $0x8b4] ss:$8 sps:$4 sm:$0xff]  }
 0xac9   : > { %10032 = vmatpush1.bf16.msra.mxu1 %v12809_v37  ;;  %v12896_v37 = vld [vmem:[%s17823_s11 + $0x8b0] ss:$8 sps:$4 sm:$0xff]  }
 0xaca   : > { %10033 = vmatprep.subr.bf16.mxu1 %v12814_v0  ;;  %v12901_v0 = vld [vmem:[%s17823_s11 + $0x8c4] ss:$8 sps:$4 sm:$0xff]  }
 0xacd   : > { %10034 = vmatpush1.bf16.msra.mxu1 %v12812_v26  ;;  %v12899_v26 = vld [vmem:[%s17823_s11 + $0x8c0] ss:$8 sps:$4 sm:$0xff]  }
 0xace   : > { %10046 = vmatprep.subr.bf16.mxu1 %v12817_v3  ;;  %v12904_v3 = vld [vmem:[%s17823_s11 + $0x8d4] ss:$8 sps:$4 sm:$0xff]  }
 0xad0   : > { %10036 = vmatmul.mubr.bf16.vlgmr.msra.gmra.mrb[96].mxu1 %v8265_v63  ;;  %v12824_v63 = vld [vmem:[%s17823_s11 + $0x730] ss:$8 sps:$4 sm:$0xff]  }
 0xad1   : > { %10047 = vmatpush1.bf16.msra.mxu1 %v12815_v1  ;;  %10078 = vmatprep.mubr.bf16.mxu1 %v8268_v35  ;;  %v12829_v35 = vld [vmem:[%s17823_s11 + $0x744] ss:$8 sps:$4 sm:$0xff]   ;;  %v12902_v1 = vld [vmem:[%s17823_s11 + $0x8d0] ss:$8 sps:$4 sm:$0xff]  }
 0xad2   : > { %10048 = vmatprep.subr.bf16.mxu1 %v12820_v7  ;;  %v12907_v7 = vld [vmem:[%s17823_s11 + $0x8e4] ss:$8 sps:$4 sm:$0xff]  }
 0xad5   : > { %10049 = vmatpush1.bf16.msra.mxu1 %v12818_v15  ;;  %v12905_v15 = vld [vmem:[%s17823_s11 + $0x8e0] ss:$8 sps:$4 sm:$0xff]  }
 0xad6   : > { %10050 = vmatprep.subr.bf16.mxu1 %v12823_v6  ;;  %v12910_v6 = vld [vmem:[%s17823_s11 + $0x8f4] ss:$8 sps:$4 sm:$0xff]  }
 0xad9   : > { %10051 = vmatpush1.bf16.msra.mxu1 %v12821_v44  ;;  %v12908_v44 = vld [vmem:[%s17823_s11 + $0x8f0] ss:$8 sps:$4 sm:$0xff]  }
 0xada   : > { %10052 = vmatprep.subr.bf16.mxu1 %v12826_v59  ;;  %v12911_v59 = vld [vmem:[%s17825_s13 + $0x40] sm:$0xff]  }
 0xadb   : > { %11837 = vmatprep.subr.bf16.mxu0 %v12911_v59 }
 0xadd   : > { %10053 = vmatpush1.bf16.msra.mxu1 %v12824_v63  ;;  %v12912_v63 = vld [vmem:[%s17825_s13] sm:$0xff]  }
 0xade   : > { %10054 = vmatprep.subr.bf16.mxu1 %v12829_v35  ;;  %v12913_v35 = vld [vmem:[%s17825_s13 + $0x48] sm:$0xff]   ;;  %11838 = vmatpush3.bf16.msra.mxu0 %v12912_v63 }
 0xadf   : > { %11839 = vmatprep.subr.bf16.mxu0 %v12913_v35 }
 0xae1   : > { %10055 = vmatpush1.bf16.msra.mxu1 %v12827_v2  ;;  %v12914_v2 = vld [vmem:[%s17825_s13 + $0x8] sm:$0xff]  }
 0xae2   : > { %10056 = vmatprep.subr.bf16.mxu1 %v12832_v61  ;;  %11840 = vmatpush3.bf16.msra.mxu0 %v12914_v2  ;;  %v12918_v61 = vld [vmem:[%s17825_s13 + $0x18] sm:$0xff]  }
 0xae3   : > { %11841 = vmatprep.subr.bf16.mxu0 %v12915_v21 }
 0xae5   : > { %10057 = vmatpush1.bf16.msra.mxu1 %v12830_v49  ;;  %v12919_v49 = vld [vmem:[%s17825_s13 + $0x60] sm:$0xff]  }
 0xae6   : > { %10058 = vmatprep.subr.bf16.mxu1 %v12835_v13  ;;  %11842 = vmatpush3.bf16.msra.mxu0 %v12916_v10  ;;  %v12920_v13 = vld [vmem:[%s17825_s13 + $0x20] sm:$0xff]  }
 0xae9   : > { %10059 = vmatpush1.bf16.msra.mxu1 %v12833_v19  ;;  %v12921_v19 = vld [vmem:[%s17825_s13 + $0x68] sm:$0xff]  }
 0xaea   : > { %10060 = vmatprep.subr.bf16.mxu1 %v12838_v22  ;;  %v12922_v22 = vld [vmem:[%s17825_s13 + $0x28] sm:$0xff]  }
 0xaed   : > { %10061 = vmatpush1.bf16.msra.mxu1 %v12836_v25  ;;  %v12923_v25 = vld [vmem:[%s17825_s13 + $0x70] sm:$0xff]  }
 0xaee   : > { %10062 = vmatprep.subr.bf16.mxu1 %v12841_v8  ;;  %v12924_v8 = vld [vmem:[%s17825_s13 + $0x30] sm:$0xff]  }
 0xaf1   : > { %10063 = vmatpush1.bf16.msra.mxu1 %v12839_v34  ;;  %v12925_v34 = vld [vmem:[%s17825_s13 + $0x78] sm:$0xff]  }
 0xaf2   : > { %10064 = vmatprep.subr.bf16.mxu1 %v12844_v14  ;;  %v12926_v14 = vld [vmem:[%s17825_s13 + $0x38] sm:$0xff]  }
 0xaf5   : > { %10065 = vmatpush1.bf16.msra.mxu1 %v12842_v32  ;;  %v13011_v32 = vmov 0.0  }
 0xaf6   : > { %10066 = vmatprep.subr.bf16.mxu1 %v12847_v62  ;;  %v7828_v62 = vld [vmem:[%s17824_s12] sm:$0x3] }
 0xaf9   : > { %10067 = vmatpush1.bf16.msra.mxu1 %v12845_v42  ;;  %v8134_v42 = vrot.slane %v7828_v62, %v6483_v18 }
 0xafa   : > { %10068 = vmatprep.subr.bf16.mxu1 %v12850_v39  ;;  %v8138_v39 = vrot.slane %v7828_v62, %v6487_v29 }
 0xafd   : > { %10069 = vmatpush1.bf16.msra.mxu1 %v12848_v28 }
 0xafe   : > { %10070 = vmatprep.subr.bf16.mxu1 %v12853_v46 }
 0xb01   : > { %10071 = vmatpush1.bf16.msra.mxu1 %v12851_v38 }
 0xb02   : > { %10072 = vmatprep.subr.bf16.mxu1 %v12856_v31 }
 0xb05   : > { %10073 = vmatpush1.bf16.msra.mxu1 %v12854_v9 }
 0xb06   : > { %10074 = vmatprep.subr.bf16.mxu1 %v12859_v30 }
 0xb09   : > { %10075 = vmatpush1.bf16.msra.mxu1 %v12857_v45 }
 0xb0a   : > { %10076 = vmatprep.subr.bf16.mxu1 %v12862_v54 }
 0xb0d   : > { %10077 = vmatpush1.bf16.msra.mxu1 %v12860_v36 }
 0xb0e   : > { %10089 = vmatprep.subr.bf16.mxu1 %v12865_v11 }
 0xb10   : > { %10079 = vmatmul.mubr.bf16.vlgmr.msra.gmra.mrb[96].mxu1 %v8267_v23  ;;  %v12872_v23 = vld [vmem:[%s17823_s11 + $0x830] ss:$8 sps:$4 sm:$0xff]  }
 0xb11   : > { %10090 = vmatpush1.bf16.msra.mxu1 %v12863_v41  ;;  %10121 = vmatprep.mubr.bf16.mxu1 %v8286_v53  ;;  %v12877_v53 = vld [vmem:[%s17823_s11 + $0x844] ss:$8 sps:$4 sm:$0xff]  }
 0xb12   : > { %10091 = vmatprep.subr.bf16.mxu1 %v12868_v5 }
 0xb15   : > { %10092 = vmatpush1.bf16.msra.mxu1 %v12866_v60 }
 0xb16   : > { %10093 = vmatprep.subr.bf16.mxu1 %v12871_v52 }
 0xb19   : > { %10094 = vmatpush1.bf16.msra.mxu1 %v12869_v56 }
 0xb1a   : > { %10095 = vmatprep.subr.bf16.mxu1 %v12874_v51 }
 0xb1d   : > { %10096 = vmatpush1.bf16.msra.mxu1 %v12872_v23 }
 0xb1e   : > { %10097 = vmatprep.subr.bf16.mxu1 %v12877_v53 }
 0xb21   : > { %10098 = vmatpush1.bf16.msra.mxu1 %v12875_v17 }
 0xb22   : > { %10099 = vmatprep.subr.bf16.mxu1 %v12880_v50 }
 0xb25   : > { %10100 = vmatpush1.bf16.msra.mxu1 %v12878_v43 }
 0xb26   : > { %10101 = vmatprep.subr.bf16.mxu1 %v12883_v27 }
 0xb29   : > { %10102 = vmatpush1.bf16.msra.mxu1 %v12881_v4 }
 0xb2a   : > { %10103 = vmatprep.subr.bf16.mxu1 %v12886_v58 }
 0xb2d   : > { %10104 = vmatpush1.bf16.msra.mxu1 %v12884_v47 }
 0xb2e   : > { %10105 = vmatprep.subr.bf16.mxu1 %v12889_v33 }
 0xb31   : > { %10106 = vmatpush1.bf16.msra.mxu1 %v12887_v12 }
 0xb32   : > { %10107 = vmatprep.subr.bf16.mxu1 %v12892_v48 }
 0xb35   : > { %10108 = vmatpush1.bf16.msra.mxu1 %v12890_v16 }
 0xb36   : > { %10109 = vmatprep.subr.bf16.mxu1 %v12895_v24 }
 0xb39   : > { %10110 = vmatpush1.bf16.msra.mxu1 %v12893_v55 }
 0xb3a   : > { %10111 = vmatprep.subr.bf16.mxu1 %v12898_v40 }
 0xb3d   : > { %10112 = vmatpush1.bf16.msra.mxu1 %v12896_v37 }
 0xb3e   : > { %10113 = vmatprep.subr.bf16.mxu1 %v12901_v0 }
 0xb41   : > { %10114 = vmatpush1.bf16.msra.mxu1 %v12899_v26 }
 0xb42   : > { %10115 = vmatprep.subr.bf16.mxu1 %v12904_v3 }
 0xb45   : > { %10116 = vmatpush1.bf16.msra.mxu1 %v12902_v1 }
 0xb46   : > { %10117 = vmatprep.subr.bf16.mxu1 %v12907_v7 }
 0xb49   : > { %10118 = vmatpush1.bf16.msra.mxu1 %v12905_v15 }
 0xb4a   : > { %10119 = vmatprep.subr.bf16.mxu1 %v12910_v6 }
 0xb4d   : > { %10120 = vmatpush1.bf16.msra.mxu1 %v12908_v44 }
 0xb50   : > { %10122 = vmatmul.mubr.bf16.vlgmr.msra.gmra.mrb[96].mxu1 %v8285_v20  ;;  %v12917_v20 = vld [vmem:[%s17825_s13 + $0x58] sm:$0xff]  }
 0xb51   : > { %11843 = vmatprep.subr.bf16.mxu0 %v12917_v20 }
 0xb52   : > { %11844 = vmatpush3.bf16.msra.mxu0 %v12918_v61 }
 0xb53   : > { %11845 = vmatprep.subr.bf16.mxu0 %v12919_v49 }
 0xb56   : > { %11846 = vmatpush3.bf16.msra.mxu0 %v12920_v13 }
 0xb57   : > { %11847 = vmatprep.subr.bf16.mxu0 %v12921_v19 }
 0xb5a   : > { %11848 = vmatpush3.bf16.msra.mxu0 %v12922_v22 }
 0xb5b   : > { %11849 = vmatprep.subr.bf16.mxu0 %v12923_v25 }
 0xb5e   : > { %11850 = vmatpush3.bf16.msra.mxu0 %v12924_v8 }
 0xb5f   : > { %11851 = vmatprep.subr.bf16.mxu0 %v12925_v34 }
 0xb62   : > { %11852 = vmatpush3.bf16.msra.mxu0 %v12926_v14 }
 0xb63   : > { %11984 = vmatprep.subr.bf16.mxu0 %v13011_v32 }
 0xc23   : > { %v10123_v28 = vpop.f32.mrb[96].mxu1 }
 0xc24   : > { %v12012_v46 = vadd.f32 %v10123_v28, %v8134_v42  ;;  %v10125_v38 = vpop.f32.mrb[97].mxu1 }
 0xc25   : > { %v12013_v31 = vadd.f32 %v10125_v38, %v8138_v39  ;;  %v10127_v9 = vpop.f32.mrb[98].mxu1 }
 0xc26   : > { %v10132_v30 = vmax.f32 %v12012_v46, 0.0  ;;  %v12014_v45 = vadd.f32 %v10127_v9, %v8134_v42  ;;  %v10129_v54 = vpop.f32.mrb[99].mxu1 }
 0xc27   : > { %v10133_v36 = vmax.f32 %v12013_v31, 0.0  ;;  %v12015_v11 = vadd.f32 %v10129_v54, %v8138_v39 }
 0xc28   : > { %v10134_v41 = vmax.f32 %v12014_v45, 0.0 }
 0xc29   : > { %v10140_v5 = vcombine.low %v10132_v30, %v10133_v36  ;;  %v10141_v60 = vcombine.high %v10132_v30, %v10133_v36  ;;  %v10135_v52 = vmax.f32 %v12015_v11, 0.0 }
 0xc2b   : > { %v10148_v56 = vmax.f32 %v10140_v5, %v10141_v60  ;;  %v10142_v51 = vcombine.low %v10134_v41, %v10135_v52  ;;  %v10143_v18 = vcombine.high %v10134_v41, %v10135_v52 }
 0xc2d   : > { %v10152_v23 = vcombine.high %v10148_v56, %v10148_v56  ;;  %v10156_v57 = vsel %vm3896_vm11, %v10148_v56, -inf  ;;  %v10184_v29 = vsel %vm6013_vm3, %v10148_v56, -inf  ;;  %v10149_v53 = vmax.f32 %v10142_v51, %v10143_v18 }
 0xc2e   : > { %v10157_v17 = vrot.slane %v10156_v57, 4  ;;  %v10185_v50 = vrot.slane %v10184_v29, 4 }
 0xc2f   : > { %v10163_v43 = vsel %vm3896_vm11, %v10152_v23, -inf  ;;  %v10191_v27 = vsel %vm6013_vm3, %v10152_v23, -inf  ;;  %v10153_v4 = vcombine.high %v10149_v53, %v10149_v53  ;;  %v10170_v58 = vsel %vm3896_vm11, %v10149_v53, -inf }
 0xc30   : > { %v10158_v47 = vmax.f32 %v10156_v57, %v10157_v17  ;;  %v10164_v33 = vrot.slane %v10163_v43, 4  ;;  %v10186_v12 = vmax.f32 %v10184_v29, %v10185_v50  ;;  %v10192_v48 = vrot.slane %v10191_v27, 4 }
 0xc31   : > { %v10171_v16 = vrot.slane %v10170_v58, 4  ;;  %v10177_v24 = vsel %vm3896_vm11, %v10153_v4, -inf  ;;  %v10198_v55 = vsel %vm6013_vm3, %v10149_v53, -inf  ;;  %v10205_v40 = vsel %vm6013_vm3, %v10153_v4, -inf }
 0xc32   : > { %v10159_v37 = vrot.slane %v10158_v47, 2  ;;  %v10165_v0 = vmax.f32 %v10163_v43, %v10164_v33  ;;  %v10187_v26 = vrot.slane %v10186_v12, 2  ;;  %v10193_v3 = vmax.f32 %v10191_v27, %v10192_v48 }
 0xc33   : > { %v10172_v1 = vmax.f32 %v10170_v58, %v10171_v16  ;;  %v10178_v7 = vrot.slane %v10177_v24, 4  ;;  %v10199_v15 = vrot.slane %v10198_v55, 4  ;;  %v10206_v6 = vrot.slane %v10205_v40, 4 }
 0xc34   : > { %v10160_v44 = vmax.f32 %v10158_v47, %v10159_v37  ;;  %v10166_v59 = vrot.slane %v10165_v0, 2  ;;  %v10188_v63 = vmax.f32 %v10186_v12, %v10187_v26  ;;  %v10194_v35 = vrot.slane %v10193_v3, 2 }
 0xc35   : > { %v10173_v2 = vrot.slane %v10172_v1, 2  ;;  %v10179_v21 = vmax.f32 %v10177_v24, %v10178_v7  ;;  %v10200_v10 = vmax.f32 %v10198_v55, %v10199_v15  ;;  %v10207_v20 = vmax.f32 %v10205_v40, %v10206_v6  ;;  %v12927_v6 = vld [vmem:[%s17827_s15] sm:$0xff]  }
 0xc36   : > { %v10161_v61 = vrot.slane %v10160_v44, 1  ;;  %v10167_v49 = vmax.f32 %v10165_v0, %v10166_v59  ;;  %v10189_v13 = vrot.slane %v10188_v63, 1  ;;  %v10195_v19 = vmax.f32 %v10193_v3, %v10194_v35  ;;  %v12928_v59 = vld [vmem:[%s17827_s15 + $0x8] sm:$0xff]   ;;  %v12930_v35 = vld [vmem:[%s17827_s15 + $0x18] sm:$0xff]  }
 0xc37   : > { %v10174_v22 = vmax.f32 %v10172_v1, %v10173_v2  ;;  %v10180_v25 = vrot.slane %v10179_v21, 2  ;;  %v10201_v8 = vrot.slane %v10200_v10, 2  ;;  %v10208_v34 = vrot.slane %v10207_v20, 2  ;;  %v12931_v2 = vld [vmem:[%s17827_s15 + $0x20] sm:$0xff]  }
 0xc38   : > { %v10162_v14 = vmax.f32 %v10160_v44, %v10161_v61  ;;  %v10168_v62 = vrot.slane %v10167_v49, 1  ;;  %v10190_v42 = vmax.f32 %v10188_v63, %v10189_v13  ;;  %v10196_v39 = vrot.slane %v10195_v19, 1  ;;  %v12929_v63 = vld [vmem:[%s17827_s15 + $0x10] sm:$0xff]  }
 0xc39   : > { %v10175_v28 = vrot.slane %v10174_v22, 1  ;;  %v10181_v46 = vmax.f32 %v10179_v21, %v10180_v25  ;;  %v10202_v38 = vmax.f32 %v10200_v10, %v10201_v8  ;;  %v10209_v31 = vmax.f32 %v10207_v20, %v10208_v34  ;;  %v12932_v21 = vld [vmem:[%s17827_s15 + $0x28] sm:$0xff]   ;;  %v12933_v10 = vld [vmem:[%s17827_s15 + $0x30] sm:$0xff]   ;;  %v12934_v20 = vld [vmem:[%s17827_s15 + $0x38] sm:$0xff]  }
 0xc3a   : > { %v10169_v9 = vmax.f32 %v10167_v49, %v10168_v62  ;;  %v10197_v30 = vmax.f32 %v10195_v19, %v10196_v39  ;;  %v10212_v41 = vsel %vm744_vm0, %v10162_v14, %v10190_v42  ;;  %v10275_v49 = vld [vmem:[%s17826_s14] sm:$0x1] }
 0xc3b   : > { %v10176_v45 = vmax.f32 %v10174_v22, %v10175_v28  ;;  %v10182_v54 = vrot.slane %v10181_v46, 1  ;;  %v10203_v36 = vrot.slane %v10202_v38, 1  ;;  %v10210_v11 = vrot.slane %v10209_v31, 1  ;;  %v10430_v62 = vld [vmem:[%s17828_s16] sm:$0x1] }
 0xc3c   : > { %v10213_v56 = vsel %vm744_vm0, %v10169_v9, %v10197_v30  ;;  %v10216_v29 = vsel %vm3896_vm11, %v10212_v41, 0.0 }
 0xc3d   : > { %v10183_v5 = vmax.f32 %v10181_v46, %v10182_v54  ;;  %v10204_v60 = vmax.f32 %v10202_v38, %v10203_v36  ;;  %v10211_v52 = vmax.f32 %v10209_v31, %v10210_v11  ;;  %v10219_v23 = vsel %vm3896_vm11, %v10213_v56, 0.0 }
 0xc3f   : > { %v10215_v51 = vsel %vm744_vm0, %v10183_v5, %v10211_v52  ;;  %v10214_v18 = vsel %vm744_vm0, %v10176_v45, %v10204_v60  ;;  %vm13012_vm0 = vmmov 0  }
 0xc40   : > { %v10220_v57 = vsel %vm3896_vm11, %v10215_v51, 0.0  ;;  %v10217_v53 = vsel %vm3896_vm11, %v10214_v18, 0.0 }
 0xc41   : > { %v10221_v17 = vadd.f32 %v10220_v57, %v10219_v23  ;;  %v10218_v50 = vadd.f32 %v10217_v53, %v10216_v29 }
 0xc43   : > { %v10224_v43 = vmul.f32 0.5, %v10221_v17  ;;  %v10223_v27 = vmul.f32 0.5, %v10218_v50 }
 0xc45   : > { %v10232_v4 = vsel %vm3896_vm11, %v10224_v43, 0.0  ;;  %v10225_v58 = vsel %vm3896_vm11, %v10223_v27, 0.0 }
 0xc46   : > { %v10233_v47 = vrot.slane %v10232_v4, 4  ;;  %v10226_v33 = vrot.slane %v10225_v58, 4 }
 0xc48   : > { %v10234_v12 = vadd.f32 %v10233_v47, %v10232_v4  ;;  %v10227_v48 = vadd.f32 %v10226_v33, %v10225_v58 }
 0xc4a   : > { %v10235_v16 = vrot.slane %v10234_v12, 2  ;;  %v10228_v24 = vrot.slane %v10227_v48, 2 }
 0xc4c   : > { %v10236_v55 = vadd.f32 %v10235_v16, %v10234_v12  ;;  %v10229_v40 = vadd.f32 %v10228_v24, %v10227_v48 }
 0xc4e   : > { %v10237_v37 = vrot.slane %v10236_v55, 1  ;;  %v10230_v0 = vrot.slane %v10229_v40, 1 }
 0xc50   : > { %v10238_v26 = vadd.f32 %v10237_v37, %v10236_v55  ;;  %v10231_v3 = vadd.f32 %v10230_v0, %v10229_v40 }
 0xc52   : > { %v10240_v1 = vmul.f32 0.5, %v10238_v26  ;;  %v10239_v7 = vmul.f32 0.5, %v10231_v3 }
 0xc54   : > { %v10242_v15 = vpack.c.bf16 %v10240_v1, %v10240_v1  ;;  %v10241_v44 = vpack.c.bf16 %v10239_v7, %v10239_v7 }
 0xc56   : > { %10404 = vmatprep.mubr.bf16.mxu0 %v10242_v15 }
 0xc57   : > { %10405 = vmatmul.mubr.bf16.vlgmr.msra.gmra.mrb[212].mxu0 %v10241_v44 }
 0xc58   : > { %11985 = vmatpush3.bf16.msra.mxu0 %v12927_v6  ;;  %12000 = vmatprep.mubr.msk.bf16.mxu0 %vm13012_vm0, %v13011_v32 }
 0xc59   : > { %11986 = vmatprep.subr.bf16.mxu0 %v13011_v32 }
 0xc5c   : > { %11987 = vmatpush3.bf16.msra.mxu0 %v12928_v59 }
 0xc5d   : > { %11988 = vmatprep.subr.bf16.mxu0 %v13011_v32 }
 0xc60   : > { %11989 = vmatpush3.bf16.msra.mxu0 %v12929_v63 }
 0xc61   : > { %11990 = vmatprep.subr.bf16.mxu0 %v13011_v32 }
 0xc64   : > { %11991 = vmatpush3.bf16.msra.mxu0 %v12930_v35 }
 0xc65   : > { %11992 = vmatprep.subr.bf16.mxu0 %v13011_v32 }
 0xc68   : > { %11993 = vmatpush3.bf16.msra.mxu0 %v12931_v2 }
 0xc69   : > { %11994 = vmatprep.subr.bf16.mxu0 %v13011_v32 }
 0xc6c   : > { %11995 = vmatpush3.bf16.msra.mxu0 %v12932_v21 }
 0xc6d   : > { %11996 = vmatprep.subr.bf16.mxu0 %v13011_v32 }
 0xc70   : > { %11997 = vmatpush3.bf16.msra.mxu0 %v12933_v10 }
 0xc71   : > { %11998 = vmatprep.subr.bf16.mxu0 %v13011_v32 }
 0xc74   : > { %11999 = vmatpush3.bf16.msra.mxu0 %v12934_v20 }
 0xd2a   : > { %v11853_v61 = vpop.f32.mrb[212].mxu0 }
 0xd2b   : > { %v11854_v13 = vpop.f32.mrb[213].mxu0 }
 0xd2c   : > { %v11855_v19 = vadd.f32 %v11854_v13, %v11853_v61  ;;  %v11856_v22 = vpop.f32.mrb[214].mxu0 }
 0xd2d   : > { %v11857_v25 = vpop.f32.mrb[215].mxu0 }
 0xd2e   : > { %v10407_v8 = vadd.f32 %v11855_v19, %v10275_v49 }
 0xd30   : > { %v10412_v34 = vmax.f32 %v10407_v8, 0.0 }
 0xd32   : > { %v10413_v14 = vpack.c.bf16 %v10412_v34, %v10412_v34 }
 0xd34   : > { %12001 = vmatmul.mubr.bf16.vlgmr.msra.gmra.mrb[216].mxu0 %v10413_v14 }
 0xe07   : > { %v10513_v32 = vpop.f32.mrb[216].mxu0 }
 0xe08   : > { %v10514_v42 = vadd.f32 %v10513_v32, %v10430_v62  ;;  %v12002_v39 = vpop.f32.mrb[217].mxu0 }
 0xe09   : > { %v10516_v28 = vpop.f32.mrb[218].mxu0 }
 0xe0a   : > { %v12003_v46 = vpop.f32.mrb[219].mxu0  ;;  %10520 = vst.msk [vmem:[%s540_s18] sm:$0x1] %vm10519_vm2, %v10514_v42 }
 0xe0b   : > { %12948 = shalt.err (!%p12945_p3)
}
 0xe0c   : > { %s12949_s0 = scalar_lea.hbm %s17770_s23, 16  ;;  %s12953_s30 = scalar_lea.hbm %s17829_s17, 32 }
 0xe0d   : > { %p12950_p4 = scmp.ne.s32.totalorder %s17770_s23, %s12949_s0  ;;  %p12954_p9 = scmp.lt.u32.totalorder %s17770_s23, %s17829_s17 }
 0xe0e   : > { %p12955_p10 = scmp.lt.u32.totalorder %s12953_s30, %s12949_s0  ;;  %p12957_p12 = scmp.lt.u32.totalorder %s12949_s0, %s17770_s23 }
 0xe0f   : > { %p12951_p7 = pnand %p12950_p4, %p13142_p5 }
 0xe10   : > { %p12956_p11 = por %p12955_p10, %p12954_p9 }
 0xe11   : > { %p12952_p8 = pneg %p12951_p7 }
 0xe12   : > { %p12958_p13 = por %p12957_p12, %p12956_p11 }
 0xe14   : > { %p12959_p0 = pnand %p12958_p13, %p12952_p8 }
 0xe16   : > { %12962 = shalt.err (!%p12959_p0)
}
 0xe17   : > { %12064 = dma.vmem_to_hbm [thread:$0]  (%p13142_p5), %s17772_s22, 16, %s17770_s23, %s10522_s28  }
 0xe18 PF: > { %p12070_p1 = scmp.ge.s32.totalorder %s12997_s27, 2  ;;  %s10546_s19 = sand.u32 1, %s12985_s24  }
 0xe19   : > { %s10547_s26 = scalar_lea.sflag [#allocation3], %s10546_s19 }
 0xe1a   : > { %p12067_p2 = pnand %p12070_p1, %p13146_p6 }
 0xe1c   : > { %12980 = dma.done.wait (!%p12067_p2), %s10547_s26, 16  }
 0xe1d   : > { %12982 = vsyncadd (!%p12067_p2), %s10547_s26, 4294967280  ;;  %s17965_s27 = sld [smem:[#allocation6_spill]]  ;;  %s17966_s0 = sld [smem:[#allocation5_spill]] }
 0xe1e   : > { %s17967_s26 = sld [smem:[#allocation7_spill]]  ;;  %s17968_s24 = smov %s12989_s25 }
 0xe23   : > { %p27_p3 = scmp.ge.s32.totalorder %s17965_s27, 4   ;;  %s17969_s25 = smov %s17966_s0 }
 0xe25   :  { %29 = sbr.rel (!%p27_p3) target bundleno = 6 (0x6), region = 123 }
 0xe2c   :  { %10551 = vsyncpa [#allocation3], 1 }
 0xe2d   :  { %10553 = vsyncpa [#allocation3 + $0x1], 1 }

</bundles_post_ra>
